<compile_context>
chip_gen: v5e
topology: v5e:2x2
jax: 0.10.0
libtpu: 0.0.40
codegen_flags: <defaults>
</compile_context>

<pallas_src>
import functools

import jax
import jax.numpy as jnp
from jax.experimental import pallas as pl
from jax.experimental.pallas import tpu as pltpu


# ----------------------------------------------------------------------------
# YOLOv3 constants (same values the original repo uses).
# ----------------------------------------------------------------------------
NUM_CLASSES = 80
NUM_ATTRIB = 5 + NUM_CLASSES                          # 85
NUM_ANCHORS_PER_SCALE = 3
LAST_LAYER_DIM = NUM_ANCHORS_PER_SCALE * NUM_ATTRIB   # 255
ANCHORS = [(10, 13), (16, 30), (33, 23),
           (30, 61), (62, 45), (59, 119),
           (116, 90), (156, 198), (373, 326)]
SCALE_IDX = {"s": (0, 1, 2), "m": (3, 4, 5), "l": (6, 7, 8)}

BN_EPS = 1e-5
LEAKY_SLOPE = 0.1


# ----------------------------------------------------------------------------
# Hardware-aware budgets (v5e/v6e: 128 MiB VMEM, v7x: 64 MiB).
# ----------------------------------------------------------------------------
def _tpu_vmem_capacity_bytes():
    try:
        cap = int(pltpu.get_tpu_info().vmem_capacity_bytes)
        if cap > 0:
            return cap
    except Exception:
        pass
    return 64 * 1024 * 1024          # conservative fallback (v7x physical)


_VMEM_CAPACITY = _tpu_vmem_capacity_bytes()
_VMEM_LIMIT = int(0.7 * _VMEM_CAPACITY)        # passed to CompilerParams
_TILE_VMEM_BUDGET = int(0.35 * _VMEM_CAPACITY)  # what the tile picker plans against


if hasattr(pl, "reciprocal"):
    def _recip(x):
        return pl.reciprocal(x, approx=True)     # EUP vrcp, ~1e-3 rel err
else:                                            # pragma: no cover - old jax fallback
    def _recip(x):
        return 1.0 / x


def _round_up(x, n):
    return -(-x // n) * n


def _pick_k_tile(k):
    """Returns (tk, k_padded).  K > 512 is tiled (tk multiple of 128)."""
    if k <= 512:
        return k, k
    tk = 512
    return tk, _round_up(k, tk)


def _pick_row_tile(m_padded, bytes_per_row, vmem_budget):
    gran = 256 if m_padded % 256 == 0 else 8
    cap_rows = max(gran, vmem_budget // max(bytes_per_row, 1))
    tm = min(m_padded, cap_rows, 2048)
    if m_padded >= 2 * gran:
        tm = min(tm, m_padded // 2)    # >=2 row tiles keeps both v7x TCs busy
    tm = max(gran, (tm // gran) * gran)
    while m_padded % tm:
        tm -= gran
    return tm


def _pick_cout_tile(cout):
    if cout <= 512:
        return cout
    for t in (512, 256, 128):
        if cout % t == 0:
            return t
    return cout


# ----------------------------------------------------------------------------
# Kernel 1: K-tiled matmul + bias [+ LeakyReLU]   (1x1 conv layers)
# ----------------------------------------------------------------------------
def _matmul_bias_act_kernel(x_ref, w_ref, b_ref, o_ref, acc_ref, *, slope, apply_act):
    kk = pl.program_id(1)

    @pl.when(kk == 0)
    def _():
        acc_ref[...] = jnp.zeros_like(acc_ref)

    acc_ref[...] += jnp.dot(x_ref[...], w_ref[...],
                            preferred_element_type=jnp.float32)

    @pl.when(kk == pl.num_programs(1) - 1)
    def _():
        y = acc_ref[...] + b_ref[...]
        if apply_act:
            y = jnp.where(y >= 0, y, slope * y)
        o_ref[...] = y.astype(o_ref.dtype)


def _fused_matmul(x_col, w_col, bias, *, slope, apply_act, out_dtype):
    m, k = x_col.shape
    _, cout = w_col.shape

    tk, k_p = _pick_k_tile(k)
    if k_p != k:
        x_col = jnp.pad(x_col, ((0, 0), (0, k_p - k)))
        w_col = jnp.pad(w_col, ((0, k_p - k), (0, 0)))
    m_p = _round_up(m, 256) if m >= 256 else _round_up(m, 8)
    if m_p != m:
        x_col = jnp.pad(x_col, ((0, m_p - m), (0, 0)))
    n_k = k_p // tk

    in_item = x_col.dtype.itemsize
    out_item = jnp.dtype(out_dtype).itemsize
    budget = max(_TILE_VMEM_BUDGET - 2 * tk * cout * in_item, 1 << 20)
    bytes_per_row = 2 * tk * in_item + 2 * cout * out_item + 4 * cout
    tm = _pick_row_tile(m_p, bytes_per_row, budget)

    kernel = functools.partial(_matmul_bias_act_kernel, slope=slope,
                               apply_act=apply_act)
    out = pl.pallas_call(
        kernel,
        out_shape=jax.ShapeDtypeStruct((m_p, cout), out_dtype),
        grid=(m_p // tm, n_k),
        in_specs=[
            pl.BlockSpec((tm, tk), lambda i, kk: (i, kk)),       # activations
            pl.BlockSpec((tk, cout), lambda i, kk: (kk, 0)),     # folded weights
            pl.BlockSpec((1, cout), lambda i, kk: (0, 0)),       # bias (resident)
        ],
        out_specs=pl.BlockSpec((tm, cout), lambda i, kk: (i, 0)),
        scratch_shapes=[pltpu.VMEM((tm, cout), jnp.float32)],
        compiler_params=pltpu.CompilerParams(
            dimension_semantics=("parallel", "arbitrary"),
            vmem_limit_bytes=_VMEM_LIMIT),
        cost_estimate=pl.CostEstimate(
            flops=2 * m_p * k_p * cout,
            transcendentals=0,
            bytes_accessed=in_item * (m_p * k_p + k_p * cout)
                           + 4 * cout + out_item * m_p * cout),
    )(x_col, w_col, bias)
    return out[:m]


def _conv1x1_bn_act(x_nhwc, p, *, out_dtype, slope=LEAKY_SLOPE, eps=BN_EPS):
    n, h, w, cin = x_nhwc.shape
    wt = p["w"]                                   # (Cout, Cin, 1, 1)
    cout = wt.shape[0]
    scale = p["gamma"] / jnp.sqrt(p["var"] + eps)            # fold BN in f32
    bias = (p["beta"] - p["mean"] * scale).reshape(1, cout).astype(jnp.float32)
    w_fold = (wt[:, :, 0, 0].T * scale[None, :]).astype(jnp.bfloat16)
    x_col = x_nhwc.reshape(n * h * w, cin).astype(jnp.bfloat16)
    y = _fused_matmul(x_col, w_fold, bias, slope=slope, apply_act=True,
                      out_dtype=out_dtype)
    return y.reshape(n, h, w, cout)


# ----------------------------------------------------------------------------
# Kernel 2: 3x3 conv (in-kernel im2col) + folded BN bias + LeakyReLU
#   The padded image is flattened to rows in the wrapper; each of the 9 taps is
#   a contiguous row window of the same resident block, so there is no im2col
#   matrix in HBM and no in-kernel reshape — just 9 MXU matmuls accumulating in
#   f32.  The 2 junk columns per image row are dropped in the wrapper.
# ----------------------------------------------------------------------------
def _conv3x3_kernel(x_ref, w_ref, b_ref, o_ref, *, wext, rows, slope):
    # x_ref: ((h+3)*wext, cin) bf16    (batch squeezed, wext = w + 2)
    # w_ref: (9, cin, tcout) bf16;  b_ref: (1, tcout) f32;  o_ref: (rows, tcout)
    acc = jnp.zeros((rows, o_ref.shape[-1]), jnp.float32)
    for dh in range(3):
        for dw in range(3):
            xt = x_ref[pl.ds(dh * wext + dw, rows), :]
            acc = acc + jnp.dot(xt, w_ref[dh * 3 + dw],
                                preferred_element_type=jnp.float32)
    y = acc + b_ref[...]
    y = jnp.where(y >= 0, y, slope * y)
    o_ref[...] = y.astype(o_ref.dtype)


def _conv3x3_bn_act(x_nhwc, p, *, out_dtype, slope=LEAKY_SLOPE, eps=BN_EPS):
    n, h, w, cin = x_nhwc.shape
    wt = p["w"]                                   # (Cout, Cin, 3, 3)
    cout = wt.shape[0]
    scale = p["gamma"] / jnp.sqrt(p["var"] + eps)
    bias = (p["beta"] - p["mean"] * scale).reshape(1, cout).astype(jnp.float32)
    # (Cout, Cin, 3, 3) -> (3, 3, Cin, Cout) -> (9, Cin, Cout), BN folded in f32.
    w9 = (jnp.transpose(wt, (2, 3, 1, 0)) * scale).reshape(9, cin, cout)
    w9 = w9.astype(jnp.bfloat16)

    wext = w + 2
    # 'same' padding (1 each side) + 1 extra bottom row so every tap's contiguous
    # row window stays in bounds; flatten (H, W) -> rows.
    xp = jnp.pad(x_nhwc, ((0, 0), (1, 2), (1, 1), (0, 0)))
    xp = xp.reshape(n, (h + 3) * wext, cin).astype(jnp.bfloat16)
    rows = h * wext

    tcout = _pick_cout_tile(cout)
    grid = (n, cout // tcout)
    kernel = functools.partial(_conv3x3_kernel, wext=wext, rows=rows, slope=slope)
    y = pl.pallas_call(
        kernel,
        out_shape=jax.ShapeDtypeStruct((n, rows, cout), out_dtype),
        grid=grid,
        in_specs=[
            pl.BlockSpec((None, (h + 3) * wext, cin), lambda b, j: (b, 0, 0)),
            pl.BlockSpec((9, cin, tcout), lambda b, j: (0, 0, j)),
            pl.BlockSpec((1, tcout), lambda b, j: (0, j)),
        ],
        out_specs=pl.BlockSpec((None, rows, tcout), lambda b, j: (b, 0, j)),
        compiler_params=pltpu.CompilerParams(
            dimension_semantics=("parallel", "parallel"),
            vmem_limit_bytes=_VMEM_LIMIT),
        cost_estimate=pl.CostEstimate(
            flops=2 * n * rows * 9 * cin * cout,
            transcendentals=0,
            bytes_accessed=2 * n * (h + 3) * wext * cin + 2 * 9 * cin * cout
                           + 4 * cout
                           + jnp.dtype(out_dtype).itemsize * n * rows * cout),
    )(xp, w9, bias)
    # (N, H*(W+2), Cout) -> (N, H, W+2, Cout), drop the 2 junk columns per row.
    return y.reshape(n, h, wext, cout)[:, :, :w, :]


# ----------------------------------------------------------------------------
# Kernel 3: conv7 (1x1 + bias) fused with the YOLO eval decode.
#   Columns padded 255 -> 256 (lane-dense stores).  Per-column tables (stride /
#   anchor / attrib selectors) and per-row grid offsets are built once in the
#   wrapper and stay VMEM-resident.  One exp per element + approx reciprocals.
# ----------------------------------------------------------------------------
def _head_decode_kernel(x_ref, w_ref, b_ref, mul_ref, isexp_ref, selx_ref,
                        sely_ref, off_ref, o_ref, acc_ref):
    kk = pl.program_id(1)

    @pl.when(kk == 0)
    def _():
        acc_ref[...] = jnp.zeros_like(acc_ref)

    acc_ref[...] += jnp.dot(x_ref[...], w_ref[...],
                            preferred_element_type=jnp.float32)

    @pl.when(kk == pl.num_programs(1) - 1)
    def _():
        y = acc_ref[...] + b_ref[...]
        e = jnp.exp(-y)                       # single transcendental per element
        sig = _recip(1.0 + e)                 # sigmoid(y)
        ex = _recip(e)                        # exp(y)
        base = jnp.where(isexp_ref[...] > 0.5, ex, sig)
        off = off_ref[...]
        gx = off[:, 0:1]                      # gx * stride
        gy = off[:, 1:2]                      # gy * stride
        o_ref[...] = (base * mul_ref[...] + gx * selx_ref[...]
                      + gy * sely_ref[...]).astype(o_ref.dtype)


def _conv7_yolo_decode(x_nhwc, p, anchors, stride, *, out_dtype):
    n, g, _, cin = x_nhwc.shape
    wt, b = p["w"], p["b"]                       # (255, Cin, 1, 1), (255,)
    cout = wt.shape[0]                           # 255
    cout_p = _round_up(cout, 128)                # 256, lane-dense
    na = NUM_ATTRIB
    a = cout // na                               # 3 anchors

    w_col = jnp.pad(wt[:, :, 0, 0].T, ((0, 0), (0, cout_p - cout))).astype(jnp.bfloat16)
    bias = jnp.pad(b, (0, cout_p - cout)).reshape(1, cout_p).astype(jnp.float32)

    # Per-column decode tables: column c = anchor*85 + attrib.
    attrib = jnp.arange(cout_p) % na
    anchor = jnp.minimum(jnp.arange(cout_p) // na, a - 1)
    col_mul = jnp.where(attrib == 0, float(stride),
              jnp.where(attrib == 1, float(stride),
              jnp.where(attrib == 2, anchors[anchor, 0],
              jnp.where(attrib == 3, anchors[anchor, 1], 1.0))))
    col_mul = col_mul.reshape(1, cout_p).astype(jnp.float32)
    col_isexp = ((attrib == 2) | (attrib == 3)).astype(jnp.float32).reshape(1, cout_p)
    col_selx = (attrib == 0).astype(jnp.float32).reshape(1, cout_p)
    col_sely = (attrib == 1).astype(jnp.float32).reshape(1, cout_p)

    # Per-row grid offsets; rows are (batch, gy, gx) flattened.
    gidx = jnp.arange(g, dtype=jnp.float32)
    gx_rows = jnp.tile(gidx, n * g)
    gy_rows = jnp.tile(jnp.repeat(gidx, g), n)
    off = jnp.stack([gx_rows, gy_rows], axis=-1) * float(stride)   # (N*G*G, 2)

    x_col = x_nhwc.reshape(n * g * g, cin).astype(jnp.bfloat16)
    m = n * g * g
    tk, k_p = _pick_k_tile(cin)
    if k_p != cin:
        x_col = jnp.pad(x_col, ((0, 0), (0, k_p - cin)))
        w_col = jnp.pad(w_col, ((0, k_p - cin), (0, 0)))
    m_p = _round_up(m, 256) if m >= 256 else _round_up(m, 8)
    if m_p != m:
        x_col = jnp.pad(x_col, ((0, m_p - m), (0, 0)))
        off = jnp.pad(off, ((0, m_p - m), (0, 0)))
    n_k = k_p // tk

    out_item = jnp.dtype(out_dtype).itemsize
    budget = max(_TILE_VMEM_BUDGET - 2 * tk * cout_p * 2, 1 << 20)
    bytes_per_row = 2 * tk * 2 + 2 * cout_p * out_item + 4 * cout_p + 16
    tm = _pick_row_tile(m_p, bytes_per_row, budget)

    head = pl.pallas_call(
        _head_decode_kernel,
        out_shape=jax.ShapeDtypeStruct((m_p, cout_p), out_dtype),
        grid=(m_p // tm, n_k),
        in_specs=[
            pl.BlockSpec((tm, tk), lambda i, kk: (i, kk)),
            pl.BlockSpec((tk, cout_p), lambda i, kk: (kk, 0)),
            pl.BlockSpec((1, cout_p), lambda i, kk: (0, 0)),
            pl.BlockSpec((1, cout_p), lambda i, kk: (0, 0)),
            pl.BlockSpec((1, cout_p), lambda i, kk: (0, 0)),
            pl.BlockSpec((1, cout_p), lambda i, kk: (0, 0)),
            pl.BlockSpec((1, cout_p), lambda i, kk: (0, 0)),
            pl.BlockSpec((tm, 2), lambda i, kk: (i, 0)),
        ],
        out_specs=pl.BlockSpec((tm, cout_p), lambda i, kk: (i, 0)),
        scratch_shapes=[pltpu.VMEM((tm, cout_p), jnp.float32)],
        compiler_params=pltpu.CompilerParams(
            dimension_semantics=("parallel", "arbitrary"),
            vmem_limit_bytes=_VMEM_LIMIT),
        cost_estimate=pl.CostEstimate(
            flops=2 * m_p * k_p * cout_p + 8 * m_p * cout_p,
            transcendentals=m_p * cout_p,
            bytes_accessed=2 * (m_p * k_p + k_p * cout_p)
                           + out_item * m_p * cout_p + 5 * 4 * cout_p + 8 * m_p),
    )(x_col, w_col, bias, col_mul, col_isexp, col_selx, col_sely, off)

    head = head[:m, :cout]
    # (N*G*G, 255) -> (N, G, G, 3, 85) -> (N, 3, G, G, 85) -> (N, 3*G*G, 85)
    return head.reshape(n, g, g, a, na).transpose(0, 3, 1, 2, 4).reshape(n, a * g * g, na)


# ----------------------------------------------------------------------------
# DetectionBlock forward (eval semantics), mirroring the PyTorch module.
# ----------------------------------------------------------------------------
def detection_block_forward(x_nchw, params, anchors, stride):
    out_dtype = x_nchw.dtype
    act_dtype = jnp.bfloat16                     # inter-layer activations in bf16
    h = jnp.transpose(x_nchw, (0, 2, 3, 1))      # NCHW -> NHWC (layout plumbing)
    h = _conv1x1_bn_act(h, params["conv1"], out_dtype=act_dtype)
    h = _conv3x3_bn_act(h, params["conv2"], out_dtype=act_dtype)
    h = _conv1x1_bn_act(h, params["conv3"], out_dtype=act_dtype)
    h = _conv3x3_bn_act(h, params["conv4"], out_dtype=act_dtype)
    branch = _conv1x1_bn_act(h, params["conv5"], out_dtype=act_dtype)  # self.branch
    h = _conv3x3_bn_act(branch, params["conv6"], out_dtype=act_dtype)
    return _conv7_yolo_decode(h, params["conv7"], anchors, stride, out_dtype=out_dtype)


# ----------------------------------------------------------------------------
# Pure-JAX f32 reference (lax.conv on NCHW, mirroring the PyTorch forward).
# ----------------------------------------------------------------------------
def _reference_forward(x, params, anchors, stride):
    def conv_bn_act(h, p, k):
        pad = (k - 1) // 2
        h = jax.lax.conv_general_dilated(
            h, p["w"], (1, 1), [(pad, pad), (pad, pad)],
            dimension_numbers=("NCHW", "OIHW", "NCHW"),
            precision=jax.lax.Precision.HIGHEST)
        scale = p["gamma"] / jnp.sqrt(p["var"] + BN_EPS)
        bias = p["beta"] - p["mean"] * scale
        h = h * scale[None, :, None, None] + bias[None, :, None, None]
        return jnp.where(h >= 0, h, LEAKY_SLOPE * h)

    h = conv_bn_act(x, params["conv1"], 1)
    h = conv_bn_act(h, params["conv2"], 3)
    h = conv_bn_act(h, params["conv3"], 1)
    h = conv_bn_act(h, params["conv4"], 3)
    h = conv_bn_act(h, params["conv5"], 1)
    h = conv_bn_act(h, params["conv6"], 3)
    h = jax.lax.conv_general_dilated(
        h, params["conv7"]["w"], (1, 1), [(0, 0), (0, 0)],
        dimension_numbers=("NCHW", "OIHW", "NCHW"),
        precision=jax.lax.Precision.HIGHEST) + params["conv7"]["b"][None, :, None, None]

    n, g = h.shape[0], h.shape[2]
    a, na = NUM_ANCHORS_PER_SCALE, NUM_ATTRIB
    p = h.reshape(n, a, na, g, g).transpose(0, 1, 3, 4, 2)
    grid_t = jnp.tile(jnp.arange(g, dtype=h.dtype), (g, 1))
    gx = grid_t.reshape(1, 1, g, g)
    gy = grid_t.T.reshape(1, 1, g, g)
    aw = anchors[:, 0].reshape(1, a, 1, 1)
    ah = anchors[:, 1].reshape(1, a, 1, 1)
    xc = (jax.nn.sigmoid(p[..., 0]) + gx) * stride
    yc = (jax.nn.sigmoid(p[..., 1]) + gy) * stride
    wp = jnp.exp(p[..., 2]) * aw
    hp = jnp.exp(p[..., 3]) * ah
    bbox = jnp.stack((xc, yc, wp, hp), axis=4).reshape(n, -1, 4)
    conf = jax.nn.sigmoid(p[..., 4]).reshape(n, -1, 1)
    cls = jax.nn.sigmoid(p[..., 5:]).reshape(n, -1, NUM_CLASSES)
    return jnp.concatenate((bbox, conf, cls), axis=-1)


# ----------------------------------------------------------------------------
# Parameter init (PyTorch layouts: conv weight OIHW, per-channel BN vectors).
# ----------------------------------------------------------------------------
def _init_conv_layer(key, cin, cout, k):
    kw, kg, kb, km, kv = jax.random.split(key, 5)
    w = jax.random.normal(kw, (cout, cin, k, k), jnp.float32) * (2.0 / (cin * k * k)) ** 0.5
    return {
        "w": w,
        "gamma": 1.0 + 0.1 * jax.random.normal(kg, (cout,), jnp.float32),
        "beta": 0.1 * jax.random.normal(kb, (cout,), jnp.float32),
        "mean": 0.1 * jax.random.normal(km, (cout,), jnp.float32),
        "var": 1.0 + 0.1 * jax.random.uniform(kv, (cout,), jnp.float32),
    }


if __name__ == "__main__":
    key = jax.random.PRNGKey(0)
    in_dim, out_dim = 8, 16
    hidden = out_dim // 2
    scale_name, stride = "s", 8
    batch, grid_size = 2, 16

    keys = jax.random.split(key, 9)
    x = jax.random.normal(keys[0], (batch, in_dim, grid_size, grid_size), jnp.float32)
    params = {
        "conv1": _init_conv_layer(keys[1], in_dim, hidden, 1),
        "conv2": _init_conv_layer(keys[2], hidden, out_dim, 3),
        "conv3": _init_conv_layer(keys[3], out_dim, hidden, 1),
        "conv4": _init_conv_layer(keys[4], hidden, out_dim, 3),
        "conv5": _init_conv_layer(keys[5], out_dim, hidden, 1),
        "conv6": _init_conv_layer(keys[6], hidden, out_dim, 3),
        "conv7": {
            "w": jax.random.normal(keys[7], (LAST_LAYER_DIM, out_dim, 1, 1), jnp.float32)
                 * (1.0 / out_dim) ** 0.5,
            "b": 0.1 * jax.random.normal(keys[8], (LAST_LAYER_DIM,), jnp.float32),
        },
    }
    anchors = jnp.asarray([ANCHORS[i] for i in SCALE_IDX[scale_name]], jnp.float32)

    fwd = jax.jit(lambda x_, p_, a_: detection_block_forward(x_, p_, a_, stride))
    out = jax.block_until_ready(fwd(x, params, anchors))

    ref = jax.block_until_ready(
        jax.jit(lambda x_, p_, a_: _reference_forward(x_, p_, a_, stride))(x, params, anchors))

    expected_shape = (batch, NUM_ANCHORS_PER_SCALE * grid_size * grid_size, NUM_ATTRIB)
    assert out.shape == expected_shape, out.shape
    assert out.dtype == x.dtype, out.dtype
    # bf16 MXU inputs (f32 accumulation) through 7 layers + exp/approx-reciprocal
    # decode -> slightly wider tolerance than a pure-f32 comparison would need.
    assert bool(jnp.allclose(out, ref, rtol=1e-1, atol=5e-2)), "mismatch vs JAX reference"

    print("KERNEL_OK")
</pallas_src>

<mosaic_0001>
module attributes {stable_mosaic.version = 11 : i64} {
  func.func @_matmul_bias_act_kernel(%arg0: i32, %arg1: i32, %arg2: memref<256x8xbf16, #tpu.memory_space<vmem>>, %arg3: memref<8x8xbf16, #tpu.memory_space<vmem>>, %arg4: memref<1x8xf32, #tpu.memory_space<vmem>>, %arg5: memref<256x8xbf16, #tpu.memory_space<vmem>>, %arg6: memref<256x8xf32, #tpu.memory_space<vmem>>) attributes {dimension_semantics = [#tpu.dimension_semantics<parallel>, #tpu.dimension_semantics<arbitrary>], iteration_bounds = array<i64: 2, 1>, scalar_prefetch = 0 : i64, scratch_operands = 1 : i64, tpu.core_type = #tpu.core_type<tc>, window_params = [{transform_indices = @transform_0, window_bounds = array<i64: 256, 8>}, {transform_indices = @transform_1, window_bounds = array<i64: 8, 8>}, {pipeline_mode = #tpu.pipeline_mode<synchronous>, transform_indices = @transform_2, window_bounds = array<i64: 1, 8>}, {transform_indices = @transform_3, window_bounds = array<i64: 256, 8>}]} {
    %c0_i32 = arith.constant 0 : i32
    %0 = arith.cmpi eq, %arg1, %c0_i32 : i32
    %1 = arith.extui %0 : i1 to i32
    %c0_i32_0 = arith.constant 0 : i32
    %2 = arith.cmpi ne, %1, %c0_i32_0 : i32
    scf.if %2 {
      %cst_10 = arith.constant 0.000000e+00 : f32
      %12 = vector.broadcast %cst_10 : f32 to vector<256x8xf32>
      %c0_11 = arith.constant 0 : index
      %c0_12 = arith.constant 0 : index
      %13 = vector.load %arg6[%c0_11, %c0_12] : memref<256x8xf32, #tpu.memory_space<vmem>>, vector<256x8xf32>
      tpu.vector_store %arg6[%c0_11, %c0_12], %12 {strides = array<i32>} : memref<256x8xf32, #tpu.memory_space<vmem>>, vector<256x8xf32>,
    } else {
    }
    %c0 = arith.constant 0 : index
    %c0_1 = arith.constant 0 : index
    %3 = vector.load %arg6[%c0, %c0_1] : memref<256x8xf32, #tpu.memory_space<vmem>>, vector<256x8xf32>
    %c0_2 = arith.constant 0 : index
    %c0_3 = arith.constant 0 : index
    %4 = vector.load %arg2[%c0_2, %c0_3] : memref<256x8xbf16, #tpu.memory_space<vmem>>, vector<256x8xbf16>
    %c0_4 = arith.constant 0 : index
    %c0_5 = arith.constant 0 : index
    %5 = vector.load %arg3[%c0_4, %c0_5] : memref<8x8xbf16, #tpu.memory_space<vmem>>, vector<8x8xbf16>
    %cst = arith.constant dense<0.000000e+00> : vector<256x8xf32>
    %6 = tpu.matmul %4, %5, %cst {dimension_numbers = #tpu.dot_dimension_numbers<[1], [0], [0], [1], [0, 0, 1, 1], [], []>} : vector<256x8xbf16>, vector<8x8xbf16>, vector<256x8xf32> -> vector<256x8xf32>
    %7 = arith.addf %3, %6 : vector<256x8xf32>
    %c0_6 = arith.constant 0 : index
    %c0_7 = arith.constant 0 : index
    %8 = vector.load %arg6[%c0_6, %c0_7] : memref<256x8xf32, #tpu.memory_space<vmem>>, vector<256x8xf32>
    tpu.vector_store %arg6[%c0_6, %c0_7], %7 {strides = array<i32>} : memref<256x8xf32, #tpu.memory_space<vmem>>, vector<256x8xf32>,
    %c0_i32_8 = arith.constant 0 : i32
    %9 = arith.cmpi eq, %arg1, %c0_i32_8 : i32
    %10 = arith.extui %9 : i1 to i32
    %c0_i32_9 = arith.constant 0 : i32
    %11 = arith.cmpi ne, %10, %c0_i32_9 : i32
    scf.if %11 {
      %c0_10 = arith.constant 0 : index
      %c0_11 = arith.constant 0 : index
      %12 = vector.load %arg6[%c0_10, %c0_11] : memref<256x8xf32, #tpu.memory_space<vmem>>, vector<256x8xf32>
      %c0_12 = arith.constant 0 : index
      %c0_13 = arith.constant 0 : index
      %13 = vector.load %arg4[%c0_12, %c0_13] : memref<1x8xf32, #tpu.memory_space<vmem>>, vector<1x8xf32>
      %14 = vector.broadcast %13 : vector<1x8xf32> to vector<256x8xf32>
      %15 = arith.addf %12, %14 : vector<256x8xf32>
      %cst_14 = arith.constant 0.000000e+00 : f32
      %16 = vector.broadcast %cst_14 : f32 to vector<256x8xf32>
      %17 = arith.cmpf oge, %15, %16 : vector<256x8xf32>
      %cst_15 = arith.constant 1.000000e-01 : f32
      %18 = vector.broadcast %cst_15 : f32 to vector<256x8xf32>
      %19 = arith.mulf %18, %15 : vector<256x8xf32>
      %20 = arith.select %17, %15, %19 : vector<256x8xi1>, vector<256x8xf32>
      %21 = arith.truncf %20 : vector<256x8xf32> to vector<256x8xbf16>
      %c0_16 = arith.constant 0 : index
      %c0_17 = arith.constant 0 : index
      %22 = vector.load %arg5[%c0_16, %c0_17] : memref<256x8xbf16, #tpu.memory_space<vmem>>, vector<256x8xbf16>
      tpu.vector_store %arg5[%c0_16, %c0_17], %21 {strides = array<i32>} : memref<256x8xbf16, #tpu.memory_space<vmem>>, vector<256x8xbf16>,
    } else {
    }
    return
  }
  func.func @transform_0(%arg0: i32, %arg1: i32) -> (i32, i32) {
    %c0_i32 = arith.constant 0 : i32
    return %arg0, %arg1 : i32, i32
  }
  func.func @transform_1(%arg0: i32, %arg1: i32) -> (i32, i32) {
    %c0_i32 = arith.constant 0 : i32
    %c0_i32_0 = arith.constant 0 : i32
    return %arg1, %c0_i32 : i32, i32
  }
  func.func @transform_2(%arg0: i32, %arg1: i32) -> (i32, i32) {
    %c0_i32 = arith.constant 0 : i32
    %c0_i32_0 = arith.constant 0 : i32
    %c0_i32_1 = arith.constant 0 : i32
    return %c0_i32, %c0_i32_0 : i32, i32
  }
  func.func @transform_3(%arg0: i32, %arg1: i32) -> (i32, i32) {
    %c0_i32 = arith.constant 0 : i32
    %c0_i32_0 = arith.constant 0 : i32
    return %arg0, %c0_i32 : i32, i32
  }
}

module attributes {stable_mosaic.version = 11 : i64} {
  func.func @_conv3x3_kernel(%arg0: i32, %arg1: i32, %arg2: memref<1x342x8xbf16, #tpu.memory_space<vmem>>, %arg3: memref<9x8x16xbf16, #tpu.memory_space<vmem>>, %arg4: memref<1x16xf32, #tpu.memory_space<vmem>>, %arg5: memref<1x288x16xbf16, #tpu.memory_space<vmem>>) attributes {dimension_semantics = [#tpu.dimension_semantics<parallel>, #tpu.dimension_semantics<parallel>], iteration_bounds = array<i64: 2, 1>, scalar_prefetch = 0 : i64, scratch_operands = 0 : i64, tpu.core_type = #tpu.core_type<tc>, window_params = [{transform_indices = @transform_0, window_bounds = array<i64: 1, 342, 8>}, {transform_indices = @transform_1, window_bounds = array<i64: 9, 8, 16>}, {transform_indices = @transform_2, window_bounds = array<i64: 1, 16>}, {transform_indices = @transform_3, window_bounds = array<i64: 1, 288, 16>}]} {
    %cst = arith.constant 0.000000e+00 : f32
    %0 = vector.broadcast %cst : f32 to vector<288x16xf32>
    %c0 = arith.constant 0 : index
    %c0_0 = arith.constant 0 : index
    %c0_1 = arith.constant 0 : index
    %1 = vector.load %arg2[%c0, %c0_0, %c0_1] : memref<1x342x8xbf16, #tpu.memory_space<vmem>>, vector<1x288x8xbf16>
    %2 = vector.shape_cast %1 : vector<1x288x8xbf16> to vector<288x8xbf16>
    %c0_2 = arith.constant 0 : index
    %c0_3 = arith.constant 0 : index
    %c0_4 = arith.constant 0 : index
    %3 = vector.load %arg3[%c0_2, %c0_3, %c0_4] : memref<9x8x16xbf16, #tpu.memory_space<vmem>>, vector<1x8x16xbf16>
    %4 = vector.shape_cast %3 : vector<1x8x16xbf16> to vector<8x16xbf16>
    %cst_5 = arith.constant dense<0.000000e+00> : vector<288x16xf32>
    %5 = tpu.matmul %2, %4, %cst_5 {dimension_numbers = #tpu.dot_dimension_numbers<[1], [0], [0], [1], [0, 0, 1, 1], [], []>} : vector<288x8xbf16>, vector<8x16xbf16>, vector<288x16xf32> -> vector<288x16xf32>
    %6 = arith.addf %0, %5 : vector<288x16xf32>
    %c0_6 = arith.constant 0 : index
    %c1 = arith.constant 1 : index
    %c0_7 = arith.constant 0 : index
    %7 = vector.load %arg2[%c0_6, %c1, %c0_7] : memref<1x342x8xbf16, #tpu.memory_space<vmem>>, vector<1x288x8xbf16>
    %8 = vector.shape_cast %7 : vector<1x288x8xbf16> to vector<288x8xbf16>
    %c1_8 = arith.constant 1 : index
    %c0_9 = arith.constant 0 : index
    %c0_10 = arith.constant 0 : index
    %9 = vector.load %arg3[%c1_8, %c0_9, %c0_10] : memref<9x8x16xbf16, #tpu.memory_space<vmem>>, vector<1x8x16xbf16>
    %10 = vector.shape_cast %9 : vector<1x8x16xbf16> to vector<8x16xbf16>
    %cst_11 = arith.constant dense<0.000000e+00> : vector<288x16xf32>
    %11 = tpu.matmul %8, %10, %cst_11 {dimension_numbers = #tpu.dot_dimension_numbers<[1], [0], [0], [1], [0, 0, 1, 1], [], []>} : vector<288x8xbf16>, vector<8x16xbf16>, vector<288x16xf32> -> vector<288x16xf32>
    %12 = arith.addf %6, %11 : vector<288x16xf32>
    %c0_12 = arith.constant 0 : index
    %c2 = arith.constant 2 : index
    %c0_13 = arith.constant 0 : index
    %13 = vector.load %arg2[%c0_12, %c2, %c0_13] : memref<1x342x8xbf16, #tpu.memory_space<vmem>>, vector<1x288x8xbf16>
    %14 = vector.shape_cast %13 : vector<1x288x8xbf16> to vector<288x8xbf16>
    %c2_14 = arith.constant 2 : index
    %c0_15 = arith.constant 0 : index
    %c0_16 = arith.constant 0 : index
    %15 = vector.load %arg3[%c2_14, %c0_15, %c0_16] : memref<9x8x16xbf16, #tpu.memory_space<vmem>>, vector<1x8x16xbf16>
    %16 = vector.shape_cast %15 : vector<1x8x16xbf16> to vector<8x16xbf16>
    %cst_17 = arith.constant dense<0.000000e+00> : vector<288x16xf32>
    %17 = tpu.matmul %14, %16, %cst_17 {dimension_numbers = #tpu.dot_dimension_numbers<[1], [0], [0], [1], [0, 0, 1, 1], [], []>} : vector<288x8xbf16>, vector<8x16xbf16>, vector<288x16xf32> -> vector<288x16xf32>
    %18 = arith.addf %12, %17 : vector<288x16xf32>
    %c0_18 = arith.constant 0 : index
    %c18 = arith.constant 18 : index
    %c0_19 = arith.constant 0 : index
    %19 = vector.load %arg2[%c0_18, %c18, %c0_19] : memref<1x342x8xbf16, #tpu.memory_space<vmem>>, vector<1x288x8xbf16>
    %20 = vector.shape_cast %19 : vector<1x288x8xbf16> to vector<288x8xbf16>
    %c3 = arith.constant 3 : index
    %c0_20 = arith.constant 0 : index
    %c0_21 = arith.constant 0 : index
    %21 = vector.load %arg3[%c3, %c0_20, %c0_21] : memref<9x8x16xbf16, #tpu.memory_space<vmem>>, vector<1x8x16xbf16>
    %22 = vector.shape_cast %21 : vector<1x8x16xbf16> to vector<8x16xbf16>
    %cst_22 = arith.constant dense<0.000000e+00> : vector<288x16xf32>
    %23 = tpu.matmul %20, %22, %cst_22 {dimension_numbers = #tpu.dot_dimension_numbers<[1], [0], [0], [1], [0, 0, 1, 1], [], []>} : vector<288x8xbf16>, vector<8x16xbf16>, vector<288x16xf32> -> vector<288x16xf32>
    %24 = arith.addf %18, %23 : vector<288x16xf32>
    %c0_23 = arith.constant 0 : index
    %c19 = arith.constant 19 : index
    %c0_24 = arith.constant 0 : index
    %25 = vector.load %arg2[%c0_23, %c19, %c0_24] : memref<1x342x8xbf16, #tpu.memory_space<vmem>>, vector<1x288x8xbf16>
    %26 = vector.shape_cast %25 : vector<1x288x8xbf16> to vector<288x8xbf16>
    %c4 = arith.constant 4 : index
    %c0_25 = arith.constant 0 : index
    %c0_26 = arith.constant 0 : index
    %27 = vector.load %arg3[%c4, %c0_25, %c0_26] : memref<9x8x16xbf16, #tpu.memory_space<vmem>>, vector<1x8x16xbf16>
    %28 = vector.shape_cast %27 : vector<1x8x16xbf16> to vector<8x16xbf16>
    %cst_27 = arith.constant dense<0.000000e+00> : vector<288x16xf32>
    %29 = tpu.matmul %26, %28, %cst_27 {dimension_numbers = #tpu.dot_dimension_numbers<[1], [0], [0], [1], [0, 0, 1, 1], [], []>} : vector<288x8xbf16>, vector<8x16xbf16>, vector<288x16xf32> -> vector<288x16xf32>
    %30 = arith.addf %24, %29 : vector<288x16xf32>
    %c0_28 = arith.constant 0 : index
    %c20 = arith.constant 20 : index
    %c0_29 = arith.constant 0 : index
    %31 = vector.load %arg2[%c0_28, %c20, %c0_29] : memref<1x342x8xbf16, #tpu.memory_space<vmem>>, vector<1x288x8xbf16>
    %32 = vector.shape_cast %31 : vector<1x288x8xbf16> to vector<288x8xbf16>
    %c5 = arith.constant 5 : index
    %c0_30 = arith.constant 0 : index
    %c0_31 = arith.constant 0 : index
    %33 = vector.load %arg3[%c5, %c0_30, %c0_31] : memref<9x8x16xbf16, #tpu.memory_space<vmem>>, vector<1x8x16xbf16>
    %34 = vector.shape_cast %33 : vector<1x8x16xbf16> to vector<8x16xbf16>
    %cst_32 = arith.constant dense<0.000000e+00> : vector<288x16xf32>
    %35 = tpu.matmul %32, %34, %cst_32 {dimension_numbers = #tpu.dot_dimension_numbers<[1], [0], [0], [1], [0, 0, 1, 1], [], []>} : vector<288x8xbf16>, vector<8x16xbf16>, vector<288x16xf32> -> vector<288x16xf32>
    %36 = arith.addf %30, %35 : vector<288x16xf32>
    %c0_33 = arith.constant 0 : index
    %c36 = arith.constant 36 : index
    %c0_34 = arith.constant 0 : index
    %37 = vector.load %arg2[%c0_33, %c36, %c0_34] : memref<1x342x8xbf16, #tpu.memory_space<vmem>>, vector<1x288x8xbf16>
    %38 = vector.shape_cast %37 : vector<1x288x8xbf16> to vector<288x8xbf16>
    %c6 = arith.constant 6 : index
    %c0_35 = arith.constant 0 : index
    %c0_36 = arith.constant 0 : index
    %39 = vector.load %arg3[%c6, %c0_35, %c0_36] : memref<9x8x16xbf16, #tpu.memory_space<vmem>>, vector<1x8x16xbf16>
    %40 = vector.shape_cast %39 : vector<1x8x16xbf16> to vector<8x16xbf16>
    %cst_37 = arith.constant dense<0.000000e+00> : vector<288x16xf32>
    %41 = tpu.matmul %38, %40, %cst_37 {dimension_numbers = #tpu.dot_dimension_numbers<[1], [0], [0], [1], [0, 0, 1, 1], [], []>} : vector<288x8xbf16>, vector<8x16xbf16>, vector<288x16xf32> -> vector<288x16xf32>
    %42 = arith.addf %36, %41 : vector<288x16xf32>
    %c0_38 = arith.constant 0 : index
    %c37 = arith.constant 37 : index
    %c0_39 = arith.constant 0 : index
    %43 = vector.load %arg2[%c0_38, %c37, %c0_39] : memref<1x342x8xbf16, #tpu.memory_space<vmem>>, vector<1x288x8xbf16>
    %44 = vector.shape_cast %43 : vector<1x288x8xbf16> to vector<288x8xbf16>
    %c7 = arith.constant 7 : index
    %c0_40 = arith.constant 0 : index
    %c0_41 = arith.constant 0 : index
    %45 = vector.load %arg3[%c7, %c0_40, %c0_41] : memref<9x8x16xbf16, #tpu.memory_space<vmem>>, vector<1x8x16xbf16>
    %46 = vector.shape_cast %45 : vector<1x8x16xbf16> to vector<8x16xbf16>
    %cst_42 = arith.constant dense<0.000000e+00> : vector<288x16xf32>
    %47 = tpu.matmul %44, %46, %cst_42 {dimension_numbers = #tpu.dot_dimension_numbers<[1], [0], [0], [1], [0, 0, 1, 1], [], []>} : vector<288x8xbf16>, vector<8x16xbf16>, vector<288x16xf32> -> vector<288x16xf32>
    %48 = arith.addf %42, %47 : vector<288x16xf32>
    %c0_43 = arith.constant 0 : index
    %c38 = arith.constant 38 : index
    %c0_44 = arith.constant 0 : index
    %49 = vector.load %arg2[%c0_43, %c38, %c0_44] : memref<1x342x8xbf16, #tpu.memory_space<vmem>>, vector<1x288x8xbf16>
    %50 = vector.shape_cast %49 : vector<1x288x8xbf16> to vector<288x8xbf16>
    %c8 = arith.constant 8 : index
    %c0_45 = arith.constant 0 : index
    %c0_46 = arith.constant 0 : index
    %51 = vector.load %arg3[%c8, %c0_45, %c0_46] : memref<9x8x16xbf16, #tpu.memory_space<vmem>>, vector<1x8x16xbf16>
    %52 = vector.shape_cast %51 : vector<1x8x16xbf16> to vector<8x16xbf16>
    %cst_47 = arith.constant dense<0.000000e+00> : vector<288x16xf32>
    %53 = tpu.matmul %50, %52, %cst_47 {dimension_numbers = #tpu.dot_dimension_numbers<[1], [0], [0], [1], [0, 0, 1, 1], [], []>} : vector<288x8xbf16>, vector<8x16xbf16>, vector<288x16xf32> -> vector<288x16xf32>
    %54 = arith.addf %48, %53 : vector<288x16xf32>
    %c0_48 = arith.constant 0 : index
    %c0_49 = arith.constant 0 : index
    %55 = vector.load %arg4[%c0_48, %c0_49] : memref<1x16xf32, #tpu.memory_space<vmem>>, vector<1x16xf32>
    %56 = vector.broadcast %55 : vector<1x16xf32> to vector<288x16xf32>
    %57 = arith.addf %54, %56 : vector<288x16xf32>
    %cst_50 = arith.constant 0.000000e+00 : f32
    %58 = vector.broadcast %cst_50 : f32 to vector<288x16xf32>
    %59 = arith.cmpf oge, %57, %58 : vector<288x16xf32>
    %cst_51 = arith.constant 1.000000e-01 : f32
    %60 = vector.broadcast %cst_51 : f32 to vector<288x16xf32>
    %61 = arith.mulf %60, %57 : vector<288x16xf32>
    %62 = arith.select %59, %57, %61 : vector<288x16xi1>, vector<288x16xf32>
    %63 = arith.truncf %62 : vector<288x16xf32> to vector<288x16xbf16>
    %c0_52 = arith.constant 0 : index
    %c0_53 = arith.constant 0 : index
    %c0_54 = arith.constant 0 : index
    %64 = vector.load %arg5[%c0_52, %c0_53, %c0_54] : memref<1x288x16xbf16, #tpu.memory_space<vmem>>, vector<1x288x16xbf16>
    %65 = vector.shape_cast %64 : vector<1x288x16xbf16> to vector<288x16xbf16>
    %66 = vector.shape_cast %63 : vector<288x16xbf16> to vector<1x288x16xbf16>
    tpu.vector_store %arg5[%c0_52, %c0_53, %c0_54], %66 {strides = array<i32>} : memref<1x288x16xbf16, #tpu.memory_space<vmem>>, vector<1x288x16xbf16>,
    return
  }
  func.func @transform_0(%arg0: i32, %arg1: i32) -> (i32, i32, i32) {
    %c0_i32 = arith.constant 0 : i32
    %c0_i32_0 = arith.constant 0 : i32
    %c0_i32_1 = arith.constant 0 : i32
    return %arg0, %c0_i32, %c0_i32_0 : i32, i32, i32
  }
  func.func @transform_1(%arg0: i32, %arg1: i32) -> (i32, i32, i32) {
    %c0_i32 = arith.constant 0 : i32
    %c0_i32_0 = arith.constant 0 : i32
    %c0_i32_1 = arith.constant 0 : i32
    return %c0_i32, %c0_i32_0, %arg1 : i32, i32, i32
  }
  func.func @transform_2(%arg0: i32, %arg1: i32) -> (i32, i32) {
    %c0_i32 = arith.constant 0 : i32
    %c0_i32_0 = arith.constant 0 : i32
    return %c0_i32, %arg1 : i32, i32
  }
  func.func @transform_3(%arg0: i32, %arg1: i32) -> (i32, i32, i32) {
    %c0_i32 = arith.constant 0 : i32
    %c0_i32_0 = arith.constant 0 : i32
    return %arg0, %c0_i32, %arg1 : i32, i32, i32
  }
}

module attributes {stable_mosaic.version = 11 : i64} {
  func.func @_matmul_bias_act_kernel(%arg0: i32, %arg1: i32, %arg2: memref<256x16xbf16, #tpu.memory_space<vmem>>, %arg3: memref<16x8xbf16, #tpu.memory_space<vmem>>, %arg4: memref<1x8xf32, #tpu.memory_space<vmem>>, %arg5: memref<256x8xbf16, #tpu.memory_space<vmem>>, %arg6: memref<256x8xf32, #tpu.memory_space<vmem>>) attributes {dimension_semantics = [#tpu.dimension_semantics<parallel>, #tpu.dimension_semantics<arbitrary>], iteration_bounds = array<i64: 2, 1>, scalar_prefetch = 0 : i64, scratch_operands = 1 : i64, tpu.core_type = #tpu.core_type<tc>, window_params = [{transform_indices = @transform_0, window_bounds = array<i64: 256, 16>}, {transform_indices = @transform_1, window_bounds = array<i64: 16, 8>}, {pipeline_mode = #tpu.pipeline_mode<synchronous>, transform_indices = @transform_2, window_bounds = array<i64: 1, 8>}, {transform_indices = @transform_3, window_bounds = array<i64: 256, 8>}]} {
    %c0_i32 = arith.constant 0 : i32
    %0 = arith.cmpi eq, %arg1, %c0_i32 : i32
    %1 = arith.extui %0 : i1 to i32
    %c0_i32_0 = arith.constant 0 : i32
    %2 = arith.cmpi ne, %1, %c0_i32_0 : i32
    scf.if %2 {
      %cst_10 = arith.constant 0.000000e+00 : f32
      %12 = vector.broadcast %cst_10 : f32 to vector<256x8xf32>
      %c0_11 = arith.constant 0 : index
      %c0_12 = arith.constant 0 : index
      %13 = vector.load %arg6[%c0_11, %c0_12] : memref<256x8xf32, #tpu.memory_space<vmem>>, vector<256x8xf32>
      tpu.vector_store %arg6[%c0_11, %c0_12], %12 {strides = array<i32>} : memref<256x8xf32, #tpu.memory_space<vmem>>, vector<256x8xf32>,
    } else {
    }
    %c0 = arith.constant 0 : index
    %c0_1 = arith.constant 0 : index
    %3 = vector.load %arg6[%c0, %c0_1] : memref<256x8xf32, #tpu.memory_space<vmem>>, vector<256x8xf32>
    %c0_2 = arith.constant 0 : index
    %c0_3 = arith.constant 0 : index
    %4 = vector.load %arg2[%c0_2, %c0_3] : memref<256x16xbf16, #tpu.memory_space<vmem>>, vector<256x16xbf16>
    %c0_4 = arith.constant 0 : index
    %c0_5 = arith.constant 0 : index
    %5 = vector.load %arg3[%c0_4, %c0_5] : memref<16x8xbf16, #tpu.memory_space<vmem>>, vector<16x8xbf16>
    %cst = arith.constant dense<0.000000e+00> : vector<256x8xf32>
    %6 = tpu.matmul %4, %5, %cst {dimension_numbers = #tpu.dot_dimension_numbers<[1], [0], [0], [1], [0, 0, 1, 1], [], []>} : vector<256x16xbf16>, vector<16x8xbf16>, vector<256x8xf32> -> vector<256x8xf32>
    %7 = arith.addf %3, %6 : vector<256x8xf32>
    %c0_6 = arith.constant 0 : index
    %c0_7 = arith.constant 0 : index
    %8 = vector.load %arg6[%c0_6, %c0_7] : memref<256x8xf32, #tpu.memory_space<vmem>>, vector<256x8xf32>
    tpu.vector_store %arg6[%c0_6, %c0_7], %7 {strides = array<i32>} : memref<256x8xf32, #tpu.memory_space<vmem>>, vector<256x8xf32>,
    %c0_i32_8 = arith.constant 0 : i32
    %9 = arith.cmpi eq, %arg1, %c0_i32_8 : i32
    %10 = arith.extui %9 : i1 to i32
    %c0_i32_9 = arith.constant 0 : i32
    %11 = arith.cmpi ne, %10, %c0_i32_9 : i32
    scf.if %11 {
      %c0_10 = arith.constant 0 : index
      %c0_11 = arith.constant 0 : index
      %12 = vector.load %arg6[%c0_10, %c0_11] : memref<256x8xf32, #tpu.memory_space<vmem>>, vector<256x8xf32>
      %c0_12 = arith.constant 0 : index
      %c0_13 = arith.constant 0 : index
      %13 = vector.load %arg4[%c0_12, %c0_13] : memref<1x8xf32, #tpu.memory_space<vmem>>, vector<1x8xf32>
      %14 = vector.broadcast %13 : vector<1x8xf32> to vector<256x8xf32>
      %15 = arith.addf %12, %14 : vector<256x8xf32>
      %cst_14 = arith.constant 0.000000e+00 : f32
      %16 = vector.broadcast %cst_14 : f32 to vector<256x8xf32>
      %17 = arith.cmpf oge, %15, %16 : vector<256x8xf32>
      %cst_15 = arith.constant 1.000000e-01 : f32
      %18 = vector.broadcast %cst_15 : f32 to vector<256x8xf32>
      %19 = arith.mulf %18, %15 : vector<256x8xf32>
      %20 = arith.select %17, %15, %19 : vector<256x8xi1>, vector<256x8xf32>
      %21 = arith.truncf %20 : vector<256x8xf32> to vector<256x8xbf16>
      %c0_16 = arith.constant 0 : index
      %c0_17 = arith.constant 0 : index
      %22 = vector.load %arg5[%c0_16, %c0_17] : memref<256x8xbf16, #tpu.memory_space<vmem>>, vector<256x8xbf16>
      tpu.vector_store %arg5[%c0_16, %c0_17], %21 {strides = array<i32>} : memref<256x8xbf16, #tpu.memory_space<vmem>>, vector<256x8xbf16>,
    } else {
    }
    return
  }
  func.func @transform_0(%arg0: i32, %arg1: i32) -> (i32, i32) {
    %c0_i32 = arith.constant 0 : i32
    return %arg0, %arg1 : i32, i32
  }
  func.func @transform_1(%arg0: i32, %arg1: i32) -> (i32, i32) {
    %c0_i32 = arith.constant 0 : i32
    %c0_i32_0 = arith.constant 0 : i32
    return %arg1, %c0_i32 : i32, i32
  }
  func.func @transform_2(%arg0: i32, %arg1: i32) -> (i32, i32) {
    %c0_i32 = arith.constant 0 : i32
    %c0_i32_0 = arith.constant 0 : i32
    %c0_i32_1 = arith.constant 0 : i32
    return %c0_i32, %c0_i32_0 : i32, i32
  }
  func.func @transform_3(%arg0: i32, %arg1: i32) -> (i32, i32) {
    %c0_i32 = arith.constant 0 : i32
    %c0_i32_0 = arith.constant 0 : i32
    return %arg0, %c0_i32 : i32, i32
  }
}

module attributes {stable_mosaic.version = 11 : i64} {
  func.func @_head_decode_kernel(%arg0: i32, %arg1: i32, %arg2: memref<256x16xbf16, #tpu.memory_space<vmem>>, %arg3: memref<16x256xbf16, #tpu.memory_space<vmem>>, %arg4: memref<1x256xf32, #tpu.memory_space<vmem>>, %arg5: memref<1x256xf32, #tpu.memory_space<vmem>>, %arg6: memref<1x256xf32, #tpu.memory_space<vmem>>, %arg7: memref<1x256xf32, #tpu.memory_space<vmem>>, %arg8: memref<1x256xf32, #tpu.memory_space<vmem>>, %arg9: memref<256x2xf32, #tpu.memory_space<vmem>>, %arg10: memref<256x256xf32, #tpu.memory_space<vmem>>, %arg11: memref<256x256xf32, #tpu.memory_space<vmem>>) attributes {dimension_semantics = [#tpu.dimension_semantics<parallel>, #tpu.dimension_semantics<arbitrary>], iteration_bounds = array<i64: 2, 1>, scalar_prefetch = 0 : i64, scratch_operands = 1 : i64, tpu.core_type = #tpu.core_type<tc>, window_params = [{transform_indices = @transform_0, window_bounds = array<i64: 256, 16>}, {transform_indices = @transform_1, window_bounds = array<i64: 16, 256>}, {pipeline_mode = #tpu.pipeline_mode<synchronous>, transform_indices = @transform_2, window_bounds = array<i64: 1, 256>}, {pipeline_mode = #tpu.pipeline_mode<synchronous>, transform_indices = @transform_3, window_bounds = array<i64: 1, 256>}, {pipeline_mode = #tpu.pipeline_mode<synchronous>, transform_indices = @transform_4, window_bounds = array<i64: 1, 256>}, {pipeline_mode = #tpu.pipeline_mode<synchronous>, transform_indices = @transform_5, window_bounds = array<i64: 1, 256>}, {pipeline_mode = #tpu.pipeline_mode<synchronous>, transform_indices = @transform_6, window_bounds = array<i64: 1, 256>}, {transform_indices = @transform_7, window_bounds = array<i64: 256, 2>}, {transform_indices = @transform_8, window_bounds = array<i64: 256, 256>}]} {
    %c0_i32 = arith.constant 0 : i32
    %0 = arith.cmpi eq, %arg1, %c0_i32 : i32
    %1 = arith.extui %0 : i1 to i32
    %c0_i32_0 = arith.constant 0 : i32
    %2 = arith.cmpi ne, %1, %c0_i32_0 : i32
    scf.if %2 {
      %cst_10 = arith.constant 0.000000e+00 : f32
      %12 = vector.broadcast %cst_10 : f32 to vector<256x256xf32>
      %c0_11 = arith.constant 0 : index
      %c0_12 = arith.constant 0 : index
      %13 = vector.load %arg11[%c0_11, %c0_12] : memref<256x256xf32, #tpu.memory_space<vmem>>, vector<256x256xf32>
      tpu.vector_store %arg11[%c0_11, %c0_12], %12 {strides = array<i32>} : memref<256x256xf32, #tpu.memory_space<vmem>>, vector<256x256xf32>,
    } else {
    }
    %c0 = arith.constant 0 : index
    %c0_1 = arith.constant 0 : index
    %3 = vector.load %arg11[%c0, %c0_1] : memref<256x256xf32, #tpu.memory_space<vmem>>, vector<256x256xf32>
    %c0_2 = arith.constant 0 : index
    %c0_3 = arith.constant 0 : index
    %4 = vector.load %arg2[%c0_2, %c0_3] : memref<256x16xbf16, #tpu.memory_space<vmem>>, vector<256x16xbf16>
    %c0_4 = arith.constant 0 : index
    %c0_5 = arith.constant 0 : index
    %5 = vector.load %arg3[%c0_4, %c0_5] : memref<16x256xbf16, #tpu.memory_space<vmem>>, vector<16x256xbf16>
    %cst = arith.constant dense<0.000000e+00> : vector<256x256xf32>
    %6 = tpu.matmul %4, %5, %cst {dimension_numbers = #tpu.dot_dimension_numbers<[1], [0], [0], [1], [0, 0, 1, 1], [], []>} : vector<256x16xbf16>, vector<16x256xbf16>, vector<256x256xf32> -> vector<256x256xf32>
    %7 = arith.addf %3, %6 : vector<256x256xf32>
    %c0_6 = arith.constant 0 : index
    %c0_7 = arith.constant 0 : index
    %8 = vector.load %arg11[%c0_6, %c0_7] : memref<256x256xf32, #tpu.memory_space<vmem>>, vector<256x256xf32>
    tpu.vector_store %arg11[%c0_6, %c0_7], %7 {strides = array<i32>} : memref<256x256xf32, #tpu.memory_space<vmem>>, vector<256x256xf32>,
    %c0_i32_8 = arith.constant 0 : i32
    %9 = arith.cmpi eq, %arg1, %c0_i32_8 : i32
    %10 = arith.extui %9 : i1 to i32
    %c0_i32_9 = arith.constant 0 : i32
    %11 = arith.cmpi ne, %10, %c0_i32_9 : i32
    scf.if %11 {
      %c0_10 = arith.constant 0 : index
      %c0_11 = arith.constant 0 : index
      %12 = vector.load %arg11[%c0_10, %c0_11] : memref<256x256xf32, #tpu.memory_space<vmem>>, vector<256x256xf32>
      %c0_12 = arith.constant 0 : index
      %c0_13 = arith.constant 0 : index
      %13 = vector.load %arg4[%c0_12, %c0_13] : memref<1x256xf32, #tpu.memory_space<vmem>>, vector<1x256xf32>
      %14 = vector.broadcast %13 : vector<1x256xf32> to vector<256x256xf32>
      %15 = arith.addf %12, %14 : vector<256x256xf32>
      %cst_14 = arith.constant 0.000000e+00 : f32
      %16 = vector.broadcast %cst_14 : f32 to vector<256x256xf32>
      %17 = arith.subf %16, %15 : vector<256x256xf32>
      %18 = math.exp %17 : vector<256x256xf32>
      %cst_15 = arith.constant 1.000000e+00 : f32
      %19 = vector.broadcast %cst_15 : f32 to vector<256x256xf32>
      %20 = arith.addf %19, %18 : vector<256x256xf32>
      %21 = tpu.reciprocal %20 {approx = true} : vector<256x256xf32> -> vector<256x256xf32>
      %22 = tpu.reciprocal %18 {approx = true} : vector<256x256xf32> -> vector<256x256xf32>
      %c0_16 = arith.constant 0 : index
      %c0_17 = arith.constant 0 : index
      %23 = vector.load %arg6[%c0_16, %c0_17] : memref<1x256xf32, #tpu.memory_space<vmem>>, vector<1x256xf32>
      %cst_18 = arith.constant 5.000000e-01 : f32
      %24 = vector.broadcast %cst_18 : f32 to vector<1x256xf32>
      %25 = arith.cmpf ogt, %23, %24 : vector<1x256xf32>
      %26 = vector.shape_cast %25 : vector<1x256xi1> to vector<1x256xi1>
      %27 = vector.broadcast %26 : vector<1x256xi1> to vector<256x256xi1>
      %28 = arith.select %27, %22, %21 : vector<256x256xi1>, vector<256x256xf32>
      %c0_19 = arith.constant 0 : index
      %c0_20 = arith.constant 0 : index
      %29 = vector.load %arg9[%c0_19, %c0_20] : memref<256x2xf32, #tpu.memory_space<vmem>>, vector<256x2xf32>
      %30 = vector.extract_strided_slice %29 {offsets = [0, 0], sizes = [256, 1], strides = [1, 1]} : vector<256x2xf32> to vector<256x1xf32>
      %31 = vector.extract_strided_slice %29 {offsets = [0, 1], sizes = [256, 1], strides = [1, 1]} : vector<256x2xf32> to vector<256x1xf32>
      %c0_21 = arith.constant 0 : index
      %c0_22 = arith.constant 0 : index
      %32 = vector.load %arg5[%c0_21, %c0_22] : memref<1x256xf32, #tpu.memory_space<vmem>>, vector<1x256xf32>
      %33 = vector.broadcast %32 : vector<1x256xf32> to vector<256x256xf32>
      %34 = arith.mulf %28, %33 : vector<256x256xf32>
      %c0_23 = arith.constant 0 : index
      %c0_24 = arith.constant 0 : index
      %35 = vector.load %arg7[%c0_23, %c0_24] : memref<1x256xf32, #tpu.memory_space<vmem>>, vector<1x256xf32>
      %36 = vector.broadcast %30 : vector<256x1xf32> to vector<256x256xf32>
      %37 = vector.broadcast %35 : vector<1x256xf32> to vector<256x256xf32>
      %38 = arith.mulf %36, %37 : vector<256x256xf32>
      %39 = arith.addf %34, %38 : vector<256x256xf32>
      %c0_25 = arith.constant 0 : index
      %c0_26 = arith.constant 0 : index
      %40 = vector.load %arg8[%c0_25, %c0_26] : memref<1x256xf32, #tpu.memory_space<vmem>>, vector<1x256xf32>
      %41 = vector.broadcast %31 : vector<256x1xf32> to vector<256x256xf32>
      %42 = vector.broadcast %40 : vector<1x256xf32> to vector<256x256xf32>
      %43 = arith.mulf %41, %42 : vector<256x256xf32>
      %44 = arith.addf %39, %43 : vector<256x256xf32>
      %c0_27 = arith.constant 0 : index
      %c0_28 = arith.constant 0 : index
      %45 = vector.load %arg10[%c0_27, %c0_28] : memref<256x256xf32, #tpu.memory_space<vmem>>, vector<256x256xf32>
      tpu.vector_store %arg10[%c0_27, %c0_28], %44 {strides = array<i32>} : memref<256x256xf32, #tpu.memory_space<vmem>>, vector<256x256xf32>,
    } else {
    }
    return
  }
  func.func @transform_0(%arg0: i32, %arg1: i32) -> (i32, i32) {
    %c0_i32 = arith.constant 0 : i32
    return %arg0, %arg1 : i32, i32
  }
  func.func @transform_1(%arg0: i32, %arg1: i32) -> (i32, i32) {
    %c0_i32 = arith.constant 0 : i32
    %c0_i32_0 = arith.constant 0 : i32
    return %arg1, %c0_i32 : i32, i32
  }
  func.func @transform_2(%arg0: i32, %arg1: i32) -> (i32, i32) {
    %c0_i32 = arith.constant 0 : i32
    %c0_i32_0 = arith.constant 0 : i32
    %c0_i32_1 = arith.constant 0 : i32
    return %c0_i32, %c0_i32_0 : i32, i32
  }
  func.func @transform_3(%arg0: i32, %arg1: i32) -> (i32, i32) {
    %c0_i32 = arith.constant 0 : i32
    %c0_i32_0 = arith.constant 0 : i32
    %c0_i32_1 = arith.constant 0 : i32
    return %c0_i32, %c0_i32_0 : i32, i32
  }
  func.func @transform_4(%arg0: i32, %arg1: i32) -> (i32, i32) {
    %c0_i32 = arith.constant 0 : i32
    %c0_i32_0 = arith.constant 0 : i32
    %c0_i32_1 = arith.constant 0 : i32
    return %c0_i32, %c0_i32_0 : i32, i32
  }
  func.func @transform_5(%arg0: i32, %arg1: i32) -> (i32, i32) {
    %c0_i32 = arith.constant 0 : i32
    %c0_i32_0 = arith.constant 0 : i32
    %c0_i32_1 = arith.constant 0 : i32
    return %c0_i32, %c0_i32_0 : i32, i32
  }
  func.func @transform_6(%arg0: i32, %arg1: i32) -> (i32, i32) {
    %c0_i32 = arith.constant 0 : i32
    %c0_i32_0 = arith.constant 0 : i32
    %c0_i32_1 = arith.constant 0 : i32
    return %c0_i32, %c0_i32_0 : i32, i32
  }
  func.func @transform_7(%arg0: i32, %arg1: i32) -> (i32, i32) {
    %c0_i32 = arith.constant 0 : i32
    %c0_i32_0 = arith.constant 0 : i32
    return %arg0, %c0_i32 : i32, i32
  }
  func.func @transform_8(%arg0: i32, %arg1: i32) -> (i32, i32) {
    %c0_i32 = arith.constant 0 : i32
    %c0_i32_0 = arith.constant 0 : i32
    return %arg0, %c0_i32 : i32, i32
  }
}

</mosaic_0001>

<bundles_post_ra>
// kernel: tile.14
= control target key start
LH: loop header
LB: loop body
LE: loop exit
PB: predicated region body
PF: predicated region fallthrough
CT: control target
= control target key end

     0   :  { %s7_s6 = smov 3  ;;  %s21_s9 = smov 3  ;;  %vm4_vm0 = vcmask 130048   ;;  %vm11_vm1 = vcmask 1048448   ;;  %vm18_vm2 = vcmask 917248   ;;  %vm25_vm3 = vcmask 786048   ;;  %s119_s0 = inlined_call_operand.vmem [shape: f32[16,16], index: 0, kind: input, shape index: {}]   ;;  %s120_s1 = inlined_call_operand.vmem [shape: f32[256], index: 1, kind: output, shape index: {}]  }
   0x1   :  { %v61_v0 = vld [vmem:[%s119_s0 + $0x7] ss:$8 sm:%s7_s6]   ;;  %s75_s10 = smov 112   ;;  %v63_v1 = vld [vmem:[%s119_s0 + $0x5] ss:$8 sm:%s21_s9]   ;;  %s76_s13 = smov 80  }
   0x2   :  { %9 = vrot.lane.b32.xlu0 %v61_v0, %s75_s10  ;;  %23 = vrot.lane.b32.xlu1 %v63_v1, %s76_s13  ;;  %s14_s14 = smov 3  ;;  %s28_s15 = smov 3  ;;  %vm32_vm4 = vcmask 654848   ;;  %vm39_vm5 = vcmask 523648   ;;  %vm46_vm6 = vcmask 392448   ;;  %vm53_vm7 = vcmask 261248  }
   0x3   :  { %s35_s16 = smov 3  ;;  %v62_v3 = vld [vmem:[%s119_s0 + $0x6] ss:$8 sm:%s14_s14]   ;;  %s77_s21 = smov 48   ;;  %v64_v4 = vld [vmem:[%s119_s0 + $0x4] ss:$8 sm:%s28_s15]  }
   0x4   :  { %v65_v2 = vld [vmem:[%s119_s0 + $0x3] ss:$8 sm:%s35_s16]   ;;  %s42_s24 = smov 3  ;;  %s78_s25 = smov 96  }
   0x5   :  { %37 = vrot.lane.b32.xlu2 %v65_v2, %s77_s21  ;;  %s79_s26 = smov 64   ;;  %s49_s27 = smov 3  ;;  %v66_v5 = vld [vmem:[%s119_s0 + $0x2] ss:$8 sm:%s42_s24]  }
   0x6   :  { %v67_v6 = vld [vmem:[%s119_s0 + $0x1] ss:$8 sm:%s49_s27]   ;;  %s80_s3 = smov 32   ;;  %s81_s4 = smov 16  }
   0x7   :  { %s2_s5 = smov 3 }
   0x8   :  { %v3_v7 = vld [vmem:[%s119_s0] ss:$8 sm:%s2_s5]  }
   0x9   :  { %5 = vst.msk [vmem:[#allocation0] sm:$0x3] %vm4_vm0, %v3_v7  }
   0xa   :  { %16 = vrot.lane.b32.xlu0 %v62_v3, %s78_s25  ;;  %30 = vrot.lane.b32.xlu1 %v64_v4, %s79_s26 }
   0xd   :  { %44 = vrot.lane.b32.xlu2 %v66_v5, %s80_s3 }
  0x12   :  { %51 = vrot.lane.b32.xlu0 %v67_v6, %s81_s4 }
  0x5f   :  { %v38_v8 = vpop.permute.xlu2 %37  }
  0x67   :  { %v45_v9 = vpop.permute.xlu2 %44  }
  0x74   :  { %v10_v10 = vpop.permute.xlu0 %9   ;;  %v24_v11 = vpop.permute.xlu1 %23  }
  0x75   :  { %12 = vst.msk [vmem:[#allocation0] sm:$0x3] %vm11_vm1, %v10_v10  }
  0x7c   :  { %v17_v12 = vpop.permute.xlu0 %16   ;;  %v31_v13 = vpop.permute.xlu1 %30  }
  0x7d   :  { %19 = vst.msk [vmem:[#allocation0] sm:$0x3] %vm18_vm2, %v17_v12  }
  0x7e   :  { %26 = vst.msk [vmem:[#allocation0] sm:$0x3] %vm25_vm3, %v24_v11  }
  0x7f   :  { %33 = vst.msk [vmem:[#allocation0] sm:$0x3] %vm32_vm4, %v31_v13  }
  0x80   :  { %40 = vst.msk [vmem:[#allocation0] sm:$0x3] %vm39_vm5, %v38_v8  }
  0x81   :  { %47 = vst.msk [vmem:[#allocation0] sm:$0x3] %vm46_vm6, %v45_v9  }
  0x84   :  { %v52_v14 = vpop.permute.xlu0 %51  }
  0x85   :  { %54 = vst.msk [vmem:[#allocation0] sm:$0x3] %vm53_vm7, %v52_v14  }
  0x8c   :  { %v57_v15 = vld [vmem:[#allocation0] sm:$0x3] }
  0x8d   :  { %60 = vst [vmem:[%s120_s1] sm:$0x3] %v57_v15 }

// kernel: tile.16
= control target key start
LH: loop header
LB: loop body
LE: loop exit
PB: predicated region body
PF: predicated region fallthrough
CT: control target
= control target key end

     0   :  { %s88_s8 = smov 112   ;;  %s89_s11 = smov 80   ;;  %vm3_vm0 = vcmask 130048   ;;  %vm9_vm1 = vcmask 1048448   ;;  %vm15_vm2 = vcmask 917248   ;;  %vm21_vm3 = vcmask 786048   ;;  %s141_s0 = inlined_call_operand.vmem [shape: f32[32,16], index: 0, kind: input, shape index: {}]   ;;  %s142_s1 = inlined_call_operand.vmem [shape: f32[512,1], index: 1, kind: output, shape index: {}]  }
   0x1   :  { %v71_v0 = vld [vmem:[%s141_s0 + $0x7] ss:$8 sm:$0xf]   ;;  %v73_v1 = vld [vmem:[%s141_s0 + $0x5] ss:$8 sm:$0xf]  }
   0x2   :  { %7 = vrot.lane.b32.xlu0 %v71_v0, %s88_s8  ;;  %19 = vrot.lane.b32.xlu1 %v73_v1, %s89_s11  ;;  %v75_v2 = vld [vmem:[%s141_s0 + $0x3] ss:$8 sm:$0xf]   ;;  %s90_s14 = smov 48   ;;  %s91_s19 = smov 96   ;;  %vm27_vm4 = vcmask 654848  }
   0x3   :  { %31 = vrot.lane.b32.xlu2 %v75_v2, %s90_s14  ;;  %v72_v3 = vld [vmem:[%s141_s0 + $0x6] ss:$8 sm:$0xf]   ;;  %v74_v4 = vld [vmem:[%s141_s0 + $0x4] ss:$8 sm:$0xf]  }
   0x4   :  { %s92_s20 = smov 64   ;;  %v76_v5 = vld [vmem:[%s141_s0 + $0x2] ss:$8 sm:$0xf]   ;;  %s93_s23 = smov 32   ;;  %vm33_vm5 = vcmask 523648  }
   0x5   :  { %v77_v6 = vld [vmem:[%s141_s0 + $0x1] ss:$8 sm:$0xf]   ;;  %s94_s26 = smov 16   ;;  %vm39_vm6 = vcmask 392448   ;;  %vm45_vm7 = vcmask 261248  }
   0x6   :  { %v2_v7 = vld [vmem:[%s141_s0] ss:$8 sm:$0xf]  }
   0x7   :  { %4 = vst.msk [vmem:[#allocation0] ss:$8 sm:$0xf] %vm3_vm0, %v2_v7  }
   0xa   :  { %13 = vrot.lane.b32.xlu0 %v72_v3, %s91_s19  ;;  %25 = vrot.lane.b32.xlu1 %v74_v4, %s92_s20 }
   0xb   :  { %37 = vrot.lane.b32.xlu2 %v76_v5, %s93_s23 }
  0x12   :  { %43 = vrot.lane.b32.xlu0 %v77_v6, %s94_s26 }
  0x5d   :  { %v32_v8 = vpop.permute.xlu2 %31  }
  0x65   :  { %v38_v9 = vpop.permute.xlu2 %37  }
  0x74   :  { %v8_v10 = vpop.permute.xlu0 %7   ;;  %v20_v11 = vpop.permute.xlu1 %19  }
  0x75   :  { %10 = vst.msk [vmem:[#allocation0] ss:$8 sm:$0xf] %vm9_vm1, %v8_v10  }
  0x7c   :  { %v14_v12 = vpop.permute.xlu0 %13   ;;  %v26_v13 = vpop.permute.xlu1 %25  }
  0x7d   :  { %16 = vst.msk [vmem:[#allocation0] ss:$8 sm:$0xf] %vm15_vm2, %v14_v12  }
  0x7e   :  { %22 = vst.msk [vmem:[#allocation0] ss:$8 sm:$0xf] %vm21_vm3, %v20_v11  }
  0x7f   :  { %28 = vst.msk [vmem:[#allocation0] ss:$8 sm:$0xf] %vm27_vm4, %v26_v13  }
  0x80   :  { %34 = vst.msk [vmem:[#allocation0] ss:$8 sm:$0xf] %vm33_vm5, %v32_v8  }
  0x81   :  { %40 = vst.msk [vmem:[#allocation0] ss:$8 sm:$0xf] %vm39_vm6, %v38_v9  }
  0x84   :  { %v44_v14 = vpop.permute.xlu0 %43  }
  0x85   :  { %46 = vst.msk [vmem:[#allocation0] ss:$8 sm:$0xf] %vm45_vm7, %v44_v14  }
  0x8c   :  { %v49_v15 = vld [vmem:[#allocation0] sm:$0x1]  ;;  %v54_v16 = vld [vmem:[#allocation0 + $0x8] sm:$0x1]  ;;  %v60_v17 = vld [vmem:[#allocation0 + $0x10] sm:$0x1] }
  0x8d   :  { %52 = vst [vmem:[%s142_s1] sm:$0x1] %v49_v15  ;;  %v66_v18 = vld [vmem:[#allocation0 + $0x18] sm:$0x1] }
  0x8e   :  { %78 = vst [vmem:[%s142_s1 + $0x1] sm:$0x1] %v54_v16 }
  0x8f   :  { %79 = vst [vmem:[%s142_s1 + $0x2] sm:$0x1] %v60_v17 }
  0x90   :  { %80 = vst [vmem:[%s142_s1 + $0x3] sm:$0x1] %v66_v18 }

// kernel: _lambda_.7
= control target key start
LH: loop header
LB: loop body
LE: loop exit
PB: predicated region body
PF: predicated region fallthrough
CT: control target
= control target key end

     0   :  { %s1100_s12 = smov 0   ;;  %s1102_s13 = smov 0   ;;  %s1344_s0 = inlined_call_operand.vmem [shape: bf16[512,8], index: 0, kind: input, shape index: {}]   ;;  %s1345_s1 = inlined_call_operand.vmem [shape: bf16[8,8], index: 1, kind: input, shape index: {}]   ;;  %s1346_s2 = inlined_call_operand.vmem [shape: f32[1,8], index: 2, kind: input, shape index: {}]   ;;  %s1347_s3 = inlined_call_operand.vmem [shape: bf16[512,8], index: 3, kind: output, shape index: {}]  }
   0x1   :  { %s1104_s14 = smov 0  }
   0x2 LB: > { %s25_s15 = sadd.s32 1, %s1073_s13  ;;  %p923_p0 = scmp.ge.s32.totalorder %s1077_s14, 1  ;;  %s1077_s14 = sphi %s1104_s14, %s13_s14   ;;  %s1073_s13 = sphi %s1102_s13, %s1349_s13   ;;  %s1069_s12 = sphi %s1100_s12, %s1348_s12  }
   0x3   : > { %p27_p1 = scmp.ge.s32.totalorder %s25_s15, 2  ;;  %p164_p2 = scmp.lt.s32.totalorder %s1077_s14, 3 }
   0x5   : > { %s1351_s15 = smov (%p27_p1, %s25_s15), 0  ;;  %p165_p3 = pnand %p923_p0, %p164_p2 }
   0x6   : > { %s924_s18 = sshll.u32 (!%p165_p3), %s1069_s12, 5 }
   0x7   : > { %168 = sbr.rel (%p165_p3) target bundleno = 228 (0xe4), region = 32  ;;  %p196_p4 = scmp.lt.s32.totalorder (!%p165_p3), %s924_s18, 63 }
   0xc   : > { %v316_v0 = vld [vmem:[%s1345_s1] sm:$0xf]  ;;  %vm446_vm0 = vcmask 1043456   ;;  %s1353_s18 = smov (!%p196_p4, %s924_s18), 63  ;;  %vm219_vm1 = vcmask 64512   ;;  %v1079_v10 = vmov 0.0  }
   0xd   : > { %v448_v1 = vsel %vm446_vm0, %v316_v0, 0  ;;  %s925_s19 = sshll.u32 %s1353_s18, 2  ;;  %220 = vst.msk [vmem:[#allocation2] sm:$0xff] %vm219_vm1, %v1079_v10  ;;  %v1200_v29 = vld [vmem:[%s1346_s2] ss:$0 sm:$0xff]  ;;  %vm802_vm4 = vcmask 60416  }
   0xe   : > { %457 = vmatpush.bf16.msra.mxu0 %v448_v1  ;;  %1026 = vmatpush.bf16.msra.mxu1 %v448_v1  ;;  %s1129_s22 = scalar_lea.vmem %s1344_s0, %s925_s19  ;;  %221 = vst.msk [vmem:[#allocation2 + $0x8] sm:$0xff] %vm219_vm1, %v1079_v10  ;;  %s1213_s27 = scalar_lea.vmem %s1347_s3, %s925_s19 }
   0xf   : > { %1027 = vmatpush.bf16.msra.mxu2 %v448_v1  ;;  %1028 = vmatpush.bf16.msra.mxu3 %v448_v1  ;;  %v1010_v2 = vld [vmem:[%s1129_s22] sm:$0xff]  ;;  %v1011_v6 = vld [vmem:[%s1129_s22 + $0x8] sm:$0xff]  ;;  %222 = vst.msk [vmem:[#allocation2 + $0x10] sm:$0xff] %vm219_vm1, %v1079_v10  ;;  %v1012_v11 = vld [vmem:[%s1129_s22 + $0x10] sm:$0xff] }
  0x10   : > { %v1014_v3 = vld [vmem:[%s1129_s22 + $0x20] sm:$0xff]  ;;  %v1015_v7 = vld [vmem:[%s1129_s22 + $0x28] sm:$0xff]  ;;  %223 = vst.msk [vmem:[#allocation2 + $0x18] sm:$0xff] %vm219_vm1, %v1079_v10  ;;  %v1016_v12 = vld [vmem:[%s1129_s22 + $0x30] sm:$0xff] }
  0x11   : > { %v1018_v4 = vld [vmem:[%s1129_s22 + $0x40] sm:$0xff]  ;;  %992 = vmatmul.msk.bf16.vlgmr.msra.gmra.mxu0 %vm219_vm1, %v1010_v2  ;;  %996 = vmatmul.msk.bf16.vlgmr.msra.gmra.mxu1 %vm219_vm1, %v1014_v3  ;;  %v1019_v8 = vld [vmem:[%s1129_s22 + $0x48] sm:$0xff]  ;;  %224 = vst.msk [vmem:[#allocation2 + $0x20] sm:$0xff] %vm219_vm1, %v1079_v10  ;;  %v1020_v13 = vld [vmem:[%s1129_s22 + $0x50] sm:$0xff] }
  0x12   : > { %v1022_v5 = vld [vmem:[%s1129_s22 + $0x60] sm:$0xff]  ;;  %1000 = vmatmul.msk.bf16.vlgmr.msra.gmra.mxu2 %vm219_vm1, %v1018_v4  ;;  %v1023_v9 = vld [vmem:[%s1129_s22 + $0x68] sm:$0xff]  ;;  %225 = vst.msk [vmem:[#allocation2 + $0x28] sm:$0xff] %vm219_vm1, %v1079_v10  ;;  %v1024_v14 = vld [vmem:[%s1129_s22 + $0x70] sm:$0xff] }
  0x13   : > { %1004 = vmatmul.msk.bf16.vlgmr.msra.gmra.mxu3 %vm219_vm1, %v1022_v5  ;;  %226 = vst.msk [vmem:[#allocation2 + $0x30] sm:$0xff] %vm219_vm1, %v1079_v10  ;;  %v1013_v15 = vld [vmem:[%s1129_s22 + $0x18] sm:$0xff] }
  0x14   : > { %227 = vst.msk [vmem:[#allocation2 + $0x38] sm:$0xff] %vm219_vm1, %v1079_v10  ;;  %v1017_v16 = vld [vmem:[%s1129_s22 + $0x38] sm:$0xff]  ;;  %v252_v19 = vld [vmem:[#allocation2] sm:$0xff] }
  0x15   : > { %228 = vst.msk [vmem:[#allocation2 + $0x40] sm:$0xff] %vm219_vm1, %v1079_v10  ;;  %v1021_v17 = vld [vmem:[%s1129_s22 + $0x58] sm:$0xff]  ;;  %v253_v27 = vld [vmem:[#allocation2 + $0x8] sm:$0xff] }
  0x16   : > { %229 = vst.msk [vmem:[#allocation2 + $0x48] sm:$0xff] %vm219_vm1, %v1079_v10  ;;  %v1025_v18 = vld [vmem:[%s1129_s22 + $0x78] sm:$0xff]  ;;  %v254_v49 = vld [vmem:[#allocation2 + $0x10] sm:$0xff] }
  0x17   : > { %230 = vst.msk [vmem:[#allocation2 + $0x50] sm:$0xff] %vm219_vm1, %v1079_v10 }
  0x18   : > { %231 = vst.msk [vmem:[#allocation2 + $0x58] sm:$0xff] %vm219_vm1, %v1079_v10 }
  0x19   : > { %232 = vst.msk [vmem:[#allocation2 + $0x60] sm:$0xff] %vm219_vm1, %v1079_v10 }
  0x1a   : > { %233 = vst.msk [vmem:[#allocation2 + $0x68] sm:$0xff] %vm219_vm1, %v1079_v10 }
  0x1b   : > { %234 = vst.msk [vmem:[#allocation2 + $0x70] sm:$0xff] %vm219_vm1, %v1079_v10 }
  0x1c   : > { %235 = vst.msk [vmem:[#allocation2 + $0x78] sm:$0xff] %vm219_vm1, %v1079_v10  ;;  %v260_v20 = vld [vmem:[#allocation2 + $0x40] sm:$0xff] }
  0x1d   : > { %236 = vst.msk [vmem:[#allocation2 + $0x80] sm:$0xff] %vm219_vm1, %v1079_v10  ;;  %v261_v28 = vld [vmem:[#allocation2 + $0x48] sm:$0xff] }
  0x1e   : > { %237 = vst.msk [vmem:[#allocation2 + $0x88] sm:$0xff] %vm219_vm1, %v1079_v10  ;;  %v262_v54 = vld [vmem:[#allocation2 + $0x50] sm:$0xff] }
  0x1f   : > { %238 = vst.msk [vmem:[#allocation2 + $0x90] sm:$0xff] %vm219_vm1, %v1079_v10 }
  0x20   : > { %239 = vst.msk [vmem:[#allocation2 + $0x98] sm:$0xff] %vm219_vm1, %v1079_v10 }
  0x21   : > { %993 = vmatmul.msk.bf16.gmra.mxu0 %vm219_vm1, %v1011_v6  ;;  %997 = vmatmul.msk.bf16.gmra.mxu1 %vm219_vm1, %v1015_v7  ;;  %240 = vst.msk [vmem:[#allocation2 + $0xa0] sm:$0xff] %vm219_vm1, %v1079_v10 }
  0x22   : > { %1001 = vmatmul.msk.bf16.gmra.mxu2 %vm219_vm1, %v1019_v8  ;;  %241 = vst.msk [vmem:[#allocation2 + $0xa8] sm:$0xff] %vm219_vm1, %v1079_v10 }
  0x23   : > { %1005 = vmatmul.msk.bf16.gmra.mxu3 %vm219_vm1, %v1023_v9  ;;  %242 = vst.msk [vmem:[#allocation2 + $0xb0] sm:$0xff] %vm219_vm1, %v1079_v10 }
  0x24   : > { %243 = vst.msk [vmem:[#allocation2 + $0xb8] sm:$0xff] %vm219_vm1, %v1079_v10  ;;  %v268_v25 = vld [vmem:[#allocation2 + $0x80] sm:$0xff] }
  0x25   : > { %244 = vst.msk [vmem:[#allocation2 + $0xc0] sm:$0xff] %vm219_vm1, %v1079_v10  ;;  %v269_v43 = vld [vmem:[#allocation2 + $0x88] sm:$0xff] }
  0x26   : > { %245 = vst.msk [vmem:[#allocation2 + $0xc8] sm:$0xff] %vm219_vm1, %v1079_v10  ;;  %v270_v8 = vld [vmem:[#allocation2 + $0x90] sm:$0xff] }
  0x27   : > { %246 = vst.msk [vmem:[#allocation2 + $0xd0] sm:$0xff] %vm219_vm1, %v1079_v10 }
  0x28   : > { %247 = vst.msk [vmem:[#allocation2 + $0xd8] sm:$0xff] %vm219_vm1, %v1079_v10 }
  0x29   : > { %248 = vst.msk [vmem:[#allocation2 + $0xe0] sm:$0xff] %vm219_vm1, %v1079_v10 }
  0x2a   : > { %249 = vst.msk [vmem:[#allocation2 + $0xe8] sm:$0xff] %vm219_vm1, %v1079_v10 }
  0x2b   : > { %250 = vst.msk [vmem:[#allocation2 + $0xf0] sm:$0xff] %vm219_vm1, %v1079_v10 }
  0x2c   : > { %251 = vst.msk [vmem:[#allocation2 + $0xf8] sm:$0xff] %vm219_vm1, %v1079_v10  ;;  %v276_v26 = vld [vmem:[#allocation2 + $0xc0] sm:$0xff] }
  0x2d   : > { %v277_v45 = vld [vmem:[#allocation2 + $0xc8] sm:$0xff] }
  0x31   : > { %994 = vmatmul.msk.bf16.gmra.mxu0 %vm219_vm1, %v1012_v11  ;;  %998 = vmatmul.msk.bf16.gmra.mxu1 %vm219_vm1, %v1016_v12 }
  0x32   : > { %1002 = vmatmul.msk.bf16.gmra.mxu2 %vm219_vm1, %v1020_v13  ;;  %v278_v13 = vld [vmem:[#allocation2 + $0xd0] sm:$0xff] }
  0x33   : > { %1006 = vmatmul.msk.bf16.gmra.mxu3 %vm219_vm1, %v1024_v14 }
  0x41   : > { %995 = vmatmul.msk.bf16.gmra.mxu0 %vm219_vm1, %v1013_v15  ;;  %999 = vmatmul.msk.bf16.gmra.mxu1 %vm219_vm1, %v1017_v16 }
  0x42   : > { %1003 = vmatmul.msk.bf16.gmra.mxu2 %vm219_vm1, %v1021_v17  ;;  %v255_v17 = vld [vmem:[#allocation2 + $0x18] sm:$0xff] }
  0x43   : > { %1007 = vmatmul.msk.bf16.gmra.mxu3 %vm219_vm1, %v1025_v18 }
  0x8e   : > { %v459_v21 = vpop.f32.mrf.mxu0  ;;  %v479_v22 = vpop.f32.mrf.mxu1 }
  0x8f   : > { %v539_v23 = vadd.f32 %v459_v21, %v252_v19  ;;  %v547_v24 = vadd.f32 %v479_v22, %v260_v20 }
  0x91   : > { %571 = vst.msk [vmem:[#allocation2] sm:$0xff] %vm219_vm1, %v539_v23  ;;  %v263_v23 = vld [vmem:[#allocation2 + $0x58] sm:$0xff] }
  0x92   : > { %579 = vst.msk [vmem:[#allocation2 + $0x40] sm:$0xff] %vm219_vm1, %v547_v24 }
  0x95   : > { %v499_v30 = vpop.f32.mrf.mxu2 }
  0x96   : > { %v519_v31 = vpop.f32.mrf.mxu3  ;;  %v555_v32 = vadd.f32 %v499_v30, %v268_v25  ;;  %v461_v34 = vpop.f32.mrf.mxu0 }
  0x97   : > { %v563_v33 = vadd.f32 %v519_v31, %v276_v26  ;;  %v481_v35 = vpop.f32.mrf.mxu1  ;;  %v540_v36 = vadd.f32 %v461_v34, %v253_v27  ;;  %v271_v34 = vld [vmem:[#allocation2 + $0x98] sm:$0xff] }
  0x98   : > { %v548_v37 = vadd.f32 %v481_v35, %v261_v28  ;;  %v606_v38 = vld [vmem:[#allocation2] sm:$0xff]  ;;  %587 = vst.msk [vmem:[#allocation2 + $0x80] sm:$0xff] %vm219_vm1, %v555_v32 }
  0x99   : > { %v642_v39 = vadd.f32 %v1200_v29, %v606_v38  ;;  %v614_v40 = vld [vmem:[#allocation2 + $0x40] sm:$0xff]  ;;  %595 = vst.msk [vmem:[#allocation2 + $0xc0] sm:$0xff] %vm219_vm1, %v563_v33 }
  0x9a   : > { %v650_v41 = vadd.f32 %v1200_v29, %v614_v40  ;;  %572 = vst.msk [vmem:[#allocation2 + $0x8] sm:$0xff] %vm219_vm1, %v540_v36 }
  0x9b   : > { %vm674_vm2 = vcmp.ge.f32.partialorder %v642_v39, 0.0  ;;  %v706_v42 = vmul.f32 0.1, %v642_v39  ;;  %580 = vst.msk [vmem:[#allocation2 + $0x48] sm:$0xff] %vm219_vm1, %v548_v37 }
  0x9c   : > { %vm682_vm3 = vcmp.ge.f32.partialorder %v650_v41, 0.0  ;;  %v714_v44 = vmul.f32 0.1, %v650_v41 }
  0x9d   : > { %v738_v46 = vsel %vm674_vm2, %v642_v39, %v706_v42  ;;  %v501_v47 = vpop.f32.mrf.mxu2 }
  0x9e   : > { %v521_v48 = vpop.f32.mrf.mxu3  ;;  %v770_v50 = vpack.c.bf16 %v738_v46, %v738_v46  ;;  %v746_v51 = vsel %vm682_vm3, %v650_v41, %v714_v44  ;;  %v556_v52 = vadd.f32 %v501_v47, %v269_v43  ;;  %v464_v53 = vpop.f32.mrf.mxu0 }
  0x9f   : > { %v484_v55 = vpop.f32.mrf.mxu1  ;;  %v778_v56 = vpack.c.bf16 %v746_v51, %v746_v51  ;;  %v622_v57 = vld [vmem:[#allocation2 + $0x80] sm:$0xff]  ;;  %v564_v58 = vadd.f32 %v521_v48, %v277_v45  ;;  %v541_v61 = vadd.f32 %v464_v53, %v254_v49  ;;  %v279_v45 = vld [vmem:[#allocation2 + $0xd8] sm:$0xff] }
  0xa0   : > { %803 = vst.msk [vmem:[%s1213_s27] sm:$0xf] %vm802_vm4, %v770_v50  ;;  %v658_v59 = vadd.f32 %v1200_v29, %v622_v57  ;;  %v630_v60 = vld [vmem:[#allocation2 + $0xc0] sm:$0xff]  ;;  %v549_v0 = vadd.f32 %v484_v55, %v262_v54 }
  0xa1   : > { %811 = vst.msk [vmem:[%s1213_s27 + $0x20] sm:$0xf] %vm802_vm4, %v778_v56  ;;  %v666_v62 = vadd.f32 %v1200_v29, %v630_v60  ;;  %v607_v63 = vld [vmem:[#allocation2 + $0x8] sm:$0xff]  ;;  %v256_v51 = vld [vmem:[#allocation2 + $0x20] sm:$0xff] }
  0xa2   : > { %vm690_vm5 = vcmp.ge.f32.partialorder %v658_v59, 0.0  ;;  %v722_v1 = vmul.f32 0.1, %v658_v59  ;;  %v643_v2 = vadd.f32 %v1200_v29, %v607_v63  ;;  %v615_v3 = vld [vmem:[#allocation2 + $0x48] sm:$0xff]  ;;  %588 = vst.msk [vmem:[#allocation2 + $0x88] sm:$0xff] %vm219_vm1, %v556_v52  ;;  %v264_v54 = vld [vmem:[#allocation2 + $0x60] sm:$0xff] }
  0xa3   : > { %vm698_vm6 = vcmp.ge.f32.partialorder %v666_v62, 0.0  ;;  %v730_v4 = vmul.f32 0.1, %v666_v62  ;;  %v651_v5 = vadd.f32 %v1200_v29, %v615_v3  ;;  %596 = vst.msk [vmem:[#allocation2 + $0xc8] sm:$0xff] %vm219_vm1, %v564_v58  ;;  %v280_v3 = vld [vmem:[#allocation2 + $0xe0] sm:$0xff] }
  0xa4   : > { %v754_v6 = vsel %vm690_vm5, %v658_v59, %v722_v1  ;;  %vm675_vm7 = vcmp.ge.f32.partialorder %v643_v2, 0.0  ;;  %v707_v7 = vmul.f32 0.1, %v643_v2  ;;  %573 = vst.msk [vmem:[#allocation2 + $0x10] sm:$0xff] %vm219_vm1, %v541_v61 }
  0xa5   : > { %v786_v9 = vpack.c.bf16 %v754_v6, %v754_v6  ;;  %v762_v10 = vsel %vm698_vm6, %v666_v62, %v730_v4  ;;  %vm683_vm8 = vcmp.ge.f32.partialorder %v651_v5, 0.0  ;;  %v715_v11 = vmul.f32 0.1, %v651_v5  ;;  %581 = vst.msk [vmem:[#allocation2 + $0x50] sm:$0xff] %vm219_vm1, %v549_v0  ;;  %v504_v12 = vpop.f32.mrf.mxu2  ;;  %v272_v0 = vld [vmem:[#allocation2 + $0xa0] sm:$0xff] }
  0xa6   : > { %v524_v14 = vpop.f32.mrf.mxu3  ;;  %v794_v15 = vpack.c.bf16 %v762_v10, %v762_v10  ;;  %v739_v16 = vsel %vm675_vm7, %v643_v2, %v707_v7  ;;  %v466_v18 = vpop.f32.mrf.mxu0  ;;  %v557_v22 = vadd.f32 %v504_v12, %v270_v8 }
  0xa7   : > { %v486_v19 = vpop.f32.mrf.mxu1  ;;  %819 = vst.msk [vmem:[%s1213_s27 + $0x40] sm:$0xf] %vm802_vm4, %v786_v9  ;;  %v771_v20 = vpack.c.bf16 %v739_v16, %v739_v16  ;;  %v747_v21 = vsel %vm683_vm8, %v651_v5, %v715_v11  ;;  %v565_v25 = vadd.f32 %v524_v14, %v278_v13  ;;  %v542_v27 = vadd.f32 %v466_v18, %v255_v17  ;;  %v257_v18 = vld [vmem:[#allocation2 + $0x28] sm:$0xff] }
  0xa8   : > { %827 = vst.msk [vmem:[%s1213_s27 + $0x60] sm:$0xf] %vm802_vm4, %v794_v15  ;;  %v779_v24 = vpack.c.bf16 %v747_v21, %v747_v21  ;;  %v550_v31 = vadd.f32 %v486_v19, %v263_v23 }
  0xa9   : > { %804 = vst.msk [vmem:[%s1213_s27 + $0x4] sm:$0xf] %vm802_vm4, %v771_v20  ;;  %v623_v26 = vld [vmem:[#allocation2 + $0x88] sm:$0xff] }
  0xaa   : > { %812 = vst.msk [vmem:[%s1213_s27 + $0x24] sm:$0xf] %vm802_vm4, %v779_v24  ;;  %v659_v28 = vadd.f32 %v1200_v29, %v623_v26  ;;  %v631_v30 = vld [vmem:[#allocation2 + $0xc8] sm:$0xff] }
  0xab   : > { %v667_v32 = vadd.f32 %v1200_v29, %v631_v30  ;;  %v608_v33 = vld [vmem:[#allocation2 + $0x10] sm:$0xff]  ;;  %589 = vst.msk [vmem:[#allocation2 + $0x90] sm:$0xff] %vm219_vm1, %v557_v22  ;;  %v265_v22 = vld [vmem:[#allocation2 + $0x68] sm:$0xff] }
  0xac   : > { %vm691_vm9 = vcmp.ge.f32.partialorder %v659_v28, 0.0  ;;  %v723_v35 = vmul.f32 0.1, %v659_v28  ;;  %v644_v36 = vadd.f32 %v1200_v29, %v608_v33  ;;  %v616_v37 = vld [vmem:[#allocation2 + $0x50] sm:$0xff]  ;;  %597 = vst.msk [vmem:[#allocation2 + $0xd0] sm:$0xff] %vm219_vm1, %v565_v25  ;;  %v273_v30 = vld [vmem:[#allocation2 + $0xa8] sm:$0xff] }
  0xad   : > { %vm699_vm10 = vcmp.ge.f32.partialorder %v667_v32, 0.0  ;;  %v731_v38 = vmul.f32 0.1, %v667_v32  ;;  %v652_v39 = vadd.f32 %v1200_v29, %v616_v37  ;;  %574 = vst.msk [vmem:[#allocation2 + $0x18] sm:$0xff] %vm219_vm1, %v542_v27  ;;  %v506_v40 = vpop.f32.mrf.mxu2 }
  0xae   : > { %v526_v41 = vpop.f32.mrf.mxu3  ;;  %v755_v42 = vsel %vm691_vm9, %v659_v28, %v723_v35  ;;  %vm676_vm11 = vcmp.ge.f32.partialorder %v644_v36, 0.0  ;;  %v708_v43 = vmul.f32 0.1, %v644_v36  ;;  %582 = vst.msk [vmem:[#allocation2 + $0x58] sm:$0xff] %vm219_vm1, %v550_v31  ;;  %v558_v44 = vadd.f32 %v506_v40, %v271_v34  ;;  %v469_v46 = vpop.f32.mrf.mxu0  ;;  %v281_v34 = vld [vmem:[#allocation2 + $0xe8] sm:$0xff] }
  0xaf   : > { %v489_v47 = vpop.f32.mrf.mxu1  ;;  %v787_v48 = vpack.c.bf16 %v755_v42, %v755_v42  ;;  %v763_v49 = vsel %vm699_vm10, %v667_v32, %v731_v38  ;;  %vm684_vm12 = vcmp.ge.f32.partialorder %v652_v39, 0.0  ;;  %v716_v50 = vmul.f32 0.1, %v652_v39 }
  0xb0   : > { %v795_v52 = vpack.c.bf16 %v763_v49, %v763_v49  ;;  %v740_v53 = vsel %vm676_vm11, %v644_v36, %v708_v43  ;;  %590 = vst.msk [vmem:[#allocation2 + $0x98] sm:$0xff] %vm219_vm1, %v558_v44  ;;  %v566_v57 = vadd.f32 %v526_v41, %v279_v45  ;;  %v543_v60 = vadd.f32 %v469_v46, %v256_v51  ;;  %v258_v36 = vld [vmem:[#allocation2 + $0x30] sm:$0xff] }
  0xb1   : > { %820 = vst.msk [vmem:[%s1213_s27 + $0x44] sm:$0xf] %vm802_vm4, %v787_v48  ;;  %v772_v55 = vpack.c.bf16 %v740_v53, %v740_v53  ;;  %v748_v56 = vsel %vm684_vm12, %v652_v39, %v716_v50  ;;  %v551_v63 = vadd.f32 %v489_v47, %v264_v54 }
  0xb2   : > { %828 = vst.msk [vmem:[%s1213_s27 + $0x64] sm:$0xf] %vm802_vm4, %v795_v52  ;;  %v780_v58 = vpack.c.bf16 %v748_v56, %v748_v56  ;;  %v624_v59 = vld [vmem:[#allocation2 + $0x90] sm:$0xff] }
  0xb3   : > { %805 = vst.msk [vmem:[%s1213_s27 + $0x8] sm:$0xf] %vm802_vm4, %v772_v55  ;;  %v660_v61 = vadd.f32 %v1200_v29, %v624_v59  ;;  %v632_v62 = vld [vmem:[#allocation2 + $0xd0] sm:$0xff] }
  0xb4   : > { %813 = vst.msk [vmem:[%s1213_s27 + $0x28] sm:$0xf] %vm802_vm4, %v780_v58  ;;  %v668_v1 = vadd.f32 %v1200_v29, %v632_v62  ;;  %v609_v2 = vld [vmem:[#allocation2 + $0x18] sm:$0xff]  ;;  %v266_v62 = vld [vmem:[#allocation2 + $0x70] sm:$0xff] }
  0xb5   : > { %vm692_vm13 = vcmp.ge.f32.partialorder %v660_v61, 0.0  ;;  %v724_v4 = vmul.f32 0.1, %v660_v61  ;;  %v645_v5 = vadd.f32 %v1200_v29, %v609_v2  ;;  %v617_v6 = vld [vmem:[#allocation2 + $0x58] sm:$0xff]  ;;  %598 = vst.msk [vmem:[#allocation2 + $0xd8] sm:$0xff] %vm219_vm1, %v566_v57  ;;  %v509_v7 = vpop.f32.mrf.mxu2  ;;  %v274_v2 = vld [vmem:[#allocation2 + $0xb0] sm:$0xff] }
  0xb6   : > { %v529_v8 = vpop.f32.mrf.mxu3  ;;  %vm700_vm14 = vcmp.ge.f32.partialorder %v668_v1, 0.0  ;;  %v732_v9 = vmul.f32 0.1, %v668_v1  ;;  %v653_v10 = vadd.f32 %v1200_v29, %v617_v6  ;;  %575 = vst.msk [vmem:[#allocation2 + $0x20] sm:$0xff] %vm219_vm1, %v543_v60  ;;  %v559_v11 = vadd.f32 %v509_v7, %v272_v0  ;;  %v471_v12 = vpop.f32.mrf.mxu0 }
  0xb7   : > { %v491_v13 = vpop.f32.mrf.mxu1  ;;  %v756_v14 = vsel %vm692_vm13, %v660_v61, %v724_v4  ;;  %vm677_vm15 = vcmp.ge.f32.partialorder %v645_v5, 0.0  ;;  %v709_v15 = vmul.f32 0.1, %v645_v5  ;;  %v625_v16 = vld [vmem:[#allocation2 + $0x98] sm:$0xff]  ;;  %583 = vst.msk [vmem:[#allocation2 + $0x60] sm:$0xff] %vm219_vm1, %v551_v63  ;;  %v567_v17 = vadd.f32 %v529_v8, %v280_v3 }
  0xb8   : > { %v788_v19 = vpack.c.bf16 %v756_v14, %v756_v14  ;;  %v764_v20 = vsel %vm700_vm14, %v668_v1, %v732_v9  ;;  %vm685_vm0 = vcmp.ge.f32.partialorder %v653_v10, 0.0  ;;  %v717_v21 = vmul.f32 0.1, %v653_v10  ;;  %591 = vst.msk [vmem:[#allocation2 + $0xa0] sm:$0xff] %vm219_vm1, %v559_v11 }
  0xb9   : > { %v796_v23 = vpack.c.bf16 %v764_v20, %v764_v20  ;;  %v741_v24 = vsel %vm677_vm15, %v645_v5, %v709_v15  ;;  %v661_v25 = vadd.f32 %v1200_v29, %v625_v16  ;;  %599 = vst.msk [vmem:[#allocation2 + $0xe0] sm:$0xff] %vm219_vm1, %v567_v17  ;;  %v544_v28 = vadd.f32 %v471_v12, %v257_v18  ;;  %v282_v5 = vld [vmem:[#allocation2 + $0xf0] sm:$0xff]  ;;  %v259_v12 = vld [vmem:[#allocation2 + $0x38] sm:$0xff] }
  0xba   : > { %821 = vst.msk [vmem:[%s1213_s27 + $0x48] sm:$0xf] %vm802_vm4, %v788_v19  ;;  %v773_v26 = vpack.c.bf16 %v741_v24, %v741_v24  ;;  %v749_v27 = vsel %vm685_vm0, %v653_v10, %v717_v21  ;;  %v552_v33 = vadd.f32 %v491_v13, %v265_v22  ;;  %v267_v20 = vld [vmem:[#allocation2 + $0x78] sm:$0xff] }
  0xbb   : > { %829 = vst.msk [vmem:[%s1213_s27 + $0x68] sm:$0xf] %vm802_vm4, %v796_v23  ;;  %v781_v31 = vpack.c.bf16 %v749_v27, %v749_v27  ;;  %vm693_vm2 = vcmp.ge.f32.partialorder %v661_v25, 0.0  ;;  %v725_v32 = vmul.f32 0.1, %v661_v25 }
  0xbc   : > { %806 = vst.msk [vmem:[%s1213_s27 + $0xc] sm:$0xf] %vm802_vm4, %v773_v26  ;;  %v633_v35 = vld [vmem:[#allocation2 + $0xd8] sm:$0xff] }
  0xbd   : > { %814 = vst.msk [vmem:[%s1213_s27 + $0x2c] sm:$0xf] %vm802_vm4, %v781_v31  ;;  %v757_v37 = vsel %vm693_vm2, %v661_v25, %v725_v32  ;;  %v669_v38 = vadd.f32 %v1200_v29, %v633_v35  ;;  %v610_v39 = vld [vmem:[#allocation2 + $0x20] sm:$0xff]  ;;  %v511_v40 = vpop.f32.mrf.mxu2 }
  0xbe   : > { %v531_v41 = vpop.f32.mrf.mxu3  ;;  %v789_v42 = vpack.c.bf16 %v757_v37, %v757_v37  ;;  %v646_v43 = vadd.f32 %v1200_v29, %v610_v39  ;;  %v618_v44 = vld [vmem:[#allocation2 + $0x60] sm:$0xff]  ;;  %576 = vst.msk [vmem:[#allocation2 + $0x28] sm:$0xff] %vm219_vm1, %v544_v28  ;;  %v560_v45 = vadd.f32 %v511_v40, %v273_v30  ;;  %v474_v47 = vpop.f32.mrf.mxu0  ;;  %v275_v39 = vld [vmem:[#allocation2 + $0xb8] sm:$0xff] }
  0xbf   : > { %v568_v46 = vadd.f32 %v531_v41, %v281_v34  ;;  %v494_v48 = vpop.f32.mrf.mxu1  ;;  %vm701_vm3 = vcmp.ge.f32.partialorder %v669_v38, 0.0  ;;  %v733_v49 = vmul.f32 0.1, %v669_v38  ;;  %v654_v50 = vadd.f32 %v1200_v29, %v618_v44  ;;  %v626_v51 = vld [vmem:[#allocation2 + $0xa0] sm:$0xff]  ;;  %584 = vst.msk [vmem:[#allocation2 + $0x68] sm:$0xff] %vm219_vm1, %v552_v33 }
  0xc0   : > { %v545_v52 = vadd.f32 %v474_v47, %v258_v36  ;;  %822 = vst.msk [vmem:[%s1213_s27 + $0x4c] sm:$0xf] %vm802_vm4, %v789_v42  ;;  %vm678_vm5 = vcmp.ge.f32.partialorder %v646_v43, 0.0  ;;  %v710_v53 = vmul.f32 0.1, %v646_v43  ;;  %v662_v54 = vadd.f32 %v1200_v29, %v626_v51  ;;  %v634_v55 = vld [vmem:[#allocation2 + $0xe0] sm:$0xff] }
  0xc1   : > { %v765_v56 = vsel %vm701_vm3, %v669_v38, %v733_v49  ;;  %vm686_vm6 = vcmp.ge.f32.partialorder %v654_v50, 0.0  ;;  %v718_v57 = vmul.f32 0.1, %v654_v50  ;;  %v670_v58 = vadd.f32 %v1200_v29, %v634_v55  ;;  %592 = vst.msk [vmem:[#allocation2 + $0xa8] sm:$0xff] %vm219_vm1, %v560_v45  ;;  %v283_v42 = vld [vmem:[#allocation2 + $0xf8] sm:$0xff] }
  0xc2   : > { %v797_v59 = vpack.c.bf16 %v765_v56, %v765_v56  ;;  %v742_v60 = vsel %vm678_vm5, %v646_v43, %v710_v53  ;;  %vm694_vm7 = vcmp.ge.f32.partialorder %v662_v54, 0.0  ;;  %v726_v61 = vmul.f32 0.1, %v662_v54  ;;  %600 = vst.msk [vmem:[#allocation2 + $0xe8] sm:$0xff] %vm219_vm1, %v568_v46 }
  0xc3   : > { %v774_v63 = vpack.c.bf16 %v742_v60, %v742_v60  ;;  %v750_v0 = vsel %vm686_vm6, %v654_v50, %v718_v57  ;;  %vm702_vm8 = vcmp.ge.f32.partialorder %v670_v58, 0.0  ;;  %v734_v1 = vmul.f32 0.1, %v670_v58  ;;  %577 = vst.msk [vmem:[#allocation2 + $0x30] sm:$0xff] %vm219_vm1, %v545_v52 }
  0xc4   : > { %830 = vst.msk [vmem:[%s1213_s27 + $0x6c] sm:$0xf] %vm802_vm4, %v797_v59  ;;  %v782_v3 = vpack.c.bf16 %v750_v0, %v750_v0  ;;  %v758_v4 = vsel %vm694_vm7, %v662_v54, %v726_v61  ;;  %v553_v9 = vadd.f32 %v494_v48, %v266_v62 }
  0xc5   : > { %807 = vst.msk [vmem:[%s1213_s27 + $0x10] sm:$0xf] %vm802_vm4, %v774_v63  ;;  %v790_v6 = vpack.c.bf16 %v758_v4, %v758_v4  ;;  %v766_v7 = vsel %vm702_vm8, %v670_v58, %v734_v1  ;;  %v611_v8 = vld [vmem:[#allocation2 + $0x28] sm:$0xff]  ;;  %v514_v10 = vpop.f32.mrf.mxu2 }
  0xc6   : > { %v534_v11 = vpop.f32.mrf.mxu3  ;;  %815 = vst.msk [vmem:[%s1213_s27 + $0x30] sm:$0xf] %vm802_vm4, %v782_v3  ;;  %v798_v13 = vpack.c.bf16 %v766_v7, %v766_v7  ;;  %v647_v14 = vadd.f32 %v1200_v29, %v611_v8  ;;  %v619_v15 = vld [vmem:[#allocation2 + $0x68] sm:$0xff]  ;;  %v561_v16 = vadd.f32 %v514_v10, %v274_v2  ;;  %v476_v17 = vpop.f32.mrf.mxu0 }
  0xc7   : > { %823 = vst.msk [vmem:[%s1213_s27 + $0x50] sm:$0xf] %vm802_vm4, %v790_v6  ;;  %v655_v18 = vadd.f32 %v1200_v29, %v619_v15  ;;  %v569_v19 = vadd.f32 %v534_v11, %v282_v5  ;;  %v496_v21 = vpop.f32.mrf.mxu1  ;;  %v546_v24 = vadd.f32 %v476_v17, %v259_v12 }
  0xc8   : > { %831 = vst.msk [vmem:[%s1213_s27 + $0x70] sm:$0xf] %vm802_vm4, %v798_v13  ;;  %vm679_vm9 = vcmp.ge.f32.partialorder %v647_v14, 0.0  ;;  %v711_v22 = vmul.f32 0.1, %v647_v14  ;;  %v627_v23 = vld [vmem:[#allocation2 + $0xa8] sm:$0xff]  ;;  %v554_v32 = vadd.f32 %v496_v21, %v267_v20 }
  0xc9   : > { %vm687_vm10 = vcmp.ge.f32.partialorder %v655_v18, 0.0  ;;  %v719_v25 = vmul.f32 0.1, %v655_v18  ;;  %v663_v26 = vadd.f32 %v1200_v29, %v627_v23  ;;  %v635_v27 = vld [vmem:[#allocation2 + $0xe8] sm:$0xff]  ;;  %585 = vst.msk [vmem:[#allocation2 + $0x70] sm:$0xff] %vm219_vm1, %v553_v9 }
  0xca   : > { %v743_v28 = vsel %vm679_vm9, %v647_v14, %v711_v22  ;;  %v671_v30 = vadd.f32 %v1200_v29, %v635_v27  ;;  %v612_v31 = vld [vmem:[#allocation2 + $0x30] sm:$0xff]  ;;  %593 = vst.msk [vmem:[#allocation2 + $0xb0] sm:$0xff] %vm219_vm1, %v561_v16 }
  0xcb   : > { %v775_v33 = vpack.c.bf16 %v743_v28, %v743_v28  ;;  %v751_v34 = vsel %vm687_vm10, %v655_v18, %v719_v25  ;;  %vm695_vm11 = vcmp.ge.f32.partialorder %v663_v26, 0.0  ;;  %v727_v35 = vmul.f32 0.1, %v663_v26  ;;  %601 = vst.msk [vmem:[#allocation2 + $0xf0] sm:$0xff] %vm219_vm1, %v569_v19 }
  0xcc   : > { %v783_v36 = vpack.c.bf16 %v751_v34, %v751_v34  ;;  %vm703_vm12 = vcmp.ge.f32.partialorder %v671_v30, 0.0  ;;  %v735_v37 = vmul.f32 0.1, %v671_v30  ;;  %v648_v38 = vadd.f32 %v1200_v29, %v612_v31  ;;  %578 = vst.msk [vmem:[#allocation2 + $0x38] sm:$0xff] %vm219_vm1, %v546_v24 }
  0xcd   : > { %808 = vst.msk [vmem:[%s1213_s27 + $0x14] sm:$0xf] %vm802_vm4, %v775_v33  ;;  %v759_v40 = vsel %vm695_vm11, %v663_v26, %v727_v35  ;;  %v516_v41 = vpop.f32.mrf.mxu2 }
  0xce   : > { %v536_v43 = vpop.f32.mrf.mxu3  ;;  %816 = vst.msk [vmem:[%s1213_s27 + $0x34] sm:$0xf] %vm802_vm4, %v783_v36  ;;  %v791_v44 = vpack.c.bf16 %v759_v40, %v759_v40  ;;  %v767_v45 = vsel %vm703_vm12, %v671_v30, %v735_v37  ;;  %vm680_vm13 = vcmp.ge.f32.partialorder %v648_v38, 0.0  ;;  %v712_v46 = vmul.f32 0.1, %v648_v38 }
  0xcf   : > { %v799_v47 = vpack.c.bf16 %v767_v45, %v767_v45  ;;  %586 = vst.msk [vmem:[#allocation2 + $0x78] sm:$0xff] %vm219_vm1, %v554_v32  ;;  %v562_v48 = vadd.f32 %v516_v41, %v275_v39  ;;  %v570_v51 = vadd.f32 %v536_v43, %v283_v42 }
  0xd0   : > { %824 = vst.msk [vmem:[%s1213_s27 + $0x54] sm:$0xf] %vm802_vm4, %v791_v44  ;;  %v744_v49 = vsel %vm680_vm13, %v648_v38, %v712_v46  ;;  %v620_v50 = vld [vmem:[#allocation2 + $0x70] sm:$0xff] }
  0xd1   : > { %832 = vst.msk [vmem:[%s1213_s27 + $0x74] sm:$0xf] %vm802_vm4, %v799_v47  ;;  %v776_v52 = vpack.c.bf16 %v744_v49, %v744_v49  ;;  %v656_v53 = vadd.f32 %v1200_v29, %v620_v50  ;;  %v628_v54 = vld [vmem:[#allocation2 + $0xb0] sm:$0xff] }
  0xd2   : > { %v664_v55 = vadd.f32 %v1200_v29, %v628_v54  ;;  %v636_v56 = vld [vmem:[#allocation2 + $0xf0] sm:$0xff]  ;;  %594 = vst.msk [vmem:[#allocation2 + $0xb8] sm:$0xff] %vm219_vm1, %v562_v48 }
  0xd3   : > { %809 = vst.msk [vmem:[%s1213_s27 + $0x18] sm:$0xf] %vm802_vm4, %v776_v52  ;;  %vm688_vm14 = vcmp.ge.f32.partialorder %v656_v53, 0.0  ;;  %v720_v57 = vmul.f32 0.1, %v656_v53  ;;  %v672_v58 = vadd.f32 %v1200_v29, %v636_v56  ;;  %v613_v59 = vld [vmem:[#allocation2 + $0x38] sm:$0xff] }
  0xd4   : > { %vm696_vm15 = vcmp.ge.f32.partialorder %v664_v55, 0.0  ;;  %v728_v60 = vmul.f32 0.1, %v664_v55  ;;  %v649_v61 = vadd.f32 %v1200_v29, %v613_v59  ;;  %602 = vst.msk [vmem:[#allocation2 + $0xf8] sm:$0xff] %vm219_vm1, %v570_v51 }
  0xd5   : > { %v752_v62 = vsel %vm688_vm14, %v656_v53, %v720_v57  ;;  %vm704_vm0 = vcmp.ge.f32.partialorder %v672_v58, 0.0  ;;  %v736_v63 = vmul.f32 0.1, %v672_v58 }
  0xd6   : > { %v784_v0 = vpack.c.bf16 %v752_v62, %v752_v62  ;;  %v760_v1 = vsel %vm696_vm15, %v664_v55, %v728_v60  ;;  %vm681_vm2 = vcmp.ge.f32.partialorder %v649_v61, 0.0  ;;  %v713_v2 = vmul.f32 0.1, %v649_v61  ;;  %v621_v3 = vld [vmem:[#allocation2 + $0x78] sm:$0xff] }
  0xd7   : > { %v792_v4 = vpack.c.bf16 %v760_v1, %v760_v1  ;;  %v768_v5 = vsel %vm704_vm0, %v672_v58, %v736_v63  ;;  %v657_v6 = vadd.f32 %v1200_v29, %v621_v3 }
  0xd8   : > { %817 = vst.msk [vmem:[%s1213_s27 + $0x38] sm:$0xf] %vm802_vm4, %v784_v0  ;;  %v800_v7 = vpack.c.bf16 %v768_v5, %v768_v5  ;;  %v745_v8 = vsel %vm681_vm2, %v649_v61, %v713_v2 }
  0xd9   : > { %825 = vst.msk [vmem:[%s1213_s27 + $0x58] sm:$0xf] %vm802_vm4, %v792_v4  ;;  %v777_v9 = vpack.c.bf16 %v745_v8, %v745_v8  ;;  %vm689_vm1 = vcmp.ge.f32.partialorder %v657_v6, 0.0  ;;  %v721_v10 = vmul.f32 0.1, %v657_v6  ;;  %v629_v11 = vld [vmem:[#allocation2 + $0xb8] sm:$0xff] }
  0xda   : > { %833 = vst.msk [vmem:[%s1213_s27 + $0x78] sm:$0xf] %vm802_vm4, %v800_v7  ;;  %v665_v12 = vadd.f32 %v1200_v29, %v629_v11 }
  0xdb   : > { %810 = vst.msk [vmem:[%s1213_s27 + $0x1c] sm:$0xf] %vm802_vm4, %v777_v9  ;;  %v753_v13 = vsel %vm689_vm1, %v657_v6, %v721_v10  ;;  %v637_v14 = vld [vmem:[#allocation2 + $0xf8] sm:$0xff] }
  0xdc   : > { %v785_v15 = vpack.c.bf16 %v753_v13, %v753_v13  ;;  %vm697_vm3 = vcmp.ge.f32.partialorder %v665_v12, 0.0  ;;  %v729_v16 = vmul.f32 0.1, %v665_v12  ;;  %v673_v17 = vadd.f32 %v1200_v29, %v637_v14 }
  0xde   : > { %818 = vst.msk [vmem:[%s1213_s27 + $0x3c] sm:$0xf] %vm802_vm4, %v785_v15  ;;  %v761_v18 = vsel %vm697_vm3, %v665_v12, %v729_v16  ;;  %vm705_vm5 = vcmp.ge.f32.partialorder %v673_v17, 0.0  ;;  %v737_v19 = vmul.f32 0.1, %v673_v17 }
  0xdf   : > { %v793_v20 = vpack.c.bf16 %v761_v18, %v761_v18 }
  0xe0   : > { %v769_v21 = vsel %vm705_vm5, %v673_v17, %v737_v19 }
  0xe1   : > { %826 = vst.msk [vmem:[%s1213_s27 + $0x5c] sm:$0xf] %vm802_vm4, %v793_v20  ;;  %v801_v22 = vpack.c.bf16 %v769_v21, %v769_v21 }
  0xe3   : > { %834 = vst.msk [vmem:[%s1213_s27 + $0x7c] sm:$0xf] %vm802_vm4, %v801_v22 }
  0xe4 PF: > { %s13_s14 = sadd.s32 1, %s1077_s14   ;;  %s1348_s12 = smov %s1073_s13 }
  0xe5   : > { %p10_p5 = scmp.ge.s32.totalorder %s13_s14, 4   ;;  %s1349_s13 = smov %s1351_s15 }
  0xe7   :  { %12 = sbr.rel (!%p10_p5) target bundleno = 2 (0x2), region = 73 }

// kernel: _lambda_.9
= control target key start
LH: loop header
LB: loop body
LE: loop exit
PB: predicated region body
PF: predicated region fallthrough
CT: control target
= control target key end

     0   :  { %s1114_s12 = smov 0   ;;  %s1116_s13 = smov 0   ;;  %s1358_s0 = inlined_call_operand.vmem [shape: bf16[512,16], index: 0, kind: input, shape index: {}]   ;;  %s1359_s1 = inlined_call_operand.vmem [shape: bf16[16,8], index: 1, kind: input, shape index: {}]   ;;  %s1360_s2 = inlined_call_operand.vmem [shape: f32[1,8], index: 2, kind: input, shape index: {}]   ;;  %s1361_s3 = inlined_call_operand.vmem [shape: bf16[512,8], index: 3, kind: output, shape index: {}]  }
   0x1   :  { %s1118_s14 = smov 0  }
   0x2 LB: > { %s25_s15 = sadd.s32 1, %s1087_s13  ;;  %p932_p0 = scmp.ge.s32.totalorder %s1091_s14, 1  ;;  %s1091_s14 = sphi %s1118_s14, %s13_s14   ;;  %s1087_s13 = sphi %s1116_s13, %s1363_s13   ;;  %s1083_s12 = sphi %s1114_s12, %s1362_s12  }
   0x3   : > { %p27_p1 = scmp.ge.s32.totalorder %s25_s15, 2  ;;  %p166_p2 = scmp.lt.s32.totalorder %s1091_s14, 3 }
   0x5   : > { %s1365_s15 = smov (%p27_p1, %s25_s15), 0  ;;  %p167_p3 = pnand %p932_p0, %p166_p2 }
   0x6   : > { %s933_s18 = sshll.u32 (!%p167_p3), %s1083_s12, 5 }
   0x7   : > { %170 = sbr.rel (%p167_p3) target bundleno = 228 (0xe4), region = 32  ;;  %p199_p4 = scmp.lt.s32.totalorder (!%p167_p3), %s933_s18, 63 }
   0xc   : > { %v1039_v0 = vld [vmem:[%s1359_s1] sm:$0xff]  ;;  %s1367_s18 = smov (!%p199_p4, %s933_s18), 63  ;;  %vm409_vm0 = vcmask 130048   ;;  %vm224_vm1 = vcmask 64512   ;;  %v1093_v9 = vmov 0.0   ;;  %vm811_vm4 = vcmask 60416  }
   0xd   : > { %465 = vmatpush.bf16.msra.mxu0 %v1039_v0  ;;  %1040 = vmatpush.bf16.msra.mxu1 %v1039_v0  ;;  %s934_s19 = sshll.u32 %s1367_s18, 2  ;;  %225 = vst.msk [vmem:[#allocation2] sm:$0xff] %vm224_vm1, %v1093_v9  ;;  %v1214_v28 = vld [vmem:[%s1360_s2] ss:$0 sm:$0xff] }
   0xe   : > { %1041 = vmatpush.bf16.msra.mxu2 %v1039_v0  ;;  %1042 = vmatpush.bf16.msra.mxu3 %v1039_v0  ;;  %s1143_s22 = scalar_lea.vmem %s1358_s0, %s934_s19  ;;  %226 = vst.msk [vmem:[#allocation2 + $0x8] sm:$0xff] %vm224_vm1, %v1093_v9  ;;  %s1227_s27 = scalar_lea.vmem %s1361_s3, %s934_s19 }
   0xf   : > { %v1023_v1 = vld [vmem:[%s1143_s22] sm:$0xff]  ;;  %v1024_v5 = vld [vmem:[%s1143_s22 + $0x8] sm:$0xff]  ;;  %227 = vst.msk [vmem:[#allocation2 + $0x10] sm:$0xff] %vm224_vm1, %v1093_v9  ;;  %v1025_v10 = vld [vmem:[%s1143_s22 + $0x10] sm:$0xff] }
  0x10   : > { %v1027_v2 = vld [vmem:[%s1143_s22 + $0x20] sm:$0xff]  ;;  %1005 = vmatmul.msk.bf16.vlgmr.msra.gmra.mxu0 %vm409_vm0, %v1023_v1  ;;  %v1028_v6 = vld [vmem:[%s1143_s22 + $0x28] sm:$0xff]  ;;  %228 = vst.msk [vmem:[#allocation2 + $0x18] sm:$0xff] %vm224_vm1, %v1093_v9  ;;  %v1029_v11 = vld [vmem:[%s1143_s22 + $0x30] sm:$0xff] }
  0x11   : > { %v1031_v3 = vld [vmem:[%s1143_s22 + $0x40] sm:$0xff]  ;;  %1009 = vmatmul.msk.bf16.vlgmr.msra.gmra.mxu1 %vm409_vm0, %v1027_v2  ;;  %v1032_v7 = vld [vmem:[%s1143_s22 + $0x48] sm:$0xff]  ;;  %229 = vst.msk [vmem:[#allocation2 + $0x20] sm:$0xff] %vm224_vm1, %v1093_v9  ;;  %v1033_v12 = vld [vmem:[%s1143_s22 + $0x50] sm:$0xff] }
  0x12   : > { %v1035_v4 = vld [vmem:[%s1143_s22 + $0x60] sm:$0xff]  ;;  %1013 = vmatmul.msk.bf16.vlgmr.msra.gmra.mxu2 %vm409_vm0, %v1031_v3  ;;  %v1036_v8 = vld [vmem:[%s1143_s22 + $0x68] sm:$0xff]  ;;  %230 = vst.msk [vmem:[#allocation2 + $0x28] sm:$0xff] %vm224_vm1, %v1093_v9  ;;  %v1037_v13 = vld [vmem:[%s1143_s22 + $0x70] sm:$0xff] }
  0x13   : > { %1017 = vmatmul.msk.bf16.vlgmr.msra.gmra.mxu3 %vm409_vm0, %v1035_v4  ;;  %231 = vst.msk [vmem:[#allocation2 + $0x30] sm:$0xff] %vm224_vm1, %v1093_v9  ;;  %v1026_v14 = vld [vmem:[%s1143_s22 + $0x18] sm:$0xff] }
  0x14   : > { %232 = vst.msk [vmem:[#allocation2 + $0x38] sm:$0xff] %vm224_vm1, %v1093_v9  ;;  %v1030_v15 = vld [vmem:[%s1143_s22 + $0x38] sm:$0xff]  ;;  %v257_v18 = vld [vmem:[#allocation2] sm:$0xff] }
  0x15   : > { %233 = vst.msk [vmem:[#allocation2 + $0x40] sm:$0xff] %vm224_vm1, %v1093_v9  ;;  %v1034_v16 = vld [vmem:[%s1143_s22 + $0x58] sm:$0xff]  ;;  %v258_v26 = vld [vmem:[#allocation2 + $0x8] sm:$0xff] }
  0x16   : > { %234 = vst.msk [vmem:[#allocation2 + $0x48] sm:$0xff] %vm224_vm1, %v1093_v9  ;;  %v1038_v17 = vld [vmem:[%s1143_s22 + $0x78] sm:$0xff]  ;;  %v259_v48 = vld [vmem:[#allocation2 + $0x10] sm:$0xff] }
  0x17   : > { %235 = vst.msk [vmem:[#allocation2 + $0x50] sm:$0xff] %vm224_vm1, %v1093_v9 }
  0x18   : > { %236 = vst.msk [vmem:[#allocation2 + $0x58] sm:$0xff] %vm224_vm1, %v1093_v9 }
  0x19   : > { %237 = vst.msk [vmem:[#allocation2 + $0x60] sm:$0xff] %vm224_vm1, %v1093_v9 }
  0x1a   : > { %238 = vst.msk [vmem:[#allocation2 + $0x68] sm:$0xff] %vm224_vm1, %v1093_v9 }
  0x1b   : > { %239 = vst.msk [vmem:[#allocation2 + $0x70] sm:$0xff] %vm224_vm1, %v1093_v9 }
  0x1c   : > { %240 = vst.msk [vmem:[#allocation2 + $0x78] sm:$0xff] %vm224_vm1, %v1093_v9  ;;  %v265_v19 = vld [vmem:[#allocation2 + $0x40] sm:$0xff] }
  0x1d   : > { %241 = vst.msk [vmem:[#allocation2 + $0x80] sm:$0xff] %vm224_vm1, %v1093_v9  ;;  %v266_v27 = vld [vmem:[#allocation2 + $0x48] sm:$0xff] }
  0x1e   : > { %242 = vst.msk [vmem:[#allocation2 + $0x88] sm:$0xff] %vm224_vm1, %v1093_v9  ;;  %v267_v53 = vld [vmem:[#allocation2 + $0x50] sm:$0xff] }
  0x1f   : > { %243 = vst.msk [vmem:[#allocation2 + $0x90] sm:$0xff] %vm224_vm1, %v1093_v9 }
  0x20   : > { %1006 = vmatmul.msk.bf16.gmra.mxu0 %vm409_vm0, %v1024_v5  ;;  %244 = vst.msk [vmem:[#allocation2 + $0x98] sm:$0xff] %vm224_vm1, %v1093_v9 }
  0x21   : > { %1010 = vmatmul.msk.bf16.gmra.mxu1 %vm409_vm0, %v1028_v6  ;;  %245 = vst.msk [vmem:[#allocation2 + $0xa0] sm:$0xff] %vm224_vm1, %v1093_v9 }
  0x22   : > { %1014 = vmatmul.msk.bf16.gmra.mxu2 %vm409_vm0, %v1032_v7  ;;  %246 = vst.msk [vmem:[#allocation2 + $0xa8] sm:$0xff] %vm224_vm1, %v1093_v9 }
  0x23   : > { %1018 = vmatmul.msk.bf16.gmra.mxu3 %vm409_vm0, %v1036_v8  ;;  %247 = vst.msk [vmem:[#allocation2 + $0xb0] sm:$0xff] %vm224_vm1, %v1093_v9 }
  0x24   : > { %248 = vst.msk [vmem:[#allocation2 + $0xb8] sm:$0xff] %vm224_vm1, %v1093_v9  ;;  %v273_v24 = vld [vmem:[#allocation2 + $0x80] sm:$0xff] }
  0x25   : > { %249 = vst.msk [vmem:[#allocation2 + $0xc0] sm:$0xff] %vm224_vm1, %v1093_v9  ;;  %v274_v42 = vld [vmem:[#allocation2 + $0x88] sm:$0xff] }
  0x26   : > { %250 = vst.msk [vmem:[#allocation2 + $0xc8] sm:$0xff] %vm224_vm1, %v1093_v9  ;;  %v275_v7 = vld [vmem:[#allocation2 + $0x90] sm:$0xff] }
  0x27   : > { %251 = vst.msk [vmem:[#allocation2 + $0xd0] sm:$0xff] %vm224_vm1, %v1093_v9 }
  0x28   : > { %252 = vst.msk [vmem:[#allocation2 + $0xd8] sm:$0xff] %vm224_vm1, %v1093_v9 }
  0x29   : > { %253 = vst.msk [vmem:[#allocation2 + $0xe0] sm:$0xff] %vm224_vm1, %v1093_v9 }
  0x2a   : > { %254 = vst.msk [vmem:[#allocation2 + $0xe8] sm:$0xff] %vm224_vm1, %v1093_v9 }
  0x2b   : > { %255 = vst.msk [vmem:[#allocation2 + $0xf0] sm:$0xff] %vm224_vm1, %v1093_v9 }
  0x2c   : > { %256 = vst.msk [vmem:[#allocation2 + $0xf8] sm:$0xff] %vm224_vm1, %v1093_v9  ;;  %v281_v25 = vld [vmem:[#allocation2 + $0xc0] sm:$0xff] }
  0x2d   : > { %v282_v44 = vld [vmem:[#allocation2 + $0xc8] sm:$0xff] }
  0x30   : > { %1007 = vmatmul.msk.bf16.gmra.mxu0 %vm409_vm0, %v1025_v10 }
  0x31   : > { %1011 = vmatmul.msk.bf16.gmra.mxu1 %vm409_vm0, %v1029_v11 }
  0x32   : > { %1015 = vmatmul.msk.bf16.gmra.mxu2 %vm409_vm0, %v1033_v12  ;;  %v283_v12 = vld [vmem:[#allocation2 + $0xd0] sm:$0xff] }
  0x33   : > { %1019 = vmatmul.msk.bf16.gmra.mxu3 %vm409_vm0, %v1037_v13 }
  0x40   : > { %1008 = vmatmul.msk.bf16.gmra.mxu0 %vm409_vm0, %v1026_v14 }
  0x41   : > { %1012 = vmatmul.msk.bf16.gmra.mxu1 %vm409_vm0, %v1030_v15 }
  0x42   : > { %1016 = vmatmul.msk.bf16.gmra.mxu2 %vm409_vm0, %v1034_v16  ;;  %v260_v16 = vld [vmem:[#allocation2 + $0x18] sm:$0xff] }
  0x43   : > { %1020 = vmatmul.msk.bf16.gmra.mxu3 %vm409_vm0, %v1038_v17 }
  0x8d   : > { %v467_v20 = vpop.f32.mrf.mxu0 }
  0x8e   : > { %v487_v21 = vpop.f32.mrf.mxu1  ;;  %v547_v22 = vadd.f32 %v467_v20, %v257_v18 }
  0x8f   : > { %v555_v23 = vadd.f32 %v487_v21, %v265_v19 }
  0x90   : > { %580 = vst.msk [vmem:[#allocation2] sm:$0xff] %vm224_vm1, %v547_v22  ;;  %v268_v22 = vld [vmem:[#allocation2 + $0x58] sm:$0xff] }
  0x91   : > { %588 = vst.msk [vmem:[#allocation2 + $0x40] sm:$0xff] %vm224_vm1, %v555_v23 }
  0x95   : > { %v507_v29 = vpop.f32.mrf.mxu2  ;;  %v469_v33 = vpop.f32.mrf.mxu0 }
  0x96   : > { %v527_v30 = vpop.f32.mrf.mxu3  ;;  %v563_v31 = vadd.f32 %v507_v29, %v273_v24  ;;  %v489_v34 = vpop.f32.mrf.mxu1  ;;  %v548_v35 = vadd.f32 %v469_v33, %v258_v26  ;;  %v276_v33 = vld [vmem:[#allocation2 + $0x98] sm:$0xff] }
  0x97   : > { %v571_v32 = vadd.f32 %v527_v30, %v281_v25  ;;  %v556_v36 = vadd.f32 %v489_v34, %v266_v27  ;;  %v615_v37 = vld [vmem:[#allocation2] sm:$0xff] }
  0x98   : > { %596 = vst.msk [vmem:[#allocation2 + $0x80] sm:$0xff] %vm224_vm1, %v563_v31  ;;  %v651_v38 = vadd.f32 %v1214_v28, %v615_v37  ;;  %v623_v39 = vld [vmem:[#allocation2 + $0x40] sm:$0xff] }
  0x99   : > { %604 = vst.msk [vmem:[#allocation2 + $0xc0] sm:$0xff] %vm224_vm1, %v571_v32  ;;  %v659_v40 = vadd.f32 %v1214_v28, %v623_v39 }
  0x9a   : > { %581 = vst.msk [vmem:[#allocation2 + $0x8] sm:$0xff] %vm224_vm1, %v548_v35  ;;  %vm683_vm2 = vcmp.ge.f32.partialorder %v651_v38, 0.0  ;;  %v715_v41 = vmul.f32 0.1, %v651_v38 }
  0x9b   : > { %589 = vst.msk [vmem:[#allocation2 + $0x48] sm:$0xff] %vm224_vm1, %v556_v36  ;;  %vm691_vm3 = vcmp.ge.f32.partialorder %v659_v40, 0.0  ;;  %v723_v43 = vmul.f32 0.1, %v659_v40 }
  0x9c   : > { %v747_v45 = vsel %vm683_vm2, %v651_v38, %v715_v41 }
  0x9d   : > { %v509_v46 = vpop.f32.mrf.mxu2  ;;  %v779_v49 = vpack.c.bf16 %v747_v45, %v747_v45  ;;  %v755_v50 = vsel %vm691_vm3, %v659_v40, %v723_v43  ;;  %v472_v52 = vpop.f32.mrf.mxu0 }
  0x9e   : > { %v529_v47 = vpop.f32.mrf.mxu3  ;;  %v564_v51 = vadd.f32 %v509_v46, %v274_v42  ;;  %v492_v54 = vpop.f32.mrf.mxu1  ;;  %v787_v55 = vpack.c.bf16 %v755_v50, %v755_v50  ;;  %v549_v60 = vadd.f32 %v472_v52, %v259_v48  ;;  %v261_v50 = vld [vmem:[#allocation2 + $0x20] sm:$0xff] }
  0x9f   : > { %v631_v56 = vld [vmem:[#allocation2 + $0x80] sm:$0xff]  ;;  %v572_v57 = vadd.f32 %v529_v47, %v282_v44  ;;  %812 = vst.msk [vmem:[%s1227_s27] sm:$0xf] %vm811_vm4, %v779_v49  ;;  %v557_v63 = vadd.f32 %v492_v54, %v267_v53  ;;  %v284_v44 = vld [vmem:[#allocation2 + $0xd8] sm:$0xff] }
  0xa0   : > { %v667_v58 = vadd.f32 %v1214_v28, %v631_v56  ;;  %v639_v59 = vld [vmem:[#allocation2 + $0xc0] sm:$0xff]  ;;  %820 = vst.msk [vmem:[%s1227_s27 + $0x20] sm:$0xf] %vm811_vm4, %v787_v55 }
  0xa1   : > { %v675_v61 = vadd.f32 %v1214_v28, %v639_v59  ;;  %v616_v62 = vld [vmem:[#allocation2 + $0x8] sm:$0xff]  ;;  %597 = vst.msk [vmem:[#allocation2 + $0x88] sm:$0xff] %vm224_vm1, %v564_v51  ;;  %v269_v53 = vld [vmem:[#allocation2 + $0x60] sm:$0xff] }
  0xa2   : > { %vm699_vm5 = vcmp.ge.f32.partialorder %v667_v58, 0.0  ;;  %v731_v0 = vmul.f32 0.1, %v667_v58  ;;  %v652_v1 = vadd.f32 %v1214_v28, %v616_v62  ;;  %v624_v2 = vld [vmem:[#allocation2 + $0x48] sm:$0xff]  ;;  %605 = vst.msk [vmem:[#allocation2 + $0xc8] sm:$0xff] %vm224_vm1, %v572_v57 }
  0xa3   : > { %vm707_vm6 = vcmp.ge.f32.partialorder %v675_v61, 0.0  ;;  %v739_v3 = vmul.f32 0.1, %v675_v61  ;;  %v660_v4 = vadd.f32 %v1214_v28, %v624_v2  ;;  %582 = vst.msk [vmem:[#allocation2 + $0x10] sm:$0xff] %vm224_vm1, %v549_v60  ;;  %v285_v2 = vld [vmem:[#allocation2 + $0xe0] sm:$0xff] }
  0xa4   : > { %v763_v5 = vsel %vm699_vm5, %v667_v58, %v731_v0  ;;  %vm684_vm7 = vcmp.ge.f32.partialorder %v652_v1, 0.0  ;;  %v716_v6 = vmul.f32 0.1, %v652_v1  ;;  %590 = vst.msk [vmem:[#allocation2 + $0x50] sm:$0xff] %vm224_vm1, %v557_v63  ;;  %v277_v63 = vld [vmem:[#allocation2 + $0xa0] sm:$0xff] }
  0xa5   : > { %v795_v8 = vpack.c.bf16 %v763_v5, %v763_v5  ;;  %v771_v9 = vsel %vm707_vm6, %v675_v61, %v739_v3  ;;  %vm692_vm8 = vcmp.ge.f32.partialorder %v660_v4, 0.0  ;;  %v724_v10 = vmul.f32 0.1, %v660_v4  ;;  %v512_v11 = vpop.f32.mrf.mxu2  ;;  %v474_v17 = vpop.f32.mrf.mxu0 }
  0xa6   : > { %v532_v13 = vpop.f32.mrf.mxu3  ;;  %v803_v14 = vpack.c.bf16 %v771_v9, %v771_v9  ;;  %v748_v15 = vsel %vm684_vm7, %v652_v1, %v716_v6  ;;  %v494_v18 = vpop.f32.mrf.mxu1  ;;  %v565_v21 = vadd.f32 %v512_v11, %v275_v7  ;;  %v550_v26 = vadd.f32 %v474_v17, %v260_v16  ;;  %v262_v17 = vld [vmem:[#allocation2 + $0x28] sm:$0xff] }
  0xa7   : > { %828 = vst.msk [vmem:[%s1227_s27 + $0x40] sm:$0xf] %vm811_vm4, %v795_v8  ;;  %v780_v19 = vpack.c.bf16 %v748_v15, %v748_v15  ;;  %v756_v20 = vsel %vm692_vm8, %v660_v4, %v724_v10  ;;  %v573_v24 = vadd.f32 %v532_v13, %v283_v12  ;;  %v558_v30 = vadd.f32 %v494_v18, %v268_v22 }
  0xa8   : > { %836 = vst.msk [vmem:[%s1227_s27 + $0x60] sm:$0xf] %vm811_vm4, %v803_v14  ;;  %v788_v23 = vpack.c.bf16 %v756_v20, %v756_v20  ;;  %v632_v25 = vld [vmem:[#allocation2 + $0x88] sm:$0xff] }
  0xa9   : > { %813 = vst.msk [vmem:[%s1227_s27 + $0x4] sm:$0xf] %vm811_vm4, %v780_v19  ;;  %v668_v27 = vadd.f32 %v1214_v28, %v632_v25  ;;  %v640_v29 = vld [vmem:[#allocation2 + $0xc8] sm:$0xff] }
  0xaa   : > { %821 = vst.msk [vmem:[%s1227_s27 + $0x24] sm:$0xf] %vm811_vm4, %v788_v23  ;;  %v676_v31 = vadd.f32 %v1214_v28, %v640_v29  ;;  %v617_v32 = vld [vmem:[#allocation2 + $0x10] sm:$0xff]  ;;  %v278_v29 = vld [vmem:[#allocation2 + $0xa8] sm:$0xff] }
  0xab   : > { %598 = vst.msk [vmem:[#allocation2 + $0x90] sm:$0xff] %vm224_vm1, %v565_v21  ;;  %vm700_vm9 = vcmp.ge.f32.partialorder %v668_v27, 0.0  ;;  %v732_v34 = vmul.f32 0.1, %v668_v27  ;;  %v653_v35 = vadd.f32 %v1214_v28, %v617_v32  ;;  %v625_v36 = vld [vmem:[#allocation2 + $0x50] sm:$0xff]  ;;  %v270_v21 = vld [vmem:[#allocation2 + $0x68] sm:$0xff] }
  0xac   : > { %606 = vst.msk [vmem:[#allocation2 + $0xd0] sm:$0xff] %vm224_vm1, %v573_v24  ;;  %vm708_vm10 = vcmp.ge.f32.partialorder %v676_v31, 0.0  ;;  %v740_v37 = vmul.f32 0.1, %v676_v31  ;;  %v661_v38 = vadd.f32 %v1214_v28, %v625_v36 }
  0xad   : > { %583 = vst.msk [vmem:[#allocation2 + $0x18] sm:$0xff] %vm224_vm1, %v550_v26  ;;  %v514_v39 = vpop.f32.mrf.mxu2  ;;  %v764_v41 = vsel %vm700_vm9, %v668_v27, %v732_v34  ;;  %vm685_vm11 = vcmp.ge.f32.partialorder %v653_v35, 0.0  ;;  %v717_v42 = vmul.f32 0.1, %v653_v35  ;;  %v477_v45 = vpop.f32.mrf.mxu0 }
  0xae   : > { %v534_v40 = vpop.f32.mrf.mxu3  ;;  %591 = vst.msk [vmem:[#allocation2 + $0x58] sm:$0xff] %vm224_vm1, %v558_v30  ;;  %v566_v43 = vadd.f32 %v514_v39, %v276_v33  ;;  %v497_v46 = vpop.f32.mrf.mxu1  ;;  %v796_v47 = vpack.c.bf16 %v764_v41, %v764_v41  ;;  %v772_v48 = vsel %vm708_vm10, %v676_v31, %v740_v37  ;;  %vm693_vm12 = vcmp.ge.f32.partialorder %v661_v38, 0.0  ;;  %v286_v33 = vld [vmem:[#allocation2 + $0xe8] sm:$0xff] }
  0xaf   : > { %v725_v49 = vmul.f32 0.1, %v661_v38  ;;  %v804_v51 = vpack.c.bf16 %v772_v48, %v772_v48  ;;  %v749_v52 = vsel %vm685_vm11, %v653_v35, %v717_v42  ;;  %v574_v56 = vadd.f32 %v534_v40, %v284_v44  ;;  %v263_v35 = vld [vmem:[#allocation2 + $0x30] sm:$0xff] }
  0xb0   : > { %599 = vst.msk [vmem:[#allocation2 + $0x98] sm:$0xff] %vm224_vm1, %v566_v43  ;;  %v781_v54 = vpack.c.bf16 %v749_v52, %v749_v52  ;;  %v551_v59 = vadd.f32 %v477_v45, %v261_v50  ;;  %v559_v62 = vadd.f32 %v497_v46, %v269_v53 }
  0xb1   : > { %829 = vst.msk [vmem:[%s1227_s27 + $0x44] sm:$0xf] %vm811_vm4, %v796_v47  ;;  %v757_v55 = vsel %vm693_vm12, %v661_v38, %v725_v49 }
  0xb2   : > { %837 = vst.msk [vmem:[%s1227_s27 + $0x64] sm:$0xf] %vm811_vm4, %v804_v51  ;;  %v789_v57 = vpack.c.bf16 %v757_v55, %v757_v55  ;;  %v633_v58 = vld [vmem:[#allocation2 + $0x90] sm:$0xff] }
  0xb3   : > { %814 = vst.msk [vmem:[%s1227_s27 + $0x8] sm:$0xf] %vm811_vm4, %v781_v54  ;;  %v669_v60 = vadd.f32 %v1214_v28, %v633_v58  ;;  %v641_v61 = vld [vmem:[#allocation2 + $0xd0] sm:$0xff] }
  0xb4   : > { %822 = vst.msk [vmem:[%s1227_s27 + $0x28] sm:$0xf] %vm811_vm4, %v789_v57  ;;  %v677_v0 = vadd.f32 %v1214_v28, %v641_v61  ;;  %v618_v1 = vld [vmem:[#allocation2 + $0x18] sm:$0xff]  ;;  %v271_v61 = vld [vmem:[#allocation2 + $0x70] sm:$0xff] }
  0xb5   : > { %vm701_vm13 = vcmp.ge.f32.partialorder %v669_v60, 0.0  ;;  %v733_v3 = vmul.f32 0.1, %v669_v60  ;;  %v654_v4 = vadd.f32 %v1214_v28, %v618_v1  ;;  %v626_v5 = vld [vmem:[#allocation2 + $0x58] sm:$0xff]  ;;  %607 = vst.msk [vmem:[#allocation2 + $0xd8] sm:$0xff] %vm224_vm1, %v574_v56  ;;  %v517_v6 = vpop.f32.mrf.mxu2  ;;  %v479_v11 = vpop.f32.mrf.mxu0  ;;  %v279_v1 = vld [vmem:[#allocation2 + $0xb0] sm:$0xff] }
  0xb6   : > { %v537_v7 = vpop.f32.mrf.mxu3  ;;  %vm709_vm14 = vcmp.ge.f32.partialorder %v677_v0, 0.0  ;;  %v741_v8 = vmul.f32 0.1, %v677_v0  ;;  %v662_v9 = vadd.f32 %v1214_v28, %v626_v5  ;;  %584 = vst.msk [vmem:[#allocation2 + $0x20] sm:$0xff] %vm224_vm1, %v551_v59  ;;  %v567_v10 = vadd.f32 %v517_v6, %v277_v63  ;;  %v499_v12 = vpop.f32.mrf.mxu1 }
  0xb7   : > { %v765_v13 = vsel %vm701_vm13, %v669_v60, %v733_v3  ;;  %vm686_vm15 = vcmp.ge.f32.partialorder %v654_v4, 0.0  ;;  %v718_v14 = vmul.f32 0.1, %v654_v4  ;;  %v634_v15 = vld [vmem:[#allocation2 + $0x98] sm:$0xff]  ;;  %592 = vst.msk [vmem:[#allocation2 + $0x60] sm:$0xff] %vm224_vm1, %v559_v62  ;;  %v575_v16 = vadd.f32 %v537_v7, %v285_v2 }
  0xb8   : > { %v797_v18 = vpack.c.bf16 %v765_v13, %v765_v13  ;;  %v773_v19 = vsel %vm709_vm14, %v677_v0, %v741_v8  ;;  %vm694_vm0 = vcmp.ge.f32.partialorder %v662_v9, 0.0  ;;  %v726_v20 = vmul.f32 0.1, %v662_v9  ;;  %600 = vst.msk [vmem:[#allocation2 + $0xa0] sm:$0xff] %vm224_vm1, %v567_v10 }
  0xb9   : > { %v805_v22 = vpack.c.bf16 %v773_v19, %v773_v19  ;;  %v750_v23 = vsel %vm686_vm15, %v654_v4, %v718_v14  ;;  %v670_v24 = vadd.f32 %v1214_v28, %v634_v15  ;;  %608 = vst.msk [vmem:[#allocation2 + $0xe0] sm:$0xff] %vm224_vm1, %v575_v16  ;;  %v552_v27 = vadd.f32 %v479_v11, %v262_v17  ;;  %v287_v4 = vld [vmem:[#allocation2 + $0xf0] sm:$0xff]  ;;  %v264_v11 = vld [vmem:[#allocation2 + $0x38] sm:$0xff] }
  0xba   : > { %830 = vst.msk [vmem:[%s1227_s27 + $0x48] sm:$0xf] %vm811_vm4, %v797_v18  ;;  %v782_v25 = vpack.c.bf16 %v750_v23, %v750_v23  ;;  %v758_v26 = vsel %vm694_vm0, %v662_v9, %v726_v20  ;;  %v560_v32 = vadd.f32 %v499_v12, %v270_v21  ;;  %v272_v19 = vld [vmem:[#allocation2 + $0x78] sm:$0xff] }
  0xbb   : > { %838 = vst.msk [vmem:[%s1227_s27 + $0x68] sm:$0xf] %vm811_vm4, %v805_v22  ;;  %v790_v30 = vpack.c.bf16 %v758_v26, %v758_v26  ;;  %vm702_vm2 = vcmp.ge.f32.partialorder %v670_v24, 0.0  ;;  %v734_v31 = vmul.f32 0.1, %v670_v24 }
  0xbc   : > { %815 = vst.msk [vmem:[%s1227_s27 + $0xc] sm:$0xf] %vm811_vm4, %v782_v25  ;;  %v642_v34 = vld [vmem:[#allocation2 + $0xd8] sm:$0xff] }
  0xbd   : > { %823 = vst.msk [vmem:[%s1227_s27 + $0x2c] sm:$0xf] %vm811_vm4, %v790_v30  ;;  %v766_v36 = vsel %vm702_vm2, %v670_v24, %v734_v31  ;;  %v678_v37 = vadd.f32 %v1214_v28, %v642_v34  ;;  %v619_v38 = vld [vmem:[#allocation2 + $0x20] sm:$0xff]  ;;  %v519_v39 = vpop.f32.mrf.mxu2  ;;  %v482_v46 = vpop.f32.mrf.mxu0 }
  0xbe   : > { %v539_v40 = vpop.f32.mrf.mxu3  ;;  %v798_v41 = vpack.c.bf16 %v766_v36, %v766_v36  ;;  %v655_v42 = vadd.f32 %v1214_v28, %v619_v38  ;;  %v627_v43 = vld [vmem:[#allocation2 + $0x60] sm:$0xff]  ;;  %585 = vst.msk [vmem:[#allocation2 + $0x28] sm:$0xff] %vm224_vm1, %v552_v27  ;;  %v568_v44 = vadd.f32 %v519_v39, %v278_v29  ;;  %v502_v47 = vpop.f32.mrf.mxu1  ;;  %v553_v51 = vadd.f32 %v482_v46, %v263_v35  ;;  %v280_v38 = vld [vmem:[#allocation2 + $0xb8] sm:$0xff] }
  0xbf   : > { %v576_v45 = vadd.f32 %v539_v40, %v286_v33  ;;  %vm710_vm3 = vcmp.ge.f32.partialorder %v678_v37, 0.0  ;;  %v742_v48 = vmul.f32 0.1, %v678_v37  ;;  %v663_v49 = vadd.f32 %v1214_v28, %v627_v43  ;;  %v635_v50 = vld [vmem:[#allocation2 + $0xa0] sm:$0xff]  ;;  %593 = vst.msk [vmem:[#allocation2 + $0x68] sm:$0xff] %vm224_vm1, %v560_v32 }
  0xc0   : > { %831 = vst.msk [vmem:[%s1227_s27 + $0x4c] sm:$0xf] %vm811_vm4, %v798_v41  ;;  %vm687_vm5 = vcmp.ge.f32.partialorder %v655_v42, 0.0  ;;  %v719_v52 = vmul.f32 0.1, %v655_v42  ;;  %v671_v53 = vadd.f32 %v1214_v28, %v635_v50  ;;  %v643_v54 = vld [vmem:[#allocation2 + $0xe0] sm:$0xff]  ;;  %v561_v8 = vadd.f32 %v502_v47, %v271_v61 }
  0xc1   : > { %v774_v55 = vsel %vm710_vm3, %v678_v37, %v742_v48  ;;  %vm695_vm6 = vcmp.ge.f32.partialorder %v663_v49, 0.0  ;;  %v727_v56 = vmul.f32 0.1, %v663_v49  ;;  %v679_v57 = vadd.f32 %v1214_v28, %v643_v54  ;;  %601 = vst.msk [vmem:[#allocation2 + $0xa8] sm:$0xff] %vm224_vm1, %v568_v44  ;;  %v288_v41 = vld [vmem:[#allocation2 + $0xf8] sm:$0xff] }
  0xc2   : > { %v806_v58 = vpack.c.bf16 %v774_v55, %v774_v55  ;;  %v751_v59 = vsel %vm687_vm5, %v655_v42, %v719_v52  ;;  %vm703_vm7 = vcmp.ge.f32.partialorder %v671_v53, 0.0  ;;  %v735_v60 = vmul.f32 0.1, %v671_v53  ;;  %609 = vst.msk [vmem:[#allocation2 + $0xe8] sm:$0xff] %vm224_vm1, %v576_v45 }
  0xc3   : > { %v783_v62 = vpack.c.bf16 %v751_v59, %v751_v59  ;;  %v759_v63 = vsel %vm695_vm6, %v663_v49, %v727_v56  ;;  %vm711_vm8 = vcmp.ge.f32.partialorder %v679_v57, 0.0  ;;  %v743_v0 = vmul.f32 0.1, %v679_v57  ;;  %586 = vst.msk [vmem:[#allocation2 + $0x30] sm:$0xff] %vm224_vm1, %v553_v51 }
  0xc4   : > { %839 = vst.msk [vmem:[%s1227_s27 + $0x6c] sm:$0xf] %vm811_vm4, %v806_v58  ;;  %v791_v2 = vpack.c.bf16 %v759_v63, %v759_v63  ;;  %v767_v3 = vsel %vm703_vm7, %v671_v53, %v735_v60 }
  0xc5   : > { %816 = vst.msk [vmem:[%s1227_s27 + $0x10] sm:$0xf] %vm811_vm4, %v783_v62  ;;  %v799_v5 = vpack.c.bf16 %v767_v3, %v767_v3  ;;  %v775_v6 = vsel %vm711_vm8, %v679_v57, %v743_v0  ;;  %v620_v7 = vld [vmem:[#allocation2 + $0x28] sm:$0xff]  ;;  %v522_v9 = vpop.f32.mrf.mxu2  ;;  %v484_v16 = vpop.f32.mrf.mxu0 }
  0xc6   : > { %v542_v10 = vpop.f32.mrf.mxu3  ;;  %824 = vst.msk [vmem:[%s1227_s27 + $0x30] sm:$0xf] %vm811_vm4, %v791_v2  ;;  %v807_v12 = vpack.c.bf16 %v775_v6, %v775_v6  ;;  %v656_v13 = vadd.f32 %v1214_v28, %v620_v7  ;;  %v628_v14 = vld [vmem:[#allocation2 + $0x68] sm:$0xff]  ;;  %v569_v15 = vadd.f32 %v522_v9, %v279_v1  ;;  %v504_v20 = vpop.f32.mrf.mxu1  ;;  %v554_v23 = vadd.f32 %v484_v16, %v264_v11 }
  0xc7   : > { %832 = vst.msk [vmem:[%s1227_s27 + $0x50] sm:$0xf] %vm811_vm4, %v799_v5  ;;  %v664_v17 = vadd.f32 %v1214_v28, %v628_v14  ;;  %v577_v18 = vadd.f32 %v542_v10, %v287_v4  ;;  %v562_v31 = vadd.f32 %v504_v20, %v272_v19 }
  0xc8   : > { %840 = vst.msk [vmem:[%s1227_s27 + $0x70] sm:$0xf] %vm811_vm4, %v807_v12  ;;  %vm688_vm9 = vcmp.ge.f32.partialorder %v656_v13, 0.0  ;;  %v720_v21 = vmul.f32 0.1, %v656_v13  ;;  %v636_v22 = vld [vmem:[#allocation2 + $0xa8] sm:$0xff] }
  0xc9   : > { %vm696_vm10 = vcmp.ge.f32.partialorder %v664_v17, 0.0  ;;  %v728_v24 = vmul.f32 0.1, %v664_v17  ;;  %v672_v25 = vadd.f32 %v1214_v28, %v636_v22  ;;  %v644_v26 = vld [vmem:[#allocation2 + $0xe8] sm:$0xff]  ;;  %594 = vst.msk [vmem:[#allocation2 + $0x70] sm:$0xff] %vm224_vm1, %v561_v8 }
  0xca   : > { %v752_v27 = vsel %vm688_vm9, %v656_v13, %v720_v21  ;;  %v680_v29 = vadd.f32 %v1214_v28, %v644_v26  ;;  %v621_v30 = vld [vmem:[#allocation2 + $0x30] sm:$0xff]  ;;  %602 = vst.msk [vmem:[#allocation2 + $0xb0] sm:$0xff] %vm224_vm1, %v569_v15 }
  0xcb   : > { %v784_v32 = vpack.c.bf16 %v752_v27, %v752_v27  ;;  %v760_v33 = vsel %vm696_vm10, %v664_v17, %v728_v24  ;;  %vm704_vm11 = vcmp.ge.f32.partialorder %v672_v25, 0.0  ;;  %v736_v34 = vmul.f32 0.1, %v672_v25  ;;  %610 = vst.msk [vmem:[#allocation2 + $0xf0] sm:$0xff] %vm224_vm1, %v577_v18 }
  0xcc   : > { %v792_v35 = vpack.c.bf16 %v760_v33, %v760_v33  ;;  %vm712_vm12 = vcmp.ge.f32.partialorder %v680_v29, 0.0  ;;  %v744_v36 = vmul.f32 0.1, %v680_v29  ;;  %v657_v37 = vadd.f32 %v1214_v28, %v621_v30  ;;  %587 = vst.msk [vmem:[#allocation2 + $0x38] sm:$0xff] %vm224_vm1, %v554_v23 }
  0xcd   : > { %817 = vst.msk [vmem:[%s1227_s27 + $0x14] sm:$0xf] %vm811_vm4, %v784_v32  ;;  %v768_v39 = vsel %vm704_vm11, %v672_v25, %v736_v34  ;;  %v524_v40 = vpop.f32.mrf.mxu2 }
  0xce   : > { %v544_v42 = vpop.f32.mrf.mxu3  ;;  %825 = vst.msk [vmem:[%s1227_s27 + $0x34] sm:$0xf] %vm811_vm4, %v792_v35  ;;  %v800_v43 = vpack.c.bf16 %v768_v39, %v768_v39  ;;  %v776_v44 = vsel %vm712_vm12, %v680_v29, %v744_v36  ;;  %vm689_vm13 = vcmp.ge.f32.partialorder %v657_v37, 0.0  ;;  %v721_v45 = vmul.f32 0.1, %v657_v37 }
  0xcf   : > { %v808_v46 = vpack.c.bf16 %v776_v44, %v776_v44  ;;  %595 = vst.msk [vmem:[#allocation2 + $0x78] sm:$0xff] %vm224_vm1, %v562_v31  ;;  %v570_v47 = vadd.f32 %v524_v40, %v280_v38  ;;  %v578_v50 = vadd.f32 %v544_v42, %v288_v41 }
  0xd0   : > { %833 = vst.msk [vmem:[%s1227_s27 + $0x54] sm:$0xf] %vm811_vm4, %v800_v43  ;;  %v753_v48 = vsel %vm689_vm13, %v657_v37, %v721_v45  ;;  %v629_v49 = vld [vmem:[#allocation2 + $0x70] sm:$0xff] }
  0xd1   : > { %841 = vst.msk [vmem:[%s1227_s27 + $0x74] sm:$0xf] %vm811_vm4, %v808_v46  ;;  %v785_v51 = vpack.c.bf16 %v753_v48, %v753_v48  ;;  %v665_v52 = vadd.f32 %v1214_v28, %v629_v49  ;;  %v637_v53 = vld [vmem:[#allocation2 + $0xb0] sm:$0xff] }
  0xd2   : > { %v673_v54 = vadd.f32 %v1214_v28, %v637_v53  ;;  %v645_v55 = vld [vmem:[#allocation2 + $0xf0] sm:$0xff]  ;;  %603 = vst.msk [vmem:[#allocation2 + $0xb8] sm:$0xff] %vm224_vm1, %v570_v47 }
  0xd3   : > { %818 = vst.msk [vmem:[%s1227_s27 + $0x18] sm:$0xf] %vm811_vm4, %v785_v51  ;;  %vm697_vm14 = vcmp.ge.f32.partialorder %v665_v52, 0.0  ;;  %v729_v56 = vmul.f32 0.1, %v665_v52  ;;  %v681_v57 = vadd.f32 %v1214_v28, %v645_v55  ;;  %v622_v58 = vld [vmem:[#allocation2 + $0x38] sm:$0xff] }
  0xd4   : > { %vm705_vm15 = vcmp.ge.f32.partialorder %v673_v54, 0.0  ;;  %v737_v59 = vmul.f32 0.1, %v673_v54  ;;  %v658_v60 = vadd.f32 %v1214_v28, %v622_v58  ;;  %611 = vst.msk [vmem:[#allocation2 + $0xf8] sm:$0xff] %vm224_vm1, %v578_v50 }
  0xd5   : > { %v761_v61 = vsel %vm697_vm14, %v665_v52, %v729_v56  ;;  %vm713_vm0 = vcmp.ge.f32.partialorder %v681_v57, 0.0  ;;  %v745_v62 = vmul.f32 0.1, %v681_v57 }
  0xd6   : > { %v793_v63 = vpack.c.bf16 %v761_v61, %v761_v61  ;;  %v769_v0 = vsel %vm705_vm15, %v673_v54, %v737_v59  ;;  %vm690_vm2 = vcmp.ge.f32.partialorder %v658_v60, 0.0  ;;  %v722_v1 = vmul.f32 0.1, %v658_v60  ;;  %v630_v2 = vld [vmem:[#allocation2 + $0x78] sm:$0xff] }
  0xd7   : > { %v801_v3 = vpack.c.bf16 %v769_v0, %v769_v0  ;;  %v777_v4 = vsel %vm713_vm0, %v681_v57, %v745_v62  ;;  %v666_v5 = vadd.f32 %v1214_v28, %v630_v2 }
  0xd8   : > { %826 = vst.msk [vmem:[%s1227_s27 + $0x38] sm:$0xf] %vm811_vm4, %v793_v63  ;;  %v809_v6 = vpack.c.bf16 %v777_v4, %v777_v4  ;;  %v754_v7 = vsel %vm690_vm2, %v658_v60, %v722_v1 }
  0xd9   : > { %834 = vst.msk [vmem:[%s1227_s27 + $0x58] sm:$0xf] %vm811_vm4, %v801_v3  ;;  %v786_v8 = vpack.c.bf16 %v754_v7, %v754_v7  ;;  %vm698_vm1 = vcmp.ge.f32.partialorder %v666_v5, 0.0  ;;  %v730_v9 = vmul.f32 0.1, %v666_v5  ;;  %v638_v10 = vld [vmem:[#allocation2 + $0xb8] sm:$0xff] }
  0xda   : > { %842 = vst.msk [vmem:[%s1227_s27 + $0x78] sm:$0xf] %vm811_vm4, %v809_v6  ;;  %v674_v11 = vadd.f32 %v1214_v28, %v638_v10 }
  0xdb   : > { %819 = vst.msk [vmem:[%s1227_s27 + $0x1c] sm:$0xf] %vm811_vm4, %v786_v8  ;;  %v762_v12 = vsel %vm698_vm1, %v666_v5, %v730_v9  ;;  %v646_v13 = vld [vmem:[#allocation2 + $0xf8] sm:$0xff] }
  0xdc   : > { %v794_v14 = vpack.c.bf16 %v762_v12, %v762_v12  ;;  %vm706_vm3 = vcmp.ge.f32.partialorder %v674_v11, 0.0  ;;  %v738_v15 = vmul.f32 0.1, %v674_v11  ;;  %v682_v16 = vadd.f32 %v1214_v28, %v646_v13 }
  0xde   : > { %827 = vst.msk [vmem:[%s1227_s27 + $0x3c] sm:$0xf] %vm811_vm4, %v794_v14  ;;  %v770_v17 = vsel %vm706_vm3, %v674_v11, %v738_v15  ;;  %vm714_vm5 = vcmp.ge.f32.partialorder %v682_v16, 0.0  ;;  %v746_v18 = vmul.f32 0.1, %v682_v16 }
  0xdf   : > { %v802_v19 = vpack.c.bf16 %v770_v17, %v770_v17 }
  0xe0   : > { %v778_v20 = vsel %vm714_vm5, %v682_v16, %v746_v18 }
  0xe1   : > { %835 = vst.msk [vmem:[%s1227_s27 + $0x5c] sm:$0xf] %vm811_vm4, %v802_v19  ;;  %v810_v21 = vpack.c.bf16 %v778_v20, %v778_v20 }
  0xe3   : > { %843 = vst.msk [vmem:[%s1227_s27 + $0x7c] sm:$0xf] %vm811_vm4, %v810_v21 }
  0xe4 PF: > { %s13_s14 = sadd.s32 1, %s1091_s14   ;;  %s1362_s12 = smov %s1087_s13 }
  0xe5   : > { %p10_p5 = scmp.ge.s32.totalorder %s13_s14, 4   ;;  %s1363_s13 = smov %s1365_s15 }
  0xe7   :  { %12 = sbr.rel (!%p10_p5) target bundleno = 2 (0x2), region = 73 }

// kernel: _lambda_.8
= control target key start
LH: loop header
LB: loop body
LE: loop exit
PB: predicated region body
PF: predicated region fallthrough
CT: control target
= control target key end

     0   :  { %s3833_s12 = smov 0   ;;  %s3835_s13 = smov 0   ;;  %s4984_s0 = inlined_call_operand.vmem [shape: bf16[2,342,8], index: 0, kind: input, shape index: {}]   ;;  %s4985_s1 = inlined_call_operand.vmem [shape: bf16[9,8,16], index: 1, kind: input, shape index: {}]   ;;  %s4986_s2 = inlined_call_operand.vmem [shape: f32[1,16], index: 2, kind: input, shape index: {}]   ;;  %s4987_s3 = inlined_call_operand.vmem [shape: bf16[2,288,16], index: 3, kind: output, shape index: {}]  }
   0x1   :  { %s3837_s14 = smov 0  }
   0x2 LB: > { %s25_s15 = sadd.s32 1, %s3807_s13  ;;  %p3301_p0 = scmp.ge.s32.totalorder %s3811_s14, 1  ;;  %s3811_s14 = sphi %s3837_s14, %s13_s14   ;;  %s3807_s13 = sphi %s3835_s13, %s5013_s13   ;;  %s3803_s12 = sphi %s3833_s12, %s5012_s12  }
   0x3   : > { %p27_p1 = scmp.ge.s32.totalorder %s25_s15, 2  ;;  %p168_p2 = scmp.lt.s32.totalorder %s3811_s14, 3 }
   0x5   : > { %s5015_s15 = smov (%p27_p1, %s25_s15), 0  ;;  %p169_p3 = pnand %p3301_p0, %p168_p2 }
   0x7   : > { %172 = sbr.rel (%p169_p3) target bundleno = 821 (0x335), region = 32 }
   0xc   : > { %v3304_v0 = vld [vmem:[%s4985_s1 + $0x4] sm:$0xf]  ;;  %vm560_vm0 = vcmask 1043456   ;;  %p202_p4 = scmp.lt.s32.totalorder %s3803_s12, 1  ;;  %v3409_v2 = vld [vmem:[%s4985_s1 + $0x8] sm:$0xf] }
   0xd   : > { %v562_v1 = vsel %vm560_vm0, %v3304_v0, 0  ;;  %v259_v3 = vld [vmem:[%s4985_s1] sm:$0xf]  ;;  %v900_v4 = vsel %vm560_vm0, %v3409_v2, 0  ;;  %v3515_v6 = vld [vmem:[%s4985_s1 + $0x10] sm:$0xf] }
   0xe   : > { %3738 = vmatpush.bf16.msra.mxu1 %v562_v1  ;;  %3739 = vmatpush.bf16.msra.mxu2 %v562_v1  ;;  %s5017_s12 = smov (!%p202_p4, %s3803_s12), 1  ;;  %v700_v5 = vsel %vm560_vm0, %v259_v3, 0  ;;  %v1630_v7 = vsel %vm560_vm0, %v3515_v6, 0  ;;  %vm356_vm1 = vsmask.f32 7424  ;;  %vm505_vm2 = vcmask 64512  }
   0xf   : > { %571 = vmatpush.bf16.msra.mxu0 %v562_v1  ;;  %s3741_s24 = smul.u32 172, %s5017_s12  ;;  %3740 = vmatpush.bf16.msra.mxu3 %v562_v1  ;;  %v3428_v45 = vld [vmem:[%s4985_s1 + $0xc] sm:$0xf]  ;;  %vm807_vm3 = vcmask 1046528   ;;  %vm1404_vm4 = vsmask.f32 6400 }
  0x10   : > { %v1261_v53 = vsel %vm560_vm0, %v3428_v45, 0  ;;  %vm2370_vm5 = vsmask.f32 5376  ;;  %vm1773_vm6 = vcmask 1045504   ;;  %vm2739_vm7 = vcmask 1044480   ;;  %s3742_s17 = smul.u32 144, %s5017_s12 }
  0x11   : > { %s3873_s27 = scalar_lea.vmem %s4984_s0, %s3741_s24  ;;  %vm3153_vm9 = vcmask 125952  }
  0x12   : > { %909 = vmatpush.bf16.msrb.mxu2 %v900_v4  ;;  %709 = vmatpush.bf16.msrb.mxu1 %v700_v5  ;;  %v3876_v8 = vld [vmem:[%s3873_s27 + $0x28] sm:$0xff]  ;;  %v3879_v9 = vld [vmem:[%s3873_s27 + $0x30] sm:$0xff]  ;;  %v3885_v11 = vld [vmem:[%s3873_s27 + $0x58] sm:$0xff]  ;;  %s4646_s19 = scalar_lea.vmem %s4987_s3, %s3742_s17 }
  0x13   : > { %1639 = vmatpush.bf16.msrb.mxu0 %v1630_v7  ;;  %v3882_v10 = vld [vmem:[%s3873_s27 + $0x50] sm:$0xff]  ;;  %v3888_v12 = vld [vmem:[%s3873_s27] sm:$0xff]   ;;  %v3891_v13 = vld [vmem:[%s3873_s27 + $0x8] sm:$0xff]  ;;  %v397_v14 = vshll.u32 %v3876_v8, 16  ;;  %v401_v15 = vshrl.u32 %v3876_v8, 16  ;;  %v405_v16 = vshll.u32 %v3879_v9, 16  ;;  %1270 = vmatpush.bf16.msrb.mxu3 %v1261_v53 }
  0x14   : > { %v437_v17 = vshll.u32 %v3882_v10, 16  ;;  %v441_v18 = vshrl.u32 %v3882_v10, 16  ;;  %v445_v19 = vshll.u32 %v3885_v11, 16  ;;  %v358_v20 = vshrl.u32 %v3888_v12, 16  ;;  %v3909_v31 = vld [vmem:[%s3873_s27 + $0x78] sm:$0xff]  ;;  %v3695_v32 = vld [vmem:[%s3873_s27 + $0x80] sm:$0xff] }
  0x15   : > { %v360_v21 = vshll.u32 %v3888_v12, 16  ;;  %v3901_v22 = vrot.slane %v397_v14, 1  ;;  %v407_v23 = vrot.slane %v405_v16, 1  ;;  %v365_v25 = vshll.u32 %v3891_v13, 16  ;;  %v3918_v37 = vld [vmem:[%s3873_s27 + $0x38] sm:$0xff]  ;;  %v3922_v38 = vld [vmem:[%s3873_s27 + $0x60] sm:$0xff] }
  0x16   : > { %v3903_v24 = vrot.slane %v437_v17, 1  ;;  %v447_v26 = vrot.slane %v445_v19, 1  ;;  %v477_v39 = vshll.u32 %v3909_v31, 16  ;;  %v481_v40 = vshrl.u32 %v3909_v31, 16  ;;  %v3927_v42 = vld [vmem:[%s3873_s27 + $0x10] sm:$0xff]  ;;  %v3696_v59 = vld [vmem:[%s3873_s27 + $0x88] sm:$0xff] }
  0x17   : > { %v362_v27 = vrot.slane %v360_v21, 1  ;;  %v403_v28 = vor.u32 %v401_v15, %v3901_v22  ;;  %v367_v30 = vrot.slane %v365_v25, 1  ;;  %v485_v41 = vshll.u32 %v3695_v32, 16  ;;  %v3946_v60 = vld [vmem:[%s3873_s27 + $0x48] sm:$0xff]  ;;  %v3955_v5 = vld [vmem:[%s3873_s27 + $0x40] sm:$0xff]  ;;  %v3963_v17 = vld [vmem:[%s3873_s27 + $0x18] sm:$0xff] }
  0x18   : > { %v443_v29 = vor.u32 %v441_v18, %v3903_v24  ;;  %v3929_v43 = vrot.slane %v477_v39, 1  ;;  %v409_v46 = vshrl.u32 %v3879_v9, 16  ;;  %v413_v47 = vshll.u32 %v3918_v37, 16  ;;  %v3958_v6 = vld [vmem:[%s3873_s27 + $0x68] sm:$0xff]  ;;  %v260_v18 = vld [vmem:[%s3873_s27 + $0x90] sm:$0x1] }
  0x19   : > { %v363_v33 = vor.u32 %v362_v27, %v358_v20  ;;  %v408_v34 = vsel %vm356_vm1, %v403_v28, %v407_v23  ;;  %v487_v44 = vrot.slane %v485_v41, 1  ;;  %v449_v48 = vshrl.u32 %v3885_v11, 16  ;;  %v3972_v27 = vld [vmem:[%s3873_s27 + $0x20] sm:$0xff] }
  0x1a   : > { %v448_v35 = vsel %vm356_vm1, %v443_v29, %v447_v26  ;;  %3378 = vmatmul.msk.bf16.vlgmr.msra.gmra.mxu1 %vm505_vm2, %v408_v34  ;;  %v453_v49 = vshll.u32 %v3922_v38, 16  ;;  %v483_v50 = vor.u32 %v481_v40, %v3929_v43  ;;  %v369_v51 = vshrl.u32 %v3891_v13, 16 }
  0x1b   : > { %3383 = vmatmul.msk.bf16.vlgmr.msra.gmra.mxu2 %vm505_vm2, %v448_v35  ;;  %v368_v36 = vsel %vm356_vm1, %v363_v33, %v367_v30  ;;  %v373_v52 = vshll.u32 %v3927_v42, 16  ;;  %v411_v55 = vor.u32 %v409_v46, %v407_v23  ;;  %v415_v56 = vrot.slane %v413_v47, 1 }
  0x1c   : > { %3373 = vmatmul.msk.bf16.vlgmr.msra.gmra.mxu0 %vm505_vm2, %v368_v36  ;;  %v488_v54 = vsel %vm356_vm1, %v483_v50, %v487_v44  ;;  %v451_v57 = vor.u32 %v449_v48, %v447_v26  ;;  %v455_v58 = vrot.slane %v453_v49, 1  ;;  %v371_v61 = vor.u32 %v369_v51, %v367_v30 }
  0x1d   : > { %3388 = vmatmul.msk.bf16.vlgmr.msra.gmra.mxu3 %vm505_vm2, %v488_v54  ;;  %v375_v62 = vrot.slane %v373_v52, 1  ;;  %v416_v63 = vsel %vm356_vm1, %v411_v55, %v415_v56  ;;  %v489_v1 = vshrl.u32 %v3695_v32, 16  ;;  %v493_v2 = vshll.u32 %v3696_v59, 16  ;;  %v3993_v52 = vld [vmem:[%s3873_s27 + $0x70] sm:$0xff] }
  0x1e   : > { %v456_v0 = vsel %vm356_vm1, %v451_v57, %v455_v58  ;;  %v429_v3 = vshll.u32 %v3946_v60, 16  ;;  %v433_v16 = vshrl.u32 %v3946_v60, 16  ;;  %v417_v20 = vshrl.u32 %v3918_v37, 16 }
  0x1f   : > { %v376_v4 = vsel %vm356_vm1, %v371_v61, %v375_v62  ;;  %v491_v7 = vor.u32 %v489_v1, %v487_v44  ;;  %v495_v14 = vrot.slane %v493_v2, 1  ;;  %v421_v21 = vshll.u32 %v3955_v5, 16 }
  0x20   : > { %v431_v15 = vrot.slane %v429_v3, 1  ;;  %v457_v23 = vshrl.u32 %v3922_v38, 16  ;;  %v461_v25 = vshll.u32 %v3958_v6, 16  ;;  %v336_v28 = vunpack.c.l.b16 %v260_v18 }
  0x21   : > { %v496_v26 = vsel %vm356_vm1, %v491_v7, %v495_v14  ;;  %v377_v30 = vshrl.u32 %v3927_v42, 16  ;;  %v381_v32 = vshll.u32 %v3963_v17, 16  ;;  %v419_v33 = vor.u32 %v417_v20, %v415_v56  ;;  %v3697_v7 = vld [vmem:[%s3873_s27 + $0x10] sm:$0xff] }
  0x22   : > { %v435_v19 = vor.u32 %v433_v16, %v431_v15  ;;  %v423_v34 = vrot.slane %v421_v21, 1  ;;  %v459_v35 = vor.u32 %v457_v23, %v455_v58  ;;  %v463_v36 = vrot.slane %v461_v25, 1  ;;  %v3553_v21 = vld [vmem:[%s4985_s1 + $0x18] sm:$0xf]  ;;  %v3640_v25 = vld [vmem:[%s4985_s1 + $0x1c] sm:$0xf] }
  0x23   : > { %v389_v39 = vshll.u32 %v3972_v27, 16  ;;  %v3982_v40 = vpack.c.b16 %v336_v28, %v336_v28  ;;  %v379_v41 = vor.u32 %v377_v30, %v375_v62  ;;  %v383_v44 = vrot.slane %v381_v32, 1  ;;  %v1037_v62 = vld [vmem:[%s3873_s27 + $0x8] sm:$0xe]  ;;  %v3659_v32 = vld [vmem:[%s4985_s1 + $0x20] sm:$0xf] }
  0x24   : > { %v3976_v29 = vsel %vm356_vm1, %v435_v19, %v3903_v24  ;;  %v424_v24 = vsel %vm356_vm1, %v419_v33, %v423_v34  ;;  %v464_v45 = vsel %vm356_vm1, %v459_v35, %v463_v36  ;;  %v497_v47 = vshrl.u32 %v3696_v59, 16 }
  0x25   : > { %v391_v46 = vrot.slane %v389_v39, 1  ;;  %v501_v48 = vshll.u32 %v3982_v40, 16  ;;  %v393_v49 = vshrl.u32 %v3972_v27, 16  ;;  %v384_v50 = vsel %vm356_vm1, %v379_v41, %v383_v44  ;;  %v3698_v41 = vld [vmem:[%s3873_s27 + $0x18] sm:$0xff] }
  0x26   : > { %v499_v53 = vor.u32 %v497_v47, %v495_v14  ;;  %v425_v56 = vshrl.u32 %v3955_v5, 16  ;;  %v465_v57 = vshrl.u32 %v3958_v6, 16  ;;  %v469_v58 = vshll.u32 %v3993_v52, 16 }
  0x27   : > { %v395_v51 = vor.u32 %v393_v49, %v391_v46  ;;  %v503_v54 = vrot.slane %v501_v48, 1  ;;  %v385_v61 = vshrl.u32 %v3963_v17, 16  ;;  %v1113_v3 = vunpack.c.l.b16 %v1037_v62 }
  0x28   : > { %v467_v1 = vor.u32 %v465_v57, %v463_v36  ;;  %v471_v2 = vrot.slane %v469_v58, 1  ;;  %v1170_v20 = vrot.slane %v3697_v7, 1  ;;  %v2596_v28 = vsel %vm560_vm0, %v3640_v25, 0 }
  0x29   : > { %v400_v55 = vsel %vm356_vm1, %v395_v51, %v3901_v22  ;;  %v504_v59 = vsel %vm356_vm1, %v499_v53, %v503_v54  ;;  %2605 = vmatpush.bf16.msra.mxu3 %v2596_v28  ;;  %v2832_v33 = vsel %vm560_vm0, %v3659_v32, 0  ;;  %v1414_v48 = vshrl.u32 %v3697_v7, 16 }
  0x2a   : > { %3379 = vmatmul.msk.bf16.gmra.mxu1 %vm505_vm2, %v416_v63  ;;  %v4004_v63 = vld [vmem:[%s3873_s27 + $0xc] sm:$0xf]  ;;  %v472_v16 = vsel %vm356_vm1, %v467_v1, %v471_v2  ;;  %2841 = vmatpush.bf16.msra.mxu0 %v2832_v33  ;;  %v1417_v49 = vshll.u32 %v3697_v7, 16  ;;  %v1423_v1 = vshrl.u32 %v3698_v41, 16  ;;  %v813_v28 = vrot.slane %v3963_v17, 1  ;;  %v3701_v33 = vld [vmem:[%s3873_s27 + $0x30] sm:$0xff] }
  0x2b   : > { %3384 = vmatmul.msk.bf16.gmra.mxu2 %vm505_vm2, %v456_v0  ;;  %v427_v0 = vor.u32 %v425_v56, %v423_v34  ;;  %v4988_v22 = vunpack.c.l.b16 %v4004_v63  ;;  %v473_v34 = vshrl.u32 %v3993_v52, 16  ;;  %v1416_v54 = vrot.slane %v1414_v48, 1 }
  0x2c   : > { %3374 = vmatmul.msk.bf16.gmra.mxu0 %vm505_vm2, %v376_v4  ;;  %v387_v4 = vor.u32 %v385_v61, %v383_v44  ;;  %v3735_v44 = vld [vmem:[%s3873_s27] sm:$0xf0]  ;;  %v1419_v56 = vrot.slane %v1417_v49, 2 }
  0x2d   : > { %3389 = vmatmul.msk.bf16.gmra.mxu3 %vm505_vm2, %v496_v26  ;;  %v432_v14 = vsel %vm356_vm1, %v427_v0, %v431_v15  ;;  %v1150_v18 = vpack.c.b16 %v4988_v22, %v1113_v3  ;;  %v2227_v15 = vsel %vm560_vm0, %v3553_v21, 0  ;;  %v3534_v26 = vld [vmem:[%s4985_s1 + $0x14] sm:$0xf]  ;;  %v475_v36 = vor.u32 %v473_v34, %v471_v2  ;;  %v3699_v61 = vld [vmem:[%s3873_s27 + $0x20] sm:$0xff] }
  0x2e   : > { %v392_v19 = vsel %vm356_vm1, %v387_v4, %v391_v46  ;;  %2236 = vmatpush.bf16.msra.mxu2 %v2227_v15  ;;  %v1866_v30 = vsel %vm560_vm0, %v3534_v26, 0  ;;  %v1420_v58 = vor.u32 %v1419_v56, %v1416_v54  ;;  %v1174_v0 = vrot.slane %v3699_v61, 1  ;;  %v3707_v22 = vld [vmem:[%s3873_s27 + $0x60] sm:$0xff] }
  0x2f   : > { %v1169_v23 = vrot.slane %v1150_v18, 1  ;;  %1875 = vmatpush.bf16.msra.mxu1 %v1866_v30  ;;  %v480_v39 = vsel %vm356_vm1, %v475_v36, %v3929_v43  ;;  %v1406_v46 = vshrl.u32 %v1150_v18, 16  ;;  %v1409_v47 = vshll.u32 %v1150_v18, 16 }
  0x30   : > { %v1426_v2 = vshll.u32 %v3698_v41, 16  ;;  %v1425_v4 = vrot.slane %v1423_v1, 1  ;;  %v1432_v21 = vshrl.u32 %v3699_v61, 16  ;;  %v1178_v34 = vrot.slane %v3701_v33, 1  ;;  %v3703_v1 = vld [vmem:[%s3873_s27 + $0x40] sm:$0xff] }
  0x31   : > { %v1171_v35 = vsel %vm807_vm3, %v1169_v23, %v1170_v20  ;;  %v1408_v43 = vrot.slane %v1406_v46, 1  ;;  %v1411_v53 = vrot.slane %v1409_v47, 2  ;;  %v1435_v23 = vshll.u32 %v3699_v61, 16  ;;  %v3702_v47 = vld [vmem:[%s3873_s27 + $0x38] sm:$0xff] }
  0x32   : > { %v1428_v7 = vrot.slane %v1426_v2, 2  ;;  %v1434_v25 = vrot.slane %v1432_v21, 1 }
  0x33   : > { %v1412_v57 = vor.u32 %v1411_v53, %v1408_v43  ;;  %v1437_v26 = vrot.slane %v1435_v23, 2  ;;  %v1453_v43 = vshll.u32 %v3701_v33, 16  ;;  %v819_v23 = vrot.slane %v3879_v9, 1 }
  0x35   : > { %v1421_v62 = vsel %vm1404_vm4, %v1412_v57, %v1420_v58  ;;  %v1438_v30 = vor.u32 %v1437_v26, %v1434_v25  ;;  %v1455_v57 = vrot.slane %v1453_v43, 2 }
  0x3a   : > { %3380 = vmatmul.msk.bf16.gmra.mxu1 %vm505_vm2, %v424_v24  ;;  %v1172_v24 = vrot.slane %v3698_v41, 1 }
  0x3b   : > { %3385 = vmatmul.msk.bf16.gmra.mxu2 %vm505_vm2, %v464_v45  ;;  %v3736_v45 = vld [vmem:[%s3873_s27] sm:$0xe] }
  0x3c   : > { %3375 = vmatmul.msk.bf16.gmra.mxu0 %vm505_vm2, %v384_v50  ;;  %v3737_v50 = vor.u32 %v3736_v45, %v3735_v44  ;;  %v1173_v51 = vsel %vm807_vm3, %v1170_v20, %v1172_v24  ;;  %v1175_v3 = vsel %vm807_vm3, %v1172_v24, %v1174_v0  ;;  %v815_v24 = vrot.slane %v3972_v27, 1 }
  0x3d   : > { %3390 = vmatmul.msk.bf16.gmra.mxu3 %vm505_vm2, %v504_v59 }
  0x4a   : > { %3381 = vmatmul.msk.bf16.gmra.mxu1 %vm505_vm2, %v432_v14  ;;  %v811_v14 = vrot.slane %v3927_v42, 1 }
  0x4b   : > { %3386 = vmatmul.msk.bf16.gmra.mxu2 %vm505_vm2, %v472_v16  ;;  %v1429_v16 = vor.u32 %v1428_v7, %v1425_v4  ;;  %v1182_v4 = vrot.slane %v3703_v1, 1  ;;  %v1459_v7 = vshrl.u32 %v3702_v47, 16 }
  0x4c   : > { %3376 = vmatmul.msk.bf16.gmra.mxu0 %vm505_vm2, %v392_v19  ;;  %v814_v32 = vsel %vm807_vm3, %v811_v14, %v813_v28 }
  0x4d   : > { %3497 = vmatmul.msk.bf16.vlgmr.msrb.gmra.mxu3 %vm505_vm2, %v1171_v35  ;;  %v1430_v19 = vsel %vm1404_vm4, %v1420_v58, %v1429_v16  ;;  %v1461_v21 = vrot.slane %v1459_v7, 1 }
  0x5a   : > { %3382 = vmatmul.msk.bf16.gmra.mxu1 %vm505_vm2, %v3976_v29  ;;  %v808_v29 = vrot.slane %v3737_v50, 1  ;;  %v1180_v50 = vrot.slane %v3702_v47, 1 }
  0x5b   : > { %3387 = vmatmul.msk.bf16.gmra.mxu2 %vm505_vm2, %v480_v39 }
  0x5c   : > { %3377 = vmatmul.msk.bf16.gmra.mxu0 %vm505_vm2, %v400_v55  ;;  %v809_v55 = vrot.slane %v3891_v13, 1  ;;  %v1181_v56 = vsel %vm807_vm3, %v1178_v34, %v1180_v50 }
  0x5d   : > { %3498 = vmatmul.msk.bf16.gmra.mxu3 %vm505_vm2, %v1173_v51  ;;  %v1450_v51 = vshrl.u32 %v3701_v33, 16 }
  0x5e   : > { %v810_v59 = vsel %vm807_vm3, %v808_v29, %v809_v55  ;;  %v812_v18 = vsel %vm807_vm3, %v809_v55, %v811_v14  ;;  %v1462_v14 = vshll.u32 %v3702_v47, 16  ;;  %v821_v47 = vrot.slane %v3918_v37, 1 }
  0x5f   : > { %v1452_v55 = vrot.slane %v1450_v51, 1 }
  0x61   : > { %v1456_v58 = vor.u32 %v1455_v57, %v1452_v55  ;;  %v3705_v55 = vld [vmem:[%s3873_s27 + $0x50] sm:$0xff] }
  0x6a   : > { %3391 = vmatmul.msk.bf16.vlgmr.msrb.gmra.mxu1 %vm505_vm2, %v3888_v12  ;;  %v3700_v12 = vld [vmem:[%s3873_s27 + $0x28] sm:$0xff] }
  0x6b   : > { %3410 = vmatmul.msk.bf16.vlgmr.msrb.gmra.mxu2 %vm505_vm2, %v810_v59  ;;  %v1176_v20 = vrot.slane %v3700_v12, 1  ;;  %v1441_v35 = vshrl.u32 %v3700_v12, 16  ;;  %v1444_v36 = vshll.u32 %v3700_v12, 16 }
  0x6c   : > { %3516 = vmatmul.msk.bf16.vlgmr.msrb.gmra.mxu0 %vm505_vm2, %v1421_v62 }
  0x6d   : > { %3499 = vmatmul.msk.bf16.gmra.mxu3 %vm505_vm2, %v1175_v3  ;;  %v1177_v15 = vsel %vm807_vm3, %v1174_v0, %v1176_v20  ;;  %v1179_v39 = vsel %vm807_vm3, %v1176_v20, %v1178_v34  ;;  %v1443_v41 = vrot.slane %v1441_v35, 1  ;;  %v1446_v44 = vrot.slane %v1444_v36, 2 }
  0x6e   : > { %v1468_v35 = vshrl.u32 %v3703_v1, 16  ;;  %v1471_v36 = vshll.u32 %v3703_v1, 16 }
  0x6f   : > { %v1447_v45 = vor.u32 %v1446_v44, %v1443_v41 }
  0x71   : > { %v1448_v49 = vsel %vm1404_vm4, %v1438_v30, %v1447_v45  ;;  %v1457_v3 = vsel %vm1404_vm4, %v1447_v45, %v1456_v58 }
  0x7a   : > { %3392 = vmatmul.msk.bf16.gmra.mxu1 %vm505_vm2, %v3891_v13  ;;  %v1439_v13 = vsel %vm1404_vm4, %v1429_v16, %v1438_v30 }
  0x7b   : > { %3411 = vmatmul.msk.bf16.gmra.mxu2 %vm505_vm2, %v812_v18 }
  0x7c   : > { %3517 = vmatmul.msk.bf16.gmra.mxu0 %vm505_vm2, %v1430_v19  ;;  %v1183_v19 = vsel %vm807_vm3, %v1180_v50, %v1182_v4 }
  0x7d   : > { %3500 = vmatmul.msk.bf16.gmra.mxu3 %vm505_vm2, %v1177_v15 }
  0x8a   : > { %3393 = vmatmul.msk.bf16.gmra.mxu1 %vm505_vm2, %v3927_v42  ;;  %v816_v42 = vsel %vm807_vm3, %v813_v28, %v815_v24 }
  0x8b   : > { %3412 = vmatmul.msk.bf16.gmra.mxu2 %vm505_vm2, %v814_v32  ;;  %v3704_v32 = vld [vmem:[%s3873_s27 + $0x48] sm:$0xff] }
  0x8c   : > { %3518 = vmatmul.msk.bf16.gmra.mxu0 %vm505_vm2, %v1439_v13  ;;  %v1184_v34 = vrot.slane %v3704_v32, 1  ;;  %v1480_v1 = vshll.u32 %v3704_v32, 16 }
  0x8d   : > { %3501 = vmatmul.msk.bf16.gmra.mxu3 %vm505_vm2, %v1179_v39 }
  0x97   : > { %v4078_v46 = vpop.f32.mrf.mxu1 }
  0x99   : > { %v4082_v48 = vpop.f32.mrf.mxu0 }
  0x9a   : > { %3394 = vmatmul.msk.bf16.gmra.mxu1 %vm505_vm2, %v3963_v17  ;;  %v817_v17 = vrot.slane %v3876_v8, 1 }
  0x9b   : > { %3413 = vmatmul.msk.bf16.gmra.mxu2 %vm505_vm2, %v816_v42  ;;  %v1470_v42 = vrot.slane %v1468_v35, 1  ;;  %v3706_v35 = vld [vmem:[%s3873_s27 + $0x58] sm:$0xff] }
  0x9c   : > { %3519 = vmatmul.msk.bf16.gmra.mxu0 %vm505_vm2, %v1448_v49  ;;  %v818_v0 = vsel %vm807_vm3, %v815_v24, %v817_v17  ;;  %v820_v30 = vsel %vm807_vm3, %v817_v17, %v819_v23  ;;  %v1185_v24 = vsel %vm807_vm3, %v1182_v4, %v1184_v34 }
  0x9d   : > { %3502 = vmatmul.msk.bf16.gmra.mxu3 %vm505_vm2, %v1181_v56  ;;  %v822_v56 = vsel %vm807_vm3, %v819_v23, %v821_v47 }
  0x9e   : > { %v4089_v53 = vpop.f32.mrf.mxu2 }
  0x9f   : > { %v4091_v54 = vpop.f32.mrf.mxu1 }
  0xa0   : > { %v4100_v61 = vpop.f32.mrf.mxu3 }
  0xa1   : > { %v4094_v29 = vpop.f32.mrf.mxu0  ;;  %4990 = vst [vmem:[#allocation2_spill] sm:$0xff] %v4100_v61 }
  0xa6   : > { %v4098_v59 = vpop.f32.mrf.mxu2 }
  0xa7   : > { %v4102_v62 = vpop.f32.mrf.mxu1 }
  0xa8   : > { %v4115_v18 = vpop.f32.mrf.mxu3 }
  0xa9   : > { %v4106_v2 = vpop.f32.mrf.mxu0  ;;  %4991 = vst [vmem:[#allocation3_spill] sm:$0xff] %v4115_v18 }
  0xaa   : > { %3395 = vmatmul.msk.bf16.gmra.mxu1 %vm505_vm2, %v3972_v27  ;;  %v1464_v27 = vrot.slane %v1462_v14, 2 }
  0xab   : > { %3414 = vmatmul.msk.bf16.gmra.mxu2 %vm505_vm2, %v818_v0  ;;  %v1477_v0 = vshrl.u32 %v3704_v32, 16 }
  0xac   : > { %3520 = vmatmul.msk.bf16.gmra.mxu0 %vm505_vm2, %v1457_v3  ;;  %v1465_v15 = vor.u32 %v1464_v27, %v1461_v21  ;;  %v823_v27 = vrot.slane %v3955_v5, 1 }
  0xad   : > { %3503 = vmatmul.msk.bf16.gmra.mxu3 %vm505_vm2, %v1183_v19  ;;  %v1479_v21 = vrot.slane %v1477_v0, 1 }
  0xae   : > { %v4113_v16 = vpop.f32.mrf.mxu2  ;;  %v1466_v13 = vsel %vm1404_vm4, %v1456_v58, %v1465_v15  ;;  %v1186_v58 = vrot.slane %v3705_v55, 1 }
  0xaf   : > { %v4117_v12 = vpop.f32.mrf.mxu1 }
  0xb0   : > { %v4126_v26 = vpop.f32.mrf.mxu3  ;;  %v1187_v14 = vsel %vm807_vm3, %v1184_v34, %v1186_v58 }
  0xb1   : > { %v4120_v20 = vpop.f32.mrf.mxu0  ;;  %4992 = vst [vmem:[#allocation4_spill] sm:$0xff] %v4126_v26 }
  0xb6   : > { %v4124_v25 = vpop.f32.mrf.mxu2 }
  0xb7   : > { %v4128_v28 = vpop.f32.mrf.mxu1 }
  0xb8   : > { %v4141_v41 = vpop.f32.mrf.mxu3 }
  0xb9   : > { %v4132_v33 = vpop.f32.mrf.mxu0  ;;  %4993 = vst [vmem:[#allocation5_spill] sm:$0xff] %v4141_v41 }
  0xba   : > { %3396 = vmatmul.msk.bf16.gmra.mxu1 %vm505_vm2, %v3876_v8  ;;  %v1473_v8 = vrot.slane %v1471_v36, 2 }
  0xbb   : > { %3415 = vmatmul.msk.bf16.gmra.mxu2 %vm505_vm2, %v820_v30 }
  0xbc   : > { %3521 = vmatmul.msk.bf16.gmra.mxu0 %vm505_vm2, %v1466_v13  ;;  %v1474_v49 = vor.u32 %v1473_v8, %v1470_v42  ;;  %v824_v13 = vsel %vm807_vm3, %v821_v47, %v823_v27  ;;  %v1486_v42 = vshrl.u32 %v3705_v55, 16  ;;  %v1489_v8 = vshll.u32 %v3705_v55, 16 }
  0xbd   : > { %3504 = vmatmul.msk.bf16.gmra.mxu3 %vm505_vm2, %v1185_v24  ;;  %v1188_v24 = vrot.slane %v3706_v35, 1 }
  0xbe   : > { %v4139_v39 = vpop.f32.mrf.mxu2  ;;  %v1475_v17 = vsel %vm1404_vm4, %v1465_v15, %v1474_v49 }
  0xbf   : > { %v4143_v44 = vpop.f32.mrf.mxu1  ;;  %v1189_v0 = vsel %vm807_vm3, %v1186_v58, %v1188_v24  ;;  %v1190_v58 = vrot.slane %v3707_v22, 1 }
  0xc0   : > { %v4152_v51 = vpop.f32.mrf.mxu3 }
  0xc1   : > { %v4146_v45 = vpop.f32.mrf.mxu0  ;;  %4994 = vst [vmem:[#allocation6_spill] sm:$0xff] %v4152_v51  ;;  %v1191_v26 = vsel %vm807_vm3, %v1188_v24, %v1190_v58  ;;  %v3708_v24 = vld [vmem:[%s3873_s27 + $0x68] sm:$0xff] }
  0xc6   : > { %v4150_v50 = vpop.f32.mrf.mxu2 }
  0xc7   : > { %v4154_v43 = vpop.f32.mrf.mxu1 }
  0xc8   : > { %v4167_v4 = vpop.f32.mrf.mxu3 }
  0xc9   : > { %v4158_v57 = vpop.f32.mrf.mxu0  ;;  %4995 = vst [vmem:[#allocation7_spill] sm:$0xff] %v4167_v4 }
  0xca   : > { %3397 = vmatmul.msk.bf16.gmra.mxu1 %vm505_vm2, %v3879_v9  ;;  %v1482_v9 = vrot.slane %v1480_v1, 2 }
  0xcb   : > { %3416 = vmatmul.msk.bf16.gmra.mxu2 %vm505_vm2, %v822_v56 }
  0xcc   : > { %3522 = vmatmul.msk.bf16.gmra.mxu0 %vm505_vm2, %v1475_v17  ;;  %v1483_v23 = vor.u32 %v1482_v9, %v1479_v21 }
  0xcd   : > { %3505 = vmatmul.msk.bf16.gmra.mxu3 %vm505_vm2, %v1187_v14  ;;  %v1491_v14 = vrot.slane %v1489_v8, 2  ;;  %v1495_v8 = vshrl.u32 %v3706_v35, 16 }
  0xce   : > { %v4165_v3 = vpop.f32.mrf.mxu2  ;;  %v1484_v34 = vsel %vm1404_vm4, %v1474_v49, %v1483_v23  ;;  %v1488_v49 = vrot.slane %v1486_v42, 1 }
  0xcf   : > { %v4169_v7 = vpop.f32.mrf.mxu1  ;;  %v1497_v61 = vrot.slane %v1495_v8, 1 }
  0xd0   : > { %v1272_v30 = vpop.f32.mrf.mxu3  ;;  %v1492_v21 = vor.u32 %v1491_v14, %v1488_v49 }
  0xd1   : > { %v4172_v19 = vpop.f32.mrf.mxu0 }
  0xd2   : > { %v1493_v51 = vsel %vm1404_vm4, %v1483_v23, %v1492_v21 }
  0xd6   : > { %v4176_v15 = vpop.f32.mrf.mxu2 }
  0xd7   : > { %v4178_v32 = vpop.f32.mrf.mxu1 }
  0xd8   : > { %v1274_v17 = vpop.f32.mrf.mxu3 }
  0xd9   : > { %v4182_v36 = vpop.f32.mrf.mxu0 }
  0xda   : > { %3398 = vmatmul.msk.bf16.gmra.mxu1 %vm505_vm2, %v3918_v37  ;;  %v825_v37 = vrot.slane %v3946_v60, 1 }
  0xdb   : > { %3417 = vmatmul.msk.bf16.gmra.mxu2 %vm505_vm2, %v824_v13 }
  0xdc   : > { %3523 = vmatmul.msk.bf16.gmra.mxu0 %vm505_vm2, %v1484_v34  ;;  %v826_v34 = vsel %vm807_vm3, %v823_v27, %v825_v37 }
  0xdd   : > { %3506 = vmatmul.msk.bf16.gmra.mxu3 %vm505_vm2, %v1189_v0  ;;  %v1498_v0 = vshll.u32 %v3706_v35, 16 }
  0xde   : > { %v4189_v56 = vpop.f32.mrf.mxu2 }
  0xdf   : > { %4996 = vst [vmem:[#allocation8_spill] sm:$0xff] %v4189_v56  ;;  %v4191_v47 = vpop.f32.mrf.mxu1 }
  0xe0   : > { %v1277_v13 = vpop.f32.mrf.mxu3 }
  0xe1   : > { %v4194_v1 = vpop.f32.mrf.mxu0 }
  0xe6   : > { %v4198_v9 = vpop.f32.mrf.mxu2 }
  0xe7   : > { %4997 = vst [vmem:[#allocation9_spill] sm:$0xff] %v4198_v9  ;;  %v711_v55 = vpop.f32.mrf.mxu1 }
  0xe8   : > { %v712_v42 = vadd.f32 %v711_v55, %v4082_v48  ;;  %v1279_v14 = vpop.f32.mrf.mxu3 }
  0xe9   : > { %v1641_v4 = vpop.f32.mrf.mxu0 }
  0xea   : > { %3399 = vmatmul.msk.bf16.gmra.mxu1 %vm505_vm2, %v3955_v5  ;;  %v1500_v5 = vrot.slane %v1498_v0, 2  ;;  %v1507_v0 = vshll.u32 %v3707_v22, 16 }
  0xeb   : > { %3418 = vmatmul.msk.bf16.gmra.mxu2 %vm505_vm2, %v826_v34 }
  0xec   : > { %3524 = vmatmul.msk.bf16.gmra.mxu0 %vm505_vm2, %v1493_v51  ;;  %v827_v51 = vrot.slane %v3882_v10, 1  ;;  %v1501_v35 = vor.u32 %v1500_v5, %v1497_v61 }
  0xed   : > { %3507 = vmatmul.msk.bf16.gmra.mxu3 %vm505_vm2, %v1191_v26 }
  0xee   : > { %v911_v49 = vpop.f32.mrf.mxu2  ;;  %v828_v56 = vsel %vm807_vm3, %v825_v37, %v827_v51  ;;  %v1502_v8 = vsel %vm1404_vm4, %v1492_v21, %v1501_v35 }
  0xef   : > { %v1001_v41 = vadd.f32 %v911_v49, %v712_v42  ;;  %v713_v27 = vpop.f32.mrf.mxu1 }
  0xf0   : > { %v714_v48 = vadd.f32 %v713_v27, %v4094_v29  ;;  %v1282_v9 = vpop.f32.mrf.mxu3  ;;  %v1192_v29 = vrot.slane %v3708_v24, 1 }
  0xf1   : > { %v1362_v23 = vadd.f32 %v1272_v30, %v1001_v41  ;;  %v1643_v18 = vpop.f32.mrf.mxu0 }
  0xf2   : > { %v1193_v21 = vsel %vm807_vm3, %v1190_v58, %v1192_v29  ;;  %v3709_v58 = vld [vmem:[%s3873_s27 + $0x70] sm:$0xff] }
  0xf3   : > { %v4210_v34 = vadd.f32 %v1641_v4, %v1362_v23  ;;  %v1504_v4 = vshrl.u32 %v3707_v22, 16 }
  0xf6   : > { %v913_v55 = vpop.f32.mrf.mxu2 }
  0xf7   : > { %v1002_v42 = vadd.f32 %v913_v55, %v714_v48  ;;  %v716_v49 = vpop.f32.mrf.mxu1  ;;  %v1506_v48 = vrot.slane %v1504_v4, 1  ;;  %v829_v55 = vrot.slane %v3885_v11, 1 }
  0xf8   : > { %v717_v61 = vadd.f32 %v716_v49, %v4106_v2  ;;  %v1284_v27 = vpop.f32.mrf.mxu3 }
  0xf9   : > { %v1363_v41 = vadd.f32 %v1274_v17, %v1002_v42  ;;  %v1646_v30 = vpop.f32.mrf.mxu0 }
  0xfa   : > { %3400 = vmatmul.msk.bf16.gmra.mxu1 %vm505_vm2, %v3946_v60 }
  0xfb   : > { %3419 = vmatmul.msk.bf16.gmra.mxu2 %vm505_vm2, %v828_v56  ;;  %v4220_v26 = vadd.f32 %v1643_v18, %v1363_v41  ;;  %v1509_v56 = vrot.slane %v1507_v0, 2 }
  0xfc   : > { %3525 = vmatmul.msk.bf16.gmra.mxu0 %vm505_vm2, %v1502_v8 }
  0xfd   : > { %3508 = vmatmul.msk.bf16.gmra.mxu3 %vm505_vm2, %v1193_v21  ;;  %v1510_v22 = vor.u32 %v1509_v56, %v1506_v48 }
  0xfe   : > { %v916_v37 = vpop.f32.mrf.mxu2 }
  0xff   : > { %v1003_v17 = vadd.f32 %v916_v37, %v717_v61  ;;  %v718_v23 = vpop.f32.mrf.mxu1  ;;  %v830_v61 = vsel %vm807_vm3, %v827_v51, %v829_v55  ;;  %v1511_v4 = vsel %vm1404_vm4, %v1501_v35, %v1510_v22 }
 0x100   : > { %v719_v2 = vadd.f32 %v718_v23, %v4120_v20  ;;  %v1287_v49 = vpop.f32.mrf.mxu3  ;;  %v1194_v20 = vrot.slane %v3709_v58, 1  ;;  %v1516_v23 = vshll.u32 %v3708_v24, 16 }
 0x101   : > { %v1364_v5 = vadd.f32 %v1277_v13, %v1003_v17  ;;  %v1648_v60 = vpop.f32.mrf.mxu0  ;;  %v1513_v17 = vshrl.u32 %v3708_v24, 16 }
 0x102   : > { %v1195_v35 = vsel %vm807_vm3, %v1192_v29, %v1194_v20  ;;  %v3710_v29 = vld [vmem:[%s3873_s27 + $0x78] sm:$0xff] }
 0x103   : > { %v4226_v18 = vadd.f32 %v1646_v30, %v1364_v5  ;;  %v1515_v56 = vrot.slane %v1513_v17, 1 }
 0x106   : > { %v918_v42 = vpop.f32.mrf.mxu2 }
 0x107   : > { %v1004_v41 = vadd.f32 %v918_v42, %v719_v2  ;;  %v721_v8 = vpop.f32.mrf.mxu1  ;;  %v1518_v2 = vrot.slane %v1516_v23, 2  ;;  %v831_v42 = vrot.slane %v3922_v38, 1 }
 0x108   : > { %v722_v0 = vadd.f32 %v721_v8, %v4132_v33  ;;  %v1289_v21 = vpop.f32.mrf.mxu3 }
 0x109   : > { %v1365_v13 = vadd.f32 %v1279_v14, %v1004_v41  ;;  %v1651_v37 = vpop.f32.mrf.mxu0  ;;  %v1519_v24 = vor.u32 %v1518_v2, %v1515_v56 }
 0x10a   : > { %3401 = vmatmul.msk.bf16.gmra.mxu1 %vm505_vm2, %v3882_v10 }
 0x10b   : > { %3420 = vmatmul.msk.bf16.gmra.mxu2 %vm505_vm2, %v830_v61  ;;  %v4236_v30 = vadd.f32 %v1648_v60, %v1365_v13  ;;  %v1520_v17 = vsel %vm1404_vm4, %v1510_v22, %v1519_v24 }
 0x10c   : > { %3526 = vmatmul.msk.bf16.gmra.mxu0 %vm505_vm2, %v1511_v4  ;;  %v832_v4 = vsel %vm807_vm3, %v829_v55, %v831_v42 }
 0x10d   : > { %3509 = vmatmul.msk.bf16.gmra.mxu3 %vm505_vm2, %v1195_v35 }
 0x10e   : > { %v921_v51 = vpop.f32.mrf.mxu2 }
 0x10f   : > { %v1005_v14 = vadd.f32 %v921_v51, %v722_v0  ;;  %v723_v5 = vpop.f32.mrf.mxu1  ;;  %v1522_v51 = vshrl.u32 %v3709_v58, 16 }
 0x110   : > { %v724_v33 = vadd.f32 %v723_v5, %v4146_v45  ;;  %v1292_v8 = vpop.f32.mrf.mxu3  ;;  %v1196_v45 = vrot.slane %v3710_v29, 1 }
 0x111   : > { %v1366_v48 = vadd.f32 %v1282_v9, %v1005_v14  ;;  %v1653_v10 = vpop.f32.mrf.mxu0  ;;  %v1525_v14 = vshll.u32 %v3709_v58, 16  ;;  %v1524_v56 = vrot.slane %v1522_v51, 1 }
 0x112   : > { %v1197_v22 = vsel %vm807_vm3, %v1194_v20, %v1196_v45  ;;  %v3711_v20 = vld [vmem:[%s3873_s27 + $0x80] sm:$0xff] }
 0x113   : > { %v4242_v60 = vadd.f32 %v1651_v37, %v1366_v48  ;;  %v1527_v2 = vrot.slane %v1525_v14, 2  ;;  %v1531_v14 = vshrl.u32 %v3710_v29, 16 }
 0x115   : > { %v1528_v58 = vor.u32 %v1527_v2, %v1524_v56  ;;  %v835_v2 = vrot.slane %v3993_v52, 1 }
 0x116   : > { %v923_v41 = vpop.f32.mrf.mxu2 }
 0x117   : > { %v1006_v61 = vadd.f32 %v923_v41, %v724_v33  ;;  %v726_v13 = vpop.f32.mrf.mxu1  ;;  %v833_v33 = vrot.slane %v3958_v6, 1 }
 0x118   : > { %v727_v23 = vadd.f32 %v726_v13, %v4158_v57  ;;  %v1294_v5 = vpop.f32.mrf.mxu3 }
 0x119   : > { %v1367_v9 = vadd.f32 %v1284_v27, %v1006_v61  ;;  %v1656_v0 = vpop.f32.mrf.mxu0 }
 0x11a   : > { %3402 = vmatmul.msk.bf16.gmra.mxu1 %vm505_vm2, %v3885_v11 }
 0x11b   : > { %3421 = vmatmul.msk.bf16.gmra.mxu2 %vm505_vm2, %v832_v4  ;;  %v4252_v37 = vadd.f32 %v1653_v10, %v1367_v9  ;;  %v834_v9 = vsel %vm807_vm3, %v831_v42, %v833_v33 }
 0x11c   : > { %3527 = vmatmul.msk.bf16.gmra.mxu0 %vm505_vm2, %v1520_v17 }
 0x11d   : > { %3510 = vmatmul.msk.bf16.gmra.mxu3 %vm505_vm2, %v1197_v22 }
 0x11e   : > { %v926_v55 = vpop.f32.mrf.mxu2 }
 0x11f   : > { %v1007_v27 = vadd.f32 %v926_v55, %v727_v23  ;;  %v728_v35 = vpop.f32.mrf.mxu1  ;;  %v1529_v23 = vsel %vm1404_vm4, %v1519_v24, %v1528_v58  ;;  %v1534_v55 = vshll.u32 %v3710_v29, 16 }
 0x120   : > { %v729_v57 = vadd.f32 %v728_v35, %v4172_v19  ;;  %v1297_v61 = vpop.f32.mrf.mxu3  ;;  %v1198_v19 = vrot.slane %v3711_v20, 1 }
 0x121   : > { %v1368_v48 = vadd.f32 %v1287_v49, %v1007_v27  ;;  %v1658_v11 = vpop.f32.mrf.mxu0  ;;  %v1536_v56 = vrot.slane %v1534_v55, 2  ;;  %v1543_v55 = vshll.u32 %v3711_v20, 16 }
 0x122   : > { %v1199_v24 = vsel %vm807_vm3, %v1196_v45, %v1198_v19  ;;  %v3712_v45 = vld [vmem:[%s3873_s27 + $0x88] sm:$0xff] }
 0x123   : > { %v4258_v10 = vadd.f32 %v1656_v0, %v1368_v48  ;;  %v1533_v48 = vrot.slane %v1531_v14, 1  ;;  %v1540_v14 = vshrl.u32 %v3711_v20, 16 }
 0x125   : > { %v1537_v29 = vor.u32 %v1536_v56, %v1533_v48  ;;  %v837_v48 = vrot.slane %v3909_v31, 1 }
 0x126   : > { %v928_v41 = vpop.f32.mrf.mxu2 }
 0x127   : > { %v1008_v13 = vadd.f32 %v928_v41, %v729_v57  ;;  %v731_v4 = vpop.f32.mrf.mxu1 }
 0x128   : > { %v732_v51 = vadd.f32 %v731_v4, %v4182_v36  ;;  %v1299_v27 = vpop.f32.mrf.mxu3 }
 0x129   : > { %v1369_v49 = vadd.f32 %v1289_v21, %v1008_v13  ;;  %v1661_v17 = vpop.f32.mrf.mxu0 }
 0x12a   : > { %3403 = vmatmul.msk.bf16.gmra.mxu1 %vm505_vm2, %v3922_v38 }
 0x12b   : > { %3422 = vmatmul.msk.bf16.gmra.mxu2 %vm505_vm2, %v834_v9  ;;  %v4268_v0 = vadd.f32 %v1658_v11, %v1369_v49  ;;  %v836_v9 = vsel %vm807_vm3, %v833_v33, %v835_v2 }
 0x12c   : > { %3528 = vmatmul.msk.bf16.gmra.mxu0 %vm505_vm2, %v1529_v23  ;;  %v1538_v23 = vsel %vm1404_vm4, %v1528_v58, %v1537_v29 }
 0x12d   : > { %3511 = vmatmul.msk.bf16.gmra.mxu3 %vm505_vm2, %v1199_v24  ;;  %v1542_v24 = vrot.slane %v1540_v14, 1 }
 0x12e   : > { %v931_v42 = vpop.f32.mrf.mxu2 }
 0x12f   : > { %v1009_v21 = vadd.f32 %v931_v42, %v732_v51  ;;  %v733_v35 = vpop.f32.mrf.mxu1 }
 0x130   : > { %v734_v36 = vadd.f32 %v733_v35, %v4194_v1  ;;  %v1302_v41 = vpop.f32.mrf.mxu3  ;;  %v1200_v1 = vrot.slane %v3712_v45, 1 }
 0x131   : > { %v1370_v22 = vadd.f32 %v1292_v8, %v1009_v21  ;;  %v1663_v38 = vpop.f32.mrf.mxu0 }
 0x132   : > { %v1201_v58 = vsel %vm807_vm3, %v1198_v19, %v1200_v1  ;;  %v3713_v19 = vld [vmem:[%s3873_s27 + $0x90] sm:$0xff] }
 0x133   : > { %v4274_v11 = vadd.f32 %v1661_v17, %v1370_v22  ;;  %v1545_v22 = vrot.slane %v1543_v55, 2 }
 0x135   : > { %v1546_v20 = vor.u32 %v1545_v22, %v1542_v24 }
 0x136   : > { %v933_v57 = vpop.f32.mrf.mxu2 }
 0x137   : > { %v1010_v13 = vadd.f32 %v933_v57, %v734_v36  ;;  %v736_v4 = vpop.f32.mrf.mxu1 }
 0x138   : > { %v737_v51 = vadd.f32 %v736_v4, %v4078_v46  ;;  %v1304_v42 = vpop.f32.mrf.mxu3  ;;  %v838_v4 = vsel %vm807_vm3, %v835_v2, %v837_v48  ;;  %v1549_v2 = vshrl.u32 %v3712_v45, 16 }
 0x139   : > { %v1371_v8 = vadd.f32 %v1294_v5, %v1010_v13  ;;  %v1666_v49 = vpop.f32.mrf.mxu0 }
 0x13a   : > { %3404 = vmatmul.msk.bf16.gmra.mxu1 %vm505_vm2, %v3958_v6 }
 0x13b   : > { %3423 = vmatmul.msk.bf16.gmra.mxu2 %vm505_vm2, %v836_v9  ;;  %v4284_v17 = vadd.f32 %v1663_v38, %v1371_v8  ;;  %v1547_v8 = vsel %vm1404_vm4, %v1537_v29, %v1546_v20 }
 0x13c   : > { %3529 = vmatmul.msk.bf16.gmra.mxu0 %vm505_vm2, %v1538_v23  ;;  %v1552_v23 = vshll.u32 %v3712_v45, 16 }
 0x13d   : > { %3512 = vmatmul.msk.bf16.gmra.mxu3 %vm505_vm2, %v1201_v58  ;;  %v1073_v58 = vld [vmem:[%s3873_s27 + $0x98] sm:$0x1] }
 0x13e   : > { %v936_v33 = vpop.f32.mrf.mxu2 }
 0x13f   : > { %v1011_v5 = vadd.f32 %v936_v33, %v737_v51  ;;  %v738_v21 = vpop.f32.mrf.mxu1 }
 0x140   : > { %v739_v46 = vadd.f32 %v738_v21, %v4091_v54  ;;  %v1307_v36 = vpop.f32.mrf.mxu3  ;;  %v1202_v54 = vrot.slane %v3713_v19, 1  ;;  %v1554_v21 = vrot.slane %v1552_v23, 2 }
 0x141   : > { %v1372_v35 = vadd.f32 %v1297_v61, %v1011_v5  ;;  %v1668_v6 = vpop.f32.mrf.mxu0  ;;  %v1551_v5 = vrot.slane %v1549_v2, 1  ;;  %v3769_v2 = vld [vmem:[%s3873_s27 + $0x78] sm:$0xff] }
 0x143   : > { %v4290_v38 = vadd.f32 %v1666_v49, %v1372_v35 }
 0x146   : > { %v938_v56 = vpop.f32.mrf.mxu2 }
 0x147   : > { %v1012_v57 = vadd.f32 %v938_v56, %v739_v46  ;;  %v741_v13 = vpop.f32.mrf.mxu1 }
 0x148   : > { %v742_v49 = vadd.f32 %v741_v13, %v4102_v62  ;;  %v4304_v51 = vpop.f32.mrf.mxu3  ;;  %v4312_v62 = vld [vmem:[%s3873_s27 + $0x80] sm:$0xff] }
 0x149   : > { %v1373_v61 = vadd.f32 %v1299_v27, %v1012_v57  ;;  %v1671_v9 = vpop.f32.mrf.mxu0  ;;  %v839_v45 = vrot.slane %v4312_v62, 1 }
 0x14a   : > { %3405 = vmatmul.msk.bf16.gmra.mxu1 %vm505_vm2, %v3993_v52  ;;  %v1203_v52 = vsel %vm807_vm3, %v1200_v1, %v1202_v54  ;;  %v1555_v1 = vor.u32 %v1554_v21, %v1551_v5  ;;  %v4336_v21 = vld [vmem:[%s3873_s27 + $0x18] sm:$0xff] }
 0x14b   : > { %3424 = vmatmul.msk.bf16.gmra.mxu2 %vm505_vm2, %v838_v4  ;;  %v4300_v31 = vadd.f32 %v1668_v6, %v1373_v61  ;;  %v1149_v6 = vunpack.c.l.b16 %v1073_v58  ;;  %v840_v57 = vsel %vm807_vm3, %v837_v48, %v839_v45 }
 0x14c   : > { %3530 = vmatmul.msk.bf16.gmra.mxu0 %vm505_vm2, %v1547_v8  ;;  %v2003_v8 = vld [vmem:[%s3873_s27 + $0x10] sm:$0xc] }
 0x14d   : > { %3513 = vmatmul.msk.bf16.gmra.mxu3 %vm505_vm2, %v1203_v52  ;;  %v1168_v13 = vpack.c.b16 %v1149_v6, %v1149_v6  ;;  %v2079_v48 = vunpack.c.l.b16 %v2003_v8 }
 0x14e   : > { %v941_v27 = vpop.f32.mrf.mxu2 }
 0x14f   : > { %v1013_v29 = vadd.f32 %v941_v27, %v742_v49  ;;  %v743_v14 = vpop.f32.mrf.mxu1  ;;  %v4322_v49 = vld [vmem:[%s3873_s27 + $0x14] sm:$0xf]  ;;  %v1204_v23 = vrot.slane %v1168_v13, 1  ;;  %v1558_v27 = vshrl.u32 %v3713_v19, 16 }
 0x150   : > { %v744_v24 = vadd.f32 %v743_v14, %v4117_v12  ;;  %v4316_v22 = vpop.f32.mrf.mxu3 }
 0x151   : > { %v1374_v55 = vadd.f32 %v1302_v41, %v1013_v29  ;;  %v1673_v33 = vpop.f32.mrf.mxu0  ;;  %v1561_v29 = vshll.u32 %v3713_v19, 16 }
 0x153   : > { %v4309_v35 = vadd.f32 %v1671_v9, %v1374_v55  ;;  %v1556_v9 = vsel %vm1404_vm4, %v1546_v20, %v1555_v1 }
 0x156   : > { %v943_v41 = vpop.f32.mrf.mxu2 }
 0x157   : > { %v1014_v46 = vadd.f32 %v943_v41, %v744_v24  ;;  %v746_v56 = vpop.f32.mrf.mxu1  ;;  %v1560_v41 = vrot.slane %v1558_v27, 1 }
 0x158   : > { %v747_v20 = vadd.f32 %v746_v56, %v4128_v28  ;;  %v4332_v52 = vpop.f32.mrf.mxu3  ;;  %v1398_v28 = vld [vmem:[%s3873_s27 + $0x98] sm:$0x3]  ;;  %v4344_v56 = vld [vmem:[%s3873_s27 + $0x88] sm:$0xff] }
 0x159   : > { %v1375_v4 = vadd.f32 %v1304_v42, %v1014_v46  ;;  %v1676_v61 = vpop.f32.mrf.mxu0  ;;  %v4989_v42 = vunpack.c.l.b16 %v4322_v49  ;;  %v1563_v46 = vrot.slane %v1561_v29, 2  ;;  %v841_v19 = vrot.slane %v4344_v56, 1 }
 0x15a   : > { %3406 = vmatmul.msk.bf16.gmra.mxu1 %vm505_vm2, %v3769_v2  ;;  %v1402_v2 = vunpack.c.l.b16 %v1398_v28 }
 0x15b   : > { %3425 = vmatmul.msk.bf16.gmra.mxu2 %vm505_vm2, %v840_v57  ;;  %v4327_v12 = vadd.f32 %v1673_v33, %v1375_v4  ;;  %v1205_v33 = vsel %vm807_vm3, %v1202_v54, %v1204_v23  ;;  %v4340_v58 = vpack.c.b16 %v4989_v42, %v2079_v48  ;;  %v2380_v4 = vshrl.u32 %v4336_v21, 16 }
 0x15c   : > { %3531 = vmatmul.msk.bf16.gmra.mxu0 %vm505_vm2, %v1556_v9  ;;  %v1564_v8 = vor.u32 %v1563_v46, %v1560_v41  ;;  %v842_v27 = vsel %vm807_vm3, %v839_v45, %v841_v19 }
 0x15d   : > { %4998 = vst [vmem:[#allocation10_spill] sm:$0xff] %v4327_v12  ;;  %3514 = vmatmul.msk.bf16.gmra.mxu3 %vm505_vm2, %v1205_v33  ;;  %v2372_v54 = vshrl.u32 %v4340_v58, 16  ;;  %v2375_v13 = vshll.u32 %v4340_v58, 16  ;;  %v4360_v12 = vpack.c.b16 %v1402_v2, %v1402_v2  ;;  %v843_v2 = vrot.slane %v3982_v40, 1 }
 0x15e   : > { %v946_v14 = vpop.f32.mrf.mxu2 }
 0x15f   : > { %v1015_v55 = vadd.f32 %v946_v14, %v747_v20  ;;  %v748_v5 = vpop.f32.mrf.mxu1  ;;  %v2374_v29 = vrot.slane %v2372_v54, 2  ;;  %v2377_v14 = vrot.slane %v2375_v13, 3 }
 0x160   : > { %v749_v9 = vadd.f32 %v748_v5, %v4143_v44  ;;  %v4355_v48 = vpop.f32.mrf.mxu3 }
 0x161   : > { %v1376_v6 = vadd.f32 %v1307_v36, %v1015_v55  ;;  %v1678_v24 = vpop.f32.mrf.mxu0  ;;  %v2383_v36 = vshll.u32 %v4336_v21, 16  ;;  %v2382_v55 = vrot.slane %v2380_v4, 2  ;;  %v2378_v45 = vor.u32 %v2377_v14, %v2374_v29 }
 0x163   : > { %v4348_v57 = vadd.f32 %v1676_v61, %v1376_v6  ;;  %v2385_v33 = vrot.slane %v2383_v36, 3 }
 0x165   : > { %4999 = vst [vmem:[#allocation11_spill] sm:$0xff] %v4348_v57  ;;  %v1565_v57 = vsel %vm1404_vm4, %v1555_v1, %v1564_v8  ;;  %v2386_v5 = vor.u32 %v2385_v33, %v2382_v55  ;;  %v1570_v1 = vshll.u32 %v4360_v12, 16  ;;  %v844_v33 = vsel %vm807_vm3, %v841_v19, %v843_v2  ;;  %v4405_v2 = vld [vmem:[%s3873_s27 + $0x28] sm:$0xff] }
 0x166   : > { %v948_v23 = vpop.f32.mrf.mxu2 }
 0x167   : > { %v1016_v20 = vadd.f32 %v948_v23, %v749_v9  ;;  %v751_v61 = vpop.f32.mrf.mxu1  ;;  %v2387_v13 = vsel %vm2370_vm5, %v2378_v45, %v2386_v5 }
 0x168   : > { %v752_v41 = vadd.f32 %v751_v61, %v4154_v43  ;;  %v4371_v28 = vpop.f32.mrf.mxu3  ;;  %v1572_v43 = vrot.slane %v1570_v1, 2  ;;  %v2733_v1 = vld [vmem:[%s3873_s27 + $0x10] sm:$0x8] }
 0x169   : > { %v1377_v6 = vadd.f32 %v4304_v51, %v1016_v20  ;;  %v1681_v42 = vpop.f32.mrf.mxu0  ;;  %v1567_v51 = vshrl.u32 %v4360_v12, 16 }
 0x16a   : > { %3407 = vmatmul.msk.bf16.gmra.mxu1 %vm505_vm2, %v4312_v62 }
 0x16b   : > { %3426 = vmatmul.msk.bf16.gmra.mxu2 %vm505_vm2, %v842_v27  ;;  %v4365_v44 = vadd.f32 %v1678_v24, %v1377_v6  ;;  %v4375_v24 = vld [vmem:[%s3873_s27 + $0x20] sm:$0xff]  ;;  %v1569_v36 = vrot.slane %v1567_v51, 1  ;;  %v1767_v6 = vld [vmem:[%s3873_s27 + $0x8] sm:$0xc] }
 0x16c   : > { %3532 = vmatmul.msk.bf16.gmra.mxu0 %vm505_vm2, %v1565_v57  ;;  %v2389_v23 = vshrl.u32 %v4375_v24, 16  ;;  %v2392_v20 = vshll.u32 %v4375_v24, 16 }
 0x16d   : > { %3641 = vmatmul.msk.bf16.vlgmr.msra.gmra.mxu3 %vm505_vm2, %v2387_v13  ;;  %v1573_v61 = vor.u32 %v1572_v43, %v1569_v36 }
 0x16e   : > { %v951_v46 = vpop.f32.mrf.mxu2  ;;  %v2394_v45 = vrot.slane %v2392_v20, 3  ;;  %v5001_v20 = vunpack.c.l.b16 %v4322_v49 }
 0x16f   : > { %v1017_v54 = vadd.f32 %v951_v46, %v752_v41  ;;  %v753_v62 = vpop.f32.mrf.mxu1  ;;  %v1574_v51 = vsel %vm1404_vm4, %v1564_v8, %v1573_v61  ;;  %v3771_v61 = vld [vmem:[%s3873_s27 + $0x10] sm:$0xff] }
 0x170   : > { %v754_v27 = vadd.f32 %v753_v62, %v4169_v7  ;;  %v1771_v7 = vunpack.c.l.b16 %v1767_v6  ;;  %v2741_v6 = vrot.slane %v4336_v21, 3 }
 0x171   : > { %v1378_v57 = vadd.f32 %v4316_v22, %v1017_v54  ;;  %v1683_v4 = vpop.f32.mrf.mxu0  ;;  %v4385_v22 = vpop.f32.mrf.mxu3 }
 0x173   : > { %v4379_v9 = vadd.f32 %v1681_v42, %v1378_v57  ;;  %v2391_v42 = vrot.slane %v2389_v23, 2  ;;  %v5000_v57 = vunpack.c.l.b16 %v4004_v63  ;;  %v2135_v63 = vrot.slane %v4340_v58, 2 }
 0x175   : > { %v2395_v19 = vor.u32 %v2394_v45, %v2391_v42  ;;  %v1772_v36 = vpack.c.b16 %v5000_v57, %v1771_v7 }
 0x176   : > { %v953_v29 = vpop.f32.mrf.mxu2 }
 0x177   : > { %v1018_v14 = vadd.f32 %v953_v29, %v754_v27  ;;  %v756_v55 = vpop.f32.mrf.mxu1  ;;  %v2396_v43 = vsel %vm2370_vm5, %v2386_v5, %v2395_v19  ;;  %v1775_v29 = vrot.slane %v3771_v61, 2  ;;  %v2398_v5 = vshrl.u32 %v4405_v2, 16 }
 0x178   : > { %v757_v54 = vadd.f32 %v756_v55, %v4178_v32  ;;  %v1774_v32 = vrot.slane %v1772_v36, 2  ;;  %v2136_v55 = vrot.slane %v4336_v21, 2 }
 0x179   : > { %v1379_v40 = vadd.f32 %v4332_v52, %v1018_v14  ;;  %v1686_v41 = vpop.f32.mrf.mxu0  ;;  %v2737_v52 = vunpack.c.l.b16 %v2733_v1  ;;  %v4399_v13 = vpop.f32.mrf.mxu3  ;;  %v2400_v1 = vrot.slane %v2398_v5, 2 }
 0x17a   : > { %3408 = vmatmul.msk.bf16.gmra.mxu1 %vm505_vm2, %v4344_v56  ;;  %v2137_v58 = vsel %vm1773_vm6, %v2135_v63, %v2136_v55  ;;  %v2138_v63 = vrot.slane %v4375_v24, 2 }
 0x17b   : > { %3427 = vmatmul.msk.bf16.gmra.mxu2 %vm505_vm2, %v844_v33  ;;  %v4395_v46 = vadd.f32 %v1683_v4, %v1379_v40  ;;  %v2738_v27 = vpack.c.b16 %v5001_v20, %v2737_v52  ;;  %v2401_v33 = vshll.u32 %v4405_v2, 16 }
 0x17c   : > { %3533 = vmatmul.msk.bf16.gmra.mxu0 %vm505_vm2, %v1574_v51  ;;  %v1776_v51 = vsel %vm1773_vm6, %v1774_v32, %v1775_v29  ;;  %v3772_v32 = vld [vmem:[%s3873_s27 + $0x18] sm:$0xff] }
 0x17d   : > { %3642 = vmatmul.msk.bf16.gmra.mxu3 %vm505_vm2, %v2396_v43  ;;  %v2740_v49 = vrot.slane %v2738_v27, 3  ;;  %v2403_v7 = vrot.slane %v2401_v33, 3  ;;  %v1777_v61 = vrot.slane %v3772_v32, 2 }
 0x17e   : > { %v956_v62 = vpop.f32.mrf.mxu2 }
 0x17f   : > { %v1019_v8 = vadd.f32 %v956_v62, %v757_v54  ;;  %v758_v56 = vpop.f32.mrf.mxu1  ;;  %v2404_v62 = vor.u32 %v2403_v7, %v2400_v1 }
 0x181   : > { %v1380_v4 = vadd.f32 %v4355_v48, %v1019_v8  ;;  %v1688_v23 = vpop.f32.mrf.mxu0  ;;  %v759_v48 = vadd.f32 %v758_v56, %v4191_v47  ;;  %v1327_v45 = vpop.f32.mrf.mxu3  ;;  %v2742_v47 = vsel %vm2739_vm7, %v2740_v49, %v2741_v6 }
 0x183   : > { %v4412_v14 = vadd.f32 %v1686_v41, %v1380_v4  ;;  %v4432_v4 = vld [vmem:[%s3873_s27 + $0x30] sm:$0xff] }
 0x184   : > { %v2410_v5 = vshll.u32 %v4432_v4, 16 }
 0x186   : > { %v958_v42 = vpop.f32.mrf.mxu2 }
 0x187   : > { %v1020_v40 = vadd.f32 %v958_v42, %v759_v48  ;;  %v761_v41 = vpop.f32.mrf.mxu1 }
 0x188   : > { %v762_v8 = vadd.f32 %v761_v41, %v4089_v53  ;;  %v2407_v53 = vshrl.u32 %v4432_v4, 16  ;;  %v2139_v41 = vsel %vm1773_vm6, %v2136_v55, %v2138_v63 }
 0x189   : > { %v1381_v54 = vadd.f32 %v4371_v28, %v1020_v40  ;;  %v1691_v52 = vpop.f32.mrf.mxu0  ;;  %v1329_v36 = vpop.f32.mrf.mxu3  ;;  %v2405_v28 = vsel %vm2370_vm5, %v2395_v19, %v2404_v62  ;;  %v2743_v19 = vrot.slane %v4375_v24, 3  ;;  %v1778_v40 = vsel %vm1773_vm6, %v1775_v29, %v1777_v61 }
 0x18a   : > { %3535 = vmatmul.msk.bf16.vlgmr.msra.gmra.mxu1 %vm505_vm2, %v1776_v51  ;;  %v2409_v51 = vrot.slane %v2407_v53, 2 }
 0x18b   : > { %3622 = vmatmul.msk.bf16.vlgmr.msra.gmra.mxu2 %vm505_vm2, %v2137_v58  ;;  %v4426_v21 = vadd.f32 %v1688_v23, %v1381_v54  ;;  %v2412_v58 = vrot.slane %v2410_v5, 3  ;;  %v2744_v54 = vsel %vm2739_vm7, %v2741_v6, %v2743_v19 }
 0x18c   : > { %3660 = vmatmul.msk.bf16.vlgmr.msra.gmra.mxu0 %vm505_vm2, %v2742_v47 }
 0x18d   : > { %3643 = vmatmul.msk.bf16.gmra.mxu3 %vm505_vm2, %v2405_v28  ;;  %v2413_v24 = vor.u32 %v2412_v58, %v2409_v51  ;;  %v3773_v28 = vld [vmem:[%s3873_s27 + $0x20] sm:$0xff] }
 0x18e   : > { %v961_v57 = vpop.f32.mrf.mxu2 }
 0x18f   : > { %v1021_v56 = vadd.f32 %v961_v57, %v762_v8  ;;  %v763_v43 = vpop.f32.mrf.mxu1  ;;  %v4456_v57 = vld [vmem:[%s3873_s27 + $0x38] sm:$0xff] }
 0x190   : > { %v764_v33 = vadd.f32 %v763_v43, %v4098_v59  ;;  %v2419_v32 = vshll.u32 %v4456_v57, 16 }
 0x191   : > { %v1382_v20 = vadd.f32 %v4385_v22, %v1021_v56  ;;  %v1693_v27 = vpop.f32.mrf.mxu0  ;;  %v1332_v49 = vpop.f32.mrf.mxu3 }
 0x193   : > { %v4436_v23 = vadd.f32 %v1691_v52, %v1382_v20  ;;  %v1779_v20 = vrot.slane %v3773_v28, 2 }
 0x196   : > { %v963_v48 = vpop.f32.mrf.mxu2 }
 0x197   : > { %v1022_v22 = vadd.f32 %v963_v48, %v764_v33  ;;  %v766_v42 = vpop.f32.mrf.mxu1 }
 0x198   : > { %v767_v29 = vadd.f32 %v766_v42, %v4113_v16  ;;  %v2416_v16 = vshrl.u32 %v4456_v57, 16 }
 0x199   : > { %v1383_v1 = vadd.f32 %v4399_v13, %v1022_v22  ;;  %v1696_v7 = vpop.f32.mrf.mxu0  ;;  %v1334_v52 = vpop.f32.mrf.mxu3  ;;  %v2414_v13 = vsel %vm2370_vm5, %v2404_v62, %v2413_v24  ;;  %v2745_v62 = vrot.slane %v4405_v2, 3  ;;  %v1780_v22 = vsel %vm1773_vm6, %v1777_v61, %v1779_v20 }
 0x19a   : > { %3536 = vmatmul.msk.bf16.gmra.mxu1 %vm505_vm2, %v1778_v40  ;;  %v2418_v40 = vrot.slane %v2416_v16, 2 }
 0x19b   : > { %3623 = vmatmul.msk.bf16.gmra.mxu2 %vm505_vm2, %v2139_v41  ;;  %v4450_v59 = vadd.f32 %v1693_v27, %v1383_v1  ;;  %v2140_v27 = vrot.slane %v4405_v2, 2  ;;  %v2421_v41 = vrot.slane %v2419_v32, 3  ;;  %v2746_v1 = vsel %vm2739_vm7, %v2743_v19, %v2745_v62 }
 0x19c   : > { %3661 = vmatmul.msk.bf16.gmra.mxu0 %vm505_vm2, %v2744_v54 }
 0x19d   : > { %3644 = vmatmul.msk.bf16.gmra.mxu3 %vm505_vm2, %v2414_v13  ;;  %v2141_v42 = vsel %vm1773_vm6, %v2138_v63, %v2140_v27  ;;  %v2422_v2 = vor.u32 %v2421_v41, %v2418_v40  ;;  %v3774_v13 = vld [vmem:[%s3873_s27 + $0x28] sm:$0xff] }
 0x19e   : > { %v966_v55 = vpop.f32.mrf.mxu2 }
 0x19f   : > { %v1023_v47 = vadd.f32 %v966_v55, %v767_v29  ;;  %v768_v8 = vpop.f32.mrf.mxu1  ;;  %v4478_v55 = vld [vmem:[%s3873_s27 + $0x40] sm:$0xff] }
 0x1a0   : > { %v769_v53 = vadd.f32 %v768_v8, %v4124_v25  ;;  %v2428_v28 = vshll.u32 %v4478_v55, 16 }
 0x1a1   : > { %v1384_v6 = vadd.f32 %v1327_v45, %v1023_v47  ;;  %v1698_v56 = vpop.f32.mrf.mxu0  ;;  %v1337_v33 = vpop.f32.mrf.mxu3 }
 0x1a3   : > { %v4459_v43 = vadd.f32 %v1696_v7, %v1384_v6  ;;  %v1781_v6 = vrot.slane %v3774_v13, 2 }
 0x1a6   : > { %v968_v5 = vpop.f32.mrf.mxu2 }
 0x1a7   : > { %v1024_v45 = vadd.f32 %v968_v5, %v769_v53  ;;  %v771_v48 = vpop.f32.mrf.mxu1 }
 0x1a8   : > { %v772_v61 = vadd.f32 %v771_v48, %v4139_v39  ;;  %v2425_v39 = vshrl.u32 %v4478_v55, 16 }
 0x1a9   : > { %v1385_v51 = vadd.f32 %v1329_v36, %v1024_v45  ;;  %v1701_v58 = vpop.f32.mrf.mxu0  ;;  %v1339_v7 = vpop.f32.mrf.mxu3  ;;  %v2423_v36 = vsel %vm2370_vm5, %v2413_v24, %v2422_v2  ;;  %v2747_v24 = vrot.slane %v4432_v4, 3  ;;  %v1782_v45 = vsel %vm1773_vm6, %v1779_v20, %v1781_v6 }
 0x1aa   : > { %3537 = vmatmul.msk.bf16.gmra.mxu1 %vm505_vm2, %v1780_v22  ;;  %v2427_v22 = vrot.slane %v2425_v39, 2 }
 0x1ab   : > { %3624 = vmatmul.msk.bf16.gmra.mxu2 %vm505_vm2, %v2141_v42  ;;  %v4472_v25 = vadd.f32 %v1698_v56, %v1385_v51  ;;  %v2142_v56 = vrot.slane %v4432_v4, 2  ;;  %v2430_v42 = vrot.slane %v2428_v28, 3  ;;  %v2748_v51 = vsel %vm2739_vm7, %v2745_v62, %v2747_v24 }
 0x1ac   : > { %3662 = vmatmul.msk.bf16.gmra.mxu0 %vm505_vm2, %v2746_v1 }
 0x1ad   : > { %3645 = vmatmul.msk.bf16.gmra.mxu3 %vm505_vm2, %v2423_v36  ;;  %v2143_v48 = vsel %vm1773_vm6, %v2140_v27, %v2142_v56  ;;  %v2431_v4 = vor.u32 %v2430_v42, %v2427_v22  ;;  %v3775_v36 = vld [vmem:[%s3873_s27 + $0x30] sm:$0xff] }
 0x1ae   : > { %v971_v63 = vpop.f32.mrf.mxu2 }
 0x1af   : > { %v1025_v54 = vadd.f32 %v971_v63, %v772_v61  ;;  %v773_v29 = vpop.f32.mrf.mxu1  ;;  %v4500_v63 = vld [vmem:[%s3873_s27 + $0x48] sm:$0xff] }
 0x1b0   : > { %v774_v16 = vadd.f32 %v773_v29, %v4150_v50  ;;  %v2437_v13 = vshll.u32 %v4500_v63, 16 }
 0x1b1   : > { %v1386_v19 = vadd.f32 %v1332_v49, %v1025_v54  ;;  %v1703_v47 = vpop.f32.mrf.mxu0  ;;  %v1342_v53 = vpop.f32.mrf.mxu3 }
 0x1b3   : > { %v4481_v8 = vadd.f32 %v1701_v58, %v1386_v19  ;;  %v1783_v19 = vrot.slane %v3775_v36, 2  ;;  %v2146_v36 = vrot.slane %v4478_v55, 2 }
 0x1b6   : > { %v973_v32 = vpop.f32.mrf.mxu2 }
 0x1b7   : > { %v1026_v49 = vadd.f32 %v973_v32, %v774_v16  ;;  %v776_v5 = vpop.f32.mrf.mxu1 }
 0x1b8   : > { %v777_v20 = vadd.f32 %v776_v5, %v4165_v3  ;;  %v2434_v3 = vshrl.u32 %v4500_v63, 16 }
 0x1b9   : > { %v1387_v40 = vadd.f32 %v1334_v52, %v1026_v49  ;;  %v1706_v41 = vpop.f32.mrf.mxu0  ;;  %v1344_v58 = vpop.f32.mrf.mxu3  ;;  %v2432_v52 = vsel %vm2370_vm5, %v2422_v2, %v2431_v4  ;;  %v2749_v2 = vrot.slane %v4456_v57, 3  ;;  %v1784_v49 = vsel %vm1773_vm6, %v1781_v6, %v1783_v19  ;;  %v5002_v6 = vld [vmem:[#allocation8_spill] sm:$0xff] }
 0x1ba   : > { %3538 = vmatmul.msk.bf16.gmra.mxu1 %vm505_vm2, %v1782_v45  ;;  %v2436_v45 = vrot.slane %v2434_v3, 2 }
 0x1bb   : > { %3625 = vmatmul.msk.bf16.gmra.mxu2 %vm505_vm2, %v2143_v48  ;;  %v4494_v50 = vadd.f32 %v1703_v47, %v1387_v40  ;;  %v2144_v47 = vrot.slane %v4456_v57, 2  ;;  %v2439_v48 = vrot.slane %v2437_v13, 3  ;;  %v2750_v40 = vsel %vm2739_vm7, %v2747_v24, %v2749_v2 }
 0x1bc   : > { %3663 = vmatmul.msk.bf16.gmra.mxu0 %vm505_vm2, %v2748_v51 }
 0x1bd   : > { %3646 = vmatmul.msk.bf16.gmra.mxu3 %vm505_vm2, %v2432_v52  ;;  %v2145_v5 = vsel %vm1773_vm6, %v2142_v56, %v2144_v47  ;;  %v2440_v57 = vor.u32 %v2439_v48, %v2436_v45  ;;  %v2147_v45 = vsel %vm1773_vm6, %v2144_v47, %v2146_v36 }
 0x1be   : > { %v976_v27 = vpop.f32.mrf.mxu2 }
 0x1bf   : > { %v1027_v1 = vadd.f32 %v976_v27, %v777_v20  ;;  %v778_v61 = vpop.f32.mrf.mxu1 }
 0x1c0   : > { %v779_v39 = vadd.f32 %v778_v61, %v4176_v15 }
 0x1c1   : > { %v1388_v62 = vadd.f32 %v1337_v33, %v1027_v1  ;;  %v1708_v54 = vpop.f32.mrf.mxu0  ;;  %v1347_v16 = vpop.f32.mrf.mxu3  ;;  %v4522_v1 = vld [vmem:[%s3873_s27 + $0x50] sm:$0xff] }
 0x1c2   : > { %v2443_v3 = vshrl.u32 %v4522_v1, 16  ;;  %v2446_v13 = vshll.u32 %v4522_v1, 16 }
 0x1c3   : > { %v4503_v29 = vadd.f32 %v1706_v41, %v1388_v62  ;;  %v3776_v62 = vld [vmem:[%s3873_s27 + $0x38] sm:$0xff] }
 0x1c4   : > { %v2445_v48 = vrot.slane %v2443_v3, 2 }
 0x1c6   : > { %v978_v28 = vpop.f32.mrf.mxu2 }
 0x1c7   : > { %v1028_v33 = vadd.f32 %v978_v28, %v779_v39  ;;  %v781_v32 = vpop.f32.mrf.mxu1  ;;  %v5003_v39 = vld [vmem:[#allocation9_spill] sm:$0xff] }
 0x1c8   : > { %v782_v41 = vadd.f32 %v781_v32, %v5002_v6 }
 0x1c9   : > { %v1389_v22 = vadd.f32 %v1339_v7, %v1028_v33  ;;  %v1711_v42 = vpop.f32.mrf.mxu0  ;;  %v1349_v51 = vpop.f32.mrf.mxu3  ;;  %v2441_v7 = vsel %vm2370_vm5, %v2431_v4, %v2440_v57  ;;  %v2751_v4 = vrot.slane %v4478_v55, 3 }
 0x1ca   : > { %3539 = vmatmul.msk.bf16.gmra.mxu1 %vm505_vm2, %v1784_v49 }
 0x1cb   : > { %3626 = vmatmul.msk.bf16.gmra.mxu2 %vm505_vm2, %v2145_v5  ;;  %v4516_v15 = vadd.f32 %v1708_v54, %v1389_v22  ;;  %v1785_v54 = vrot.slane %v3776_v62, 2  ;;  %v2448_v22 = vrot.slane %v2446_v13, 3  ;;  %v2752_v6 = vsel %vm2739_vm7, %v2749_v2, %v2751_v4 }
 0x1cc   : > { %3664 = vmatmul.msk.bf16.gmra.mxu0 %vm505_vm2, %v2750_v40 }
 0x1cd   : > { %3647 = vmatmul.msk.bf16.gmra.mxu3 %vm505_vm2, %v2441_v7  ;;  %v1786_v5 = vsel %vm1773_vm6, %v1783_v19, %v1785_v54  ;;  %v5004_v19 = vld [vmem:[#allocation2_spill] sm:$0xff] }
 0x1ce   : > { %v981_v56 = vpop.f32.mrf.mxu2 }
 0x1cf   : > { %v1029_v20 = vadd.f32 %v981_v56, %v782_v41  ;;  %v783_v27 = vpop.f32.mrf.mxu1  ;;  %v2449_v41 = vor.u32 %v2448_v22, %v2445_v48 }
 0x1d0   : > { %v784_v28 = vadd.f32 %v783_v27, %v5003_v39  ;;  %v2148_v39 = vrot.slane %v4500_v63, 2 }
 0x1d1   : > { %v1390_v24 = vadd.f32 %v1342_v53, %v1029_v20  ;;  %v1713_v61 = vpop.f32.mrf.mxu0  ;;  %v1352_v32 = vpop.f32.mrf.mxu3 }
 0x1d3   : > { %v4525_v52 = vadd.f32 %v1711_v42, %v1390_v24  ;;  %v4544_v24 = vld [vmem:[%s3873_s27 + $0x58] sm:$0xff] }
 0x1d6   : > { %v983_v33 = vpop.f32.mrf.mxu2 }
 0x1d7   : > { %v1030_v53 = vadd.f32 %v983_v33, %v784_v28  ;;  %v786_v49 = vpop.f32.mrf.mxu1  ;;  %v2452_v28 = vshrl.u32 %v4544_v24, 16  ;;  %v2455_v33 = vshll.u32 %v4544_v24, 16 }
 0x1d8   : > { %v787_v56 = vadd.f32 %v786_v49, %v5004_v19 }
 0x1d9   : > { %v1391_v42 = vadd.f32 %v1344_v58, %v1030_v53  ;;  %v1716_v40 = vpop.f32.mrf.mxu0  ;;  %v1354_v20 = vpop.f32.mrf.mxu3  ;;  %v2450_v58 = vsel %vm2370_vm5, %v2440_v57, %v2449_v41  ;;  %v5005_v53 = vld [vmem:[#allocation3_spill] sm:$0xff]  ;;  %v2753_v57 = vrot.slane %v4500_v63, 3 }
 0x1da   : > { %3540 = vmatmul.msk.bf16.gmra.mxu1 %vm505_vm2, %v1786_v5 }
 0x1db   : > { %3627 = vmatmul.msk.bf16.gmra.mxu2 %vm505_vm2, %v2147_v45  ;;  %v4538_v55 = vadd.f32 %v1713_v61, %v1391_v42  ;;  %v3777_v61 = vld [vmem:[%s3873_s27 + $0x40] sm:$0xff]  ;;  %v2149_v42 = vsel %vm1773_vm6, %v2146_v36, %v2148_v39 }
 0x1dc   : > { %3665 = vmatmul.msk.bf16.gmra.mxu0 %vm505_vm2, %v2752_v6  ;;  %v1787_v13 = vrot.slane %v3777_v61, 2  ;;  %v2457_v6 = vrot.slane %v2455_v33, 3 }
 0x1dd   : > { %3648 = vmatmul.msk.bf16.gmra.mxu3 %vm505_vm2, %v2450_v58 }
 0x1de   : > { %v986_v47 = vpop.f32.mrf.mxu2  ;;  %v1788_v22 = vsel %vm1773_vm6, %v1785_v54, %v1787_v13  ;;  %v5006_v54 = vld [vmem:[#allocation4_spill] sm:$0xff] }
 0x1df   : > { %v1031_v27 = vadd.f32 %v986_v47, %v787_v56  ;;  %v788_v7 = vpop.f32.mrf.mxu1  ;;  %v2754_v47 = vsel %vm2739_vm7, %v2751_v4, %v2753_v57 }
 0x1e0   : > { %v789_v49 = vadd.f32 %v788_v7, %v5005_v53 }
 0x1e1   : > { %v1392_v2 = vadd.f32 %v1347_v16, %v1031_v27  ;;  %v1718_v62 = vpop.f32.mrf.mxu0  ;;  %v1357_v45 = vpop.f32.mrf.mxu3 }
 0x1e3   : > { %v4547_v3 = vadd.f32 %v1716_v40, %v1392_v2  ;;  %v2454_v40 = vrot.slane %v2452_v28, 2  ;;  %v4566_v28 = vld [vmem:[%s3873_s27 + $0x60] sm:$0xff] }
 0x1e5   : > { %v2458_v27 = vor.u32 %v2457_v6, %v2454_v40 }
 0x1e6   : > { %v988_v5 = vpop.f32.mrf.mxu2 }
 0x1e7   : > { %v1032_v16 = vadd.f32 %v988_v5, %v789_v49  ;;  %v791_v48 = vpop.f32.mrf.mxu1  ;;  %v2150_v5 = vrot.slane %v4522_v1, 2 }
 0x1e8   : > { %v792_v7 = vadd.f32 %v791_v48, %v5006_v54  ;;  %v2464_v48 = vshll.u32 %v4566_v28, 16 }
 0x1e9   : > { %v1393_v19 = vadd.f32 %v1349_v51, %v1032_v16  ;;  %v1721_v56 = vpop.f32.mrf.mxu0  ;;  %v1359_v58 = vpop.f32.mrf.mxu3  ;;  %v2459_v51 = vsel %vm2370_vm5, %v2449_v41, %v2458_v27  ;;  %v2461_v16 = vshrl.u32 %v4566_v28, 16  ;;  %v2755_v41 = vrot.slane %v4522_v1, 3 }
 0x1ea   : > { %3541 = vmatmul.msk.bf16.gmra.mxu1 %vm505_vm2, %v1788_v22  ;;  %v5007_v22 = vld [vmem:[#allocation5_spill] sm:$0xff] }
 0x1eb   : > { %3628 = vmatmul.msk.bf16.gmra.mxu2 %vm505_vm2, %v2149_v42  ;;  %v4560_v63 = vadd.f32 %v1718_v62, %v1393_v19  ;;  %v3778_v62 = vld [vmem:[%s3873_s27 + $0x48] sm:$0xff]  ;;  %v2463_v54 = vrot.slane %v2461_v16, 2 }
 0x1ec   : > { %3666 = vmatmul.msk.bf16.gmra.mxu0 %vm505_vm2, %v2754_v47  ;;  %v1789_v49 = vrot.slane %v3778_v62, 2 }
 0x1ed   : > { %3649 = vmatmul.msk.bf16.gmra.mxu3 %vm505_vm2, %v2459_v51  ;;  %v2756_v51 = vsel %vm2739_vm7, %v2753_v57, %v2755_v41  ;;  %v4590_v57 = vld [vmem:[%s3873_s27 + $0x68] sm:$0xff] }
 0x1ee   : > { %v991_v36 = vpop.f32.mrf.mxu2  ;;  %v1790_v47 = vsel %vm1773_vm6, %v1787_v13, %v1789_v49  ;;  %v5008_v13 = vld [vmem:[#allocation6_spill] sm:$0xff] }
 0x1ef   : > { %v1033_v2 = vadd.f32 %v991_v36, %v792_v7  ;;  %v793_v61 = vpop.f32.mrf.mxu1  ;;  %v2466_v7 = vrot.slane %v2464_v48, 3 }
 0x1f0   : > { %v794_v42 = vadd.f32 %v793_v61, %v5007_v22 }
 0x1f1   : > { %v1394_v4 = vadd.f32 %v1352_v32, %v1033_v2  ;;  %v1723_v33 = vpop.f32.mrf.mxu0  ;;  %v2607_v6 = vpop.f32.mrf.mxu3  ;;  %v2467_v61 = vor.u32 %v2466_v7, %v2463_v54  ;;  %v5009_v54 = vld [vmem:[#allocation7_spill] sm:$0xff] }
 0x1f3   : > { %v4569_v53 = vadd.f32 %v1721_v56, %v1394_v4  ;;  %v2151_v56 = vsel %vm1773_vm6, %v2148_v39, %v2150_v5  ;;  %v2468_v48 = vsel %vm2370_vm5, %v2458_v27, %v2467_v61  ;;  %v2757_v27 = vrot.slane %v4544_v24, 3 }
 0x1f6   : > { %v993_v40 = vpop.f32.mrf.mxu2 }
 0x1f7   : > { %v1034_v32 = vadd.f32 %v993_v40, %v794_v42  ;;  %v796_v19 = vpop.f32.mrf.mxu1  ;;  %v3779_v40 = vld [vmem:[%s3873_s27 + $0x50] sm:$0xff] }
 0x1f8   : > { %v797_v4 = vadd.f32 %v796_v19, %v5008_v13  ;;  %v2470_v19 = vshrl.u32 %v4590_v57, 16 }
 0x1f9   : > { %v1395_v36 = vadd.f32 %v1354_v20, %v1034_v32  ;;  %v1726_v2 = vpop.f32.mrf.mxu0  ;;  %v4586_v62 = vpop.f32.mrf.mxu3  ;;  %v1791_v32 = vrot.slane %v3779_v40, 2  ;;  %v2758_v40 = vsel %vm2739_vm7, %v2755_v41, %v2757_v27 }
 0x1fa   : > { %3542 = vmatmul.msk.bf16.gmra.mxu1 %vm505_vm2, %v1790_v47  ;;  %v2152_v47 = vrot.slane %v4544_v24, 2 }
 0x1fb   : > { %3629 = vmatmul.msk.bf16.gmra.mxu2 %vm505_vm2, %v2151_v56  ;;  %v4582_v1 = vadd.f32 %v1723_v33, %v1395_v36  ;;  %v2473_v56 = vshll.u32 %v4590_v57, 16 }
 0x1fc   : > { %3667 = vmatmul.msk.bf16.gmra.mxu0 %vm505_vm2, %v2756_v51 }
 0x1fd   : > { %3650 = vmatmul.msk.bf16.gmra.mxu3 %vm505_vm2, %v2468_v48 }
 0x1fe   : > { %v996_v39 = vpop.f32.mrf.mxu2 }
 0x1ff   : > { %v1035_v16 = vadd.f32 %v996_v39, %v797_v4  ;;  %v798_v20 = vpop.f32.mrf.mxu1  ;;  %v2153_v4 = vsel %vm1773_vm6, %v2150_v5, %v2152_v47  ;;  %v2472_v39 = vrot.slane %v2470_v19, 2 }
 0x200   : > { %v799_v7 = vadd.f32 %v798_v20, %v5009_v54  ;;  %v4616_v54 = vld [vmem:[%s3873_s27 + $0x70] sm:$0xff] }
 0x201   : > { %v1396_v22 = vadd.f32 %v1357_v45, %v1035_v16  ;;  %v1728_v42 = vpop.f32.mrf.mxu0  ;;  %v4601_v51 = vpop.f32.mrf.mxu3  ;;  %v2475_v16 = vrot.slane %v2473_v56, 3 }
 0x203   : > { %v4593_v33 = vadd.f32 %v1726_v2, %v1396_v22  ;;  %v1792_v2 = vsel %vm1773_vm6, %v1789_v49, %v1791_v32  ;;  %v2476_v20 = vor.u32 %v2475_v16, %v2472_v39  ;;  %v2759_v16 = vrot.slane %v4566_v28, 3 }
 0x205   : > { %v2477_v41 = vsel %vm2370_vm5, %v2467_v61, %v2476_v20  ;;  %v2479_v61 = vshrl.u32 %v4616_v54, 16 }
 0x206   : > { %v998_v36 = vpop.f32.mrf.mxu2 }
 0x207   : > { %v1036_v45 = vadd.f32 %v998_v36, %v799_v7  ;;  %v1877_v13 = vpop.f32.mrf.mxu1 }
 0x208   : > { %v1967_v49 = vadd.f32 %v1877_v13, %v4210_v34  ;;  %v4625_v34 = vld [vmem:[%s3873_s27 + $0x58] sm:$0xff] }
 0x209   : > { %v1397_v48 = vadd.f32 %v1359_v58, %v1036_v45  ;;  %v2843_v22 = vpop.f32.mrf.mxu0  ;;  %v4612_v19 = vpop.f32.mrf.mxu3  ;;  %v1793_v13 = vrot.slane %v4625_v34, 2 }
 0x20a   : > { %3543 = vmatmul.msk.bf16.gmra.mxu1 %vm505_vm2, %v1792_v2  ;;  %v2154_v2 = vrot.slane %v4566_v28, 2 }
 0x20b   : > { %3630 = vmatmul.msk.bf16.gmra.mxu2 %vm505_vm2, %v2153_v4  ;;  %v4608_v24 = vadd.f32 %v1728_v42, %v1397_v48  ;;  %v4621_v42 = vld [vmem:[%s4986_s2] ss:$0 sm:$0xff]  ;;  %v2482_v4 = vshll.u32 %v4616_v54, 16 }
 0x20c   : > { %3668 = vmatmul.msk.bf16.gmra.mxu0 %vm505_vm2, %v2758_v40 }
 0x20d   : > { %3651 = vmatmul.msk.bf16.gmra.mxu3 %vm505_vm2, %v2477_v41  ;;  %v2155_v41 = vsel %vm1773_vm6, %v2152_v47, %v2154_v2 }
 0x20e   : > { %v2238_v5 = vpop.f32.mrf.mxu2 }
 0x20f   : > { %v2328_v58 = vadd.f32 %v2238_v5, %v1967_v49  ;;  %v1879_v56 = vpop.f32.mrf.mxu1 }
 0x210   : > { %v1968_v39 = vadd.f32 %v1879_v56, %v4220_v26 }
 0x211   : > { %v2697_v7 = vadd.f32 %v2607_v6, %v2328_v58  ;;  %v2845_v36 = vpop.f32.mrf.mxu0  ;;  %v1794_v58 = vsel %vm1773_vm6, %v1791_v32, %v1793_v13  ;;  %v2760_v32 = vsel %vm2739_vm7, %v2757_v27, %v2759_v16 }
 0x213   : > { %v2933_v45 = vadd.f32 %v2843_v22, %v2697_v7  ;;  %v4635_v22 = vpop.f32.mrf.mxu3  ;;  %v2481_v7 = vrot.slane %v2479_v61, 2 }
 0x215   : > { %v2973_v6 = vadd.f32 %v4621_v42, %v2933_v45  ;;  %v2484_v45 = vrot.slane %v2482_v4, 3 }
 0x216   : > { %v2240_v48 = vpop.f32.mrf.mxu2 }
 0x217   : > { %vm3009_vm8 = vcmp.ge.f32.partialorder %v2973_v6, 0.0  ;;  %v3045_v40 = vmul.f32 0.1, %v2973_v6  ;;  %v2329_v49 = vadd.f32 %v2240_v48, %v1968_v39  ;;  %v1882_v5 = vpop.f32.mrf.mxu1  ;;  %v2485_v61 = vor.u32 %v2484_v45, %v2481_v7 }
 0x219   : > { %v3081_v26 = vsel %vm3009_vm8, %v2973_v6, %v3045_v40  ;;  %v2698_v56 = vadd.f32 %v4586_v62, %v2329_v49  ;;  %v2848_v39 = vpop.f32.mrf.mxu0  ;;  %v1969_v62 = vadd.f32 %v1882_v5, %v4226_v18  ;;  %v3781_v18 = vld [vmem:[%s3873_s27 + $0x60] sm:$0xff] }
 0x21a   : > { %v3117_v48 = vpack.c.bf16 %v3081_v26, %v3081_v26  ;;  %3544 = vmatmul.msk.bf16.gmra.mxu1 %vm505_vm2, %v1794_v58  ;;  %v2486_v58 = vsel %vm2370_vm5, %v2476_v20, %v2485_v61  ;;  %v1795_v5 = vrot.slane %v3781_v18, 2 }
 0x21b   : > { %v2934_v47 = vadd.f32 %v2845_v36, %v2698_v56  ;;  %3631 = vmatmul.msk.bf16.gmra.mxu2 %vm505_vm2, %v2155_v41  ;;  %v4659_v27 = vpop.f32.mrf.mxu3  ;;  %v4663_v41 = vld [vmem:[%s3873_s27 + $0x78] sm:$0xff] }
 0x21c   : > { %3154 = vst.msk [vmem:[%s4646_s19] sm:$0xf] %vm3153_vm9, %v3117_v48  ;;  %3669 = vmatmul.msk.bf16.gmra.mxu0 %vm505_vm2, %v2760_v32  ;;  %v2156_v48 = vrot.slane %v4590_v57, 2  ;;  %v2491_v20 = vshll.u32 %v4663_v41, 16 }
 0x21d   : > { %v2974_v4 = vadd.f32 %v4621_v42, %v2934_v47  ;;  %3652 = vmatmul.msk.bf16.gmra.mxu3 %vm505_vm2, %v2486_v58  ;;  %v2488_v47 = vshrl.u32 %v4663_v41, 16 }
 0x21e   : > { %v2243_v6 = vpop.f32.mrf.mxu2 }
 0x21f   : > { %vm3010_vm10 = vcmp.ge.f32.partialorder %v2974_v4, 0.0  ;;  %v3046_v36 = vmul.f32 0.1, %v2974_v4  ;;  %v2330_v40 = vadd.f32 %v2243_v6, %v1969_v62  ;;  %v1884_v49 = vpop.f32.mrf.mxu1 }
 0x221   : > { %v3082_v26 = vsel %vm3010_vm10, %v2974_v4, %v3046_v36  ;;  %v2699_v7 = vadd.f32 %v4601_v51, %v2330_v40  ;;  %v2850_v45 = vpop.f32.mrf.mxu0  ;;  %v1970_v4 = vadd.f32 %v1884_v49, %v4236_v30  ;;  %v2761_v51 = vrot.slane %v4590_v57, 3 }
 0x222   : > { %v3118_v56 = vpack.c.bf16 %v3082_v26, %v3082_v26  ;;  %v1796_v26 = vsel %vm1773_vm6, %v1793_v13, %v1795_v5  ;;  %v2493_v30 = vrot.slane %v2491_v20, 3 }
 0x223   : > { %v2935_v32 = vadd.f32 %v2848_v39, %v2699_v7  ;;  %v4676_v39 = vpop.f32.mrf.mxu3  ;;  %v2157_v7 = vsel %vm1773_vm6, %v2154_v2, %v2156_v48  ;;  %v2762_v18 = vsel %vm2739_vm7, %v2759_v16, %v2761_v51 }
 0x224   : > { %3155 = vst.msk [vmem:[%s4646_s19 + $0x4] sm:$0xf] %vm3153_vm9, %v3118_v56  ;;  %v2490_v56 = vrot.slane %v2488_v47, 2 }
 0x225   : > { %v2975_v62 = vadd.f32 %v4621_v42, %v2935_v32 }
 0x226   : > { %v2245_v6 = vpop.f32.mrf.mxu2  ;;  %v2494_v34 = vor.u32 %v2493_v30, %v2490_v56  ;;  %v2158_v30 = vrot.slane %v4616_v54, 2 }
 0x227   : > { %vm3011_vm11 = vcmp.ge.f32.partialorder %v2975_v62, 0.0  ;;  %v3047_v36 = vmul.f32 0.1, %v2975_v62  ;;  %v2331_v40 = vadd.f32 %v2245_v6, %v1970_v4  ;;  %v1887_v58 = vpop.f32.mrf.mxu1 }
 0x228   : > { %v2495_v20 = vsel %vm2370_vm5, %v2485_v61, %v2494_v34 }
 0x229   : > { %v3083_v49 = vsel %vm3011_vm11, %v2975_v62, %v3047_v36  ;;  %v2700_v57 = vadd.f32 %v4612_v19, %v2331_v40  ;;  %v2853_v32 = vpop.f32.mrf.mxu0  ;;  %v1971_v19 = vadd.f32 %v1887_v58, %v4242_v60  ;;  %v4699_v62 = vld [vmem:[%s3873_s27 + $0x80] sm:$0xff]  ;;  %v3782_v60 = vld [vmem:[%s3873_s27 + $0x68] sm:$0xff] }
 0x22a   : > { %v3119_v4 = vpack.c.bf16 %v3083_v49, %v3083_v49  ;;  %3545 = vmatmul.msk.bf16.gmra.mxu1 %vm505_vm2, %v1796_v26  ;;  %v1797_v58 = vrot.slane %v3782_v60, 2  ;;  %v2497_v49 = vshrl.u32 %v4699_v62, 16  ;;  %v2500_v61 = vshll.u32 %v4699_v62, 16 }
 0x22b   : > { %v2936_v6 = vadd.f32 %v2850_v45, %v2700_v57  ;;  %3632 = vmatmul.msk.bf16.gmra.mxu2 %vm505_vm2, %v2157_v7  ;;  %v4695_v2 = vpop.f32.mrf.mxu3 }
 0x22c   : > { %3156 = vst.msk [vmem:[%s4646_s19 + $0x8] sm:$0xf] %vm3153_vm9, %v3119_v4  ;;  %3670 = vmatmul.msk.bf16.gmra.mxu0 %vm505_vm2, %v2762_v18 }
 0x22d   : > { %v2976_v13 = vadd.f32 %v4621_v42, %v2936_v6  ;;  %3653 = vmatmul.msk.bf16.gmra.mxu3 %vm505_vm2, %v2495_v20  ;;  %v2502_v20 = vrot.slane %v2500_v61, 3 }
 0x22e   : > { %v2248_v28 = vpop.f32.mrf.mxu2 }
 0x22f   : > { %vm3012_vm12 = vcmp.ge.f32.partialorder %v2976_v13, 0.0  ;;  %v3048_v16 = vmul.f32 0.1, %v2976_v13  ;;  %v2332_v45 = vadd.f32 %v2248_v28, %v1971_v19  ;;  %v1889_v47 = vpop.f32.mrf.mxu1  ;;  %v1798_v28 = vsel %vm1773_vm6, %v1795_v5, %v1797_v58 }
 0x230   : > { %v1972_v18 = vadd.f32 %v1889_v47, %v4252_v37 }
 0x231   : > { %v3084_v36 = vsel %vm3012_vm12, %v2976_v13, %v3048_v16  ;;  %v2701_v40 = vadd.f32 %v4635_v22, %v2332_v45  ;;  %v2855_v26 = vpop.f32.mrf.mxu0  ;;  %v2763_v22 = vrot.slane %v4616_v54, 3  ;;  %v2159_v16 = vsel %vm1773_vm6, %v2156_v48, %v2158_v30 }
 0x232   : > { %v3120_v7 = vpack.c.bf16 %v3084_v36, %v3084_v36  ;;  %v2499_v45 = vrot.slane %v2497_v49, 2 }
 0x233   : > { %v2937_v56 = vadd.f32 %v2853_v32, %v2701_v40  ;;  %v4712_v32 = vpop.f32.mrf.mxu3  ;;  %v2764_v54 = vsel %vm2739_vm7, %v2761_v51, %v2763_v22 }
 0x234   : > { %3157 = vst.msk [vmem:[%s4646_s19 + $0xc] sm:$0xf] %vm3153_vm9, %v3120_v7  ;;  %v2503_v5 = vor.u32 %v2502_v20, %v2499_v45 }
 0x235   : > { %v2977_v57 = vadd.f32 %v4621_v42, %v2937_v56 }
 0x236   : > { %v2250_v4 = vpop.f32.mrf.mxu2  ;;  %v2504_v61 = vsel %vm2370_vm5, %v2494_v34, %v2503_v5 }
 0x237   : > { %vm3013_vm13 = vcmp.ge.f32.partialorder %v2977_v57, 0.0  ;;  %v3049_v6 = vmul.f32 0.1, %v2977_v57  ;;  %v2333_v13 = vadd.f32 %v2250_v4, %v1972_v18  ;;  %v1892_v19 = vpop.f32.mrf.mxu1 }
 0x239   : > { %v3085_v36 = vsel %vm3013_vm13, %v2977_v57, %v3049_v6  ;;  %v2702_v40 = vadd.f32 %v4659_v27, %v2333_v13  ;;  %v2858_v37 = vpop.f32.mrf.mxu0  ;;  %v1973_v27 = vadd.f32 %v1892_v19, %v4258_v10  ;;  %v4729_v57 = vld [vmem:[%s3873_s27 + $0x88] sm:$0xff]  ;;  %v3783_v10 = vld [vmem:[%s3873_s27 + $0x70] sm:$0xff] }
 0x23a   : > { %v3121_v47 = vpack.c.bf16 %v3085_v36, %v3085_v36  ;;  %3546 = vmatmul.msk.bf16.gmra.mxu1 %vm505_vm2, %v1798_v28  ;;  %v1799_v19 = vrot.slane %v3783_v10, 2  ;;  %v2506_v45 = vshrl.u32 %v4729_v57, 16  ;;  %v2509_v34 = vshll.u32 %v4729_v57, 16 }
 0x23b   : > { %v2938_v7 = vadd.f32 %v2855_v26, %v2702_v40  ;;  %3633 = vmatmul.msk.bf16.gmra.mxu2 %vm505_vm2, %v2159_v16  ;;  %v4725_v51 = vpop.f32.mrf.mxu3  ;;  %v2160_v16 = vrot.slane %v4663_v41, 2 }
 0x23c   : > { %3158 = vst.msk [vmem:[%s4646_s19 + $0x10] sm:$0xf] %vm3153_vm9, %v3121_v47  ;;  %3671 = vmatmul.msk.bf16.gmra.mxu0 %vm505_vm2, %v2764_v54 }
 0x23d   : > { %v2978_v48 = vadd.f32 %v4621_v42, %v2938_v7  ;;  %3654 = vmatmul.msk.bf16.gmra.mxu3 %vm505_vm2, %v2504_v61 }
 0x23e   : > { %v2253_v56 = vpop.f32.mrf.mxu2 }
 0x23f   : > { %vm3014_vm14 = vcmp.ge.f32.partialorder %v2978_v48, 0.0  ;;  %v3050_v26 = vmul.f32 0.1, %v2978_v48  ;;  %v2334_v60 = vadd.f32 %v2253_v56, %v1973_v27  ;;  %v1894_v49 = vpop.f32.mrf.mxu1  ;;  %v2161_v27 = vsel %vm1773_vm6, %v2158_v30, %v2160_v16 }
 0x240   : > { %v1974_v36 = vadd.f32 %v1894_v49, %v4268_v0  ;;  %v2508_v56 = vrot.slane %v2506_v45, 2  ;;  %v4759_v45 = vld [vmem:[%s3873_s27 + $0x90] sm:$0xff] }
 0x241   : > { %v3086_v18 = vsel %vm3014_vm14, %v2978_v48, %v3050_v26  ;;  %v2703_v4 = vadd.f32 %v4676_v39, %v2334_v60  ;;  %v2860_v6 = vpop.f32.mrf.mxu0  ;;  %v2765_v39 = vrot.slane %v4663_v41, 3  ;;  %v1800_v48 = vsel %vm1773_vm6, %v1797_v58, %v1799_v19 }
 0x242   : > { %v3122_v13 = vpack.c.bf16 %v3086_v18, %v3086_v18  ;;  %v2511_v26 = vrot.slane %v2509_v34, 3 }
 0x243   : > { %v2939_v28 = vadd.f32 %v2858_v37, %v2703_v4  ;;  %v4742_v37 = vpop.f32.mrf.mxu3  ;;  %v2766_v41 = vsel %vm2739_vm7, %v2763_v22, %v2765_v39 }
 0x244   : > { %3159 = vst.msk [vmem:[%s4646_s19 + $0x14] sm:$0xf] %vm3153_vm9, %v3122_v13  ;;  %v2512_v58 = vor.u32 %v2511_v26, %v2508_v56 }
 0x245   : > { %v2979_v20 = vadd.f32 %v4621_v42, %v2939_v28 }
 0x246   : > { %v2255_v40 = vpop.f32.mrf.mxu2  ;;  %v2513_v10 = vsel %vm2370_vm5, %v2503_v5, %v2512_v58  ;;  %v2518_v5 = vshll.u32 %v4759_v45, 16 }
 0x247   : > { %vm3015_vm15 = vcmp.ge.f32.partialorder %v2979_v20, 0.0  ;;  %v3051_v54 = vmul.f32 0.1, %v2979_v20  ;;  %v2335_v47 = vadd.f32 %v2255_v40, %v1974_v36  ;;  %v1897_v7 = vpop.f32.mrf.mxu1 }
 0x249   : > { %v3087_v60 = vsel %vm3015_vm15, %v2979_v20, %v3051_v54  ;;  %v2704_v61 = vadd.f32 %v4695_v2, %v2335_v47  ;;  %v2863_v0 = vpop.f32.mrf.mxu0  ;;  %v1975_v2 = vadd.f32 %v1897_v7, %v4274_v11  ;;  %v3784_v11 = vld [vmem:[%s3873_s27 + $0x78] sm:$0xff]  ;;  %v2162_v7 = vrot.slane %v4699_v62, 2 }
 0x24a   : > { %v3123_v49 = vpack.c.bf16 %v3087_v60, %v3087_v60  ;;  %3547 = vmatmul.msk.bf16.gmra.mxu1 %vm505_vm2, %v1800_v48  ;;  %v1801_v47 = vrot.slane %v3784_v11, 2  ;;  %v2515_v48 = vshrl.u32 %v4759_v45, 16 }
 0x24b   : > { %v2940_v18 = vadd.f32 %v2860_v6, %v2704_v61  ;;  %3634 = vmatmul.msk.bf16.gmra.mxu2 %vm505_vm2, %v2161_v27  ;;  %v4755_v22 = vpop.f32.mrf.mxu3 }
 0x24c   : > { %3160 = vst.msk [vmem:[%s4646_s19 + $0x18] sm:$0xf] %vm3153_vm9, %v3123_v49  ;;  %3672 = vmatmul.msk.bf16.gmra.mxu0 %vm505_vm2, %v2766_v41  ;;  %v1802_v49 = vsel %vm1773_vm6, %v1799_v19, %v1801_v47 }
 0x24d   : > { %v2980_v30 = vadd.f32 %v4621_v42, %v2940_v18  ;;  %3655 = vmatmul.msk.bf16.gmra.mxu3 %vm505_vm2, %v2513_v10  ;;  %v2163_v18 = vsel %vm1773_vm6, %v2160_v16, %v2162_v7 }
 0x24e   : > { %v2258_v4 = vpop.f32.mrf.mxu2 }
 0x24f   : > { %vm3016_vm0 = vcmp.ge.f32.partialorder %v2980_v30, 0.0  ;;  %v3052_v6 = vmul.f32 0.1, %v2980_v30  ;;  %v2336_v13 = vadd.f32 %v2258_v4, %v1975_v2  ;;  %v1899_v28 = vpop.f32.mrf.mxu1  ;;  %v2520_v2 = vrot.slane %v2518_v5, 3 }
 0x250   : > { %v1976_v56 = vadd.f32 %v1899_v28, %v4284_v17 }
 0x251   : > { %v3088_v34 = vsel %vm3016_vm0, %v2980_v30, %v3052_v6  ;;  %v2705_v20 = vadd.f32 %v4712_v32, %v2336_v13  ;;  %v2865_v36 = vpop.f32.mrf.mxu0  ;;  %v2767_v32 = vrot.slane %v4699_v62, 3  ;;  %v2517_v30 = vrot.slane %v2515_v48, 2 }
 0x252   : > { %v3124_v40 = vpack.c.bf16 %v3088_v34, %v3088_v34 }
 0x253   : > { %v2941_v54 = vadd.f32 %v2863_v0, %v2705_v20  ;;  %v4772_v60 = vpop.f32.mrf.mxu3  ;;  %v2768_v62 = vsel %vm2739_vm7, %v2765_v39, %v2767_v32  ;;  %v2521_v19 = vor.u32 %v2520_v2, %v2517_v30 }
 0x254   : > { %3161 = vst.msk [vmem:[%s4646_s19 + $0x1c] sm:$0xf] %vm3153_vm9, %v3124_v40 }
 0x255   : > { %v2981_v27 = vadd.f32 %v4621_v42, %v2941_v54  ;;  %v2522_v40 = vsel %vm2370_vm5, %v2512_v58, %v2521_v19  ;;  %v4789_v54 = vld [vmem:[%s3873_s27 + $0x98] sm:$0xff] }
 0x256   : > { %v2260_v26 = vpop.f32.mrf.mxu2  ;;  %v2524_v58 = vshrl.u32 %v4789_v54, 16 }
 0x257   : > { %vm3017_vm1 = vcmp.ge.f32.partialorder %v2981_v27, 0.0  ;;  %v3053_v61 = vmul.f32 0.1, %v2981_v27  ;;  %v2337_v0 = vadd.f32 %v2260_v26, %v1976_v56  ;;  %v1902_v41 = vpop.f32.mrf.mxu1 }
 0x259   : > { %v3089_v4 = vsel %vm3017_vm1, %v2981_v27, %v3053_v61  ;;  %v2706_v6 = vadd.f32 %v4725_v51, %v2337_v0  ;;  %v2868_v17 = vpop.f32.mrf.mxu0  ;;  %v1977_v51 = vadd.f32 %v1902_v41, %v4290_v38  ;;  %v4796_v38 = vld [vmem:[%s3873_s27 + $0x80] sm:$0xff]  ;;  %v2164_v61 = vrot.slane %v4729_v57, 2 }
 0x25a   : > { %v3125_v13 = vpack.c.bf16 %v3089_v4, %v3089_v4  ;;  %3548 = vmatmul.msk.bf16.gmra.mxu1 %vm505_vm2, %v1802_v49  ;;  %v1803_v26 = vrot.slane %v4796_v38, 2  ;;  %v2527_v0 = vshll.u32 %v4789_v54, 16  ;;  %v2769_v49 = vrot.slane %v4729_v57, 3 }
 0x25b   : > { %v2942_v28 = vadd.f32 %v2865_v36, %v2706_v6  ;;  %3635 = vmatmul.msk.bf16.gmra.mxu2 %vm505_vm2, %v2163_v18  ;;  %v4785_v39 = vpop.f32.mrf.mxu3 }
 0x25c   : > { %3162 = vst.msk [vmem:[%s4646_s19 + $0x20] sm:$0xf] %vm3153_vm9, %v3125_v13  ;;  %3673 = vmatmul.msk.bf16.gmra.mxu0 %vm505_vm2, %v2768_v62  ;;  %v2165_v62 = vsel %vm1773_vm6, %v2162_v7, %v2164_v61  ;;  %v2526_v13 = vrot.slane %v2524_v58, 2 }
 0x25d   : > { %v2982_v16 = vadd.f32 %v4621_v42, %v2942_v28  ;;  %3656 = vmatmul.msk.bf16.gmra.mxu3 %vm505_vm2, %v2522_v40  ;;  %v2529_v28 = vrot.slane %v2527_v0, 3 }
 0x25e   : > { %v2263_v10 = vpop.f32.mrf.mxu2 }
 0x25f   : > { %vm3018_vm3 = vcmp.ge.f32.partialorder %v2982_v16, 0.0  ;;  %v3054_v34 = vmul.f32 0.1, %v2982_v16  ;;  %v2338_v20 = vadd.f32 %v2263_v10, %v1977_v51  ;;  %v1904_v36 = vpop.f32.mrf.mxu1  ;;  %v2770_v10 = vsel %vm2739_vm7, %v2767_v32, %v2769_v49 }
 0x261   : > { %v3090_v11 = vsel %vm3018_vm3, %v2982_v16, %v3054_v34  ;;  %v2707_v48 = vadd.f32 %v4742_v37, %v2338_v20  ;;  %v2870_v5 = vpop.f32.mrf.mxu0  ;;  %v1978_v37 = vadd.f32 %v1904_v36, %v4300_v31  ;;  %v2364_v34 = vld [vmem:[%s3873_s27 + $0xa0] sm:$0x7] }
 0x262   : > { %v3126_v27 = vpack.c.bf16 %v3090_v11, %v3090_v11  ;;  %v2368_v7 = vunpack.c.l.b16 %v2364_v34 }
 0x263   : > { %v2943_v56 = vadd.f32 %v2868_v17, %v2707_v48  ;;  %v4805_v30 = vpop.f32.mrf.mxu3  ;;  %v1804_v17 = vsel %vm1773_vm6, %v1801_v47, %v1803_v26  ;;  %v2530_v47 = vor.u32 %v2529_v28, %v2526_v13 }
 0x264   : > { %3163 = vst.msk [vmem:[%s4646_s19 + $0x24] sm:$0xf] %vm3153_vm9, %v3126_v27  ;;  %v4824_v38 = vpack.c.b16 %v2368_v7, %v2368_v7 }
 0x265   : > { %v2983_v41 = vadd.f32 %v4621_v42, %v2943_v56  ;;  %v2531_v56 = vsel %vm2370_vm5, %v2521_v19, %v2530_v47 }
 0x266   : > { %v2265_v18 = vpop.f32.mrf.mxu2  ;;  %v2536_v19 = vshll.u32 %v4824_v38, 16 }
 0x267   : > { %vm3019_vm4 = vcmp.ge.f32.partialorder %v2983_v41, 0.0  ;;  %v3055_v2 = vmul.f32 0.1, %v2983_v41  ;;  %v2339_v4 = vadd.f32 %v2265_v18, %v1978_v37  ;;  %v1907_v6 = vpop.f32.mrf.mxu1 }
 0x268   : > { %v1979_v40 = vadd.f32 %v1907_v6, %v4309_v35  ;;  %v3786_v35 = vld [vmem:[%s3873_s27 + $0x88] sm:$0xff]  ;;  %v2533_v6 = vshrl.u32 %v4824_v38, 16  ;;  %v2538_v7 = vrot.slane %v2536_v19, 3 }
 0x269   : > { %v3091_v16 = vsel %vm3019_vm4, %v2983_v41, %v3055_v2  ;;  %v2708_v31 = vadd.f32 %v4755_v22, %v2339_v4  ;;  %v2873_v51 = vpop.f32.mrf.mxu0  ;;  %v1805_v2 = vrot.slane %v3786_v35, 2  ;;  %v2166_v4 = vrot.slane %v4759_v45, 2 }
 0x26a   : > { %v3127_v20 = vpack.c.bf16 %v3091_v16, %v3091_v16  ;;  %3549 = vmatmul.msk.bf16.gmra.mxu1 %vm505_vm2, %v1804_v17 }
 0x26b   : > { %v2944_v36 = vadd.f32 %v2870_v5, %v2708_v31  ;;  %3636 = vmatmul.msk.bf16.gmra.mxu2 %vm505_vm2, %v2165_v62  ;;  %v4821_v11 = vpop.f32.mrf.mxu3  ;;  %v5010_v62 = vld [vmem:[#allocation10_spill] sm:$0xff]  ;;  %v1806_v34 = vsel %vm1773_vm6, %v1803_v26, %v1805_v2 }
 0x26c   : > { %3164 = vst.msk [vmem:[%s4646_s19 + $0x28] sm:$0xf] %vm3153_vm9, %v3127_v20  ;;  %3674 = vmatmul.msk.bf16.gmra.mxu0 %vm505_vm2, %v2770_v10  ;;  %v2167_v20 = vsel %vm1773_vm6, %v2164_v61, %v2166_v4 }
 0x26d   : > { %v2984_v22 = vadd.f32 %v4621_v42, %v2944_v36  ;;  %3657 = vmatmul.msk.bf16.gmra.mxu3 %vm505_vm2, %v2531_v56  ;;  %v2535_v36 = vrot.slane %v2533_v6, 2 }
 0x26e   : > { %v2268_v32 = vpop.f32.mrf.mxu2 }
 0x26f   : > { %vm3020_vm8 = vcmp.ge.f32.partialorder %v2984_v22, 0.0  ;;  %v3056_v48 = vmul.f32 0.1, %v2984_v22  ;;  %v2340_v5 = vadd.f32 %v2268_v32, %v1979_v40  ;;  %v1909_v27 = vpop.f32.mrf.mxu1  ;;  %v2539_v26 = vor.u32 %v2538_v7, %v2535_v36 }
 0x270   : > { %v1980_v13 = vadd.f32 %v1909_v27, %v5010_v62 }
 0x271   : > { %v3092_v58 = vsel %vm3020_vm8, %v2984_v22, %v3056_v48  ;;  %v2709_v0 = vadd.f32 %v4772_v60, %v2340_v5  ;;  %v2875_v41 = vpop.f32.mrf.mxu0  ;;  %v2771_v60 = vrot.slane %v4759_v45, 3 }
 0x272   : > { %v3128_v37 = vpack.c.bf16 %v3092_v58, %v3092_v58 }
 0x273   : > { %v2945_v18 = vadd.f32 %v2873_v51, %v2709_v0  ;;  %v4837_v16 = vpop.f32.mrf.mxu3  ;;  %v2772_v45 = vsel %vm2739_vm7, %v2769_v49, %v2771_v60 }
 0x274   : > { %3165 = vst.msk [vmem:[%s4646_s19 + $0x2c] sm:$0xf] %vm3153_vm9, %v3128_v37 }
 0x275   : > { %v2985_v17 = vadd.f32 %v4621_v42, %v2945_v18 }
 0x276   : > { %v2270_v28 = vpop.f32.mrf.mxu2 }
 0x277   : > { %vm3021_vm10 = vcmp.ge.f32.partialorder %v2985_v17, 0.0  ;;  %v3057_v31 = vmul.f32 0.1, %v2985_v17  ;;  %v2341_v51 = vadd.f32 %v2270_v28, %v1980_v13  ;;  %v1912_v10 = vpop.f32.mrf.mxu1  ;;  %v2168_v13 = vrot.slane %v4789_v54, 2 }
 0x279   : > { %v3093_v22 = vsel %vm3021_vm10, %v2985_v17, %v3057_v31  ;;  %v2710_v40 = vadd.f32 %v4785_v39, %v2341_v51  ;;  %v2878_v32 = vpop.f32.mrf.mxu0  ;;  %v5011_v39 = vld [vmem:[#allocation11_spill] sm:$0xff]  ;;  %v3787_v17 = vld [vmem:[%s3873_s27 + $0x90] sm:$0xff]  ;;  %v2169_v7 = vsel %vm1773_vm6, %v2166_v4, %v2168_v13 }
 0x27a   : > { %v3129_v48 = vpack.c.bf16 %v3093_v22, %v3093_v22  ;;  %3550 = vmatmul.msk.bf16.gmra.mxu1 %vm505_vm2, %v1806_v34  ;;  %v1981_v27 = vadd.f32 %v1912_v10, %v5011_v39  ;;  %v1807_v62 = vrot.slane %v3787_v17, 2 }
 0x27b   : > { %v2946_v5 = vadd.f32 %v2875_v41, %v2710_v40  ;;  %3637 = vmatmul.msk.bf16.gmra.mxu2 %vm505_vm2, %v2167_v20  ;;  %v4852_v56 = vpop.f32.mrf.mxu3  ;;  %v2540_v41 = vsel %vm2370_vm5, %v2530_v47, %v2539_v26  ;;  %v2773_v47 = vrot.slane %v4789_v54, 3 }
 0x27c   : > { %3166 = vst.msk [vmem:[%s4646_s19 + $0x30] sm:$0xf] %vm3153_vm9, %v3129_v48  ;;  %3675 = vmatmul.msk.bf16.gmra.mxu0 %vm505_vm2, %v2772_v45  ;;  %v1808_v36 = vsel %vm1773_vm6, %v1805_v2, %v1807_v62  ;;  %v2039_v45 = vld [vmem:[%s3873_s27 + $0xa0] sm:$0x3] }
 0x27d   : > { %v2986_v61 = vadd.f32 %v4621_v42, %v2946_v5  ;;  %3658 = vmatmul.msk.bf16.gmra.mxu3 %vm505_vm2, %v2540_v41  ;;  %v2115_v2 = vunpack.c.l.b16 %v2039_v45 }
 0x27e   : > { %v2273_v57 = vpop.f32.mrf.mxu2 }
 0x27f   : > { %vm3022_vm11 = vcmp.ge.f32.partialorder %v2986_v61, 0.0  ;;  %v3058_v49 = vmul.f32 0.1, %v2986_v61  ;;  %v2342_v58 = vadd.f32 %v2273_v57, %v1981_v27  ;;  %v1914_v0 = vpop.f32.mrf.mxu1  ;;  %v2134_v27 = vpack.c.b16 %v2115_v2, %v2115_v2 }
 0x280   : > { %v1982_v31 = vadd.f32 %v1914_v0, %v4365_v44  ;;  %v2774_v44 = vsel %vm2739_vm7, %v2771_v60, %v2773_v47 }
 0x281   : > { %v3094_v37 = vsel %vm3022_vm11, %v2986_v61, %v3058_v49  ;;  %v2711_v18 = vadd.f32 %v4805_v30, %v2342_v58  ;;  %v2880_v35 = vpop.f32.mrf.mxu0 }
 0x282   : > { %v3130_v6 = vpack.c.bf16 %v3094_v37, %v3094_v37  ;;  %v1809_v37 = vrot.slane %v4360_v12, 2 }
 0x283   : > { %v2947_v19 = vadd.f32 %v2878_v32, %v2711_v18  ;;  %v4864_v30 = vpop.f32.mrf.mxu3  ;;  %v2170_v18 = vrot.slane %v2134_v27, 2 }
 0x284   : > { %3167 = vst.msk [vmem:[%s4646_s19 + $0x34] sm:$0xf] %vm3153_vm9, %v3130_v6  ;;  %v2775_v6 = vrot.slane %v4824_v38, 3 }
 0x285   : > { %v2987_v28 = vadd.f32 %v4621_v42, %v2947_v19 }
 0x286   : > { %v2275_v51 = vpop.f32.mrf.mxu2 }
 0x287   : > { %vm3023_vm5 = vcmp.ge.f32.partialorder %v2987_v28, 0.0  ;;  %v3059_v10 = vmul.f32 0.1, %v2987_v28  ;;  %v2343_v34 = vadd.f32 %v2275_v51, %v1982_v31  ;;  %v1917_v20 = vpop.f32.mrf.mxu1  ;;  %v1810_v51 = vsel %vm1773_vm6, %v1807_v62, %v1809_v37 }
 0x289   : > { %v3095_v22 = vsel %vm3023_vm5, %v2987_v28, %v3059_v10  ;;  %v2712_v40 = vadd.f32 %v4821_v11, %v2343_v34  ;;  %v2883_v32 = vpop.f32.mrf.mxu0  ;;  %v1983_v11 = vadd.f32 %v1917_v20, %v4379_v9  ;;  %v2171_v10 = vsel %vm1773_vm6, %v2168_v13, %v2170_v18 }
 0x28a   : > { %v3131_v54 = vpack.c.bf16 %v3095_v22, %v3095_v22  ;;  %3551 = vmatmul.msk.bf16.gmra.mxu1 %vm505_vm2, %v1808_v36  ;;  %v2776_v36 = vsel %vm2739_vm7, %v2773_v47, %v2775_v6 }
 0x28b   : > { %v2948_v48 = vadd.f32 %v2880_v35, %v2712_v40  ;;  %3638 = vmatmul.msk.bf16.gmra.mxu2 %vm505_vm2, %v2169_v7  ;;  %v2654_v26 = vpop.f32.mrf.mxu3 }
 0x28c   : > { %3168 = vst.msk [vmem:[%s4646_s19 + $0x38] sm:$0xf] %vm3153_vm9, %v3131_v54  ;;  %3676 = vmatmul.msk.bf16.gmra.mxu0 %vm505_vm2, %v2774_v44 }
 0x28d   : > { %v2988_v4 = vadd.f32 %v4621_v42, %v2948_v48 }
 0x28e   : > { %v2278_v5 = vpop.f32.mrf.mxu2 }
 0x28f   : > { %vm3024_vm12 = vcmp.ge.f32.partialorder %v2988_v4, 0.0  ;;  %v3060_v60 = vmul.f32 0.1, %v2988_v4  ;;  %v2344_v61 = vadd.f32 %v2278_v5, %v1983_v11  ;;  %v1919_v39 = vpop.f32.mrf.mxu1 }
 0x290   : > { %v1984_v35 = vadd.f32 %v1919_v39, %v4395_v46 }
 0x291   : > { %v3096_v57 = vsel %vm3024_vm12, %v2988_v4, %v3060_v60  ;;  %v2713_v49 = vadd.f32 %v4837_v16, %v2344_v61  ;;  %v2885_v58 = vpop.f32.mrf.mxu0 }
 0x292   : > { %v3132_v0 = vpack.c.bf16 %v3096_v57, %v3096_v57 }
 0x293   : > { %v2949_v41 = vadd.f32 %v2883_v32, %v2713_v49  ;;  %v2657_v17 = vpop.f32.mrf.mxu3 }
 0x294   : > { %3169 = vst.msk [vmem:[%s4646_s19 + $0x3c] sm:$0xf] %vm3153_vm9, %v3132_v0 }
 0x295   : > { %v2989_v9 = vadd.f32 %v4621_v42, %v2949_v41 }
 0x296   : > { %v2280_v19 = vpop.f32.mrf.mxu2 }
 0x297   : > { %vm3025_vm13 = vcmp.ge.f32.partialorder %v2989_v9, 0.0  ;;  %v3061_v28 = vmul.f32 0.1, %v2989_v9  ;;  %v2345_v16 = vadd.f32 %v2280_v19, %v1984_v35  ;;  %v1922_v31 = vpop.f32.mrf.mxu1 }
 0x298   : > { %v1985_v62 = vadd.f32 %v1922_v31, %v4412_v14 }
 0x299   : > { %v3097_v34 = vsel %vm3025_vm13, %v2989_v9, %v3061_v28  ;;  %v2714_v12 = vadd.f32 %v4852_v56, %v2345_v16  ;;  %v2888_v20 = vpop.f32.mrf.mxu0 }
 0x29a   : > { %v3133_v46 = vpack.c.bf16 %v3097_v34, %v3097_v34  ;;  %3552 = vmatmul.msk.bf16.gmra.mxu1 %vm505_vm2, %v1810_v51 }
 0x29b   : > { %v2950_v7 = vadd.f32 %v2885_v58, %v2714_v12  ;;  %3639 = vmatmul.msk.bf16.gmra.mxu2 %vm505_vm2, %v2171_v10  ;;  %v2659_v56 = vpop.f32.mrf.mxu3 }
 0x29c   : > { %3170 = vst.msk [vmem:[%s4646_s19 + $0x40] sm:$0xf] %vm3153_vm9, %v3133_v46  ;;  %3677 = vmatmul.msk.bf16.gmra.mxu0 %vm505_vm2, %v2776_v36 }
 0x29d   : > { %v2990_v38 = vadd.f32 %v4621_v42, %v2950_v7 }
 0x29e   : > { %v2283_v13 = vpop.f32.mrf.mxu2 }
 0x29f   : > { %vm3026_vm6 = vcmp.ge.f32.partialorder %v2990_v38, 0.0  ;;  %v3062_v22 = vmul.f32 0.1, %v2990_v38  ;;  %v2346_v47 = vadd.f32 %v2283_v13, %v1985_v62  ;;  %v1924_v40 = vpop.f32.mrf.mxu1 }
 0x2a0   : > { %v1986_v4 = vadd.f32 %v1924_v40, %v4426_v21 }
 0x2a1   : > { %v3098_v32 = vsel %vm3026_vm6, %v2990_v38, %v3062_v22  ;;  %v2715_v44 = vadd.f32 %v4864_v30, %v2346_v47  ;;  %v2890_v45 = vpop.f32.mrf.mxu0 }
 0x2a2   : > { %v3134_v54 = vpack.c.bf16 %v3098_v32, %v3098_v32 }
 0x2a3   : > { %v2951_v48 = vadd.f32 %v2888_v20, %v2715_v44  ;;  %v2662_v11 = vpop.f32.mrf.mxu3 }
 0x2a4   : > { %3171 = vst.msk [vmem:[%s4646_s19 + $0x44] sm:$0xf] %vm3153_vm9, %v3134_v54 }
 0x2a5   : > { %v2991_v2 = vadd.f32 %v4621_v42, %v2951_v48 }
 0x2a6   : > { %v2285_v14 = vpop.f32.mrf.mxu2 }
 0x2a7   : > { %vm3027_vm2 = vcmp.ge.f32.partialorder %v2991_v2, 0.0  ;;  %v3063_v5 = vmul.f32 0.1, %v2991_v2  ;;  %v2347_v60 = vadd.f32 %v2285_v14, %v1986_v4  ;;  %v1927_v61 = vpop.f32.mrf.mxu1 }
 0x2a8   : > { %v1987_v0 = vadd.f32 %v1927_v61, %v4436_v23 }
 0x2a9   : > { %v3099_v39 = vsel %vm3027_vm2, %v2991_v2, %v3063_v5  ;;  %v2716_v27 = vadd.f32 %v2654_v26, %v2347_v60  ;;  %v2893_v57 = vpop.f32.mrf.mxu0 }
 0x2aa   : > { %v3135_v30 = vpack.c.bf16 %v3099_v39, %v3099_v39 }
 0x2ab   : > { %v2952_v49 = vadd.f32 %v2890_v45, %v2716_v27  ;;  %v2664_v9 = vpop.f32.mrf.mxu3 }
 0x2ac   : > { %3172 = vst.msk [vmem:[%s4646_s19 + $0x48] sm:$0xf] %vm3153_vm9, %v3135_v30 }
 0x2ad   : > { %v2992_v58 = vadd.f32 %v4621_v42, %v2952_v49 }
 0x2ae   : > { %v2288_v41 = vpop.f32.mrf.mxu2 }
 0x2af   : > { %vm3028_vm7 = vcmp.ge.f32.partialorder %v2992_v58, 0.0  ;;  %v3064_v21 = vmul.f32 0.1, %v2992_v58  ;;  %v2348_v37 = vadd.f32 %v2288_v41, %v1987_v0  ;;  %v1929_v18 = vpop.f32.mrf.mxu1 }
 0x2b0   : > { %v1988_v31 = vadd.f32 %v1929_v18, %v4450_v59 }
 0x2b1   : > { %v3100_v35 = vsel %vm3028_vm7, %v2992_v58, %v3064_v21  ;;  %v2717_v6 = vadd.f32 %v2657_v17, %v2348_v37  ;;  %v2895_v19 = vpop.f32.mrf.mxu0 }
 0x2b2   : > { %v3136_v26 = vpack.c.bf16 %v3100_v35, %v3100_v35 }
 0x2b3   : > { %v2953_v28 = vadd.f32 %v2893_v57, %v2717_v6  ;;  %v2667_v17 = vpop.f32.mrf.mxu3 }
 0x2b4   : > { %3173 = vst.msk [vmem:[%s4646_s19 + $0x4c] sm:$0xf] %vm3153_vm9, %v3136_v26 }
 0x2b5   : > { %v2993_v16 = vadd.f32 %v4621_v42, %v2953_v28 }
 0x2b6   : > { %v2290_v51 = vpop.f32.mrf.mxu2 }
 0x2b7   : > { %vm3029_vm14 = vcmp.ge.f32.partialorder %v2993_v16, 0.0  ;;  %v3065_v23 = vmul.f32 0.1, %v2993_v16  ;;  %v2349_v10 = vadd.f32 %v2290_v51, %v1988_v31  ;;  %v1932_v34 = vpop.f32.mrf.mxu1 }
 0x2b8   : > { %v1989_v62 = vadd.f32 %v1932_v34, %v4459_v43 }
 0x2b9   : > { %v3101_v12 = vsel %vm3029_vm14, %v2993_v16, %v3065_v23  ;;  %v2718_v20 = vadd.f32 %v2659_v56, %v2349_v10  ;;  %v2898_v36 = vpop.f32.mrf.mxu0 }
 0x2ba   : > { %v3137_v46 = vpack.c.bf16 %v3101_v12, %v3101_v12 }
 0x2bb   : > { %v2954_v7 = vadd.f32 %v2895_v19, %v2718_v20  ;;  %v2669_v54 = vpop.f32.mrf.mxu3 }
 0x2bc   : > { %3174 = vst.msk [vmem:[%s4646_s19 + $0x50] sm:$0xf] %vm3153_vm9, %v3137_v46 }
 0x2bd   : > { %v2994_v38 = vadd.f32 %v4621_v42, %v2954_v7 }
 0x2be   : > { %v2293_v13 = vpop.f32.mrf.mxu2 }
 0x2bf   : > { %vm3030_vm15 = vcmp.ge.f32.partialorder %v2994_v38, 0.0  ;;  %v3066_v59 = vmul.f32 0.1, %v2994_v38  ;;  %v2350_v22 = vadd.f32 %v2293_v13, %v1989_v62  ;;  %v1934_v47 = vpop.f32.mrf.mxu1 }
 0x2c0   : > { %v1990_v2 = vadd.f32 %v1934_v47, %v4472_v25 }
 0x2c1   : > { %v3102_v40 = vsel %vm3030_vm15, %v2994_v38, %v3066_v59  ;;  %v2719_v32 = vadd.f32 %v2662_v11, %v2350_v22  ;;  %v2900_v44 = vpop.f32.mrf.mxu0 }
 0x2c2   : > { %v3138_v56 = vpack.c.bf16 %v3102_v40, %v3102_v40 }
 0x2c3   : > { %v2955_v45 = vadd.f32 %v2898_v36, %v2719_v32  ;;  %v2672_v58 = vpop.f32.mrf.mxu3 }
 0x2c4   : > { %3175 = vst.msk [vmem:[%s4646_s19 + $0x54] sm:$0xf] %vm3153_vm9, %v3138_v56 }
 0x2c5   : > { %v2995_v48 = vadd.f32 %v4621_v42, %v2955_v45 }
 0x2c6   : > { %v2295_v4 = vpop.f32.mrf.mxu2 }
 0x2c7   : > { %vm3031_vm0 = vcmp.ge.f32.partialorder %v2995_v48, 0.0  ;;  %v3067_v43 = vmul.f32 0.1, %v2995_v48  ;;  %v2351_v14 = vadd.f32 %v2295_v4, %v1990_v2  ;;  %v1937_v5 = vpop.f32.mrf.mxu1 }
 0x2c8   : > { %v1991_v30 = vadd.f32 %v1937_v5, %v4481_v8 }
 0x2c9   : > { %v3103_v60 = vsel %vm3031_vm0, %v2995_v48, %v3067_v43  ;;  %v2720_v61 = vadd.f32 %v2664_v9, %v2351_v14  ;;  %v2903_v39 = vpop.f32.mrf.mxu0 }
 0x2ca   : > { %v3139_v11 = vpack.c.bf16 %v3103_v60, %v3103_v60 }
 0x2cb   : > { %v2956_v27 = vadd.f32 %v2900_v44, %v2720_v61  ;;  %v2674_v31 = vpop.f32.mrf.mxu3 }
 0x2cc   : > { %3176 = vst.msk [vmem:[%s4646_s19 + $0x58] sm:$0xf] %vm3153_vm9, %v3139_v11 }
 0x2cd   : > { %v2996_v57 = vadd.f32 %v4621_v42, %v2956_v27 }
 0x2ce   : > { %v2298_v49 = vpop.f32.mrf.mxu2 }
 0x2cf   : > { %vm3032_vm1 = vcmp.ge.f32.partialorder %v2996_v57, 0.0  ;;  %v3068_v25 = vmul.f32 0.1, %v2996_v57  ;;  %v2352_v0 = vadd.f32 %v2298_v49, %v1991_v30  ;;  %v1939_v41 = vpop.f32.mrf.mxu1 }
 0x2d0   : > { %v1992_v19 = vadd.f32 %v1939_v41, %v4494_v50 }
 0x2d1   : > { %v3104_v21 = vsel %vm3032_vm1, %v2996_v57, %v3068_v25  ;;  %v2721_v37 = vadd.f32 %v2667_v17, %v2352_v0  ;;  %v2905_v18 = vpop.f32.mrf.mxu0 }
 0x2d2   : > { %v3140_v9 = vpack.c.bf16 %v3104_v21, %v3104_v21 }
 0x2d3   : > { %v2957_v35 = vadd.f32 %v2903_v39, %v2721_v37  ;;  %v2677_v22 = vpop.f32.mrf.mxu3 }
 0x2d4   : > { %3177 = vst.msk [vmem:[%s4646_s19 + $0x5c] sm:$0xf] %vm3153_vm9, %v3140_v9 }
 0x2d5   : > { %v2997_v6 = vadd.f32 %v4621_v42, %v2957_v35 }
 0x2d6   : > { %v2300_v26 = vpop.f32.mrf.mxu2 }
 0x2d7   : > { %vm3033_vm3 = vcmp.ge.f32.partialorder %v2997_v6, 0.0  ;;  %v3069_v8 = vmul.f32 0.1, %v2997_v6  ;;  %v2353_v28 = vadd.f32 %v2300_v26, %v1992_v19  ;;  %v1942_v16 = vpop.f32.mrf.mxu1 }
 0x2d8   : > { %v1993_v36 = vadd.f32 %v1942_v16, %v4503_v29 }
 0x2d9   : > { %v3105_v51 = vsel %vm3033_vm3, %v2997_v6, %v3069_v8  ;;  %v2722_v23 = vadd.f32 %v2669_v54, %v2353_v28  ;;  %v2908_v10 = vpop.f32.mrf.mxu0 }
 0x2da   : > { %v3141_v34 = vpack.c.bf16 %v3105_v51, %v3105_v51 }
 0x2db   : > { %v2958_v12 = vadd.f32 %v2905_v18, %v2722_v23  ;;  %v2679_v14 = vpop.f32.mrf.mxu3 }
 0x2dc   : > { %3178 = vst.msk [vmem:[%s4646_s19 + $0x60] sm:$0xf] %vm3153_vm9, %v3141_v34 }
 0x2dd   : > { %v2998_v20 = vadd.f32 %v4621_v42, %v2958_v12 }
 0x2de   : > { %v2303_v46 = vpop.f32.mrf.mxu2 }
 0x2df   : > { %vm3034_vm4 = vcmp.ge.f32.partialorder %v2998_v20, 0.0  ;;  %v3070_v50 = vmul.f32 0.1, %v2998_v20  ;;  %v2354_v17 = vadd.f32 %v2303_v46, %v1993_v36  ;;  %v1944_v7 = vpop.f32.mrf.mxu1 }
 0x2e0   : > { %v1994_v32 = vadd.f32 %v1944_v7, %v4516_v15 }
 0x2e1   : > { %v3106_v38 = vsel %vm3034_vm4, %v2998_v20, %v3070_v50  ;;  %v2723_v62 = vadd.f32 %v2672_v58, %v2354_v17  ;;  %v2910_v13 = vpop.f32.mrf.mxu0 }
 0x2e2   : > { %v3142_v59 = vpack.c.bf16 %v3106_v38, %v3106_v38 }
 0x2e3   : > { %v2959_v47 = vadd.f32 %v2908_v10, %v2723_v62  ;;  %v2682_v21 = vpop.f32.mrf.mxu3 }
 0x2e4   : > { %3179 = vst.msk [vmem:[%s4646_s19 + $0x64] sm:$0xf] %vm3153_vm9, %v3142_v59 }
 0x2e5   : > { %v2999_v40 = vadd.f32 %v4621_v42, %v2959_v47  ;;  %v4938_v42 = vld [vmem:[%s4986_s2] ss:$0 sm:$0xff] }
 0x2e6   : > { %v2305_v44 = vpop.f32.mrf.mxu2 }
 0x2e7   : > { %vm3035_vm8 = vcmp.ge.f32.partialorder %v2999_v40, 0.0  ;;  %v3071_v29 = vmul.f32 0.1, %v2999_v40  ;;  %v2355_v56 = vadd.f32 %v2305_v44, %v1994_v32  ;;  %v1947_v45 = vpop.f32.mrf.mxu1 }
 0x2e8   : > { %v1995_v5 = vadd.f32 %v1947_v45, %v4525_v52 }
 0x2e9   : > { %v3107_v54 = vsel %vm3035_vm8, %v2999_v40, %v3071_v29  ;;  %v2724_v48 = vadd.f32 %v2674_v31, %v2355_v56  ;;  %v2913_v2 = vpop.f32.mrf.mxu0 }
 0x2ea   : > { %v3143_v4 = vpack.c.bf16 %v3107_v54, %v3107_v54 }
 0x2eb   : > { %v2960_v43 = vadd.f32 %v2910_v13, %v2724_v48  ;;  %v2684_v23 = vpop.f32.mrf.mxu3 }
 0x2ec   : > { %3180 = vst.msk [vmem:[%s4646_s19 + $0x68] sm:$0xf] %vm3153_vm9, %v3143_v4 }
 0x2ed   : > { %v3000_v15 = vadd.f32 %v4938_v42, %v2960_v43 }
 0x2ee   : > { %v2308_v60 = vpop.f32.mrf.mxu2 }
 0x2ef   : > { %vm3036_vm10 = vcmp.ge.f32.partialorder %v3000_v15, 0.0  ;;  %v3072_v61 = vmul.f32 0.1, %v3000_v15  ;;  %v2356_v39 = vadd.f32 %v2308_v60, %v1995_v5  ;;  %v1949_v11 = vpop.f32.mrf.mxu1 }
 0x2f0   : > { %v1996_v0 = vadd.f32 %v1949_v11, %v4538_v55 }
 0x2f1   : > { %v3108_v27 = vsel %vm3036_vm10, %v3000_v15, %v3072_v61  ;;  %v2725_v57 = vadd.f32 %v2677_v22, %v2356_v39  ;;  %v2915_v30 = vpop.f32.mrf.mxu0 }
 0x2f2   : > { %v3144_v49 = vpack.c.bf16 %v3108_v27, %v3108_v27 }
 0x2f3   : > { %v2961_v58 = vadd.f32 %v2913_v2, %v2725_v57  ;;  %v2687_v22 = vpop.f32.mrf.mxu3 }
 0x2f4   : > { %3181 = vst.msk [vmem:[%s4646_s19 + $0x6c] sm:$0xf] %vm3153_vm9, %v3144_v49 }
 0x2f5   : > { %v3001_v25 = vadd.f32 %v4938_v42, %v2961_v58 }
 0x2f6   : > { %v2310_v41 = vpop.f32.mrf.mxu2 }
 0x2f7   : > { %vm3037_vm11 = vcmp.ge.f32.partialorder %v3001_v25, 0.0  ;;  %v3073_v52 = vmul.f32 0.1, %v3001_v25  ;;  %v2357_v37 = vadd.f32 %v2310_v41, %v1996_v0  ;;  %v1952_v18 = vpop.f32.mrf.mxu1 }
 0x2f8   : > { %v1997_v28 = vadd.f32 %v1952_v18, %v4547_v3 }
 0x2f9   : > { %v3109_v9 = vsel %vm3037_vm11, %v3001_v25, %v3073_v52  ;;  %v2726_v35 = vadd.f32 %v2679_v14, %v2357_v37  ;;  %v2918_v6 = vpop.f32.mrf.mxu0 }
 0x2fa   : > { %v3145_v19 = vpack.c.bf16 %v3109_v9, %v3109_v9 }
 0x2fb   : > { %v2962_v26 = vadd.f32 %v2915_v30, %v2726_v35  ;;  %v2689_v43 = vpop.f32.mrf.mxu3 }
 0x2fc   : > { %3182 = vst.msk [vmem:[%s4646_s19 + $0x70] sm:$0xf] %vm3153_vm9, %v3145_v19 }
 0x2fd   : > { %v3002_v8 = vadd.f32 %v4938_v42, %v2962_v26 }
 0x2fe   : > { %v2313_v16 = vpop.f32.mrf.mxu2 }
 0x2ff   : > { %vm3038_vm5 = vcmp.ge.f32.partialorder %v3002_v8, 0.0  ;;  %v3074_v55 = vmul.f32 0.1, %v3002_v8  ;;  %v2358_v31 = vadd.f32 %v2313_v16, %v1997_v28  ;;  %v1954_v51 = vpop.f32.mrf.mxu1 }
 0x300   : > { %v1998_v50 = vadd.f32 %v1954_v51, %v4560_v63 }
 0x301   : > { %v3110_v10 = vsel %vm3038_vm5, %v3002_v8, %v3074_v55  ;;  %v2727_v34 = vadd.f32 %v2682_v21, %v2358_v31  ;;  %v2920_v20 = vpop.f32.mrf.mxu0 }
 0x302   : > { %v3146_v12 = vpack.c.bf16 %v3110_v10, %v3110_v10 }
 0x303   : > { %v2963_v36 = vadd.f32 %v2918_v6, %v2727_v34  ;;  %v2692_v25 = vpop.f32.mrf.mxu3 }
 0x304   : > { %3183 = vst.msk [vmem:[%s4646_s19 + $0x74] sm:$0xf] %vm3153_vm9, %v3146_v12 }
 0x305   : > { %v3003_v46 = vadd.f32 %v4938_v42, %v2963_v36 }
 0x306   : > { %v2315_v17 = vpop.f32.mrf.mxu2 }
 0x307   : > { %vm3039_vm12 = vcmp.ge.f32.partialorder %v3003_v46, 0.0  ;;  %v3075_v3 = vmul.f32 0.1, %v3003_v46  ;;  %v2359_v7 = vadd.f32 %v2315_v17, %v1998_v50  ;;  %v1957_v38 = vpop.f32.mrf.mxu1 }
 0x308   : > { %v1999_v44 = vadd.f32 %v1957_v38, %v4569_v53 }
 0x309   : > { %v3111_v62 = vsel %vm3039_vm12, %v3003_v46, %v3075_v3  ;;  %v2728_v13 = vadd.f32 %v2684_v23, %v2359_v7  ;;  %v2923_v40 = vpop.f32.mrf.mxu0 }
 0x30a   : > { %v3147_v59 = vpack.c.bf16 %v3111_v62, %v3111_v62 }
 0x30b   : > { %v2964_v47 = vadd.f32 %v2920_v20, %v2728_v13  ;;  %v2694_v28 = vpop.f32.mrf.mxu3 }
 0x30c   : > { %3184 = vst.msk [vmem:[%s4646_s19 + $0x78] sm:$0xf] %vm3153_vm9, %v3147_v59 }
 0x30d   : > { %v3004_v32 = vadd.f32 %v4938_v42, %v2964_v47 }
 0x30e   : > { %v2318_v29 = vpop.f32.mrf.mxu2 }
 0x30f   : > { %vm3040_vm13 = vcmp.ge.f32.partialorder %v3004_v32, 0.0  ;;  %v3076_v63 = vmul.f32 0.1, %v3004_v32  ;;  %v2360_v56 = vadd.f32 %v2318_v29, %v1999_v44  ;;  %v1959_v45 = vpop.f32.mrf.mxu1 }
 0x310   : > { %v2000_v15 = vadd.f32 %v1959_v45, %v4582_v1 }
 0x311   : > { %v3112_v54 = vsel %vm3040_vm13, %v3004_v32, %v3076_v63  ;;  %v2729_v48 = vadd.f32 %v2687_v22, %v2360_v56  ;;  %v2925_v5 = vpop.f32.mrf.mxu0 }
 0x312   : > { %v3148_v2 = vpack.c.bf16 %v3112_v54, %v3112_v54 }
 0x313   : > { %v2965_v4 = vadd.f32 %v2923_v40, %v2729_v48 }
 0x314   : > { %3185 = vst.msk [vmem:[%s4646_s19 + $0x7c] sm:$0xf] %vm3153_vm9, %v3148_v2 }
 0x315   : > { %v3005_v14 = vadd.f32 %v4938_v42, %v2965_v4 }
 0x316   : > { %v2320_v60 = vpop.f32.mrf.mxu2 }
 0x317   : > { %vm3041_vm6 = vcmp.ge.f32.partialorder %v3005_v14, 0.0  ;;  %v3077_v53 = vmul.f32 0.1, %v3005_v14  ;;  %v2361_v61 = vadd.f32 %v2320_v60, %v2000_v15  ;;  %v1962_v39 = vpop.f32.mrf.mxu1 }
 0x318   : > { %v2001_v58 = vadd.f32 %v1962_v39, %v4593_v33 }
 0x319   : > { %v3113_v11 = vsel %vm3041_vm6, %v3005_v14, %v3077_v53  ;;  %v2730_v27 = vadd.f32 %v2689_v43, %v2361_v61  ;;  %v2928_v21 = vpop.f32.mrf.mxu0 }
 0x31a   : > { %v3149_v57 = vpack.c.bf16 %v3113_v11, %v3113_v11 }
 0x31b   : > { %v2966_v30 = vadd.f32 %v2925_v5, %v2730_v27 }
 0x31c   : > { %3186 = vst.msk [vmem:[%s4646_s19 + $0x80] sm:$0xf] %vm3153_vm9, %v3149_v57 }
 0x31d   : > { %v3006_v49 = vadd.f32 %v4938_v42, %v2966_v30 }
 0x31e   : > { %v2323_v0 = vpop.f32.mrf.mxu2 }
 0x31f   : > { %vm3042_vm2 = vcmp.ge.f32.partialorder %v3006_v49, 0.0  ;;  %v3078_v1 = vmul.f32 0.1, %v3006_v49  ;;  %v2362_v41 = vadd.f32 %v2323_v0, %v2001_v58  ;;  %v1964_v9 = vpop.f32.mrf.mxu1 }
 0x320   : > { %v2002_v19 = vadd.f32 %v1964_v9, %v4608_v24 }
 0x321   : > { %v3114_v52 = vsel %vm3042_vm2, %v3006_v49, %v3078_v1  ;;  %v2731_v37 = vadd.f32 %v2692_v25, %v2362_v41  ;;  %v2930_v51 = vpop.f32.mrf.mxu0 }
 0x322   : > { %v3150_v18 = vpack.c.bf16 %v3114_v52, %v3114_v52 }
 0x323   : > { %v2967_v35 = vadd.f32 %v2928_v21, %v2731_v37 }
 0x324   : > { %3187 = vst.msk [vmem:[%s4646_s19 + $0x84] sm:$0xf] %vm3153_vm9, %v3150_v18 }
 0x325   : > { %v3007_v6 = vadd.f32 %v4938_v42, %v2967_v35 }
 0x326   : > { %v2325_v26 = vpop.f32.mrf.mxu2 }
 0x327   : > { %vm3043_vm7 = vcmp.ge.f32.partialorder %v3007_v6, 0.0  ;;  %v3079_v33 = vmul.f32 0.1, %v3007_v6  ;;  %v2363_v8 = vadd.f32 %v2325_v26, %v2002_v19 }
 0x329   : > { %v3115_v16 = vsel %vm3043_vm7, %v3007_v6, %v3079_v33  ;;  %v2732_v55 = vadd.f32 %v2694_v28, %v2363_v8 }
 0x32a   : > { %v3151_v31 = vpack.c.bf16 %v3115_v16, %v3115_v16 }
 0x32b   : > { %v2968_v23 = vadd.f32 %v2930_v51, %v2732_v55 }
 0x32c   : > { %3188 = vst.msk [vmem:[%s4646_s19 + $0x88] sm:$0xf] %vm3153_vm9, %v3151_v31 }
 0x32d   : > { %v3008_v10 = vadd.f32 %v4938_v42, %v2968_v23 }
 0x32f   : > { %vm3044_vm14 = vcmp.ge.f32.partialorder %v3008_v10, 0.0  ;;  %v3080_v34 = vmul.f32 0.1, %v3008_v10 }
 0x331   : > { %v3116_v12 = vsel %vm3044_vm14, %v3008_v10, %v3080_v34 }
 0x332   : > { %v3152_v20 = vpack.c.bf16 %v3116_v12, %v3116_v12 }
 0x334   : > { %3189 = vst.msk [vmem:[%s4646_s19 + $0x8c] sm:$0xf] %vm3153_vm9, %v3152_v20 }
 0x335 PF: > { %s13_s14 = sadd.s32 1, %s3811_s14   ;;  %s5012_s12 = smov %s3807_s13 }
 0x336   : > { %p10_p5 = scmp.ge.s32.totalorder %s13_s14, 4   ;;  %s5013_s13 = smov %s5015_s15 }
 0x338   :  { %12 = sbr.rel (!%p10_p5) target bundleno = 2 (0x2), region = 76 }

// kernel: _lambda_.13
= control target key start
LH: loop header
LB: loop body
LE: loop exit
PB: predicated region body
PF: predicated region fallthrough
CT: control target
= control target key end

     0   :  { %s3031_s27 = smov 0   ;;  %s3033_s28 = smov 0   ;;  %s4419_s0 = inlined_call_operand.vmem [shape: bf16[512,16], index: 0, kind: input, shape index: {}]   ;;  %s4420_s1 = inlined_call_operand.vmem [shape: bf16[16,256], index: 1, kind: input, shape index: {}]   ;;  %s4421_s2 = inlined_call_operand.vmem [shape: f32[1,256], index: 2, kind: input, shape index: {}]   ;;  %s4422_s3 = inlined_call_operand.vmem [shape: f32[1,256], index: 3, kind: input, shape index: {}]   ;;  %s4423_s4 = inlined_call_operand.vmem [shape: f32[1,256], index: 4, kind: input, shape index: {}]   ;;  %s4424_s5 = inlined_call_operand.vmem [shape: f32[1,256], index: 5, kind: input, shape index: {}]   ;;  %s4425_s6 = inlined_call_operand.vmem [shape: f32[1,256], index: 6, kind: input, shape index: {}]   ;;  %s4426_s7 = inlined_call_operand.vmem [shape: f32[512,2], index: 7, kind: input, shape index: {}]   ;;  %s4427_s8 = inlined_call_operand.vmem [shape: f32[512,256], index: 8, kind: output, shape index: {}]  }
   0x1   :  { %s3035_s29 = smov 0  }
   0x2 LB: > { %s30_s30 = sadd.s32 1, %s2978_s28  ;;  %p2409_p0 = scmp.ge.s32.totalorder %s2982_s29, 1  ;;  %s2982_s29 = sphi %s3035_s29, %s18_s29   ;;  %s2978_s28 = sphi %s3033_s28, %s4563_s28   ;;  %s2974_s27 = sphi %s3031_s27, %s4562_s27  }
   0x3   : > { %p32_p1 = scmp.ge.s32.totalorder %s30_s30, 2  ;;  %p303_p2 = scmp.lt.s32.totalorder %s2982_s29, 3 }
   0x5   : > { %s4565_s30 = smov (%p32_p1, %s30_s30), 0  ;;  %p304_p3 = pnand %p2409_p0, %p303_p2 }
   0x7   : > { %307 = sbr.rel (%p304_p3) target bundleno = 373 (0x175), region = 52 }
   0xc   : > { %v2483_v0 = vld [vmem:[%s4420_s1] sm:$0xf]  ;;  %s2410_s11 = sshll.u32 %s2974_s27, 5  ;;  %v2984_v1 = vmov 0   ;;  %v2541_v2 = vld [vmem:[%s4420_s1 + $0x4] sm:$0xf0] }
   0xd   : > { %2572 = vset.pattern.permute.xlu2 %v2984_v1  ;;  %2571 = vset.pattern.permute.xlu1 %v2984_v1  ;;  %v2540_v3 = vld [vmem:[%s4420_s1 + $0x4] sm:$0xf]  ;;  %p353_p4 = scmp.lt.s32.totalorder %s2410_s11, 63  ;;  %v2484_v4 = vor.u32 %v2541_v2, %v2483_v0  ;;  %v2485_v5 = vld [vmem:[%s4420_s1 + $0x8] sm:$0xf0]  ;;  %vm638_vm0 = vcmask 130048  }
   0xe   : > { %2570 = vset.pattern.permute.xlu0 %v2984_v1  ;;  %v2488_v6 = vor.u32 %v2540_v3, %v2485_v5  ;;  %v2985_v51 = vmov 1   ;;  %v1514_v62 = vld [vmem:[%s4423_s4] sm:$0x3] }
   0xf   : > { %s4567_s11 = smov (!%p353_p4, %s2410_s11), 63  ;;  %694 = vmatpush.bf16.msra.mxu0 %v2484_v4  ;;  %2542 = vmatpush.bf16.msra.mxu2 %v2484_v4  ;;  %v1060_v2 = vld [vmem:[%s4421_s2] sm:$0x3]  ;;  %vm1515_vm1 = vcmp.gt.f32.partialorder %v1514_v62, 0.5 }
  0x10   : > { %783 = vmatpush.bf16.msra.mxu1 %v2488_v6  ;;  %2543 = vmatpush.bf16.msra.mxu3 %v2488_v6  ;;  %s2413_s18 = sshll.u32 %s4567_s11, 3  ;;  %s2411_s22 = sshll.u32 %s4567_s11, 2  ;;  %v3276_v4 = vperm.slane %v1060_v2, 0  ;;  %v3278_v5 = vperm.slane %v1060_v2, 1  ;;  %v1687_v6 = vld [vmem:[%s4424_s5] sm:$0x3] }
  0x11   : > { %s3070_s21 = scalar_lea.vmem %s4426_s7, %s2413_s18  ;;  %s3087_s25 = scalar_lea.vmem %s4419_s0, %s2411_s22 }
  0x12   : > { %v3073_v7 = vld [vmem:[%s3070_s21 + $0x20] sm:$0xff]  ;;  %v3076_v8 = vld [vmem:[%s3070_s21 + $0x10] sm:$0xff]  ;;  %v3097_v12 = vld [vmem:[%s3070_s21 + $0x28] sm:$0xff]  ;;  %s2523_s18 = sshll.u32 %s4567_s11, 4 }
  0x13   : > { %v3079_v9 = vld [vmem:[%s3070_s21] sm:$0xff]  ;;  %1710 = vperm.xlu2 %2572, %v3073_v7   ;;  %1700 = vperm.xlu1 %2571, %v3076_v8   ;;  %v3100_v13 = vld [vmem:[%s3070_s21 + $0x18] sm:$0xff]  ;;  %v3103_v14 = vld [vmem:[%s3070_s21 + $0x8] sm:$0xff]  ;;  %s3579_s20 = scalar_lea.vmem %s4427_s8, %s2523_s18 }
  0x14   : > { %1690 = vperm.xlu0 %2570, %v3079_v9   ;;  %v2524_v10 = vld [vmem:[%s3087_s25] sm:$0xff]  ;;  %v3112_v16 = vld [vmem:[%s3070_s21 + $0x38] sm:$0xff]  ;;  %v3115_v17 = vld [vmem:[%s3070_s21 + $0x30] sm:$0xff] }
  0x15   : > { %v2532_v11 = vld [vmem:[%s3087_s25 + $0x40] sm:$0xff]  ;;  %2489 = vmatmul.msk.bf16.vlgmr.msra.gmra.mxu0 %vm638_vm0, %v2524_v10  ;;  %2505 = vmatmul.msk.bf16.vlgmr.msra.gmra.mxu1 %vm638_vm0, %v2524_v10  ;;  %v2525_v18 = vld [vmem:[%s3087_s25 + $0x8] sm:$0xff]  ;;  %v3127_v20 = vld [vmem:[%s3070_s21 + $0x58] sm:$0xff] }
  0x16   : > { %2497 = vmatmul.msk.bf16.vlgmr.msra.gmra.mxu2 %vm638_vm0, %v2532_v11  ;;  %2513 = vmatmul.msk.bf16.vlgmr.msra.gmra.mxu3 %vm638_vm0, %v2532_v11  ;;  %v3109_v15 = vld [vmem:[%s3070_s21 + $0x40] sm:$0xff]  ;;  %v2533_v19 = vld [vmem:[%s3087_s25 + $0x48] sm:$0xff]  ;;  %v3130_v21 = vld [vmem:[%s3070_s21 + $0x50] sm:$0xff]  ;;  %v3288_v11 = vperm.slane %v1687_v6, 0 }
  0x17   : > { %v3133_v22 = vld [vmem:[%s3070_s21 + $0x48] sm:$0xff]  ;;  %v3139_v23 = vld [vmem:[%s3070_s21 + $0x70] sm:$0xff]  ;;  %v3145_v25 = vld [vmem:[%s3070_s21 + $0x60] sm:$0xff] }
  0x18   : > { %v3142_v24 = vld [vmem:[%s3070_s21 + $0x68] sm:$0xff]  ;;  %v2526_v26 = vld [vmem:[%s3087_s25 + $0x10] sm:$0xff]  ;;  %v3160_v29 = vld [vmem:[%s3070_s21 + $0x80] sm:$0xff]  ;;  %4432 = vst [vmem:[#allocation3_spill] sm:$0xff] %v3288_v11 }
  0x19   : > { %v2534_v27 = vld [vmem:[%s3087_s25 + $0x50] sm:$0xff]  ;;  %v3157_v28 = vld [vmem:[%s3070_s21 + $0x88] sm:$0xff]  ;;  %v3163_v30 = vld [vmem:[%s3070_s21 + $0x78] sm:$0xff] }
  0x1a   : > { %v3169_v31 = vld [vmem:[%s3070_s21 + $0xa0] sm:$0xff]  ;;  %v3172_v32 = vld [vmem:[%s3070_s21 + $0x98] sm:$0xff]  ;;  %v3175_v33 = vld [vmem:[%s3070_s21 + $0x90] sm:$0xff] }
  0x1b   : > { %1715 = vperm.xlu2 %2572, %v3097_v12   ;;  %1705 = vperm.xlu1 %2571, %v3100_v13   ;;  %v2527_v34 = vld [vmem:[%s3087_s25 + $0x18] sm:$0xff]  ;;  %v3190_v37 = vld [vmem:[%s3070_s21 + $0xb0] sm:$0xff]  ;;  %v3193_v38 = vld [vmem:[%s3070_s21 + $0xa8] sm:$0xff] }
  0x1c   : > { %1695 = vperm.xlu0 %2570, %v3103_v14   ;;  %v2535_v35 = vld [vmem:[%s3087_s25 + $0x58] sm:$0xff]  ;;  %v3199_v39 = vld [vmem:[%s3070_s21 + $0xd0] sm:$0xff]  ;;  %v3202_v40 = vld [vmem:[%s3070_s21 + $0xc8] sm:$0xff] }
  0x1d   : > { %v3187_v36 = vld [vmem:[%s3070_s21 + $0xb8] sm:$0xff]  ;;  %v3205_v41 = vld [vmem:[%s3070_s21 + $0xc0] sm:$0xff]  ;;  %v3217_v44 = vld [vmem:[%s3070_s21 + $0xe8] sm:$0xff] }
  0x1e   : > { %v2528_v42 = vld [vmem:[%s3087_s25 + $0x20] sm:$0xff]  ;;  %v3223_v46 = vld [vmem:[%s3070_s21 + $0xd8] sm:$0xff]  ;;  %v3232_v48 = vld [vmem:[%s3070_s21 + $0xf0] sm:$0xff] }
  0x1f   : > { %v2536_v43 = vld [vmem:[%s3087_s25 + $0x60] sm:$0xff]  ;;  %v3229_v47 = vld [vmem:[%s3070_s21 + $0xf8] sm:$0xff]  ;;  %v2529_v49 = vld [vmem:[%s3087_s25 + $0x28] sm:$0xff] }
  0x20   : > { %v3220_v45 = vld [vmem:[%s3070_s21 + $0xe0] sm:$0xff]  ;;  %v2537_v50 = vld [vmem:[%s3087_s25 + $0x68] sm:$0xff]  ;;  %v2530_v53 = vld [vmem:[%s3087_s25 + $0x30] sm:$0xff] }
  0x21   : > { %v2538_v54 = vld [vmem:[%s3087_s25 + $0x70] sm:$0xff]  ;;  %v2531_v57 = vld [vmem:[%s3087_s25 + $0x38] sm:$0xff] }
  0x22   : > { %v2539_v58 = vld [vmem:[%s3087_s25 + $0x78] sm:$0xff] }
  0x23   : > { %1730 = vperm.xlu2 %2572, %v3109_v15   ;;  %1725 = vperm.xlu1 %2571, %v3112_v16  }
  0x24   : > { %1720 = vperm.xlu0 %2570, %v3115_v17  }
  0x25   : > { %2490 = vmatmul.msk.bf16.gmra.mxu0 %vm638_vm0, %v2525_v18  ;;  %2506 = vmatmul.msk.bf16.gmra.mxu1 %vm638_vm0, %v2525_v18 }
  0x26   : > { %2498 = vmatmul.msk.bf16.gmra.mxu2 %vm638_vm0, %v2533_v19  ;;  %2514 = vmatmul.msk.bf16.gmra.mxu3 %vm638_vm0, %v2533_v19 }
  0x2b   : > { %1745 = vperm.xlu2 %2572, %v3127_v20   ;;  %1740 = vperm.xlu1 %2571, %v3130_v21  }
  0x2c   : > { %1735 = vperm.xlu0 %2570, %v3133_v22  }
  0x33   : > { %1760 = vperm.xlu2 %2572, %v3139_v23   ;;  %1755 = vperm.xlu1 %2571, %v3142_v24  }
  0x34   : > { %1750 = vperm.xlu0 %2570, %v3145_v25  }
  0x35   : > { %2491 = vmatmul.msk.bf16.gmra.mxu0 %vm638_vm0, %v2526_v26  ;;  %2507 = vmatmul.msk.bf16.gmra.mxu1 %vm638_vm0, %v2526_v26 }
  0x36   : > { %2499 = vmatmul.msk.bf16.gmra.mxu2 %vm638_vm0, %v2534_v27  ;;  %2515 = vmatmul.msk.bf16.gmra.mxu3 %vm638_vm0, %v2534_v27 }
  0x3b   : > { %1775 = vperm.xlu2 %2572, %v3157_v28   ;;  %1770 = vperm.xlu1 %2571, %v3160_v29  }
  0x3c   : > { %1765 = vperm.xlu0 %2570, %v3163_v30  }
  0x43   : > { %1790 = vperm.xlu2 %2572, %v3169_v31   ;;  %1785 = vperm.xlu1 %2571, %v3172_v32  }
  0x44   : > { %1780 = vperm.xlu0 %2570, %v3175_v33  }
  0x45   : > { %2492 = vmatmul.msk.bf16.gmra.mxu0 %vm638_vm0, %v2527_v34  ;;  %2508 = vmatmul.msk.bf16.gmra.mxu1 %vm638_vm0, %v2527_v34 }
  0x46   : > { %2500 = vmatmul.msk.bf16.gmra.mxu2 %vm638_vm0, %v2535_v35  ;;  %2516 = vmatmul.msk.bf16.gmra.mxu3 %vm638_vm0, %v2535_v35 }
  0x4b   : > { %1805 = vperm.xlu2 %2572, %v3187_v36   ;;  %1800 = vperm.xlu1 %2571, %v3190_v37  }
  0x4c   : > { %1795 = vperm.xlu0 %2570, %v3193_v38  }
  0x53   : > { %1820 = vperm.xlu2 %2572, %v3199_v39   ;;  %1815 = vperm.xlu1 %2571, %v3202_v40  }
  0x54   : > { %1810 = vperm.xlu0 %2570, %v3205_v41  }
  0x55   : > { %2493 = vmatmul.msk.bf16.gmra.mxu0 %vm638_vm0, %v2528_v42  ;;  %2509 = vmatmul.msk.bf16.gmra.mxu1 %vm638_vm0, %v2528_v42 }
  0x56   : > { %2501 = vmatmul.msk.bf16.gmra.mxu2 %vm638_vm0, %v2536_v43  ;;  %2517 = vmatmul.msk.bf16.gmra.mxu3 %vm638_vm0, %v2536_v43 }
  0x5b   : > { %1835 = vperm.xlu2 %2572, %v3217_v44   ;;  %1830 = vperm.xlu1 %2571, %v3220_v45  }
  0x5c   : > { %1825 = vperm.xlu0 %2570, %v3223_v46  }
  0x63   : > { %2573 = vset.pattern.permute.xlu2 %v2985_v51  ;;  %1845 = vperm.xlu1 %2571, %v3229_v47  }
  0x64   : > { %1840 = vperm.xlu0 %2570, %v3232_v48   ;;  %1983 = vperm.xlu2 %2573, %v3079_v9  }
  0x65   : > { %2494 = vmatmul.msk.bf16.gmra.mxu0 %vm638_vm0, %v2529_v49  ;;  %2510 = vmatmul.msk.bf16.gmra.mxu1 %vm638_vm0, %v2529_v49 }
  0x66   : > { %2502 = vmatmul.msk.bf16.gmra.mxu2 %vm638_vm0, %v2537_v50  ;;  %2518 = vmatmul.msk.bf16.gmra.mxu3 %vm638_vm0, %v2537_v50 }
  0x6b   : > { %2575 = vset.pattern.permute.xlu1 %v2985_v51 }
  0x6c   : > { %2574 = vset.pattern.permute.xlu0 %v2985_v51  ;;  %1991 = vperm.xlu1 %2575, %v3076_v8  }
  0x6d   : > { %1995 = vperm.xlu2 %2573, %v3100_v13   ;;  %1987 = vperm.xlu0 %2574, %v3103_v14   ;;  %v1711_v52 = vpop.permute.xlu2 %1710 }
  0x6e   : > { %v3298_v19 = vmul.f32 %v3288_v11, %v1711_v52 }
  0x70   : > { %4434 = vst [vmem:[#allocation5_spill] sm:$0xff] %v3298_v19 }
  0x74   : > { %1999 = vperm.xlu1 %2575, %v3073_v7   ;;  %v3284_v7 = vsel %vm1515_vm1, 1, %v2984_v1 }
  0x75   : > { %2003 = vperm.xlu2 %2573, %v3097_v12   ;;  %2007 = vperm.xlu0 %2574, %v3115_v17   ;;  %v1716_v55 = vpop.permute.xlu2 %1715  ;;  %v3290_v12 = vperm.slane %v1687_v6, 1  ;;  %v1517_v1 = vperm.slane %v3284_v7, 0  ;;  %v1518_v18 = vperm.slane %v3284_v7, 1 }
  0x76   : > { %2495 = vmatmul.msk.bf16.gmra.mxu0 %vm638_vm0, %v2530_v53  ;;  %2503 = vmatmul.msk.bf16.gmra.mxu2 %vm638_vm0, %v2538_v54 }
  0x77   : > { %2511 = vmatmul.msk.bf16.gmra.mxu1 %vm638_vm0, %v2530_v53  ;;  %2519 = vmatmul.msk.bf16.gmra.mxu3 %vm638_vm0, %v2538_v54  ;;  %4433 = vst [vmem:[#allocation4_spill] sm:$0xff] %v3290_v12  ;;  %vm3373_vm2 = vcmp.eq.s32.totalorder %v1517_v1, 1  ;;  %vm3388_vm3 = vcmp.eq.s32.totalorder %v1518_v18, 1 }
  0x7c   : > { %2011 = vperm.xlu1 %2575, %v3112_v16  }
  0x7d   : > { %2015 = vperm.xlu2 %2573, %v3109_v15   ;;  %2019 = vperm.xlu0 %2574, %v3133_v22   ;;  %v1731_v56 = vpop.permute.xlu2 %1730  ;;  %v3304_v22 = vmul.f32 %v3288_v11, %v1716_v55 }
  0x7e   : > { %v3313_v26 = vmul.f32 %v3290_v12, %v1731_v56 }
  0x80   : > { %4437 = vst [vmem:[#allocation8_spill] sm:$0xff] %v3313_v26 }
  0x84   : > { %2023 = vperm.xlu1 %2575, %v3130_v21  }
  0x85   : > { %2027 = vperm.xlu2 %2573, %v3127_v20   ;;  %2031 = vperm.xlu0 %2574, %v3145_v25   ;;  %v1746_v59 = vpop.permute.xlu2 %1745  ;;  %v1701_v60 = vpop.permute.xlu1 %1700  ;;  %v3301_v20 = vmul.f32 %v3290_v12, %v1711_v52 }
  0x86   : > { %v1691_v61 = vpop.permute.xlu0 %1690  ;;  %2496 = vmatmul.msk.bf16.gmra.mxu0 %vm638_vm0, %v2531_v57  ;;  %2504 = vmatmul.msk.bf16.gmra.mxu2 %vm638_vm0, %v2539_v58  ;;  %v3316_v27 = vmul.f32 %v3288_v11, %v1746_v59  ;;  %v3325_v34 = vmul.f32 %v3290_v12, %v1701_v60 }
  0x87   : > { %2512 = vmatmul.msk.bf16.gmra.mxu1 %vm638_vm0, %v2531_v57  ;;  %2520 = vmatmul.msk.bf16.gmra.mxu3 %vm638_vm0, %v2539_v58  ;;  %4435 = vst [vmem:[#allocation6_spill] sm:$0xff] %v3301_v20  ;;  %v3329_v43 = vmul.f32 %v3288_v11, %v1691_v61  ;;  %v3332_v49 = vmul.f32 %v3290_v12, %v1691_v61 }
  0x88   : > { %4438 = vst [vmem:[#allocation9_spill] sm:$0xff] %v3316_v27 }
  0x8c   : > { %2035 = vperm.xlu1 %2575, %v3142_v24   ;;  %v3310_v24 = vmul.f32 %v3288_v11, %v1731_v56 }
  0x8d   : > { %2039 = vperm.xlu2 %2573, %v3139_v23   ;;  %2043 = vperm.xlu0 %2574, %v3163_v30   ;;  %v1761_v63 = vpop.permute.xlu2 %1760  ;;  %v1706_v0 = vpop.permute.xlu1 %1705  ;;  %v3307_v23 = vmul.f32 %v3290_v12, %v1716_v55 }
  0x8e   : > { %v1696_v3 = vpop.permute.xlu0 %1695  ;;  %4436 = vst [vmem:[#allocation7_spill] sm:$0xff] %v3310_v24  ;;  %v3336_v52 = vmul.f32 %v3288_v11, %v1761_v63  ;;  %v3339_v53 = vmul.f32 %v3290_v12, %v1761_v63  ;;  %v3344_v57 = vmul.f32 %v3288_v11, %v1706_v0  ;;  %v3347_v58 = vmul.f32 %v3290_v12, %v1706_v0  ;;  %v1617_v0 = vld [vmem:[%s4422_s3] sm:$0x3] }
  0x8f   : > { %v3353_v63 = vmul.f32 %v3288_v11, %v1696_v3 }
  0x90   : > { %4440 = vst [vmem:[#allocation11_spill] sm:$0xff] %v3336_v52 }
  0x91   : > { %4441 = vst [vmem:[#allocation12_spill] sm:$0xff] %v3339_v53 }
  0x92   : > { %v696_v8 = vpop.f32.mrf.mxu0  ;;  %v785_v10 = vpop.f32.mrf.mxu1 }
  0x93   : > { %v1066_v9 = vadd.f32 %v3276_v4, %v696_v8  ;;  %v1067_v13 = vadd.f32 %v3278_v5, %v785_v10 }
  0x94   : > { %2047 = vperm.xlu1 %2575, %v3160_v29  }
  0x95   : > { %2051 = vperm.xlu2 %2573, %v3157_v28   ;;  %2055 = vperm.xlu0 %2574, %v3175_v33   ;;  %v1776_v14 = vpop.permute.xlu2 %1775  ;;  %v1726_v15 = vpop.permute.xlu1 %1725  ;;  %v1130_v16 = vsub.f32 0.0, %v1066_v9  ;;  %v1131_v21 = vsub.f32 0.0, %v1067_v13  ;;  %v3319_v28 = vmul.f32 %v3290_v12, %v1746_v59  ;;  %v3322_v33 = vmul.f32 %v3288_v11, %v1701_v60 }
  0x96   : > { %v1721_v17 = vpop.permute.xlu0 %1720  ;;  %v3362_v9 = vmul.f32 %v3288_v11, %v1776_v14  ;;  %v3371_v10 = vmul.f32 %v3290_v12, %v1726_v15 }
  0x97   : > { %v1194_v25 = vmul.f32 1.442695, %v1130_v16  ;;  %4439 = vst [vmem:[#allocation10_spill] sm:$0xff] %v3319_v28  ;;  %v1196_v29 = vmul.f32 1.442695, %v1131_v21  ;;  %v3378_v16 = vmul.f32 %v3288_v11, %v1721_v17  ;;  %v3381_v21 = vmul.f32 %v3290_v12, %v1721_v17 }
  0x98   : > { %4443 = vst [vmem:[#allocation14_spill] sm:$0xff] %v3362_v9 }
  0x99   : > { %v736_v30 = vpop.f32.mrf.mxu2  ;;  %2576 = vpow2.f32 %v1194_v25  ;;  %v825_v42 = vpop.f32.mrf.mxu3  ;;  %4446 = vst [vmem:[#allocation17_spill] sm:$0xff] %v3371_v10 }
  0x9a   : > { %v1098_v35 = vadd.f32 %v3276_v4, %v736_v30  ;;  %2578 = vpow2.f32 %v1196_v29  ;;  %v1099_v50 = vadd.f32 %v3278_v5, %v825_v42  ;;  %v698_v51 = vpop.f32.mrf.mxu0  ;;  %v787_v56 = vpop.f32.mrf.mxu1  ;;  %4449 = vst [vmem:[#allocation18_spill] sm:$0xff] %v3378_v16 }
  0x9b   : > { %v1068_v55 = vadd.f32 %v3276_v4, %v698_v51  ;;  %v1069_v60 = vadd.f32 %v3278_v5, %v787_v56  ;;  %4450 = vst [vmem:[#allocation19_spill] sm:$0xff] %v3381_v21 }
  0x9c   : > { %v1162_v54 = vsub.f32 0.0, %v1098_v35  ;;  %2059 = vperm.xlu1 %2575, %v3172_v32   ;;  %v1163_v59 = vsub.f32 0.0, %v1099_v50  ;;  %v3356_v32 = vmul.f32 %v3290_v12, %v1696_v3 }
  0x9d   : > { %2063 = vperm.xlu2 %2573, %v3169_v31   ;;  %2067 = vperm.xlu0 %2574, %v3193_v38   ;;  %v1791_v61 = vpop.permute.xlu2 %1790  ;;  %v1741_v62 = vpop.permute.xlu1 %1740  ;;  %v1132_v6 = vsub.f32 0.0, %v1068_v55  ;;  %v3365_v31 = vmul.f32 %v3290_v12, %v1776_v14  ;;  %v3368_v38 = vmul.f32 %v3288_v11, %v1726_v15  ;;  %v1133_v14 = vsub.f32 0.0, %v1069_v60 }
  0x9e   : > { %4442 = vst [vmem:[#allocation13_spill] sm:$0xff] %v3356_v32  ;;  %v1258_v2 = vmul.f32 1.442695, %v1162_v54  ;;  %v1736_v8 = vpop.permute.xlu0 %1735  ;;  %v1260_v30 = vmul.f32 1.442695, %v1163_v59  ;;  %v3383_v15 = vperm.slane %v1617_v0, 0  ;;  %v3393_v54 = vmul.f32 %v3288_v11, %v1791_v61 }
  0x9f   : > { %4444 = vst [vmem:[#allocation15_spill] sm:$0xff] %v3365_v31  ;;  %v2577_v3 = vpop.eup %2576  ;;  %v1198_v1 = vmul.f32 1.442695, %v1132_v6  ;;  %v3396_v59 = vperm.slane %v1617_v0, 1  ;;  %v1200_v60 = vmul.f32 1.442695, %v1133_v14  ;;  %v3401_v7 = vmul.f32 %v3290_v12, %v1791_v61 }
  0xa0   : > { %4445 = vst [vmem:[#allocation16_spill] sm:$0xff] %v3368_v38  ;;  %2580 = vpow2.f32 %v1258_v2  ;;  %v2579_v25 = vpop.eup %2578  ;;  %v1322_v29 = vadd.f32 1.0, %v2577_v3 }
  0xa1   : > { %2582 = vrcp.f32 %v2577_v3  ;;  %v738_v35 = vpop.f32.mrf.mxu2  ;;  %v1323_v42 = vadd.f32 1.0, %v2579_v25  ;;  %v827_v51 = vpop.f32.mrf.mxu3  ;;  %4453 = vst [vmem:[#allocation20_spill] sm:$0xff] %v3393_v54 }
  0xa2   : > { %2584 = vrcp.f32 %v2579_v25  ;;  %v1100_v50 = vadd.f32 %v3276_v4, %v738_v35  ;;  %v1101_v55 = vadd.f32 %v3278_v5, %v827_v51  ;;  %v701_v56 = vpop.f32.mrf.mxu0  ;;  %v790_v3 = vpop.f32.mrf.mxu1  ;;  %4454 = vst [vmem:[#allocation21_spill] sm:$0xff] %v3401_v7  ;;  %v3407_v35 = vmul.f32 %v3288_v11, %v1741_v62 }
  0xa3   : > { %2586 = vrcp.f32 %v1322_v29  ;;  %v1070_v6 = vadd.f32 %v3276_v4, %v701_v56  ;;  %v1071_v25 = vadd.f32 %v3278_v5, %v790_v3 }
  0xa4   : > { %2588 = vrcp.f32 %v1323_v42  ;;  %v1164_v2 = vsub.f32 0.0, %v1100_v50  ;;  %2071 = vperm.xlu1 %2575, %v3190_v37   ;;  %v1165_v18 = vsub.f32 0.0, %v1101_v55  ;;  %4455 = vst [vmem:[#allocation22_spill] sm:$0xff] %v3407_v35 }
  0xa5   : > { %2590 = vpow2.f32 %v1260_v30  ;;  %2075 = vperm.xlu2 %2573, %v3187_v36   ;;  %2079 = vperm.xlu0 %2574, %v3205_v41   ;;  %v1806_v0 = vpop.permute.xlu2 %1805  ;;  %v1756_v29 = vpop.permute.xlu1 %1755  ;;  %v1134_v37 = vsub.f32 0.0, %v1070_v6  ;;  %v1135_v55 = vsub.f32 0.0, %v1071_v25  ;;  %v3412_v36 = vmul.f32 %v3290_v12, %v1741_v62 }
  0xa6   : > { %v2581_v14 = vpop.eup %2580  ;;  %2592 = vpow2.f32 %v1198_v1  ;;  %v1262_v42 = vmul.f32 1.442695, %v1164_v2  ;;  %v1751_v30 = vpop.permute.xlu0 %1750  ;;  %v1264_v51 = vmul.f32 1.442695, %v1165_v18  ;;  %v3415_v41 = vmul.f32 %v3288_v11, %v1736_v8 }
  0xa7   : > { %v2583_v50 = vpop.eup %2582  ;;  %v1354_v61 = vadd.f32 1.0, %v2581_v14  ;;  %2594 = vrcp.f32 %v2581_v14  ;;  %4456 = vst [vmem:[#allocation23_spill] sm:$0xff] %v3412_v36  ;;  %v3418_v1 = vmul.f32 %v3290_v12, %v1736_v8  ;;  %v3420_v6 = vmul.f32 1.442695, %v1134_v37 }
  0xa8   : > { %v3409_v56 = vpop.eup %2584  ;;  %2596 = vpow2.f32 %v1200_v60  ;;  %4457 = vst [vmem:[#allocation24_spill] sm:$0xff] %v3415_v41  ;;  %v3423_v3 = vmul.f32 %v3288_v11, %v1806_v0  ;;  %v3426_v18 = vmul.f32 %v3290_v12, %v1806_v0  ;;  %v3430_v62 = vmul.f32 1.442695, %v1135_v55 }
  0xa9   : > { %4458 = vst [vmem:[#allocation25_spill] sm:$0xff] %v3418_v1  ;;  %v2587_v2 = vpop.eup %2586  ;;  %2598 = vrcp.f32 %v1354_v61  ;;  %v741_v60 = vpop.f32.mrf.mxu2  ;;  %v3433_v14 = vmul.f32 %v3288_v11, %v1756_v29  ;;  %v3437_v53 = vmul.f32 %v3290_v12, %v1756_v29  ;;  %v3445_v29 = vmul.f32 %v3288_v11, %v1751_v30 }
  0xaa   : > { %4459 = vst [vmem:[#allocation26_spill] sm:$0xff] %v3423_v3  ;;  %v3428_v25 = vpop.eup %2588  ;;  %2600 = vpow2.f32 %v1262_v42  ;;  %v1102_v8 = vadd.f32 %v3276_v4, %v741_v60  ;;  %v830_v61 = vpop.f32.mrf.mxu3  ;;  %v1521_v28 = vsel %vm3373_vm2, %v2583_v50, %v2587_v2 }
  0xab   : > { %4460 = vst [vmem:[#allocation27_spill] sm:$0xff] %v3426_v18  ;;  %v2591_v37 = vpop.eup %2590  ;;  %2602 = vpow2.f32 %v1264_v51  ;;  %v1103_v0 = vadd.f32 %v3278_v5, %v830_v61  ;;  %v703_v52 = vpop.f32.mrf.mxu0 }
  0xac   : > { %4461 = vst [vmem:[#allocation28_spill] sm:$0xff] %v3433_v14  ;;  %v2593_v42 = vpop.eup %2592  ;;  %v1355_v55 = vadd.f32 1.0, %v2591_v37  ;;  %2604 = vrcp.f32 %v2591_v37  ;;  %v1166_v27 = vsub.f32 0.0, %v1102_v8  ;;  %v1072_v14 = vadd.f32 %v3276_v4, %v703_v52  ;;  %v792_v36 = vpop.f32.mrf.mxu1  ;;  %2083 = vperm.xlu1 %2575, %v3202_v40  }
  0xad   : > { %4462 = vst [vmem:[#allocation29_spill] sm:$0xff] %v3437_v53  ;;  %v2595_v60 = vpop.eup %2594  ;;  %v1324_v51 = vadd.f32 1.0, %v2593_v42  ;;  %2606 = vrcp.f32 %v2593_v42  ;;  %v1167_v61 = vsub.f32 0.0, %v1103_v0  ;;  %2087 = vperm.xlu2 %2573, %v3199_v39   ;;  %2091 = vperm.xlu0 %2574, %v3223_v46   ;;  %v1821_v50 = vpop.permute.xlu2 %1820  ;;  %v3450_v52 = vmul.f32 %v3290_v12, %v1751_v30 }
  0xae   : > { %4463 = vst [vmem:[#allocation30_spill] sm:$0xff] %v3445_v29  ;;  %v1771_v2 = vpop.permute.xlu1 %1770  ;;  %v2597_v37 = vpop.eup %2596  ;;  %2608 = vrcp.f32 %v1355_v55  ;;  %v1073_v40 = vadd.f32 %v3278_v5, %v792_v36  ;;  %v1136_v46 = vsub.f32 0.0, %v1072_v14  ;;  %v3460_v53 = vmul.f32 %v3383_v15, %v1521_v28 }
  0xaf   : > { %4464 = vst [vmem:[#allocation31_spill] sm:$0xff] %v3450_v52  ;;  %v3453_v8 = vpop.permute.xlu0 %1765  ;;  %v2599_v42 = vpop.eup %2598  ;;  %2610 = vrcp.f32 %v1324_v51  ;;  %v1325_v39 = vadd.f32 1.0, %v2597_v37  ;;  %v1266_v30 = vmul.f32 1.442695, %v1166_v27  ;;  %v3463_v52 = vmul.f32 %v3288_v11, %v1821_v50 }
  0xb0   : > { %v2601_v55 = vpop.eup %2600  ;;  %2612 = vrcp.f32 %v2597_v37  ;;  %v1553_v36 = vsel %vm3373_vm2, %v2595_v60, %v2599_v42  ;;  %v1268_v0 = vmul.f32 1.442695, %v1167_v61  ;;  %v1137_v41 = vsub.f32 0.0, %v1073_v40 }
  0xb1   : > { %4465 = vst [vmem:[#allocation32_spill] sm:$0xff] %v3463_v52  ;;  %v2603_v29 = vpop.eup %2602  ;;  %2614 = vrcp.f32 %v1325_v39  ;;  %v1356_v35 = vadd.f32 1.0, %v2601_v55  ;;  %v1655_v51 = vmul.f32 %v3383_v15, %v1553_v36  ;;  %v743_v1 = vpop.f32.mrf.mxu2  ;;  %v1885_v37 = vmul.f32 %v3288_v11, %v1771_v2 }
  0xb2   : > { %v2605_v14 = vpop.eup %2604  ;;  %2616 = vrcp.f32 %v2601_v55  ;;  %v1357_v28 = vadd.f32 1.0, %v2603_v29  ;;  %v832_v27 = vpop.f32.mrf.mxu3  ;;  %v1206_v52 = vmul.f32 1.442695, %v1136_v46  ;;  %v1886_v60 = vmul.f32 %v3290_v12, %v1771_v2 }
  0xb3   : > { %v3469_v18 = vpop.eup %2606  ;;  %2618 = vrcp.f32 %v1356_v35  ;;  %v1104_v42 = vadd.f32 %v3276_v4, %v743_v1  ;;  %v706_v39 = vpop.f32.mrf.mxu0  ;;  %v3473_v36 = vadd.f32 %v1885_v37, %v1655_v51  ;;  %v1105_v55 = vadd.f32 %v3278_v5, %v832_v27 }
  0xb4   : > { %v2609_v61 = vpop.eup %2608  ;;  %2620 = vrcp.f32 %v1357_v28  ;;  %v1074_v40 = vadd.f32 %v3276_v4, %v706_v39  ;;  %v795_v26 = vpop.f32.mrf.mxu1  ;;  %2095 = vperm.xlu1 %2575, %v3220_v45  }
  0xb5   : > { %4466 = vst [vmem:[#allocation33_spill] sm:$0xff] %v3473_v36  ;;  %v3478_v24 = vpop.eup %2610  ;;  %2622 = vrcp.f32 %v2603_v29  ;;  %v1554_v35 = vsel %vm3388_vm3, %v2605_v14, %v2609_v61  ;;  %v1168_v2 = vsub.f32 0.0, %v1104_v42  ;;  %v1075_v1 = vadd.f32 %v3278_v5, %v795_v26  ;;  %2099 = vperm.xlu2 %2573, %v3217_v44   ;;  %2103 = vperm.xlu0 %2574, %v3232_v48   ;;  %v1836_v29 = vpop.permute.xlu2 %1835 }
  0xb6   : > { %v1786_v46 = vpop.permute.xlu1 %1785  ;;  %v3485_v51 = vpop.eup %2612  ;;  %2624 = vpow2.f32 %v3420_v6  ;;  %v1656_v45 = vmul.f32 %v3396_v59, %v1554_v35  ;;  %v1169_v28 = vsub.f32 0.0, %v1105_v55  ;;  %v1138_v37 = vsub.f32 0.0, %v1074_v40 }
  0xb7   : > { %v1781_v27 = vpop.permute.xlu0 %1780  ;;  %v3489_v39 = vpop.eup %2614  ;;  %2626 = vpow2.f32 %v3430_v62  ;;  %v1208_v26 = vmul.f32 1.442695, %v1137_v41  ;;  %v3493_v44 = vmul.f32 %v3290_v12, %v1821_v50  ;;  %v1139_v48 = vsub.f32 0.0, %v1075_v1 }
  0xb8   : > { %v3495_v14 = vpop.eup %2616  ;;  %2628 = vpow2.f32 %v1266_v30  ;;  %v3497_v42 = vadd.f32 %v1886_v60, %v1656_v45  ;;  %v3501_v6 = vmul.f32 %v3288_v11, %v3453_v8  ;;  %v1270_v61 = vmul.f32 1.442695, %v1168_v2 }
  0xb9   : > { %4467 = vst [vmem:[#allocation34_spill] sm:$0xff] %v3493_v44  ;;  %v3503_v55 = vpop.eup %2618  ;;  %2630 = vpow2.f32 %v1268_v0  ;;  %v3507_v41 = vmul.f32 %v3290_v12, %v3453_v8  ;;  %v3509_v62 = vmul.f32 1.442695, %v1169_v28  ;;  %v3512_v50 = vmul.f32 %v3288_v11, %v1836_v29  ;;  %v746_v30 = vpop.f32.mrf.mxu2 }
  0xba   : > { %4468 = vst [vmem:[#allocation35_spill] sm:$0xff] %v3495_v14  ;;  %v3514_v60 = vpop.eup %2620  ;;  %2632 = vpow2.f32 %v1206_v52  ;;  %v3516_v40 = vmul.f32 1.442695, %v1138_v37  ;;  %v3518_v35 = vmul.f32 1.442695, %v1139_v48  ;;  %v3521_v2 = vmul.f32 %v3290_v12, %v1836_v29  ;;  %v835_v0 = vpop.f32.mrf.mxu3 }
  0xbb   : > { %4469 = vst [vmem:[#allocation36_spill] sm:$0xff] %v3497_v42  ;;  %v3523_v1 = vpop.eup %2622  ;;  %2634 = vpow2.f32 %v1208_v26  ;;  %v3526_v8 = vmul.f32 %v3288_v11, %v1786_v46  ;;  %v1106_v45 = vadd.f32 %v3276_v4, %v746_v30  ;;  %v1107_v28 = vadd.f32 %v3278_v5, %v835_v0  ;;  %v1981_v26 = vld [vmem:[%s4425_s6] sm:$0x3] }
  0xbc   : > { %4470 = vst [vmem:[#allocation37_spill] sm:$0xff] %v3501_v6  ;;  %v2625_v52 = vpop.eup %2624  ;;  %2636 = vpow2.f32 %v1270_v61  ;;  %v3531_v37 = vmul.f32 %v3290_v12, %v1786_v46  ;;  %v3534_v29 = vmul.f32 %v3288_v11, %v1781_v27  ;;  %v797_v6 = vpop.f32.mrf.mxu1  ;;  %2107 = vperm.xlu1 %2575, %v3229_v47   ;;  %v3543_v47 = vmul.f32 %v3290_v12, %v1781_v27 }
  0xbd   : > { %4471 = vst [vmem:[#allocation38_spill] sm:$0xff] %v3507_v41  ;;  %v708_v41 = vpop.f32.mrf.mxu0  ;;  %v2627_v30 = vpop.eup %2626  ;;  %v1326_v0 = vadd.f32 1.0, %v2625_v52  ;;  %2638 = vrcp.f32 %v2625_v52  ;;  %v1171_v61 = vsub.f32 0.0, %v1107_v28  ;;  %v1077_v36 = vadd.f32 %v3278_v5, %v797_v6 }
  0xbe   : > { %4472 = vst [vmem:[#allocation39_spill] sm:$0xff] %v3512_v50  ;;  %v1076_v48 = vadd.f32 %v3276_v4, %v708_v41  ;;  %v1801_v50 = vpop.permute.xlu1 %1800  ;;  %v2629_v46 = vpop.eup %2628  ;;  %v1327_v44 = vadd.f32 1.0, %v2627_v30  ;;  %2640 = vrcp.f32 %v2627_v30  ;;  %v3545_v38 = vperm.slane %v1981_v26, 0 }
  0xbf   : > { %4473 = vst [vmem:[#allocation40_spill] sm:$0xff] %v3514_v60  ;;  %v2631_v41 = vpop.eup %2630  ;;  %2642 = vrcp.f32 %v1326_v0  ;;  %v1358_v3 = vadd.f32 1.0, %v2629_v46  ;;  %v1796_v10 = vpop.permute.xlu0 %1795  ;;  %v3547_v28 = vperm.slane %v1981_v26, 1  ;;  %v4476_v6 = vsel %vm3388_vm3, %v3409_v56, %v3428_v25 }
  0xc0   : > { %4474 = vst [vmem:[#allocation41_spill] sm:$0xff] %v3521_v2  ;;  %v1170_v2 = vsub.f32 0.0, %v1106_v45  ;;  %v1140_v42 = vsub.f32 0.0, %v1076_v48  ;;  %v2633_v52 = vpop.eup %2632  ;;  %2644 = vrcp.f32 %v1327_v44  ;;  %v1359_v45 = vadd.f32 1.0, %v2631_v41  ;;  %v1984_v54 = vpop.permute.xlu2 %1983 }
  0xc1   : > { %4475 = vst [vmem:[#allocation42_spill] sm:$0xff] %v3523_v1  ;;  %v1624_v48 = vmul.f32 %v3396_v59, %v4476_v6  ;;  %v2635_v30 = vpop.eup %2634  ;;  %2646 = vrcp.f32 %v1358_v3  ;;  %v1328_v27 = vadd.f32 1.0, %v2633_v52  ;;  %v3557_v7 = vmul.f32 1.442695, %v1171_v61  ;;  %v748_v31 = vpop.f32.mrf.mxu2 }
  0xc2   : > { %v3555_v0 = vmul.f32 1.442695, %v1170_v2  ;;  %v2637_v44 = vpop.eup %2636  ;;  %2648 = vrcp.f32 %v2629_v46  ;;  %v3560_v26 = vmul.f32 1.442695, %v1140_v42  ;;  %v1141_v9 = vsub.f32 0.0, %v1077_v36  ;;  %v837_v56 = vpop.f32.mrf.mxu3 }
  0xc3   : > { %v3563_v21 = vmul.f32 %v3288_v11, %v1801_v50  ;;  %v3565_v25 = vpop.eup %2638  ;;  %2650 = vrcp.f32 %v1359_v45  ;;  %v1329_v3 = vadd.f32 1.0, %v2635_v30  ;;  %v1360_v2 = vadd.f32 1.0, %v2637_v44 }
  0xc4   : > { %v1917_v61 = vadd.f32 %v3329_v43, %v3460_v53  ;;  %v3569_v16 = vpop.eup %2640  ;;  %2652 = vrcp.f32 %v2631_v41  ;;  %v1918_v42 = vadd.f32 %v3332_v49, %v1624_v48  ;;  %v2115_v36 = vmul.f32 %v3545_v38, %v1984_v54 }
  0xc5   : > { %4477 = vst [vmem:[#allocation43_spill] sm:$0xff] %v3563_v21  ;;  %v711_v6 = vpop.f32.mrf.mxu0  ;;  %v2116_v46 = vmul.f32 %v3547_v28, %v1984_v54  ;;  %v800_v21 = vpop.f32.mrf.mxu1  ;;  %2654 = vrcp.f32 %v1328_v27  ;;  %v1108_v43 = vadd.f32 %v3276_v4, %v748_v31  ;;  %v1109_v53 = vadd.f32 %v3278_v5, %v837_v56 }
  0xc6   : > { %v3574_v20 = vpop.eup %2642  ;;  %v1078_v49 = vadd.f32 %v3276_v4, %v711_v6  ;;  %2656 = vrcp.f32 %v2633_v52  ;;  %v2179_v54 = vadd.f32 %v2115_v36, %v1917_v61  ;;  %v1079_v48 = vadd.f32 %v3278_v5, %v800_v21  ;;  %v1816_v1 = vpop.permute.xlu1 %1815 }
  0xc7   : > { %v3584_v41 = vpop.eup %2644  ;;  %v2180_v45 = vadd.f32 %v2116_v46, %v1918_v42  ;;  %2658 = vrcp.f32 %v1329_v3  ;;  %v3588_v32 = vmul.f32 %v3290_v12, %v1801_v50  ;;  %v1172_v27 = vsub.f32 0.0, %v1108_v43  ;;  %v1811_v61 = vpop.permute.xlu0 %1810 }
  0xc8   : > { %v2647_v19 = vpop.eup %2646  ;;  %v1173_v31 = vsub.f32 0.0, %v1109_v53  ;;  %2660 = vrcp.f32 %v2635_v30  ;;  %v1216_v60 = vmul.f32 1.442695, %v1141_v9  ;;  %2243 = vst [vmem:[%s3579_s20] sm:$0xff] %v2179_v54  ;;  %v1142_v6 = vsub.f32 0.0, %v1078_v49 }
  0xc9   : > { %4478 = vst [vmem:[#allocation44_spill] sm:$0xff] %v3588_v32  ;;  %v2649_v56 = vpop.eup %2648  ;;  %v1143_v14 = vsub.f32 0.0, %v1079_v48  ;;  %2662 = vrcp.f32 %v1360_v2  ;;  %v3594_v3 = vmul.f32 %v3288_v11, %v1796_v10  ;;  %v3597_v50 = vmul.f32 %v3290_v12, %v1796_v10  ;;  %v751_v36 = vpop.f32.mrf.mxu2 }
  0xca   : > { %v2651_v52 = vpop.eup %2650  ;;  %v1557_v21 = vsel %vm3373_vm2, %v2649_v56, %v2647_v19  ;;  %2244 = vst [vmem:[%s3579_s20 + $0x8] sm:$0xff] %v2180_v45  ;;  %2664 = vrcp.f32 %v2637_v44  ;;  %v3600_v30 = vmul.f32 1.442695, %v1172_v27  ;;  %v3603_v9 = vmul.f32 %v3288_v11, %v1816_v1  ;;  %v840_v19 = vpop.f32.mrf.mxu3 }
  0xcb   : > { %v2653_v42 = vpop.eup %2652  ;;  %v3606_v2 = vmul.f32 %v3290_v12, %v1816_v1  ;;  %2666 = vpow2.f32 %v3509_v62  ;;  %v1659_v43 = vmul.f32 %v3383_v15, %v1557_v21  ;;  %v3612_v53 = vmul.f32 1.442695, %v1173_v31  ;;  %v1996_v45 = vpop.permute.xlu2 %1995 }
  0xcc   : > { %4479 = vst [vmem:[#allocation45_spill] sm:$0xff] %v3603_v9  ;;  %v2655_v46 = vpop.eup %2654  ;;  %v1558_v10 = vsel %vm3388_vm3, %v2653_v42, %v2651_v52  ;;  %2668 = vpow2.f32 %v3516_v40  ;;  %v3615_v49 = vmul.f32 1.442695, %v1142_v6  ;;  %v3617_v54 = vmul.f32 1.442695, %v1143_v14 }
  0xcd   : > { %4480 = vst [vmem:[#allocation46_spill] sm:$0xff] %v3606_v2  ;;  %v2657_v44 = vpop.eup %2656  ;;  %v3620_v1 = vmul.f32 %v3288_v11, %v1811_v61  ;;  %v713_v48 = vpop.f32.mrf.mxu0  ;;  %2670 = vpow2.f32 %v3518_v35  ;;  %v3624_v27 = vmul.f32 %v3290_v12, %v1811_v61  ;;  %v1110_v40 = vadd.f32 %v3276_v4, %v751_v36 }
  0xce   : > { %v2659_v62 = vpop.eup %2658  ;;  %v1527_v31 = vsel %vm3373_vm2, %v2657_v44, %v2655_v46  ;;  %v802_v56 = vpop.f32.mrf.mxu1  ;;  %v1660_v14 = vmul.f32 %v3396_v59, %v1558_v10  ;;  %2672 = vpow2.f32 %v3555_v0  ;;  %v1111_v21 = vadd.f32 %v3278_v5, %v840_v19 }
  0xcf   : > { %4481 = vst [vmem:[#allocation47_spill] sm:$0xff] %v3620_v1  ;;  %v2661_v6 = vpop.eup %2660  ;;  %v1629_v52 = vmul.f32 %v3383_v15, %v1527_v31  ;;  %2674 = vpow2.f32 %v3557_v7  ;;  %v2121_v61 = vmul.f32 %v3545_v38, %v1996_v45  ;;  %v1080_v36 = vadd.f32 %v3276_v4, %v713_v48  ;;  %v1826_v1 = vpop.permute.xlu0 %1825 }
  0xd0   : > { %4482 = vst [vmem:[#allocation48_spill] sm:$0xff] %v3624_v27  ;;  %v2663_v42 = vpop.eup %2662  ;;  %v1528_v35 = vsel %vm3388_vm3, %v2661_v6, %v2659_v62  ;;  %2676 = vpow2.f32 %v3560_v26  ;;  %v2122_v0 = vmul.f32 %v3547_v28, %v1996_v45  ;;  %v1174_v44 = vsub.f32 0.0, %v1110_v40  ;;  %v1831_v27 = vpop.permute.xlu1 %1830 }
  0xd1   : > { %v2665_v46 = vpop.eup %2664  ;;  %v1630_v10 = vmul.f32 %v3396_v59, %v1528_v35  ;;  %2678 = vpow2.f32 %v1216_v60  ;;  %v1923_v7 = vadd.f32 %v3344_v57, %v1629_v52  ;;  %v1175_v62 = vsub.f32 0.0, %v1111_v21  ;;  %v753_v21 = vpop.f32.mrf.mxu2 }
  0xd2   : > { %v2667_v31 = vpop.eup %2666  ;;  %v1559_v19 = vsel %vm3373_vm2, %v2665_v46, %v2663_v42  ;;  %v1144_v40 = vsub.f32 0.0, %v1080_v36  ;;  %v842_v46 = vpop.f32.mrf.mxu3 }
  0xd3   : > { %v2669_v6 = vpop.eup %2668  ;;  %v1361_v2 = vadd.f32 1.0, %v2667_v31  ;;  %2680 = vrcp.f32 %v2667_v31  ;;  %v1661_v48 = vmul.f32 %v3383_v15, %v1559_v19  ;;  %v1924_v26 = vadd.f32 %v3347_v58, %v1630_v10 }
  0xd4   : > { %v2671_v9 = vpop.eup %2670  ;;  %v1330_v35 = vadd.f32 1.0, %v2669_v6  ;;  %2682 = vrcp.f32 %v2669_v6  ;;  %v2185_v45 = vadd.f32 %v2121_v61, %v1923_v7  ;;  %v3650_v58 = vadd.f32 %v3534_v29, %v1659_v43 }
  0xd5   : > { %v2673_v42 = vpop.eup %2672  ;;  %2684 = vrcp.f32 %v1361_v2  ;;  %v1331_v57 = vadd.f32 1.0, %v2671_v9  ;;  %v3647_v60 = vadd.f32 %v3526_v8, %v1661_v48  ;;  %v2186_v52 = vadd.f32 %v2122_v0, %v1924_v26  ;;  %v716_v0 = vpop.f32.mrf.mxu0 }
  0xd6   : > { %v2675_v31 = vpop.eup %2674  ;;  %2686 = vrcp.f32 %v1330_v35  ;;  %v1362_v10 = vadd.f32 1.0, %v2673_v42  ;;  %2249 = vst [vmem:[%s3579_s20 + $0x30] sm:$0xff] %v2185_v45  ;;  %v1081_v61 = vadd.f32 %v3278_v5, %v802_v56  ;;  %v3655_v2 = vadd.f32 %v3543_v47, %v1660_v14  ;;  %v805_v56 = vpop.f32.mrf.mxu1 }
  0xd7   : > { %v2677_v36 = vpop.eup %2676  ;;  %2688 = vrcp.f32 %v1331_v57  ;;  %v1363_v19 = vadd.f32 1.0, %v2675_v31  ;;  %2250 = vst [vmem:[%s3579_s20 + $0x38] sm:$0xff] %v2186_v52  ;;  %v3658_v8 = vmul.f32 1.442695, %v1174_v44  ;;  %v3660_v6 = vmul.f32 1.442695, %v1175_v62  ;;  %v2004_v62 = vpop.permute.xlu2 %2003 }
  0xd8   : > { %v2679_v7 = vpop.eup %2678  ;;  %2690 = vrcp.f32 %v2671_v9  ;;  %v3662_v29 = vmul.f32 1.442695, %v1144_v40  ;;  %v3665_v43 = vmul.f32 %v3288_v11, %v1831_v27  ;;  %v1332_v26 = vadd.f32 1.0, %v2677_v36 }
  0xd9   : > { %v2681_v48 = vpop.eup %2680  ;;  %2692 = vrcp.f32 %v1362_v10  ;;  %v1145_v47 = vsub.f32 0.0, %v1081_v61  ;;  %v3668_v14 = vmul.f32 %v3290_v12, %v1831_v27  ;;  %v1333_v35 = vadd.f32 1.0, %v2679_v7 }
  0xda   : > { %4483 = vst [vmem:[#allocation49_spill] sm:$0xff] %v3665_v43  ;;  %v3670_v44 = vpop.eup %2682  ;;  %2694 = vrcp.f32 %v2673_v42  ;;  %v3673_v9 = vmul.f32 %v3288_v11, %v1826_v1  ;;  %v1112_v45 = vadd.f32 %v3276_v4, %v753_v21  ;;  %v1113_v57 = vadd.f32 %v3278_v5, %v842_v46 }
  0xdb   : > { %4484 = vst [vmem:[#allocation50_spill] sm:$0xff] %v3668_v14  ;;  %v2685_v40 = vpop.eup %2684  ;;  %2696 = vrcp.f32 %v1363_v19  ;;  %v1082_v52 = vadd.f32 %v3276_v4, %v716_v0  ;;  %v1083_v10 = vadd.f32 %v3278_v5, %v805_v56  ;;  %v3684_v61 = vmul.f32 %v3290_v12, %v1826_v1  ;;  %v845_v1 = vpop.f32.mrf.mxu3 }
  0xdc   : > { %4485 = vst [vmem:[#allocation51_spill] sm:$0xff] %v3673_v9  ;;  %v3679_v27 = vpop.eup %2686  ;;  %v1560_v42 = vsel %vm3388_vm3, %v2681_v48, %v2685_v40  ;;  %2698 = vrcp.f32 %v2675_v31  ;;  %v1176_v14 = vsub.f32 0.0, %v1112_v45  ;;  %v1177_v46 = vsub.f32 0.0, %v1113_v57  ;;  %v756_v48 = vpop.f32.mrf.mxu2 }
  0xdd   : > { %4486 = vst [vmem:[#allocation52_spill] sm:$0xff] %v3684_v61  ;;  %v3686_v43 = vpop.eup %2688  ;;  %v1662_v21 = vmul.f32 %v3396_v59, %v1560_v42  ;;  %2700 = vrcp.f32 %v1332_v26  ;;  %v1146_v19 = vsub.f32 0.0, %v1082_v52  ;;  %v3691_v56 = vmul.f32 1.442695, %v1145_v47  ;;  %v718_v47 = vpop.f32.mrf.mxu0 }
  0xde   : > { %v3689_v0 = vpop.eup %2690  ;;  %2702 = vrcp.f32 %v2677_v36  ;;  %v3694_v9 = vmul.f32 %v3545_v38, %v2004_v62  ;;  %v1147_v31 = vsub.f32 0.0, %v1083_v10  ;;  %v3702_v26 = vmul.f32 %v3547_v28, %v2004_v62  ;;  %v1841_v36 = vpop.permute.xlu0 %1840 }
  0xdf   : > { %v3696_v40 = vpop.eup %2692  ;;  %v3699_v45 = vadd.f32 %v3531_v37, %v1662_v21  ;;  %2704 = vrcp.f32 %v1333_v35  ;;  %v3704_v57 = vmul.f32 1.442695, %v1176_v14  ;;  %v3708_v42 = vmul.f32 1.442695, %v1177_v46 }
  0xe0   : > { %v3706_v52 = vpop.eup %2694  ;;  %2706 = vrcp.f32 %v2679_v7  ;;  %v3710_v10 = vmul.f32 1.442695, %v1146_v19  ;;  %v3712_v61 = vmul.f32 1.442695, %v1147_v31  ;;  %v1114_v37 = vadd.f32 %v3276_v4, %v756_v48  ;;  %v3723_v7 = vpop.permute.xlu1 %1845 }
  0xe1   : > { %v3714_v32 = vpop.eup %2696  ;;  %2708 = vpow2.f32 %v3600_v30  ;;  %v1115_v14 = vadd.f32 %v3278_v5, %v845_v1  ;;  %v1084_v35 = vadd.f32 %v3276_v4, %v718_v47  ;;  %4487 = vst [vmem:[#allocation53_spill] sm:$0xff] %v3723_v7  ;;  %v3726_v21 = vmul.f32 %v3288_v11, %v1841_v36  ;;  %v807_v11 = vpop.f32.mrf.mxu1 }
  0xe2   : > { %v3720_v62 = vpop.eup %2698  ;;  %2710 = vpow2.f32 %v3612_v53  ;;  %v1525_v30 = vsel %vm3373_vm2, %v3565_v25, %v3574_v20  ;;  %v1526_v46 = vsel %vm3388_vm3, %v3569_v16, %v3584_v41  ;;  %v3738_v53 = vmul.f32 %v3290_v12, %v1841_v36  ;;  %v2016_v20 = vpop.permute.xlu2 %2015 }
  0xe3   : > { %4488 = vst [vmem:[#allocation54_spill] sm:$0xff] %v3726_v21  ;;  %v2701_v19 = vpop.eup %2700  ;;  %2712 = vpow2.f32 %v3615_v49  ;;  %v1178_v31 = vsub.f32 0.0, %v1114_v37  ;;  %v1523_v48 = vsel %vm3373_vm2, %v3469_v18, %v3478_v24  ;;  %v1179_v25 = vsub.f32 0.0, %v1115_v14 }
  0xe4   : > { %4489 = vst [vmem:[#allocation55_spill] sm:$0xff] %v3738_v53  ;;  %v2703_v1 = vpop.eup %2702  ;;  %2714 = vpow2.f32 %v3617_v54  ;;  %v1148_v47 = vsub.f32 0.0, %v1084_v35  ;;  %v1627_v16 = vmul.f32 %v3383_v15, %v1525_v30  ;;  %v1628_v36 = vmul.f32 %v3396_v59, %v1526_v46 }
  0xe5   : > { %v2705_v41 = vpop.eup %2704  ;;  %2716 = vpow2.f32 %v3658_v8  ;;  %v1531_v49 = vsel %vm3373_vm2, %v2703_v1, %v2701_v19  ;;  %v1524_v24 = vsel %vm3388_vm3, %v3485_v51, %v3489_v39  ;;  %v3757_v37 = vmul.f32 %v3545_v38, %v2016_v20 }
  0xe6   : > { %v2707_v18 = vpop.eup %2706  ;;  %2718 = vpow2.f32 %v3660_v6  ;;  %v1633_v54 = vmul.f32 %v3383_v15, %v1531_v49  ;;  %v3760_v8 = vmul.f32 %v3547_v28, %v2016_v20  ;;  %v3765_v30 = vmul.f32 1.442695, %v1178_v31 }
  0xe7   : > { %v2709_v14 = vpop.eup %2708  ;;  %2720 = vpow2.f32 %v3662_v29  ;;  %v1532_v35 = vsel %vm3388_vm3, %v2707_v18, %v2705_v41  ;;  %v1085_v51 = vadd.f32 %v3278_v5, %v807_v11  ;;  %v3770_v49 = vmul.f32 1.442695, %v1179_v25 }
  0xe8   : > { %v2711_v39 = vpop.eup %2710  ;;  %v1364_v6 = vadd.f32 1.0, %v2709_v14  ;;  %2722 = vrcp.f32 %v2709_v14  ;;  %v1634_v46 = vmul.f32 %v3396_v59, %v1532_v35  ;;  %v1927_v19 = vadd.f32 %v3304_v22, %v1633_v54 }
  0xe9   : > { %v2713_v1 = vpop.eup %2712  ;;  %v1365_v20 = vadd.f32 1.0, %v2711_v39  ;;  %2724 = vrcp.f32 %v2711_v39  ;;  %v1149_v29 = vsub.f32 0.0, %v1085_v51  ;;  %v3774_v35 = vmul.f32 1.442695, %v1148_v47  ;;  %v1992_v39 = vpop.permute.xlu1 %1991 }
  0xea   : > { %v2715_v12 = vpop.eup %2714  ;;  %2726 = vrcp.f32 %v1364_v6  ;;  %v1334_v31 = vadd.f32 1.0, %v2713_v1  ;;  %v1928_v41 = vadd.f32 %v3307_v23, %v1634_v46  ;;  %v2189_v11 = vadd.f32 %v3694_v9, %v1927_v19 }
  0xeb   : > { %v2717_v18 = vpop.eup %2716  ;;  %2728 = vrcp.f32 %v1365_v20  ;;  %v1335_v14 = vadd.f32 1.0, %v2715_v12  ;;  %v1921_v22 = vadd.f32 %v3322_v33, %v1627_v16  ;;  %v1625_v6 = vmul.f32 %v3383_v15, %v1523_v48 }
  0xec   : > { %v2719_v54 = vpop.eup %2718  ;;  %2730 = vrcp.f32 %v1334_v31  ;;  %v1366_v25 = vadd.f32 1.0, %v2717_v18  ;;  %v2190_v51 = vadd.f32 %v3702_v26, %v1928_v41  ;;  %2253 = vst [vmem:[%s3579_s20 + $0x50] sm:$0xff] %v2189_v11  ;;  %v3780_v9 = vmul.f32 1.442695, %v1149_v29  ;;  %v2028_v26 = vpop.permute.xlu2 %2027 }
  0xed   : > { %v2721_v23 = vpop.eup %2720  ;;  %2732 = vrcp.f32 %v2713_v1  ;;  %v1922_v46 = vadd.f32 %v3325_v34, %v1628_v36  ;;  %v1529_v33 = vsel %vm3373_vm2, %v3670_v44, %v3679_v27  ;;  %v1367_v16 = vadd.f32 1.0, %v2719_v54 }
  0xee   : > { %v3787_v47 = vpop.eup %2722  ;;  %2734 = vrcp.f32 %v1335_v14  ;;  %2254 = vst [vmem:[%s3579_s20 + $0x58] sm:$0xff] %v2190_v51  ;;  %v1626_v19 = vmul.f32 %v3396_v59, %v1524_v24  ;;  %v1530_v48 = vsel %vm3388_vm3, %v3689_v0, %v3686_v43  ;;  %v1336_v34 = vadd.f32 1.0, %v2721_v23  ;;  %v1988_v14 = vpop.permute.xlu0 %1987  ;;  %v4491_v51 = vld [vmem:[#allocation40_spill] sm:$0xff] }
  0xef   : > { %v3795_v1 = vpop.eup %2724  ;;  %2736 = vrcp.f32 %v2715_v12  ;;  %v2119_v36 = vmul.f32 %v3545_v38, %v1992_v39  ;;  %v2120_v44 = vmul.f32 %v3547_v28, %v1992_v39  ;;  %v3802_v20 = vmul.f32 %v3545_v38, %v2028_v26  ;;  %v4492_v39 = vld [vmem:[#allocation42_spill] sm:$0xff] }
  0xf0   : > { %v3799_v27 = vpop.eup %2726  ;;  %2738 = vrcp.f32 %v1366_v25  ;;  %v1919_v24 = vadd.f32 %v3353_v63, %v1625_v6  ;;  %v1631_v29 = vmul.f32 %v3383_v15, %v1529_v33  ;;  %v1632_v31 = vmul.f32 %v3396_v59, %v1530_v48  ;;  %v4490_v25 = vld [vmem:[#allocation35_spill] sm:$0xff]  ;;  %v4493_v6 = vld [vmem:[#allocation13_spill] sm:$0xff] }
  0xf1   : > { %v3806_v43 = vpop.eup %2728  ;;  %2740 = vrcp.f32 %v2717_v18  ;;  %v2183_v12 = vadd.f32 %v2119_v36, %v1921_v22  ;;  %v2184_v0 = vadd.f32 %v2120_v44, %v1922_v46  ;;  %v3810_v11 = vmul.f32 %v3547_v28, %v2028_v26  ;;  %v4494_v33 = vld [vmem:[#allocation5_spill] sm:$0xff]  ;;  %v4495_v26 = vld [vmem:[#allocation6_spill] sm:$0xff] }
  0xf2   : > { %v2731_v41 = vpop.eup %2730  ;;  %2742 = vrcp.f32 %v1367_v16  ;;  %v1555_v63 = vsel %vm3373_vm2, %v4490_v25, %v3503_v55  ;;  %v1556_v18 = vsel %vm3388_vm3, %v4492_v39, %v4491_v51  ;;  %v1920_v46 = vadd.f32 %v4493_v6, %v1626_v19  ;;  %v847_v51 = vpop.f32.mrf.mxu3 }
  0xf3   : > { %v2733_v22 = vpop.eup %2732  ;;  %2744 = vrcp.f32 %v2719_v54  ;;  %2247 = vst [vmem:[%s3579_s20 + $0x20] sm:$0xff] %v2183_v12  ;;  %v3823_v16 = vadd.f32 %v4494_v33, %v1631_v29  ;;  %v3826_v48 = vadd.f32 %v4495_v26, %v1632_v31  ;;  %v1657_v55 = vmul.f32 %v3383_v15, %v1555_v63  ;;  %v758_v31 = vpop.f32.mrf.mxu2  ;;  %v4497_v33 = vld [vmem:[#allocation19_spill] sm:$0xff] }
  0xf4   : > { %v2735_v36 = vpop.eup %2734  ;;  %2746 = vrcp.f32 %v1336_v34  ;;  %2248 = vst [vmem:[%s3579_s20 + $0x28] sm:$0xff] %v2184_v0  ;;  %v1658_v44 = vmul.f32 %v3396_v59, %v1556_v18  ;;  %v1561_v54 = vsel %vm3373_vm2, %v3706_v52, %v3696_v40  ;;  %v2117_v19 = vmul.f32 %v3545_v38, %v1988_v14 }
  0xf5   : > { %v2737_v12 = vpop.eup %2736  ;;  %2748 = vrcp.f32 %v2721_v23  ;;  %v2118_v29 = vmul.f32 %v3547_v28, %v1988_v14  ;;  %v1533_v34 = vsel %vm3373_vm2, %v2733_v22, %v2731_v41  ;;  %v1116_v25 = vadd.f32 %v3276_v4, %v758_v31 }
  0xf6   : > { %v3839_v0 = vpop.eup %2738  ;;  %2750 = vpow2.f32 %v3691_v56  ;;  %v1534_v40 = vsel %vm3388_vm3, %v2737_v12, %v2735_v36  ;;  %v1635_v52 = vmul.f32 %v3383_v15, %v1533_v34  ;;  %v2181_v14 = vadd.f32 %v2117_v19, %v1919_v24  ;;  %v4496_v24 = vld [vmem:[#allocation18_spill] sm:$0xff]  ;;  %v810_v34 = vpop.f32.mrf.mxu1 }
  0xf7   : > { %v3846_v23 = vpop.eup %2740  ;;  %2752 = vpow2.f32 %v3704_v57  ;;  %v2182_v63 = vadd.f32 %v2118_v29, %v1920_v46  ;;  %v1636_v41 = vmul.f32 %v3396_v59, %v1534_v40  ;;  %v1180_v56 = vsub.f32 0.0, %v1116_v25  ;;  %v721_v57 = vpop.f32.mrf.mxu0 }
  0xf8   : > { %v3850_v39 = vpop.eup %2742  ;;  %2754 = vpow2.f32 %v3708_v42  ;;  %v1117_v18 = vadd.f32 %v3278_v5, %v847_v51  ;;  %v1562_v22 = vsel %vm3388_vm3, %v3720_v62, %v3714_v32  ;;  %2245 = vst [vmem:[%s3579_s20 + $0x10] sm:$0xff] %v2181_v14  ;;  %v3863_v46 = vadd.f32 %v4496_v24, %v1635_v52  ;;  %v4498_v42 = vld [vmem:[#allocation14_spill] sm:$0xff] }
  0xf9   : > { %v3858_v6 = vpop.eup %2744  ;;  %2756 = vpow2.f32 %v3710_v10  ;;  %v3866_v26 = vadd.f32 %v4497_v33, %v1636_v41  ;;  %v3869_v36 = vadd.f32 %v4498_v42, %v1657_v55  ;;  %2246 = vst [vmem:[%s3579_s20 + $0x18] sm:$0xff] %v2182_v63  ;;  %v1086_v62 = vadd.f32 %v3276_v4, %v721_v57  ;;  %v4499_v10 = vld [vmem:[#allocation15_spill] sm:$0xff] }
  0xfa   : > { %v3871_v12 = vpop.eup %2746  ;;  %2758 = vpow2.f32 %v3712_v61  ;;  %v1181_v32 = vsub.f32 0.0, %v1117_v18  ;;  %v3877_v19 = vadd.f32 %v4499_v10, %v1658_v44  ;;  %v3880_v31 = vmul.f32 1.442695, %v1180_v56  ;;  %v4500_v18 = vld [vmem:[#allocation20_spill] sm:$0xff] }
  0xfb   : > { %v2749_v29 = vpop.eup %2748  ;;  %2760 = vpow2.f32 %v3765_v30  ;;  %v1663_v55 = vmul.f32 %v3383_v15, %v1561_v54  ;;  %v3884_v25 = vmul.f32 %v3396_v59, %v1562_v22  ;;  %v1150_v61 = vsub.f32 0.0, %v1086_v62  ;;  %v2000_v54 = vpop.permute.xlu1 %1999 }
  0xfc   : > { %v2751_v40 = vpop.eup %2750  ;;  %2762 = vpow2.f32 %v3770_v49  ;;  %v1087_v52 = vadd.f32 %v3278_v5, %v810_v34  ;;  %v3892_v63 = vmul.f32 1.442695, %v1181_v32  ;;  %v1535_v51 = vsel %vm3373_vm2, %v2749_v29, %v3871_v12  ;;  %v2040_v32 = vpop.permute.xlu2 %2039 }
  0xfd   : > { %v2753_v30 = vpop.eup %2752  ;;  %v1337_v14 = vadd.f32 1.0, %v2751_v40  ;;  %2764 = vrcp.f32 %v2751_v40  ;;  %v3898_v22 = vadd.f32 %v4500_v18, %v1663_v55  ;;  %v2123_v33 = vmul.f32 %v3545_v38, %v2000_v54  ;;  %v2008_v62 = vpop.permute.xlu0 %2007 }
  0xfe   : > { %v2755_v41 = vpop.eup %2754  ;;  %v1368_v49 = vadd.f32 1.0, %v2753_v30  ;;  %2766 = vrcp.f32 %v2753_v30  ;;  %v1151_v56 = vsub.f32 0.0, %v1087_v52  ;;  %v2124_v42 = vmul.f32 %v3547_v28, %v2000_v54  ;;  %v761_v40 = vpop.f32.mrf.mxu2 }
  0xff   : > { %v2757_v57 = vpop.eup %2756  ;;  %2768 = vrcp.f32 %v1337_v14  ;;  %v1369_v24 = vadd.f32 1.0, %v2755_v41  ;;  %v3902_v12 = vmul.f32 1.442695, %v1150_v61  ;;  %v2187_v30 = vadd.f32 %v2123_v33, %v3823_v16  ;;  %v850_v54 = vpop.f32.mrf.mxu3 }
 0x100   : > { %v2759_v10 = vpop.eup %2758  ;;  %2770 = vrcp.f32 %v1368_v49  ;;  %v1338_v34 = vadd.f32 1.0, %v2757_v57  ;;  %v3904_v29 = vmul.f32 1.442695, %v1151_v56  ;;  %v2188_v14 = vadd.f32 %v2124_v42, %v3826_v48 }
 0x101   : > { %v2761_v55 = vpop.eup %2760  ;;  %2772 = vrcp.f32 %v1369_v24  ;;  %v1339_v52 = vadd.f32 1.0, %v2759_v10  ;;  %v3909_v49 = vmul.f32 %v3545_v38, %v2040_v32  ;;  %v2127_v61 = vmul.f32 %v3545_v38, %v2008_v62  ;;  %2251 = vst [vmem:[%s3579_s20 + $0x40] sm:$0xff] %v2187_v30 }
 0x102   : > { %v2763_v18 = vpop.eup %2762  ;;  %2774 = vrcp.f32 %v2755_v41  ;;  %v1370_v44 = vadd.f32 1.0, %v2761_v55  ;;  %v3914_v24 = vmul.f32 %v3547_v28, %v2040_v32  ;;  %v2128_v16 = vmul.f32 %v3547_v28, %v2008_v62  ;;  %2252 = vst [vmem:[%s3579_s20 + $0x48] sm:$0xff] %v2188_v14  ;;  %v4503_v14 = vld [vmem:[#allocation21_spill] sm:$0xff] }
 0x103   : > { %4501 = vst [vmem:[#allocation35_spill] sm:$0xff] %v3909_v49  ;;  %v2765_v56 = vpop.eup %2764  ;;  %2776 = vrcp.f32 %v1338_v34  ;;  %v1118_v48 = vadd.f32 %v3276_v4, %v761_v40  ;;  %v2191_v41 = vadd.f32 %v2127_v61, %v3863_v46  ;;  %v1119_v42 = vadd.f32 %v3278_v5, %v850_v54  ;;  %v723_v40 = vpop.f32.mrf.mxu0  ;;  %v4504_v61 = vld [vmem:[#allocation16_spill] sm:$0xff] }
 0x104   : > { %4502 = vst [vmem:[#allocation40_spill] sm:$0xff] %v3914_v24  ;;  %v2767_v33 = vpop.eup %2766  ;;  %2778 = vrcp.f32 %v2757_v57  ;;  %v1637_v53 = vmul.f32 %v3383_v15, %v1535_v51  ;;  %v1371_v30 = vadd.f32 1.0, %v2763_v18  ;;  %v2192_v32 = vadd.f32 %v2128_v16, %v3866_v26  ;;  %v812_v57 = vpop.f32.mrf.mxu1 }
 0x105   : > { %v2769_v34 = vpop.eup %2768  ;;  %2780 = vrcp.f32 %v1339_v52  ;;  %v1182_v7 = vsub.f32 0.0, %v1118_v48  ;;  %2255 = vst [vmem:[%s3579_s20 + $0x60] sm:$0xff] %v2191_v41  ;;  %v1183_v62 = vsub.f32 0.0, %v1119_v42  ;;  %v3928_v54 = vadd.f32 %v4503_v14, %v3884_v25 }
 0x106   : > { %v2771_v21 = vpop.eup %2770  ;;  %2782 = vrcp.f32 %v2759_v10  ;;  %v1536_v46 = vsel %vm3388_vm3, %v2765_v56, %v2769_v34  ;;  %2256 = vst [vmem:[%s3579_s20 + $0x68] sm:$0xff] %v2192_v32  ;;  %v1088_v52 = vadd.f32 %v3276_v4, %v723_v40  ;;  %v1089_v26 = vadd.f32 %v3278_v5, %v812_v57 }
 0x107   : > { %v2773_v51 = vpop.eup %2772  ;;  %2784 = vrcp.f32 %v1370_v44  ;;  %v1931_v10 = vadd.f32 %v4504_v61, %v1637_v53  ;;  %v1298_v48 = vmul.f32 1.442695, %v1182_v7  ;;  %v1638_v41 = vmul.f32 %v3396_v59, %v1536_v46  ;;  %v4505_v53 = vld [vmem:[#allocation17_spill] sm:$0xff] }
 0x108   : > { %v2775_v16 = vpop.eup %2774  ;;  %2786 = vrcp.f32 %v2761_v55  ;;  %v1567_v56 = vsel %vm3373_vm2, %v2767_v33, %v2771_v21  ;;  %v1152_v25 = vsub.f32 0.0, %v1088_v52  ;;  %v1153_v34 = vsub.f32 0.0, %v1089_v26  ;;  %v2012_v33 = vpop.permute.xlu1 %2011 }
 0x109   : > { %v2777_v42 = vpop.eup %2776  ;;  %2788 = vrcp.f32 %v1371_v30  ;;  %v1568_v44 = vsel %vm3388_vm3, %v2775_v16, %v2773_v51  ;;  %v3939_v40 = vmul.f32 1.442695, %v1183_v62  ;;  %v1932_v57 = vadd.f32 %v4505_v53, %v1638_v41  ;;  %v2052_v52 = vpop.permute.xlu2 %2051  ;;  %v4507_v16 = vld [vmem:[#allocation26_spill] sm:$0xff] }
 0x10a   : > { %v2779_v32 = vpop.eup %2778  ;;  %2790 = vrcp.f32 %v2763_v18  ;;  %v1669_v7 = vmul.f32 %v3383_v15, %v1567_v56  ;;  %v3946_v21 = vmul.f32 1.442695, %v1152_v25  ;;  %v1670_v30 = vmul.f32 %v3396_v59, %v1568_v44 }
 0x10b   : > { %v2781_v55 = vpop.eup %2780  ;;  %v1537_v46 = vsel %vm3373_vm2, %v2779_v32, %v2777_v42  ;;  %2792 = vpow2.f32 %v3774_v35  ;;  %v2129_v62 = vmul.f32 %v3545_v38, %v2012_v33  ;;  %v2130_v51 = vmul.f32 %v3547_v28, %v2012_v33  ;;  %v4509_v42 = vld [vmem:[#allocation7_spill] sm:$0xff]  ;;  %v2020_v32 = vpop.permute.xlu0 %2019 }
 0x10c   : > { %v2783_v14 = vpop.eup %2782  ;;  %v1639_v18 = vmul.f32 %v3383_v15, %v1537_v46  ;;  %2794 = vpow2.f32 %v3780_v9  ;;  %v3958_v61 = vmul.f32 1.442695, %v1153_v34  ;;  %v3961_v41 = vadd.f32 %v4507_v16, %v1669_v7  ;;  %v852_v46 = vpop.f32.mrf.mxu3 }
 0x10d   : > { %v3953_v26 = vpop.eup %2784  ;;  %v1538_v35 = vsel %vm3388_vm3, %v2783_v14, %v2781_v55  ;;  %2796 = vpow2.f32 %v3880_v31  ;;  %v2193_v44 = vadd.f32 %v2129_v62, %v1931_v10  ;;  %v2194_v31 = vadd.f32 %v2130_v51, %v1932_v57  ;;  %v763_v55 = vpop.f32.mrf.mxu2  ;;  %v4512_v14 = vld [vmem:[#allocation8_spill] sm:$0xff]  ;;  %v4513_v10 = vld [vmem:[#allocation27_spill] sm:$0xff] }
 0x10e   : > { %4506 = vst [vmem:[#allocation42_spill] sm:$0xff] %v3953_v26  ;;  %v3963_v56 = vpop.eup %2786  ;;  %v1640_v9 = vmul.f32 %v3396_v59, %v1538_v35  ;;  %v1933_v25 = vadd.f32 %v4509_v42, %v1639_v18  ;;  %2798 = vpow2.f32 %v3892_v63  ;;  %v2149_v34 = vmul.f32 %v3545_v38, %v2052_v52  ;;  %v726_v35 = vpop.f32.mrf.mxu0 }
 0x10f   : > { %4508 = vst [vmem:[#allocation13_spill] sm:$0xff] %v3963_v56  ;;  %v3968_v53 = vpop.eup %2788  ;;  %2800 = vpow2.f32 %v3902_v12  ;;  %v2150_v7 = vmul.f32 %v3547_v28, %v2052_v52  ;;  %v3980_v62 = vadd.f32 %v4513_v10, %v1670_v30  ;;  %v3986_v52 = vmul.f32 %v3545_v38, %v2020_v32 }
 0x110   : > { %4510 = vst [vmem:[#allocation5_spill] sm:$0xff] %v3968_v53  ;;  %v3973_v33 = vpop.eup %2790  ;;  %v1934_v18 = vadd.f32 %v4512_v14, %v1640_v9  ;;  %v2195_v63 = vadd.f32 %v3757_v37, %v1933_v25  ;;  %2802 = vpow2.f32 %v3904_v29  ;;  %v2213_v57 = vadd.f32 %v2149_v34, %v3869_v36  ;;  %v815_v37 = vpop.f32.mrf.mxu1 }
 0x111   : > { %4511 = vst [vmem:[#allocation6_spill] sm:$0xff] %v3973_v33  ;;  %v2793_v12 = vpop.eup %2792  ;;  %2804 = vpow2.f32 %v1298_v48  ;;  %v2214_v51 = vadd.f32 %v2150_v7, %v3877_v19  ;;  %v1120_v48 = vadd.f32 %v3276_v4, %v763_v55  ;;  %v1121_v36 = vadd.f32 %v3278_v5, %v852_v46 }
 0x112   : > { %2257 = vst [vmem:[%s3579_s20 + $0x70] sm:$0xff] %v2193_v44  ;;  %v2795_v16 = vpop.eup %2794  ;;  %v2196_v29 = vadd.f32 %v3760_v8, %v1934_v18  ;;  %v1340_v30 = vadd.f32 1.0, %v2793_v12  ;;  %2806 = vrcp.f32 %v2793_v12  ;;  %v1090_v19 = vadd.f32 %v3276_v4, %v726_v35  ;;  %v2024_v12 = vpop.permute.xlu1 %2023 }
 0x113   : > { %2258 = vst [vmem:[%s3579_s20 + $0x78] sm:$0xff] %v2194_v31  ;;  %v2797_v9 = vpop.eup %2796  ;;  %v1341_v42 = vadd.f32 1.0, %v2795_v16  ;;  %2808 = vrcp.f32 %v2795_v16  ;;  %v1184_v31 = vsub.f32 0.0, %v1120_v48  ;;  %v1091_v8 = vadd.f32 %v3278_v5, %v815_v37 }
 0x114   : > { %2259 = vst [vmem:[%s3579_s20 + $0x80] sm:$0xff] %v2195_v63  ;;  %v2799_v25 = vpop.eup %2798  ;;  %2810 = vrcp.f32 %v1340_v30  ;;  %v1372_v44 = vadd.f32 1.0, %v2797_v9  ;;  %v1185_v55 = vsub.f32 0.0, %v1121_v36  ;;  %v1154_v14 = vsub.f32 0.0, %v1090_v19  ;;  %v2032_v30 = vpop.permute.xlu0 %2031 }
 0x115   : > { %2277 = vst [vmem:[%s3579_s20 + $0x110] sm:$0xff] %v2213_v57  ;;  %v2801_v34 = vpop.eup %2800  ;;  %2812 = vrcp.f32 %v1341_v42  ;;  %v1373_v7 = vadd.f32 1.0, %v2799_v25  ;;  %v3998_v46 = vmul.f32 %v3547_v28, %v2020_v32  ;;  %v1155_v10 = vsub.f32 0.0, %v1091_v8  ;;  %v2064_v57 = vpop.permute.xlu2 %2063 }
 0x116   : > { %2260 = vst [vmem:[%s3579_s20 + $0x88] sm:$0xff] %v2196_v29  ;;  %v2803_v18 = vpop.eup %2802  ;;  %2814 = vrcp.f32 %v1372_v44  ;;  %v1342_v63 = vadd.f32 1.0, %v2801_v34  ;;  %v4000_v29 = vmul.f32 1.442695, %v1184_v31  ;;  %v4002_v37 = vmul.f32 1.442695, %v1185_v55  ;;  %v855_v8 = vpop.f32.mrf.mxu3 }
 0x117   : > { %2278 = vst [vmem:[%s3579_s20 + $0x118] sm:$0xff] %v2214_v51  ;;  %v2805_v35 = vpop.eup %2804  ;;  %2816 = vrcp.f32 %v2797_v9  ;;  %v1343_v16 = vadd.f32 1.0, %v2803_v18  ;;  %v766_v51 = vpop.f32.mrf.mxu2  ;;  %v4004_v36 = vmul.f32 1.442695, %v1154_v14  ;;  %v4006_v19 = vmul.f32 1.442695, %v1155_v10 }
 0x118   : > { %v2807_v48 = vpop.eup %2806  ;;  %2818 = vrcp.f32 %v1373_v7  ;;  %v1374_v42 = vadd.f32 1.0, %v2805_v35  ;;  %v4009_v44 = vmul.f32 %v3545_v38, %v2024_v12  ;;  %v2155_v9 = vmul.f32 %v3545_v38, %v2064_v57 }
 0x119   : > { %v2809_v32 = vpop.eup %2808  ;;  %2820 = vrcp.f32 %v2799_v25  ;;  %v2156_v31 = vmul.f32 %v3547_v28, %v2064_v57  ;;  %v4014_v24 = vmul.f32 %v3547_v28, %v2024_v12  ;;  %v4017_v7 = vmul.f32 %v3545_v38, %v2032_v30  ;;  %v728_v25 = vpop.f32.mrf.mxu0 }
 0x11a   : > { %v2811_v55 = vpop.eup %2810  ;;  %2822 = vrcp.f32 %v1342_v63  ;;  %v1122_v14 = vadd.f32 %v3276_v4, %v766_v51  ;;  %v2219_v57 = vadd.f32 %v2155_v9, %v3898_v22  ;;  %v817_v63 = vpop.f32.mrf.mxu1  ;;  %v1123_v22 = vadd.f32 %v3278_v5, %v855_v8 }
 0x11b   : > { %v2813_v10 = vpop.eup %2812  ;;  %2824 = vrcp.f32 %v2801_v34  ;;  %v1539_v49 = vsel %vm3373_vm2, %v2807_v48, %v2811_v55  ;;  %v2220_v33 = vadd.f32 %v2156_v31, %v3928_v54  ;;  %v1092_v54 = vadd.f32 %v3276_v4, %v728_v25  ;;  %v2036_v31 = vpop.permute.xlu1 %2035 }
 0x11c   : > { %v4024_v12 = vpop.eup %2814  ;;  %2826 = vrcp.f32 %v1343_v16  ;;  %v1540_v53 = vsel %vm3388_vm3, %v2809_v32, %v2813_v10  ;;  %v1641_v51 = vmul.f32 %v3383_v15, %v1539_v49  ;;  %v1186_v56 = vsub.f32 0.0, %v1122_v14  ;;  %2283 = vst [vmem:[%s3579_s20 + $0x140] sm:$0xff] %v2219_v57  ;;  %v4514_v16 = vld [vmem:[#allocation24_spill] sm:$0xff] }
 0x11d   : > { %v4029_v26 = vpop.eup %2816  ;;  %2828 = vrcp.f32 %v2803_v18  ;;  %v1642_v34 = vmul.f32 %v3396_v59, %v1540_v53  ;;  %2284 = vst [vmem:[%s3579_s20 + $0x148] sm:$0xff] %v2220_v33  ;;  %v4040_v32 = vmul.f32 %v3547_v28, %v2032_v30  ;;  %v1093_v49 = vadd.f32 %v3278_v5, %v817_v63  ;;  %v4515_v53 = vld [vmem:[#allocation25_spill] sm:$0xff]  ;;  %v2076_v10 = vpop.permute.xlu2 %2075 }
 0x11e   : > { %v4035_v48 = vpop.eup %2818  ;;  %2830 = vrcp.f32 %v1374_v42  ;;  %v1935_v9 = vadd.f32 %v4514_v16, %v1641_v51  ;;  %v1187_v8 = vsub.f32 0.0, %v1123_v22  ;;  %v1156_v14 = vsub.f32 0.0, %v1092_v54 }
 0x11f   : > { %v4043_v18 = vpop.eup %2820  ;;  %2832 = vrcp.f32 %v2805_v35  ;;  %v1936_v55 = vadd.f32 %v4515_v53, %v1642_v34  ;;  %v4048_v33 = vmul.f32 1.442695, %v1186_v56  ;;  %v1157_v30 = vsub.f32 0.0, %v1093_v49  ;;  %v4057_v34 = vpop.permute.xlu0 %2043 }
 0x120   : > { %v2823_v25 = vpop.eup %2822  ;;  %2834 = vpow2.f32 %v3939_v40  ;;  %v2197_v42 = vadd.f32 %v3986_v52, %v1935_v9  ;;  %v4052_v63 = vmul.f32 1.442695, %v1187_v8  ;;  %v4055_v51 = vmul.f32 %v3545_v38, %v2036_v31  ;;  %4516 = vst [vmem:[#allocation18_spill] sm:$0xff] %v4057_v34  ;;  %v768_v9 = vpop.f32.mrf.mxu2 }
 0x121   : > { %v2825_v57 = vpop.eup %2824  ;;  %2836 = vpow2.f32 %v3946_v21  ;;  %v2198_v35 = vadd.f32 %v3998_v46, %v1936_v55  ;;  %v4063_v52 = vmul.f32 1.442695, %v1156_v14  ;;  %v4065_v22 = vmul.f32 1.442695, %v1157_v30 }
 0x122   : > { %v2827_v40 = vpop.eup %2826  ;;  %2838 = vpow2.f32 %v3958_v61  ;;  %2261 = vst [vmem:[%s3579_s20 + $0x90] sm:$0xff] %v2197_v42  ;;  %v1541_v56 = vsel %vm3373_vm2, %v2825_v57, %v2823_v25  ;;  %v2161_v54 = vmul.f32 %v3545_v38, %v2076_v10  ;;  %v2162_v16 = vmul.f32 %v3547_v28, %v2076_v10  ;;  %v857_v61 = vpop.f32.mrf.mxu3  ;;  %v4519_v25 = vld [vmem:[#allocation22_spill] sm:$0xff] }
 0x123   : > { %v2829_v21 = vpop.eup %2828  ;;  %2262 = vst [vmem:[%s3579_s20 + $0x98] sm:$0xff] %v2198_v35  ;;  %2840 = vpow2.f32 %v4000_v29  ;;  %v1643_v46 = vmul.f32 %v3383_v15, %v1541_v56  ;;  %v4078_v55 = vmul.f32 %v3547_v28, %v2036_v31  ;;  %v4082_v29 = vmul.f32 %v3545_v38, %v4057_v34  ;;  %v731_v35 = vpop.f32.mrf.mxu0 }
 0x124   : > { %v4072_v49 = vpop.eup %2830  ;;  %2842 = vpow2.f32 %v4002_v37  ;;  %v1542_v53 = vsel %vm3388_vm3, %v2829_v21, %v2827_v40  ;;  %v2225_v37 = vadd.f32 %v2161_v54, %v3961_v41  ;;  %v2226_v31 = vadd.f32 %v2162_v16, %v3980_v62  ;;  %v820_v16 = vpop.f32.mrf.mxu1 }
 0x125   : > { %4517 = vst [vmem:[#allocation19_spill] sm:$0xff] %v4078_v55  ;;  %v4084_v8 = vpop.eup %2832  ;;  %2844 = vpow2.f32 %v4004_v36  ;;  %v1644_v14 = vmul.f32 %v3396_v59, %v1542_v53  ;;  %v1937_v42 = vadd.f32 %v4519_v25, %v1643_v46  ;;  %v1124_v10 = vadd.f32 %v3276_v4, %v768_v9  ;;  %v4520_v36 = vld [vmem:[#allocation23_spill] sm:$0xff] }
 0x126   : > { %4518 = vst [vmem:[#allocation14_spill] sm:$0xff] %v4082_v29  ;;  %v2835_v30 = vpop.eup %2834  ;;  %2846 = vpow2.f32 %v4006_v19  ;;  %v1125_v57 = vadd.f32 %v3278_v5, %v857_v61  ;;  %v1094_v25 = vadd.f32 %v3276_v4, %v731_v35  ;;  %v4522_v29 = vld [vmem:[#allocation36_spill] sm:$0xff] }
 0x127   : > { %v2837_v40 = vpop.eup %2836  ;;  %v1375_v56 = vadd.f32 1.0, %v2835_v30  ;;  %2848 = vrcp.f32 %v2835_v30  ;;  %v1938_v21 = vadd.f32 %v4520_v36, %v1644_v14  ;;  %v2199_v46 = vadd.f32 %v4009_v44, %v1937_v42  ;;  %2289 = vst [vmem:[%s3579_s20 + $0x170] sm:$0xff] %v2225_v37  ;;  %v2048_v14 = vpop.permute.xlu1 %2047 }
 0x128   : > { %v2839_v41 = vpop.eup %2838  ;;  %v1344_v54 = vadd.f32 1.0, %v2837_v40  ;;  %2850 = vrcp.f32 %v2837_v40  ;;  %2290 = vst [vmem:[%s3579_s20 + $0x178] sm:$0xff] %v2226_v31  ;;  %v1188_v19 = vsub.f32 0.0, %v1124_v10  ;;  %v1189_v62 = vsub.f32 0.0, %v1125_v57 }
 0x129   : > { %v2841_v9 = vpop.eup %2840  ;;  %2852 = vrcp.f32 %v1375_v56  ;;  %v1345_v61 = vadd.f32 1.0, %v2839_v41  ;;  %v2200_v53 = vadd.f32 %v4014_v24, %v1938_v21  ;;  %2263 = vst [vmem:[%s3579_s20 + $0xa0] sm:$0xff] %v2199_v46  ;;  %v1158_v57 = vsub.f32 0.0, %v1094_v25  ;;  %v2088_v21 = vpop.permute.xlu2 %2087  ;;  %v4521_v25 = vld [vmem:[#allocation33_spill] sm:$0xff] }
 0x12a   : > { %v2843_v30 = vpop.eup %2842  ;;  %2854 = vrcp.f32 %v1344_v54  ;;  %v1376_v44 = vadd.f32 1.0, %v2841_v9  ;;  %v4101_v42 = vmul.f32 1.442695, %v1188_v19  ;;  %v4103_v37 = vmul.f32 1.442695, %v1189_v62 }
 0x12b   : > { %v2845_v31 = vpop.eup %2844  ;;  %2856 = vrcp.f32 %v1345_v61  ;;  %v1377_v10 = vadd.f32 1.0, %v2843_v30  ;;  %2264 = vst [vmem:[%s3579_s20 + $0xa8] sm:$0xff] %v2200_v53  ;;  %v1095_v40 = vadd.f32 %v3278_v5, %v820_v16  ;;  %v2147_v35 = vmul.f32 %v3545_v38, %v2048_v14  ;;  %v2056_v61 = vpop.permute.xlu0 %2055 }
 0x12c   : > { %v2847_v56 = vpop.eup %2846  ;;  %2858 = vrcp.f32 %v2839_v41  ;;  %v1346_v24 = vadd.f32 1.0, %v2845_v31  ;;  %v2148_v36 = vmul.f32 %v3547_v28, %v2048_v14  ;;  %v4109_v19 = vmul.f32 1.442695, %v1158_v57 }
 0x12d   : > { %v2849_v46 = vpop.eup %2848  ;;  %2860 = vrcp.f32 %v1376_v44  ;;  %v1347_v54 = vadd.f32 1.0, %v2847_v56  ;;  %v1159_v62 = vsub.f32 0.0, %v1095_v40  ;;  %v2211_v16 = vadd.f32 %v2147_v35, %v4521_v25 }
 0x12e   : > { %v2851_v53 = vpop.eup %2850  ;;  %2862 = vrcp.f32 %v2841_v9  ;;  %v2212_v41 = vadd.f32 %v2148_v36, %v4522_v29  ;;  %v1573_v14 = vsel %vm3373_vm2, %v4084_v8, %v4072_v49  ;;  %v2167_v40 = vmul.f32 %v3545_v38, %v2088_v21 }
 0x12f   : > { %v2853_v34 = vpop.eup %2852  ;;  %2864 = vrcp.f32 %v1377_v10  ;;  %v4117_v44 = vmul.f32 1.442695, %v1159_v62  ;;  %v1675_v57 = vmul.f32 %v3383_v15, %v1573_v14  ;;  %2275 = vst [vmem:[%s3579_s20 + $0x100] sm:$0xff] %v2211_v16  ;;  %v2168_v9 = vmul.f32 %v3547_v28, %v2088_v21  ;;  %v4523_v10 = vld [vmem:[#allocation32_spill] sm:$0xff]  ;;  %v860_v16 = vpop.f32.mrf.mxu3 }
 0x130   : > { %v2855_v55 = vpop.eup %2854  ;;  %2866 = vrcp.f32 %v2843_v30  ;;  %v1574_v29 = vsel %vm3388_vm3, %v2849_v46, %v2853_v34  ;;  %v2151_v35 = vmul.f32 %v3545_v38, %v2056_v61  ;;  %2276 = vst [vmem:[%s3579_s20 + $0x108] sm:$0xff] %v2212_v41  ;;  %v2152_v34 = vmul.f32 %v3547_v28, %v2056_v61  ;;  %v771_v46 = vpop.f32.mrf.mxu2 }
 0x131   : > { %v2857_v36 = vpop.eup %2856  ;;  %v1543_v49 = vsel %vm3373_vm2, %v2851_v53, %v2855_v55  ;;  %2868 = vrcp.f32 %v1346_v24  ;;  %v1676_v8 = vmul.f32 %v3396_v59, %v1574_v29  ;;  %v1969_v62 = vadd.f32 %v4523_v10, %v1675_v57  ;;  %v4524_v24 = vld [vmem:[#allocation34_spill] sm:$0xff]  ;;  %v733_v57 = vpop.f32.mrf.mxu0 }
 0x132   : > { %v2859_v25 = vpop.eup %2858  ;;  %v1645_v30 = vmul.f32 %v3383_v15, %v1543_v49  ;;  %2870 = vrcp.f32 %v2845_v31  ;;  %v2215_v21 = vadd.f32 %v2151_v35, %v3650_v58  ;;  %v4525_v31 = vld [vmem:[#allocation9_spill] sm:$0xff]  ;;  %v2216_v58 = vadd.f32 %v2152_v34, %v3655_v2  ;;  %v822_v35 = vpop.f32.mrf.mxu1  ;;  %v4526_v2 = vld [vmem:[#allocation10_spill] sm:$0xff] }
 0x133   : > { %v4134_v14 = vpop.eup %2860  ;;  %v1544_v55 = vsel %vm3388_vm3, %v2859_v25, %v2857_v36  ;;  %2872 = vrcp.f32 %v1347_v54  ;;  %v1970_v53 = vadd.f32 %v4524_v24, %v1676_v8  ;;  %v2231_v41 = vadd.f32 %v2167_v40, %v1969_v62  ;;  %v2060_v8 = vpop.permute.xlu1 %2059 }
 0x134   : > { %v4139_v29 = vpop.eup %2862  ;;  %v1939_v49 = vadd.f32 %v4525_v31, %v1645_v30  ;;  %v1646_v61 = vmul.f32 %v3396_v59, %v1544_v55  ;;  %2874 = vrcp.f32 %v2847_v56  ;;  %2279 = vst [vmem:[%s3579_s20 + $0x120] sm:$0xff] %v2215_v21  ;;  %v1126_v40 = vadd.f32 %v3276_v4, %v771_v46 }
 0x135   : > { %v4145_v10 = vpop.eup %2864  ;;  %2876 = vpow2.f32 %v4048_v33  ;;  %v2232_v54 = vadd.f32 %v2168_v9, %v1970_v53  ;;  %2295 = vst [vmem:[%s3579_s20 + $0x1a0] sm:$0xff] %v2231_v41  ;;  %v1127_v36 = vadd.f32 %v3278_v5, %v860_v16  ;;  %v1096_v30 = vadd.f32 %v3276_v4, %v733_v57 }
 0x136   : > { %v4151_v62 = vpop.eup %2866  ;;  %v2201_v56 = vadd.f32 %v3802_v20, %v1939_v49  ;;  %v1940_v25 = vadd.f32 %v4526_v2, %v1646_v61  ;;  %2878 = vpow2.f32 %v4052_v63  ;;  %2280 = vst [vmem:[%s3579_s20 + $0x128] sm:$0xff] %v2216_v58  ;;  %v1190_v9 = vsub.f32 0.0, %v1126_v40 }
 0x137   : > { %v2869_v33 = vpop.eup %2868  ;;  %2880 = vpow2.f32 %v4063_v52  ;;  %2296 = vst [vmem:[%s3579_s20 + $0x1a8] sm:$0xff] %v2232_v54  ;;  %v1191_v34 = vsub.f32 0.0, %v1127_v36  ;;  %v1097_v21 = vadd.f32 %v3278_v5, %v822_v35  ;;  %v1160_v16 = vsub.f32 0.0, %v1096_v30  ;;  %v4527_v54 = vld [vmem:[#allocation30_spill] sm:$0xff]  ;;  %v2100_v36 = vpop.permute.xlu2 %2099 }
 0x138   : > { %v2871_v46 = vpop.eup %2870  ;;  %2265 = vst [vmem:[%s3579_s20 + $0xb0] sm:$0xff] %v2201_v56  ;;  %v2202_v20 = vadd.f32 %v3810_v11, %v1940_v25  ;;  %2882 = vpow2.f32 %v4065_v22  ;;  %v2153_v63 = vmul.f32 %v3545_v38, %v2060_v8  ;;  %v4168_v52 = vmul.f32 1.442695, %v1190_v9 }
 0x139   : > { %v2873_v55 = vpop.eup %2872  ;;  %v1545_v24 = vsel %vm3373_vm2, %v2871_v46, %v2869_v33  ;;  %2884 = vpow2.f32 %v4101_v42  ;;  %v4170_v53 = vmul.f32 1.442695, %v1191_v34  ;;  %v4175_v11 = vmul.f32 1.442695, %v1160_v16 }
 0x13a   : > { %v2875_v41 = vpop.eup %2874  ;;  %2266 = vst [vmem:[%s3579_s20 + $0xb8] sm:$0xff] %v2202_v20  ;;  %v1647_v57 = vmul.f32 %v3383_v15, %v1545_v24  ;;  %2886 = vpow2.f32 %v4103_v37  ;;  %v1161_v22 = vsub.f32 0.0, %v1097_v21  ;;  %v2154_v42 = vmul.f32 %v3547_v28, %v2060_v8 }
 0x13b   : > { %v2877_v31 = vpop.eup %2876  ;;  %v1546_v49 = vsel %vm3388_vm3, %v2875_v41, %v2873_v55  ;;  %2888 = vpow2.f32 %v4109_v19  ;;  %v2217_v61 = vadd.f32 %v2153_v63, %v3647_v60  ;;  %v4528_v60 = vld [vmem:[#allocation31_spill] sm:$0xff]  ;;  %v4192_v46 = vmul.f32 %v3545_v38, %v2100_v36 }
 0x13c   : > { %v2879_v58 = vpop.eup %2878  ;;  %v1648_v35 = vmul.f32 %v3396_v59, %v1546_v49  ;;  %v1941_v40 = vadd.f32 %v4527_v54, %v1647_v57  ;;  %v1378_v37 = vadd.f32 1.0, %v2877_v31  ;;  %2890 = vrcp.f32 %v2877_v31 }
 0x13d   : > { %v2881_v56 = vpop.eup %2880  ;;  %v1379_v2 = vadd.f32 1.0, %v2879_v58  ;;  %2892 = vrcp.f32 %v2879_v58  ;;  %v4184_v25 = vmul.f32 1.442695, %v1161_v22  ;;  %v2218_v19 = vadd.f32 %v2154_v42, %v3699_v45  ;;  %2281 = vst [vmem:[%s3579_s20 + $0x130] sm:$0xff] %v2217_v61 }
 0x13e   : > { %v2883_v8 = vpop.eup %2882  ;;  %v1942_v30 = vadd.f32 %v4528_v60, %v1648_v35  ;;  %v2203_v33 = vadd.f32 %v4017_v7, %v1941_v40  ;;  %2894 = vrcp.f32 %v1378_v37  ;;  %v1348_v9 = vadd.f32 1.0, %v2881_v56  ;;  %v2068_v7 = vpop.permute.xlu0 %2067 }
 0x13f   : > { %v2885_v34 = vpop.eup %2884  ;;  %2896 = vrcp.f32 %v1379_v2  ;;  %v1349_v21 = vadd.f32 1.0, %v2883_v8  ;;  %2282 = vst [vmem:[%s3579_s20 + $0x138] sm:$0xff] %v2218_v19  ;;  %v4195_v20 = vmul.f32 %v3547_v28, %v2100_v36  ;;  %v1564_v55 = vsel %vm3388_vm3, %v3795_v1, %v3806_v43  ;;  %v4535_v19 = vld [vmem:[#allocation44_spill] sm:$0xff] }
 0x140   : > { %v2887_v45 = vpop.eup %2886  ;;  %v2204_v16 = vadd.f32 %v4040_v32, %v1942_v30  ;;  %2267 = vst [vmem:[%s3579_s20 + $0xc0] sm:$0xff] %v2203_v33  ;;  %2898 = vrcp.f32 %v1348_v9  ;;  %v1380_v63 = vadd.f32 1.0, %v2885_v34  ;;  %v4529_v57 = vsel %vm3373_vm2, %v3787_v47, %v3799_v27  ;;  %v4536_v9 = vld [vmem:[#allocation47_spill] sm:$0xff] }
 0x141   : > { %v2889_v24 = vpop.eup %2888  ;;  %2900 = vrcp.f32 %v2881_v56  ;;  %v1381_v41 = vadd.f32 1.0, %v2887_v45  ;;  %v1665_v22 = vmul.f32 %v3383_v15, %v4529_v57  ;;  %v1666_v32 = vmul.f32 %v3396_v59, %v1564_v55  ;;  %v773_v57 = vpop.f32.mrf.mxu2 }
 0x142   : > { %v4210_v31 = vpop.eup %2890  ;;  %2268 = vst [vmem:[%s3579_s20 + $0xc8] sm:$0xff] %v2204_v16  ;;  %2902 = vrcp.f32 %v1349_v21  ;;  %v1350_v49 = vadd.f32 1.0, %v2889_v24  ;;  %v1565_v1 = vsel %vm3373_vm2, %v3846_v23, %v3839_v0  ;;  %v1566_v43 = vsel %vm3388_vm3, %v3858_v6, %v3850_v39  ;;  %v4530_v0 = vld [vmem:[#allocation42_spill] sm:$0xff]  ;;  %v4531_v23 = vld [vmem:[#allocation13_spill] sm:$0xff]  ;;  %v4537_v21 = vld [vmem:[#allocation48_spill] sm:$0xff] }
 0x143   : > { %v4221_v47 = vpop.eup %2892  ;;  %2904 = vrcp.f32 %v2883_v8  ;;  %v1959_v27 = vadd.f32 %v3594_v3, %v1665_v22  ;;  %v1960_v42 = vadd.f32 %v3597_v50, %v1666_v32  ;;  %v1667_v61 = vmul.f32 %v3383_v15, %v1565_v1  ;;  %v4532_v39 = vld [vmem:[#allocation5_spill] sm:$0xff]  ;;  %v4533_v6 = vld [vmem:[#allocation6_spill] sm:$0xff]  ;;  %v4534_v50 = vld [vmem:[#allocation43_spill] sm:$0xff] }
 0x144   : > { %v4226_v58 = vpop.eup %2894  ;;  %2906 = vrcp.f32 %v1380_v63  ;;  %v1668_v35 = vmul.f32 %v3396_v59, %v1566_v43  ;;  %v1569_v54 = vsel %vm3373_vm2, %v4531_v23, %v4530_v0  ;;  %v1570_v40 = vsel %vm3388_vm3, %v4533_v6, %v4532_v39 }
 0x145   : > { %v4237_v3 = vpop.eup %2896  ;;  %2908 = vrcp.f32 %v2885_v34  ;;  %v4240_v37 = vadd.f32 %v4534_v50, %v1667_v61  ;;  %v1671_v36 = vmul.f32 %v3383_v15, %v1569_v54  ;;  %v1672_v56 = vmul.f32 %v3396_v59, %v1570_v40  ;;  %v2072_v61 = vpop.permute.xlu1 %2071  ;;  %v4539_v50 = vld [vmem:[#allocation29_spill] sm:$0xff] }
 0x146   : > { %v2899_v2 = vpop.eup %2898  ;;  %2910 = vrcp.f32 %v1381_v41  ;;  %v4245_v8 = vadd.f32 %v4535_v19, %v1668_v35  ;;  %v1571_v60 = vsel %vm3373_vm2, %v4029_v26, %v4024_v12  ;;  %v1572_v30 = vsel %vm3388_vm3, %v4043_v18, %v4035_v48  ;;  %v2080_v23 = vpop.permute.xlu0 %2079 }
 0x147   : > { %v2901_v33 = vpop.eup %2900  ;;  %2912 = vrcp.f32 %v2887_v45  ;;  %v4256_v34 = vadd.f32 %v4536_v9, %v1671_v36  ;;  %v4259_v16 = vadd.f32 %v4537_v21, %v1672_v56  ;;  %v4262_v63 = vmul.f32 %v3383_v15, %v1571_v60  ;;  %v862_v45 = vpop.f32.mrf.mxu3  ;;  %v4540_v9 = vld [vmem:[#allocation19_spill] sm:$0xff] }
 0x148   : > { %v2903_v55 = vpop.eup %2902  ;;  %v1547_v26 = vsel %vm3373_vm2, %v2901_v33, %v2899_v2  ;;  %2914 = vrcp.f32 %v1350_v49  ;;  %v2157_v12 = vmul.f32 %v3545_v38, %v2068_v7  ;;  %v2158_v41 = vmul.f32 %v3547_v28, %v2068_v7 }
 0x149   : > { %v2905_v22 = vpop.eup %2904  ;;  %v1649_v32 = vmul.f32 %v3383_v15, %v1547_v26  ;;  %2916 = vrcp.f32 %v2889_v24  ;;  %v1128_v1 = vadd.f32 %v3276_v4, %v773_v57  ;;  %v1129_v43 = vadd.f32 %v3278_v5, %v862_v45  ;;  %v4538_v24 = vld [vmem:[#allocation28_spill] sm:$0xff] }
 0x14a   : > { %v2907_v35 = vpop.eup %2906  ;;  %v1548_v49 = vsel %vm3388_vm3, %v2905_v22, %v2903_v55  ;;  %2918 = vpow2.f32 %v4117_v44  ;;  %v2221_v0 = vadd.f32 %v2157_v12, %v1959_v27  ;;  %v2222_v7 = vadd.f32 %v2158_v41, %v1960_v42 }
 0x14b   : > { %v2909_v54 = vpop.eup %2908  ;;  %v1650_v39 = vmul.f32 %v3396_v59, %v1548_v49  ;;  %v1943_v6 = vadd.f32 %v4538_v24, %v1649_v32  ;;  %2920 = vpow2.f32 %v4168_v52  ;;  %v1192_v4 = vsub.f32 0.0, %v1128_v1  ;;  %v4542_v1 = vld [vmem:[#allocation41_spill] sm:$0xff] }
 0x14c   : > { %v2911_v5 = vpop.eup %2910  ;;  %2922 = vpow2.f32 %v4170_v53  ;;  %v1579_v40 = vsel %vm3373_vm2, %v2909_v54, %v2907_v35  ;;  %2285 = vst [vmem:[%s3579_s20 + $0x150] sm:$0xff] %v2221_v0  ;;  %v1193_v44 = vsub.f32 0.0, %v1129_v43  ;;  %v2159_v27 = vmul.f32 %v3545_v38, %v2072_v61  ;;  %v4543_v54 = vld [vmem:[#allocation11_spill] sm:$0xff] }
 0x14d   : > { %v2913_v42 = vpop.eup %2912  ;;  %v1944_v36 = vadd.f32 %v4539_v50, %v1650_v39  ;;  %v2205_v56 = vadd.f32 %v4055_v51, %v1943_v6  ;;  %2924 = vpow2.f32 %v4175_v11  ;;  %v1681_v52 = vmul.f32 %v3383_v15, %v1579_v40  ;;  %2286 = vst [vmem:[%s3579_s20 + $0x158] sm:$0xff] %v2222_v7  ;;  %v4541_v11 = vld [vmem:[#allocation39_spill] sm:$0xff] }
 0x14e   : > { %v2915_v2 = vpop.eup %2914  ;;  %2926 = vpow2.f32 %v4184_v25  ;;  %v1580_v53 = vsel %vm3388_vm3, %v2913_v42, %v2911_v5  ;;  %v1318_v19 = vmul.f32 1.442695, %v1192_v4  ;;  %v4290_v60 = vmul.f32 1.442695, %v1193_v44  ;;  %v4544_v44 = vld [vmem:[#allocation35_spill] sm:$0xff] }
 0x14f   : > { %v2917_v33 = vpop.eup %2916  ;;  %v2206_v21 = vadd.f32 %v4540_v9, %v1944_v36  ;;  %2269 = vst [vmem:[%s3579_s20 + $0xd0] sm:$0xff] %v2205_v56  ;;  %v1682_v51 = vmul.f32 %v3396_v59, %v1580_v53  ;;  %v1975_v55 = vadd.f32 %v4541_v11, %v1681_v52  ;;  %v2160_v26 = vmul.f32 %v3547_v28, %v2072_v61  ;;  %v2084_v61 = vpop.permute.xlu1 %2083  ;;  %v4546_v53 = vld [vmem:[#allocation46_spill] sm:$0xff] }
 0x150   : > { %v2919_v12 = vpop.eup %2918  ;;  %v1549_v25 = vsel %vm3373_vm2, %v2917_v33, %v2915_v2  ;;  %2928 = vpow2.f32 %v1318_v19  ;;  %v2223_v41 = vadd.f32 %v2159_v27, %v4240_v37  ;;  %v2163_v57 = vmul.f32 %v3545_v38, %v2080_v23 }
 0x151   : > { %v2921_v45 = vpop.eup %2920  ;;  %2270 = vst [vmem:[%s3579_s20 + $0xd8] sm:$0xff] %v2206_v21  ;;  %v1651_v22 = vmul.f32 %v3383_v15, %v1549_v25  ;;  %v1351_v32 = vadd.f32 1.0, %v2919_v12  ;;  %2930 = vrcp.f32 %v2919_v12  ;;  %v1976_v43 = vadd.f32 %v4542_v1, %v1682_v51  ;;  %v4547_v12 = vld [vmem:[#allocation51_spill] sm:$0xff] }
 0x152   : > { %v2923_v35 = vpop.eup %2922  ;;  %v1382_v49 = vadd.f32 1.0, %v2921_v45  ;;  %2932 = vrcp.f32 %v2921_v45  ;;  %v2237_v0 = vadd.f32 %v4192_v46, %v1975_v55  ;;  %v2224_v7 = vadd.f32 %v2160_v26, %v4245_v8  ;;  %2287 = vst [vmem:[%s3579_s20 + $0x160] sm:$0xff] %v2223_v41  ;;  %v2092_v8 = vpop.permute.xlu0 %2091  ;;  %v4548_v41 = vld [vmem:[#allocation52_spill] sm:$0xff] }
 0x153   : > { %v2925_v37 = vpop.eup %2924  ;;  %v1945_v39 = vadd.f32 %v4543_v54, %v1651_v22  ;;  %2934 = vrcp.f32 %v1351_v32  ;;  %v1383_v24 = vadd.f32 1.0, %v2923_v35  ;;  %v2238_v6 = vadd.f32 %v4195_v20, %v1976_v43 }
 0x154   : > { %v2927_v4 = vpop.eup %2926  ;;  %2936 = vrcp.f32 %v1382_v49  ;;  %v1352_v5 = vadd.f32 1.0, %v2925_v37  ;;  %2301 = vst [vmem:[%s3579_s20 + $0x1d0] sm:$0xff] %v2237_v0  ;;  %v2164_v40 = vmul.f32 %v3547_v28, %v2080_v23  ;;  %v2227_v46 = vadd.f32 %v2163_v57, %v4256_v34  ;;  %v4545_v34 = vld [vmem:[#allocation45_spill] sm:$0xff] }
 0x155   : > { %v2207_v27 = vadd.f32 %v4544_v44, %v1945_v39  ;;  %2938 = vrcp.f32 %v1383_v24  ;;  %v1353_v42 = vadd.f32 1.0, %v2927_v4  ;;  %2302 = vst [vmem:[%s3579_s20 + $0x1d8] sm:$0xff] %v2238_v6  ;;  %v1674_v20 = vmul.f32 %v3396_v59, %v1572_v30  ;;  %v4550_v39 = vld [vmem:[#allocation40_spill] sm:$0xff]  ;;  %v4552_v44 = vld [vmem:[#allocation50_spill] sm:$0xff] }
 0x156   : > { %v2929_v50 = vpop.eup %2928  ;;  %2940 = vrcp.f32 %v2923_v35  ;;  %2288 = vst [vmem:[%s3579_s20 + $0x168] sm:$0xff] %v2224_v7  ;;  %v2228_v23 = vadd.f32 %v2164_v40, %v4259_v16  ;;  %v1967_v36 = vadd.f32 %v4545_v34, %v4262_v63  ;;  %v2165_v56 = vmul.f32 %v3545_v38, %v2084_v61 }
 0x157   : > { %v2931_v52 = vpop.eup %2930  ;;  %2271 = vst [vmem:[%s3579_s20 + $0xe0] sm:$0xff] %v2207_v27  ;;  %2942 = vrcp.f32 %v1352_v5  ;;  %v1384_v2 = vadd.f32 1.0, %v2929_v50  ;;  %v1968_v48 = vadd.f32 %v4546_v53, %v1674_v20  ;;  %v2166_v18 = vmul.f32 %v3547_v28, %v2084_v61  ;;  %v2096_v11 = vpop.permute.xlu1 %2095  ;;  %v4549_v61 = vld [vmem:[#allocation12_spill] sm:$0xff] }
 0x158   : > { %v2933_v30 = vpop.eup %2932  ;;  %2944 = vrcp.f32 %v2925_v37  ;;  %2291 = vst [vmem:[%s3579_s20 + $0x180] sm:$0xff] %v2227_v46  ;;  %v2229_v19 = vadd.f32 %v2165_v56, %v1967_v36  ;;  %v1575_v16 = vsel %vm3373_vm2, %v4139_v29, %v4134_v14  ;;  %v1576_v63 = vsel %vm3388_vm3, %v4151_v62, %v4145_v10  ;;  %v4551_v46 = vld [vmem:[#allocation49_spill] sm:$0xff] }
 0x159   : > { %v2935_v33 = vpop.eup %2934  ;;  %2946 = vrcp.f32 %v1353_v42  ;;  %2292 = vst [vmem:[%s3579_s20 + $0x188] sm:$0xff] %v2228_v23  ;;  %v2230_v9 = vadd.f32 %v2166_v18, %v1968_v48  ;;  %v1677_v21 = vmul.f32 %v3383_v15, %v1575_v16  ;;  %v1678_v51 = vmul.f32 %v3396_v59, %v1576_v63  ;;  %v4553_v23 = vld [vmem:[#allocation54_spill] sm:$0xff]  ;;  %v4555_v63 = vld [vmem:[#allocation53_spill] sm:$0xff] }
 0x15a   : > { %v2937_v55 = vpop.eup %2936  ;;  %v1550_v26 = vsel %vm3388_vm3, %v2931_v52, %v2935_v33  ;;  %2948 = vrcp.f32 %v2927_v4  ;;  %2293 = vst [vmem:[%s3579_s20 + $0x190] sm:$0xff] %v2229_v19  ;;  %v2169_v14 = vmul.f32 %v3545_v38, %v2092_v8  ;;  %v2170_v29 = vmul.f32 %v3547_v28, %v2092_v8  ;;  %v4556_v33 = vld [vmem:[#allocation3_spill] sm:$0xff] }
 0x15b   : > { %v2939_v10 = vpop.eup %2938  ;;  %v1652_v62 = vmul.f32 %v3396_v59, %v1550_v26  ;;  %2950 = vrcp.f32 %v1384_v2  ;;  %2294 = vst [vmem:[%s3579_s20 + $0x198] sm:$0xff] %v2230_v9  ;;  %v1971_v25 = vadd.f32 %v4547_v12, %v1677_v21  ;;  %v1972_v57 = vadd.f32 %v4548_v41, %v1678_v51  ;;  %v4554_v2 = vld [vmem:[#allocation37_spill] sm:$0xff]  ;;  %v4557_v21 = vld [vmem:[#allocation55_spill] sm:$0xff]  ;;  %v4558_v26 = vld [vmem:[#allocation18_spill] sm:$0xff] }
 0x15c   : > { %v2941_v45 = vpop.eup %2940  ;;  %2952 = vrcp.f32 %v2929_v50  ;;  %v1577_v22 = vsel %vm3373_vm2, %v4210_v31, %v4226_v58  ;;  %v1578_v32 = vsel %vm3388_vm3, %v4221_v47, %v4237_v3  ;;  %v2171_v1 = vmul.f32 %v3545_v38, %v2096_v11  ;;  %v2104_v47 = vpop.permute.xlu0 %2103 }
 0x15d   : > { %v2943_v43 = vpop.eup %2942  ;;  %v1946_v35 = vadd.f32 %v4549_v61, %v1652_v62  ;;  %2954 = vpow2.f32 %v4290_v60  ;;  %v2233_v49 = vadd.f32 %v2169_v14, %v1971_v25  ;;  %v2234_v0 = vadd.f32 %v2170_v29, %v1972_v57  ;;  %v4559_v29 = vld [vmem:[#allocation14_spill] sm:$0xff] }
 0x15e   : > { %v2945_v7 = vpop.eup %2944  ;;  %v1679_v37 = vmul.f32 %v3383_v15, %v1577_v22  ;;  %v1680_v31 = vmul.f32 %v3396_v59, %v1578_v32  ;;  %v2172_v58 = vmul.f32 %v3547_v28, %v2096_v11  ;;  %v1581_v3 = vsel %vm3373_vm2, %v2933_v30, %v2937_v55  ;;  %v4560_v62 = vld [vmem:[#allocation38_spill] sm:$0xff] }
 0x15f   : > { %v2947_v54 = vpop.eup %2946  ;;  %v2208_v24 = vadd.f32 %v4550_v39, %v1946_v35  ;;  %v1551_v60 = vsel %vm3373_vm2, %v2945_v7, %v2943_v43  ;;  %2297 = vst [vmem:[%s3579_s20 + $0x1b0] sm:$0xff] %v2233_v49  ;;  %v1582_v6 = vsel %vm3388_vm3, %v2941_v45, %v2939_v10  ;;  %v1683_v4 = vmul.f32 %v3383_v15, %v1581_v3  ;;  %v2108_v19 = vpop.permute.xlu1 %2107  ;;  %v4561_v35 = vld [vmem:[#allocation4_spill] sm:$0xff] }
 0x160   : > { %v2949_v5 = vpop.eup %2948  ;;  %v1653_v40 = vmul.f32 %v3383_v15, %v1551_v60  ;;  %2298 = vst [vmem:[%s3579_s20 + $0x1b8] sm:$0xff] %v2234_v0  ;;  %v1973_v8 = vadd.f32 %v4551_v46, %v1679_v37  ;;  %v1974_v27 = vadd.f32 %v4552_v44, %v1680_v31  ;;  %v1684_v42 = vmul.f32 %v3396_v59, %v1582_v6 }
 0x161   : > { %v2951_v20 = vpop.eup %2950  ;;  %2272 = vst [vmem:[%s3579_s20 + $0xe8] sm:$0xff] %v2208_v24  ;;  %v1552_v50 = vsel %vm3388_vm3, %v2949_v5, %v2947_v54  ;;  %v1977_v34 = vadd.f32 %v4553_v23, %v1683_v4  ;;  %v2175_v36 = vmul.f32 %v3545_v38, %v2104_v47  ;;  %v2176_v56 = vmul.f32 %v3547_v28, %v2104_v47 }
 0x162   : > { %v2953_v52 = vpop.eup %2952  ;;  %v1947_v53 = vadd.f32 %v4554_v2, %v1653_v40  ;;  %v1654_v48 = vmul.f32 %v3396_v59, %v1552_v50  ;;  %v2235_v18 = vadd.f32 %v2171_v1, %v1973_v8  ;;  %v2236_v30 = vadd.f32 %v2172_v58, %v1974_v27 }
 0x163   : > { %v2955_v16 = vpop.eup %2954  ;;  %v1915_v9 = vmul.f32 %v4556_v33, %v4555_v63  ;;  %v1978_v51 = vadd.f32 %v4557_v21, %v1684_v42  ;;  %v2239_v11 = vadd.f32 %v2175_v36, %v1977_v34  ;;  %v1583_v55 = vsel %vm3373_vm2, %v2953_v52, %v2951_v20 }
 0x164   : > { %v2146_v14 = vmul.f32 %v3547_v28, %v4558_v26  ;;  %v2209_v10 = vadd.f32 %v4559_v29, %v1947_v53  ;;  %v1948_v12 = vadd.f32 %v4560_v62, %v1654_v48  ;;  %v1385_v25 = vadd.f32 1.0, %v2955_v16  ;;  %2299 = vst [vmem:[%s3579_s20 + $0x1c0] sm:$0xff] %v2235_v18 }
 0x165   : > { %2956 = vrcp.f32 %v2955_v16  ;;  %2300 = vst [vmem:[%s3579_s20 + $0x1c8] sm:$0xff] %v2236_v30  ;;  %v2240_v41 = vadd.f32 %v2176_v56, %v1978_v51  ;;  %v1685_v57 = vmul.f32 %v3383_v15, %v1583_v55  ;;  %v2177_v13 = vmul.f32 %v3545_v38, %v2108_v19 }
 0x166   : > { %2273 = vst [vmem:[%s3579_s20 + $0xf0] sm:$0xff] %v2209_v10  ;;  %v2210_v45 = vadd.f32 %v2146_v14, %v1948_v12  ;;  %2958 = vrcp.f32 %v1385_v25  ;;  %v1916_v15 = vmul.f32 %v4561_v35, %v4555_v63  ;;  %v2178_v49 = vmul.f32 %v3547_v28, %v2108_v19 }
 0x167   : > { %2303 = vst [vmem:[%s3579_s20 + $0x1e0] sm:$0xff] %v2239_v11  ;;  %v1979_v22 = vadd.f32 %v1915_v9, %v1685_v57 }
 0x168   : > { %2274 = vst [vmem:[%s3579_s20 + $0xf8] sm:$0xff] %v2210_v45 }
 0x169   : > { %2304 = vst [vmem:[%s3579_s20 + $0x1e8] sm:$0xff] %v2240_v41  ;;  %v2241_v32 = vadd.f32 %v2177_v13, %v1979_v22 }
 0x16b   : > { %v2957_v1 = vpop.eup %2956  ;;  %2305 = vst [vmem:[%s3579_s20 + $0x1f0] sm:$0xff] %v2241_v32 }
 0x16c   : > { %v2959_v43 = vpop.eup %2958 }
 0x16d   : > { %v1584_v61 = vsel %vm3388_vm3, %v2957_v1, %v2959_v43 }
 0x16e   : > { %v1686_v38 = vmul.f32 %v3396_v59, %v1584_v61 }
 0x170   : > { %v1980_v0 = vadd.f32 %v1916_v15, %v1686_v38 }
 0x172   : > { %v2242_v7 = vadd.f32 %v2178_v49, %v1980_v0 }
 0x174   : > { %2306 = vst [vmem:[%s3579_s20 + $0x1f8] sm:$0xff] %v2242_v7 }
 0x175 PF: > { %s18_s29 = sadd.s32 1, %s2982_s29   ;;  %s4562_s27 = smov %s2978_s28 }
 0x176   : > { %p15_p5 = scmp.ge.s32.totalorder %s18_s29, 4   ;;  %s4563_s28 = smov %s4565_s30 }
 0x178   :  { %17 = sbr.rel (!%p15_p5) target bundleno = 2 (0x2), region = 96 }

</bundles_post_ra>
